<compile_context>
chip_gen: v5e
topology: v5e:2x2
jax: 0.10.0
libtpu: 0.0.40
codegen_flags: <defaults>
</compile_context>

<pallas_src>
import jax
import jax.numpy as jnp
import numpy as np
from jax.experimental import pallas as pl
from jax.experimental.pallas import tpu as pltpu


def _round_up(x, m):
    return (x + m - 1) // m * m


# ---------------------------------------------------------------------------
# Fused encoder kernel: all blocks + pools for ONE image per grid step.
# ---------------------------------------------------------------------------
def _make_encoder_kernel(meta):
    nb = len(meta)

    def kernel(*refs):
        # ---- unpack refs: inputs, outputs, scratches ----------------------
        pos = 0
        x0_ref = refs[pos]; pos += 1
        blk = []
        for b in range(nb):
            wa, ba, wb, bb = refs[pos], refs[pos + 1], refs[pos + 2], refs[pos + 3]
            pos += 4
            sel = None
            if b < nb - 1:
                sel = refs[pos]; pos += 1
            blk.append((wa, ba, wb, bb, sel))
        outs = refs[pos:pos + nb]; pos += nb
        scr = refs[pos:]

        xins, cols_a, cols_b, mids = [], [], [], []
        spos = 0
        for b in range(nb):
            if b > 0:
                xins.append(scr[spos]); spos += 1
            else:
                xins.append(None)
            cols_a.append(scr[spos]); spos += 1
            cols_b.append(scr[spos]); spos += 1
            mids.append(scr[spos]); spos += 1

        def conv3x3_relu(read_win, w_ref, b_ref, col_ref, w_in, c_in_p):
            # im2col gather: 9 lane-shifted windows of the (C_in, L) activation
            # stored at sublane offset k*C_in (aligned, lane-dense).
            for k in range(9):
                kh, kw = divmod(k, 3)
                col_ref[k * c_in_p:(k + 1) * c_in_p, :] = read_win(kh * w_in + kw)
            # One MXU matmul per conv: (C_out, 9*C_in) @ (9*C_in, L).
            acc = jnp.dot(w_ref[...], col_ref[...],
                          preferred_element_type=jnp.float32)
            return jnp.maximum(acc + b_ref[...], 0.0)

        for b in range(nb):
            mb = meta[b]
            w_in, l_pad, l_ext = mb["w_in"], mb["l_pad"], mb["l_ext"]
            c_in_p, c_out = mb["c_in_p"], mb["c_out"]
            wa, ba, wb, bb, sel = blk[b]
            o_ref = outs[b]

            if b == 0:
                read1 = lambda off, _r=x0_ref, _l=l_pad: _r[0, :, off:off + _l]
            else:
                read1 = lambda off, _r=xins[b], _l=l_pad: _r[:, off:off + _l]
            read2 = lambda off, _r=mids[b], _l=l_pad: _r[:, off:off + _l]

            # conv1 + ReLU -> VMEM scratch (single dense store); zero the tail
            # so conv2's shifted window reads stay finite.
            h = conv3x3_relu(read1, wa, ba, cols_a[b], w_in, c_in_p)
            mids[b][:, :l_pad] = h
            mids[b][:, l_pad:] = jnp.zeros((c_out, l_ext - l_pad), jnp.float32)

            # conv2 + ReLU -> block output (lane-dense store); zero the tail.
            y = conv3x3_relu(read2, wb, bb, cols_b[b], w_in, c_out)
            o_ref[0, :, :l_pad] = y.astype(o_ref.dtype)
            o_ref[0, :, l_pad:] = jnp.zeros((c_out, l_ext - l_pad), o_ref.dtype)

            # Fused MaxPool2d(2,2): max of the 4 shifted windows, then one
            # 0/1 selection matmul that decimates 2x2, re-packs to the next
            # block's flat row stride and zero-fills its lane padding.
            if b < nb - 1:
                m = o_ref[0, :, 0:l_pad]
                for off in (1, w_in, w_in + 1):
                    m = jnp.maximum(m, o_ref[0, :, off:off + l_pad])
                pooled = jnp.dot(m, sel[...], preferred_element_type=jnp.float32)
                nxt = meta[b + 1]
                if nxt["c_in_p"] == c_out:
                    xins[b + 1][...] = pooled
                else:  # (unused for the default channel list)
                    xins[b + 1][:c_out, :] = pooled
                    xins[b + 1][c_out:, :] = jnp.zeros(
                        (nxt["c_in_p"] - c_out, nxt["l_ext"]), jnp.float32)

    return kernel


# ---------------------------------------------------------------------------
# Wrapper: one fused pallas_call for the whole encoder.
# ---------------------------------------------------------------------------
def encoder_forward(x_nchw, params):
    """Encoder.forward: list of the (pre-pool) block outputs, NCHW."""
    n, c0, h0, w0 = x_nchw.shape
    nb = len(params)

    # ---- static per-block metadata ---------------------------------------
    meta = []
    h_in, w_in, c_in = h0, w0, c0
    for b, (w1, b1, w2, b2) in enumerate(params):
        c_out = int(w1.shape[0])
        assert w1.shape == (c_out, c_in, 3, 3) and w2.shape == (c_out, c_out, 3, 3)
        h_out, w_out = h_in - 4, w_in - 4
        assert h_out > 0 and w_out > 0
        l_pad = _round_up(h_in * w_in, 128)
        l_ext = l_pad + _round_up(2 * w_in + 2, 128)
        meta.append(dict(h_in=h_in, w_in=w_in, c_in=c_in,
                         c_in_p=_round_up(c_in, 8), c_out=c_out,
                         h_out=h_out, w_out=w_out, l_pad=l_pad, l_ext=l_ext))
        if b < nb - 1:
            assert h_out % 2 == 0 and w_out % 2 == 0
            h_in, w_in, c_in = h_out // 2, w_out // 2, c_out

    m0 = meta[0]

    # ---- operands ---------------------------------------------------------
    # NCHW flattens directly into the kernel's (C, L) layout: no transposes.
    x_flat = x_nchw.astype(jnp.float32).reshape(n, c0, h0 * w0)
    x_flat = jnp.pad(x_flat, ((0, 0), (0, m0["c_in_p"] - c0),
                              (0, m0["l_ext"] - h0 * w0)))

    def prep_w(wt, c_in_p):
        c_out, c_in = int(wt.shape[0]), int(wt.shape[1])
        wt = jnp.transpose(wt.astype(jnp.float32), (0, 2, 3, 1))    # (co,3,3,ci)
        wt = jnp.pad(wt, ((0, 0), (0, 0), (0, 0), (0, c_in_p - c_in)))
        return wt.reshape(c_out, 9 * c_in_p)                        # tap-major K

    def make_sel(mb, mn):
        # 0/1 matrix: rows = flat conv2-output lanes (row stride w_in), cols =
        # next block's flat input lanes (row stride w_in/2 of the valid region,
        # extra cols zero -> padding lanes of the next input become exactly 0).
        hp, wp = mb["h_out"] // 2, mb["w_out"] // 2
        q = np.arange(mn["l_ext"])
        src = 2 * (q // wp) * mb["w_in"] + 2 * (q % wp)
        valid = q < hp * wp
        p = np.arange(mb["l_pad"])[:, None]
        return jnp.asarray(np.where(valid[None, :], p == src[None, :], False),
                           dtype=jnp.float32)

    const2 = lambda i: (0, 0)
    operands = [x_flat]
    in_specs = [pl.BlockSpec((1, m0["c_in_p"], m0["l_ext"]), lambda i: (i, 0, 0))]
    for b, (w1, b1, w2, b2) in enumerate(params):
        mb = meta[b]
        wa = prep_w(w1, mb["c_in_p"])
        wb = prep_w(w2, mb["c_out"])
        ba = b1.astype(jnp.float32).reshape(mb["c_out"], 1)
        bb = b2.astype(jnp.float32).reshape(mb["c_out"], 1)
        operands += [wa, ba, wb, bb]
        in_specs += [pl.BlockSpec(tuple(wa.shape), const2),
                     pl.BlockSpec((mb["c_out"], 1), const2),
                     pl.BlockSpec(tuple(wb.shape), const2),
                     pl.BlockSpec((mb["c_out"], 1), const2)]
        if b < nb - 1:
            sel = make_sel(mb, meta[b + 1])
            operands.append(sel)
            in_specs.append(pl.BlockSpec(tuple(sel.shape), const2))

    out_shapes, out_specs = [], []
    for mb in meta:
        out_shapes.append(jax.ShapeDtypeStruct((n, mb["c_out"], mb["l_ext"]),
                                               jnp.float32))
        out_specs.append(pl.BlockSpec((1, mb["c_out"], mb["l_ext"]),
                                      lambda i: (i, 0, 0)))

    scratch_shapes = []
    for b, mb in enumerate(meta):
        if b > 0:
            scratch_shapes.append(pltpu.VMEM((mb["c_in_p"], mb["l_ext"]),
                                             jnp.float32))
        scratch_shapes.append(pltpu.VMEM((9 * mb["c_in_p"], mb["l_pad"]),
                                         jnp.float32))
        scratch_shapes.append(pltpu.VMEM((9 * mb["c_out"], mb["l_pad"]),
                                         jnp.float32))
        scratch_shapes.append(pltpu.VMEM((mb["c_out"], mb["l_ext"]),
                                         jnp.float32))

    outs_flat = pl.pallas_call(
        _make_encoder_kernel(meta),
        out_shape=tuple(out_shapes),
        grid_spec=pltpu.PrefetchScalarGridSpec(
            num_scalar_prefetch=0,
            grid=(n,),
            in_specs=in_specs,
            out_specs=out_specs,
            scratch_shapes=scratch_shapes,
        ),
        compiler_params=pltpu.CompilerParams(
            dimension_semantics=("parallel",)),
    )(*operands)

    # Un-flatten the three block outputs (pure slice/reshape, already NCHW).
    block_outputs = []
    for b, mb in enumerate(meta):
        o = outs_flat[b][:, :, :mb["h_out"] * mb["w_in"]]
        o = o.reshape(n, mb["c_out"], mb["h_out"], mb["w_in"])[:, :, :, :mb["w_out"]]
        block_outputs.append(o.astype(x_nchw.dtype))
    return block_outputs


# ---------------------------------------------------------------------------
# Pure-XLA reference
# ---------------------------------------------------------------------------
def _reference_encoder(x, params):
    dn = ("NCHW", "OIHW", "NCHW")
    prec = jax.lax.Precision.HIGHEST
    outs = []
    for w1, b1, w2, b2 in params:
        x = jax.lax.conv_general_dilated(x, w1, (1, 1), "VALID",
                                         dimension_numbers=dn, precision=prec)
        x = jnp.maximum(x + b1[None, :, None, None], 0.0)
        x = jax.lax.conv_general_dilated(x, w2, (1, 1), "VALID",
                                         dimension_numbers=dn, precision=prec)
        x = jnp.maximum(x + b2[None, :, None, None], 0.0)
        outs.append(x)
        n, c, hh, ww = x.shape
        x = x.reshape(n, c, hh // 2, 2, ww // 2, 2).max(axis=(3, 5))
    return outs


if __name__ == "__main__":
    # Smallest spatial size for which all 3 encoder stages stay valid and the
    # pooled sizes stay even: 36 -> 32 -> 16 -> 12 -> 6 -> 2.
    N, H, W = 2, 36, 36
    channels = [3, 16, 32, 64]

    key = jax.random.PRNGKey(0)
    keys = jax.random.split(key, 1 + 4 * (len(channels) - 1))
    x = jax.random.normal(keys[0], (N, channels[0], H, W), dtype=jnp.float32)

    params = []
    ki = 1
    for i in range(len(channels) - 1):
        cin, cout = channels[i], channels[i + 1]
        w1 = 0.1 * jax.random.normal(keys[ki], (cout, cin, 3, 3), jnp.float32); ki += 1
        b1 = 0.1 * jax.random.normal(keys[ki], (cout,), jnp.float32); ki += 1
        w2 = 0.1 * jax.random.normal(keys[ki], (cout, cout, 3, 3), jnp.float32); ki += 1
        b2 = 0.1 * jax.random.normal(keys[ki], (cout,), jnp.float32); ki += 1
        params.append((w1, b1, w2, b2))

    outs = jax.block_until_ready(encoder_forward(x, params))
    refs = jax.block_until_ready(_reference_encoder(x, params))

    # Tolerance absorbs MXU f32 pass-decomposition / summation-order differences
    # between the Mosaic matmul path and XLA's convolution path.
    for o, r in zip(outs, refs):
        np.testing.assert_allclose(np.asarray(o), np.asarray(r),
                                   rtol=2e-3, atol=2e-3)

    print("KERNEL_OK")
</pallas_src>

<mosaic_0001>
module attributes {stable_mosaic.version = 11 : i64} {
  func.func @kernel(%arg0: i32, %arg1: memref<1x8x1536xf32, #tpu.memory_space<vmem>>, %arg2: memref<16x72xf32, #tpu.memory_space<vmem>>, %arg3: memref<16x1xf32, #tpu.memory_space<vmem>>, %arg4: memref<16x144xf32, #tpu.memory_space<vmem>>, %arg5: memref<16x1xf32, #tpu.memory_space<vmem>>, %arg6: memref<1408x384xf32, #tpu.memory_space<vmem>>, %arg7: memref<32x144xf32, #tpu.memory_space<vmem>>, %arg8: memref<32x1xf32, #tpu.memory_space<vmem>>, %arg9: memref<32x288xf32, #tpu.memory_space<vmem>>, %arg10: memref<32x1xf32, #tpu.memory_space<vmem>>, %arg11: memref<256x256xf32, #tpu.memory_space<vmem>>, %arg12: memref<64x288xf32, #tpu.memory_space<vmem>>, %arg13: memref<64x1xf32, #tpu.memory_space<vmem>>, %arg14: memref<64x576xf32, #tpu.memory_space<vmem>>, %arg15: memref<64x1xf32, #tpu.memory_space<vmem>>, %arg16: memref<1x16x1536xf32, #tpu.memory_space<vmem>>, %arg17: memref<1x32x384xf32, #tpu.memory_space<vmem>>, %arg18: memref<1x64x256xf32, #tpu.memory_space<vmem>>, %arg19: memref<72x1408xf32, #tpu.memory_space<vmem>>, %arg20: memref<144x1408xf32, #tpu.memory_space<vmem>>, %arg21: memref<16x1536xf32, #tpu.memory_space<vmem>>, %arg22: memref<16x384xf32, #tpu.memory_space<vmem>>, %arg23: memref<144x256xf32, #tpu.memory_space<vmem>>, %arg24: memref<288x256xf32, #tpu.memory_space<vmem>>, %arg25: memref<32x384xf32, #tpu.memory_space<vmem>>, %arg26: memref<32x256xf32, #tpu.memory_space<vmem>>, %arg27: memref<288x128xf32, #tpu.memory_space<vmem>>, %arg28: memref<576x128xf32, #tpu.memory_space<vmem>>, %arg29: memref<64x256xf32, #tpu.memory_space<vmem>>) attributes {dimension_semantics = [#tpu.dimension_semantics<parallel>], iteration_bounds = array<i64: 2>, scalar_prefetch = 0 : i64, scratch_operands = 11 : i64, tpu.core_type = #tpu.core_type<tc>, window_params = [{transform_indices = @transform_0, window_bounds = array<i64: 1, 8, 1536>}, {pipeline_mode = #tpu.pipeline_mode<synchronous>, transform_indices = @transform_1, window_bounds = array<i64: 16, 72>}, {pipeline_mode = #tpu.pipeline_mode<synchronous>, transform_indices = @transform_2, window_bounds = array<i64: 16, 1>}, {pipeline_mode = #tpu.pipeline_mode<synchronous>, transform_indices = @transform_3, window_bounds = array<i64: 16, 144>}, {pipeline_mode = #tpu.pipeline_mode<synchronous>, transform_indices = @transform_4, window_bounds = array<i64: 16, 1>}, {pipeline_mode = #tpu.pipeline_mode<synchronous>, transform_indices = @transform_5, window_bounds = array<i64: 1408, 384>}, {pipeline_mode = #tpu.pipeline_mode<synchronous>, transform_indices = @transform_6, window_bounds = array<i64: 32, 144>}, {pipeline_mode = #tpu.pipeline_mode<synchronous>, transform_indices = @transform_7, window_bounds = array<i64: 32, 1>}, {pipeline_mode = #tpu.pipeline_mode<synchronous>, transform_indices = @transform_8, window_bounds = array<i64: 32, 288>}, {pipeline_mode = #tpu.pipeline_mode<synchronous>, transform_indices = @transform_9, window_bounds = array<i64: 32, 1>}, {pipeline_mode = #tpu.pipeline_mode<synchronous>, transform_indices = @transform_10, window_bounds = array<i64: 256, 256>}, {pipeline_mode = #tpu.pipeline_mode<synchronous>, transform_indices = @transform_11, window_bounds = array<i64: 64, 288>}, {pipeline_mode = #tpu.pipeline_mode<synchronous>, transform_indices = @transform_12, window_bounds = array<i64: 64, 1>}, {pipeline_mode = #tpu.pipeline_mode<synchronous>, transform_indices = @transform_13, window_bounds = array<i64: 64, 576>}, {pipeline_mode = #tpu.pipeline_mode<synchronous>, transform_indices = @transform_14, window_bounds = array<i64: 64, 1>}, {transform_indices = @transform_15, window_bounds = array<i64: 1, 16, 1536>}, {transform_indices = @transform_16, window_bounds = array<i64: 1, 32, 384>}, {transform_indices = @transform_17, window_bounds = array<i64: 1, 64, 256>}]} {
    %c0 = arith.constant 0 : index
    %c0_0 = arith.constant 0 : index
    %c0_1 = arith.constant 0 : index
    %0 = vector.load %arg1[%c0, %c0_0, %c0_1] : memref<1x8x1536xf32, #tpu.memory_space<vmem>>, vector<1x8x1408xf32>
    %1 = vector.shape_cast %0 : vector<1x8x1408xf32> to vector<8x1408xf32>
    %c0_2 = arith.constant 0 : index
    %c0_3 = arith.constant 0 : index
    %2 = vector.load %arg19[%c0_2, %c0_3] : memref<72x1408xf32, #tpu.memory_space<vmem>>, vector<8x1408xf32>
    tpu.vector_store %arg19[%c0_2, %c0_3], %1 {strides = array<i32>} : memref<72x1408xf32, #tpu.memory_space<vmem>>, vector<8x1408xf32>,
    %c0_4 = arith.constant 0 : index
    %c0_5 = arith.constant 0 : index
    %c1 = arith.constant 1 : index
    %3 = vector.load %arg1[%c0_4, %c0_5, %c1] : memref<1x8x1536xf32, #tpu.memory_space<vmem>>, vector<1x8x1408xf32>
    %4 = vector.shape_cast %3 : vector<1x8x1408xf32> to vector<8x1408xf32>
    %c8 = arith.constant 8 : index
    %c0_6 = arith.constant 0 : index
    %5 = vector.load %arg19[%c8, %c0_6] : memref<72x1408xf32, #tpu.memory_space<vmem>>, vector<8x1408xf32>
    tpu.vector_store %arg19[%c8, %c0_6], %4 {strides = array<i32>} : memref<72x1408xf32, #tpu.memory_space<vmem>>, vector<8x1408xf32>,
    %c0_7 = arith.constant 0 : index
    %c0_8 = arith.constant 0 : index
    %c2 = arith.constant 2 : index
    %6 = vector.load %arg1[%c0_7, %c0_8, %c2] : memref<1x8x1536xf32, #tpu.memory_space<vmem>>, vector<1x8x1408xf32>
    %7 = vector.shape_cast %6 : vector<1x8x1408xf32> to vector<8x1408xf32>
    %c16 = arith.constant 16 : index
    %c0_9 = arith.constant 0 : index
    %8 = vector.load %arg19[%c16, %c0_9] : memref<72x1408xf32, #tpu.memory_space<vmem>>, vector<8x1408xf32>
    tpu.vector_store %arg19[%c16, %c0_9], %7 {strides = array<i32>} : memref<72x1408xf32, #tpu.memory_space<vmem>>, vector<8x1408xf32>,
    %c0_10 = arith.constant 0 : index
    %c0_11 = arith.constant 0 : index
    %c36 = arith.constant 36 : index
    %9 = vector.load %arg1[%c0_10, %c0_11, %c36] : memref<1x8x1536xf32, #tpu.memory_space<vmem>>, vector<1x8x1408xf32>
    %10 = vector.shape_cast %9 : vector<1x8x1408xf32> to vector<8x1408xf32>
    %c24 = arith.constant 24 : index
    %c0_12 = arith.constant 0 : index
    %11 = vector.load %arg19[%c24, %c0_12] : memref<72x1408xf32, #tpu.memory_space<vmem>>, vector<8x1408xf32>
    tpu.vector_store %arg19[%c24, %c0_12], %10 {strides = array<i32>} : memref<72x1408xf32, #tpu.memory_space<vmem>>, vector<8x1408xf32>,
    %c0_13 = arith.constant 0 : index
    %c0_14 = arith.constant 0 : index
    %c37 = arith.constant 37 : index
    %12 = vector.load %arg1[%c0_13, %c0_14, %c37] : memref<1x8x1536xf32, #tpu.memory_space<vmem>>, vector<1x8x1408xf32>
    %13 = vector.shape_cast %12 : vector<1x8x1408xf32> to vector<8x1408xf32>
    %c32 = arith.constant 32 : index
    %c0_15 = arith.constant 0 : index
    %14 = vector.load %arg19[%c32, %c0_15] : memref<72x1408xf32, #tpu.memory_space<vmem>>, vector<8x1408xf32>
    tpu.vector_store %arg19[%c32, %c0_15], %13 {strides = array<i32>} : memref<72x1408xf32, #tpu.memory_space<vmem>>, vector<8x1408xf32>,
    %c0_16 = arith.constant 0 : index
    %c0_17 = arith.constant 0 : index
    %c38 = arith.constant 38 : index
    %15 = vector.load %arg1[%c0_16, %c0_17, %c38] : memref<1x8x1536xf32, #tpu.memory_space<vmem>>, vector<1x8x1408xf32>
    %16 = vector.shape_cast %15 : vector<1x8x1408xf32> to vector<8x1408xf32>
    %c40 = arith.constant 40 : index
    %c0_18 = arith.constant 0 : index
    %17 = vector.load %arg19[%c40, %c0_18] : memref<72x1408xf32, #tpu.memory_space<vmem>>, vector<8x1408xf32>
    tpu.vector_store %arg19[%c40, %c0_18], %16 {strides = array<i32>} : memref<72x1408xf32, #tpu.memory_space<vmem>>, vector<8x1408xf32>,
    %c0_19 = arith.constant 0 : index
    %c0_20 = arith.constant 0 : index
    %c72 = arith.constant 72 : index
    %18 = vector.load %arg1[%c0_19, %c0_20, %c72] : memref<1x8x1536xf32, #tpu.memory_space<vmem>>, vector<1x8x1408xf32>
    %19 = vector.shape_cast %18 : vector<1x8x1408xf32> to vector<8x1408xf32>
    %c48 = arith.constant 48 : index
    %c0_21 = arith.constant 0 : index
    %20 = vector.load %arg19[%c48, %c0_21] : memref<72x1408xf32, #tpu.memory_space<vmem>>, vector<8x1408xf32>
    tpu.vector_store %arg19[%c48, %c0_21], %19 {strides = array<i32>} : memref<72x1408xf32, #tpu.memory_space<vmem>>, vector<8x1408xf32>,
    %c0_22 = arith.constant 0 : index
    %c0_23 = arith.constant 0 : index
    %c73 = arith.constant 73 : index
    %21 = vector.load %arg1[%c0_22, %c0_23, %c73] : memref<1x8x1536xf32, #tpu.memory_space<vmem>>, vector<1x8x1408xf32>
    %22 = vector.shape_cast %21 : vector<1x8x1408xf32> to vector<8x1408xf32>
    %c56 = arith.constant 56 : index
    %c0_24 = arith.constant 0 : index
    %23 = vector.load %arg19[%c56, %c0_24] : memref<72x1408xf32, #tpu.memory_space<vmem>>, vector<8x1408xf32>
    tpu.vector_store %arg19[%c56, %c0_24], %22 {strides = array<i32>} : memref<72x1408xf32, #tpu.memory_space<vmem>>, vector<8x1408xf32>,
    %c0_25 = arith.constant 0 : index
    %c0_26 = arith.constant 0 : index
    %c74 = arith.constant 74 : index
    %24 = vector.load %arg1[%c0_25, %c0_26, %c74] : memref<1x8x1536xf32, #tpu.memory_space<vmem>>, vector<1x8x1408xf32>
    %25 = vector.shape_cast %24 : vector<1x8x1408xf32> to vector<8x1408xf32>
    %c64 = arith.constant 64 : index
    %c0_27 = arith.constant 0 : index
    %26 = vector.load %arg19[%c64, %c0_27] : memref<72x1408xf32, #tpu.memory_space<vmem>>, vector<8x1408xf32>
    tpu.vector_store %arg19[%c64, %c0_27], %25 {strides = array<i32>} : memref<72x1408xf32, #tpu.memory_space<vmem>>, vector<8x1408xf32>,
    %c0_28 = arith.constant 0 : index
    %c0_29 = arith.constant 0 : index
    %27 = vector.load %arg2[%c0_28, %c0_29] : memref<16x72xf32, #tpu.memory_space<vmem>>, vector<16x72xf32>
    %c0_30 = arith.constant 0 : index
    %c0_31 = arith.constant 0 : index
    %28 = vector.load %arg19[%c0_30, %c0_31] : memref<72x1408xf32, #tpu.memory_space<vmem>>, vector<72x1408xf32>
    %cst = arith.constant dense<0.000000e+00> : vector<16x1408xf32>
    %29 = tpu.matmul %27, %28, %cst {dimension_numbers = #tpu.dot_dimension_numbers<[1], [0], [0], [1], [0, 0, 1, 1], [], []>} : vector<16x72xf32>, vector<72x1408xf32>, vector<16x1408xf32> -> vector<16x1408xf32>
    %c0_32 = arith.constant 0 : index
    %c0_33 = arith.constant 0 : index
    %30 = vector.load %arg3[%c0_32, %c0_33] : memref<16x1xf32, #tpu.memory_space<vmem>>, vector<16x1xf32>
    %31 = vector.broadcast %30 : vector<16x1xf32> to vector<16x1408xf32>
    %32 = arith.addf %29, %31 : vector<16x1408xf32>
    %cst_34 = arith.constant 0.000000e+00 : f32
    %33 = vector.broadcast %cst_34 : f32 to vector<16x1408xf32>
    %34 = arith.maximumf %32, %33 : vector<16x1408xf32>
    %c0_35 = arith.constant 0 : index
    %c0_36 = arith.constant 0 : index
    %35 = vector.load %arg21[%c0_35, %c0_36] : memref<16x1536xf32, #tpu.memory_space<vmem>>, vector<16x1408xf32>
    tpu.vector_store %arg21[%c0_35, %c0_36], %34 {strides = array<i32>} : memref<16x1536xf32, #tpu.memory_space<vmem>>, vector<16x1408xf32>,
    %cst_37 = arith.constant 0.000000e+00 : f32
    %36 = vector.broadcast %cst_37 : f32 to vector<16x128xf32>
    %c0_38 = arith.constant 0 : index
    %c1408 = arith.constant 1408 : index
    %37 = vector.load %arg21[%c0_38, %c1408] : memref<16x1536xf32, #tpu.memory_space<vmem>>, vector<16x128xf32>
    tpu.vector_store %arg21[%c0_38, %c1408], %36 {strides = array<i32>} : memref<16x1536xf32, #tpu.memory_space<vmem>>, vector<16x128xf32>,
    %c0_39 = arith.constant 0 : index
    %c0_40 = arith.constant 0 : index
    %38 = vector.load %arg21[%c0_39, %c0_40] : memref<16x1536xf32, #tpu.memory_space<vmem>>, vector<16x1408xf32>
    %c0_41 = arith.constant 0 : index
    %c0_42 = arith.constant 0 : index
    %39 = vector.load %arg20[%c0_41, %c0_42] : memref<144x1408xf32, #tpu.memory_space<vmem>>, vector<16x1408xf32>
    tpu.vector_store %arg20[%c0_41, %c0_42], %38 {strides = array<i32>} : memref<144x1408xf32, #tpu.memory_space<vmem>>, vector<16x1408xf32>,
    %c0_43 = arith.constant 0 : index
    %c1_44 = arith.constant 1 : index
    %40 = vector.load %arg21[%c0_43, %c1_44] : memref<16x1536xf32, #tpu.memory_space<vmem>>, vector<16x1408xf32>
    %c16_45 = arith.constant 16 : index
    %c0_46 = arith.constant 0 : index
    %41 = vector.load %arg20[%c16_45, %c0_46] : memref<144x1408xf32, #tpu.memory_space<vmem>>, vector<16x1408xf32>
    tpu.vector_store %arg20[%c16_45, %c0_46], %40 {strides = array<i32>} : memref<144x1408xf32, #tpu.memory_space<vmem>>, vector<16x1408xf32>,
    %c0_47 = arith.constant 0 : index
    %c2_48 = arith.constant 2 : index
    %42 = vector.load %arg21[%c0_47, %c2_48] : memref<16x1536xf32, #tpu.memory_space<vmem>>, vector<16x1408xf32>
    %c32_49 = arith.constant 32 : index
    %c0_50 = arith.constant 0 : index
    %43 = vector.load %arg20[%c32_49, %c0_50] : memref<144x1408xf32, #tpu.memory_space<vmem>>, vector<16x1408xf32>
    tpu.vector_store %arg20[%c32_49, %c0_50], %42 {strides = array<i32>} : memref<144x1408xf32, #tpu.memory_space<vmem>>, vector<16x1408xf32>,
    %c0_51 = arith.constant 0 : index
    %c36_52 = arith.constant 36 : index
    %44 = vector.load %arg21[%c0_51, %c36_52] : memref<16x1536xf32, #tpu.memory_space<vmem>>, vector<16x1408xf32>
    %c48_53 = arith.constant 48 : index
    %c0_54 = arith.constant 0 : index
    %45 = vector.load %arg20[%c48_53, %c0_54] : memref<144x1408xf32, #tpu.memory_space<vmem>>, vector<16x1408xf32>
    tpu.vector_store %arg20[%c48_53, %c0_54], %44 {strides = array<i32>} : memref<144x1408xf32, #tpu.memory_space<vmem>>, vector<16x1408xf32>,
    %c0_55 = arith.constant 0 : index
    %c37_56 = arith.constant 37 : index
    %46 = vector.load %arg21[%c0_55, %c37_56] : memref<16x1536xf32, #tpu.memory_space<vmem>>, vector<16x1408xf32>
    %c64_57 = arith.constant 64 : index
    %c0_58 = arith.constant 0 : index
    %47 = vector.load %arg20[%c64_57, %c0_58] : memref<144x1408xf32, #tpu.memory_space<vmem>>, vector<16x1408xf32>
    tpu.vector_store %arg20[%c64_57, %c0_58], %46 {strides = array<i32>} : memref<144x1408xf32, #tpu.memory_space<vmem>>, vector<16x1408xf32>,
    %c0_59 = arith.constant 0 : index
    %c38_60 = arith.constant 38 : index
    %48 = vector.load %arg21[%c0_59, %c38_60] : memref<16x1536xf32, #tpu.memory_space<vmem>>, vector<16x1408xf32>
    %c80 = arith.constant 80 : index
    %c0_61 = arith.constant 0 : index
    %49 = vector.load %arg20[%c80, %c0_61] : memref<144x1408xf32, #tpu.memory_space<vmem>>, vector<16x1408xf32>
    tpu.vector_store %arg20[%c80, %c0_61], %48 {strides = array<i32>} : memref<144x1408xf32, #tpu.memory_space<vmem>>, vector<16x1408xf32>,
    %c0_62 = arith.constant 0 : index
    %c72_63 = arith.constant 72 : index
    %50 = vector.load %arg21[%c0_62, %c72_63] : memref<16x1536xf32, #tpu.memory_space<vmem>>, vector<16x1408xf32>
    %c96 = arith.constant 96 : index
    %c0_64 = arith.constant 0 : index
    %51 = vector.load %arg20[%c96, %c0_64] : memref<144x1408xf32, #tpu.memory_space<vmem>>, vector<16x1408xf32>
    tpu.vector_store %arg20[%c96, %c0_64], %50 {strides = array<i32>} : memref<144x1408xf32, #tpu.memory_space<vmem>>, vector<16x1408xf32>,
    %c0_65 = arith.constant 0 : index
    %c73_66 = arith.constant 73 : index
    %52 = vector.load %arg21[%c0_65, %c73_66] : memref<16x1536xf32, #tpu.memory_space<vmem>>, vector<16x1408xf32>
    %c112 = arith.constant 112 : index
    %c0_67 = arith.constant 0 : index
    %53 = vector.load %arg20[%c112, %c0_67] : memref<144x1408xf32, #tpu.memory_space<vmem>>, vector<16x1408xf32>
    tpu.vector_store %arg20[%c112, %c0_67], %52 {strides = array<i32>} : memref<144x1408xf32, #tpu.memory_space<vmem>>, vector<16x1408xf32>,
    %c0_68 = arith.constant 0 : index
    %c74_69 = arith.constant 74 : index
    %54 = vector.load %arg21[%c0_68, %c74_69] : memref<16x1536xf32, #tpu.memory_space<vmem>>, vector<16x1408xf32>
    %c128 = arith.constant 128 : index
    %c0_70 = arith.constant 0 : index
    %55 = vector.load %arg20[%c128, %c0_70] : memref<144x1408xf32, #tpu.memory_space<vmem>>, vector<16x1408xf32>
    tpu.vector_store %arg20[%c128, %c0_70], %54 {strides = array<i32>} : memref<144x1408xf32, #tpu.memory_space<vmem>>, vector<16x1408xf32>,
    %c0_71 = arith.constant 0 : index
    %c0_72 = arith.constant 0 : index
    %56 = vector.load %arg4[%c0_71, %c0_72] : memref<16x144xf32, #tpu.memory_space<vmem>>, vector<16x144xf32>
    %c0_73 = arith.constant 0 : index
    %c0_74 = arith.constant 0 : index
    %57 = vector.load %arg20[%c0_73, %c0_74] : memref<144x1408xf32, #tpu.memory_space<vmem>>, vector<144x1408xf32>
    %cst_75 = arith.constant dense<0.000000e+00> : vector<16x1408xf32>
    %58 = tpu.matmul %56, %57, %cst_75 {dimension_numbers = #tpu.dot_dimension_numbers<[1], [0], [0], [1], [0, 0, 1, 1], [], []>} : vector<16x144xf32>, vector<144x1408xf32>, vector<16x1408xf32> -> vector<16x1408xf32>
    %c0_76 = arith.constant 0 : index
    %c0_77 = arith.constant 0 : index
    %59 = vector.load %arg5[%c0_76, %c0_77] : memref<16x1xf32, #tpu.memory_space<vmem>>, vector<16x1xf32>
    %60 = vector.broadcast %59 : vector<16x1xf32> to vector<16x1408xf32>
    %61 = arith.addf %58, %60 : vector<16x1408xf32>
    %cst_78 = arith.constant 0.000000e+00 : f32
    %62 = vector.broadcast %cst_78 : f32 to vector<16x1408xf32>
    %63 = arith.maximumf %61, %62 : vector<16x1408xf32>
    %c0_79 = arith.constant 0 : index
    %c0_80 = arith.constant 0 : index
    %c0_81 = arith.constant 0 : index
    %64 = vector.load %arg16[%c0_79, %c0_80, %c0_81] : memref<1x16x1536xf32, #tpu.memory_space<vmem>>, vector<1x16x1408xf32>
    %65 = vector.shape_cast %64 : vector<1x16x1408xf32> to vector<16x1408xf32>
    %66 = vector.shape_cast %63 : vector<16x1408xf32> to vector<1x16x1408xf32>
    tpu.vector_store %arg16[%c0_79, %c0_80, %c0_81], %66 {strides = array<i32>} : memref<1x16x1536xf32, #tpu.memory_space<vmem>>, vector<1x16x1408xf32>,
    %cst_82 = arith.constant 0.000000e+00 : f32
    %67 = vector.broadcast %cst_82 : f32 to vector<16x128xf32>
    %c0_83 = arith.constant 0 : index
    %c0_84 = arith.constant 0 : index
    %c1408_85 = arith.constant 1408 : index
    %68 = vector.load %arg16[%c0_83, %c0_84, %c1408_85] : memref<1x16x1536xf32, #tpu.memory_space<vmem>>, vector<1x16x128xf32>
    %69 = vector.shape_cast %68 : vector<1x16x128xf32> to vector<16x128xf32>
    %70 = vector.shape_cast %67 : vector<16x128xf32> to vector<1x16x128xf32>
    tpu.vector_store %arg16[%c0_83, %c0_84, %c1408_85], %70 {strides = array<i32>} : memref<1x16x1536xf32, #tpu.memory_space<vmem>>, vector<1x16x128xf32>,
    %c0_86 = arith.constant 0 : index
    %c0_87 = arith.constant 0 : index
    %c0_88 = arith.constant 0 : index
    %71 = vector.load %arg16[%c0_86, %c0_87, %c0_88] : memref<1x16x1536xf32, #tpu.memory_space<vmem>>, vector<1x16x1408xf32>
    %72 = vector.shape_cast %71 : vector<1x16x1408xf32> to vector<16x1408xf32>
    %c0_89 = arith.constant 0 : index
    %c0_90 = arith.constant 0 : index
    %c1_91 = arith.constant 1 : index
    %73 = vector.load %arg16[%c0_89, %c0_90, %c1_91] : memref<1x16x1536xf32, #tpu.memory_space<vmem>>, vector<1x16x1408xf32>
    %74 = vector.shape_cast %73 : vector<1x16x1408xf32> to vector<16x1408xf32>
    %75 = arith.maximumf %72, %74 : vector<16x1408xf32>
    %c0_92 = arith.constant 0 : index
    %c0_93 = arith.constant 0 : index
    %c36_94 = arith.constant 36 : index
    %76 = vector.load %arg16[%c0_92, %c0_93, %c36_94] : memref<1x16x1536xf32, #tpu.memory_space<vmem>>, vector<1x16x1408xf32>
    %77 = vector.shape_cast %76 : vector<1x16x1408xf32> to vector<16x1408xf32>
    %78 = arith.maximumf %75, %77 : vector<16x1408xf32>
    %c0_95 = arith.constant 0 : index
    %c0_96 = arith.constant 0 : index
    %c37_97 = arith.constant 37 : index
    %79 = vector.load %arg16[%c0_95, %c0_96, %c37_97] : memref<1x16x1536xf32, #tpu.memory_space<vmem>>, vector<1x16x1408xf32>
    %80 = vector.shape_cast %79 : vector<1x16x1408xf32> to vector<16x1408xf32>
    %81 = arith.maximumf %78, %80 : vector<16x1408xf32>
    %c0_98 = arith.constant 0 : index
    %c0_99 = arith.constant 0 : index
    %82 = vector.load %arg6[%c0_98, %c0_99] : memref<1408x384xf32, #tpu.memory_space<vmem>>, vector<1408x384xf32>
    %cst_100 = arith.constant dense<0.000000e+00> : vector<16x384xf32>
    %83 = tpu.matmul %81, %82, %cst_100 {dimension_numbers = #tpu.dot_dimension_numbers<[1], [0], [0], [1], [0, 0, 1, 1], [], []>} : vector<16x1408xf32>, vector<1408x384xf32>, vector<16x384xf32> -> vector<16x384xf32>
    %c0_101 = arith.constant 0 : index
    %c0_102 = arith.constant 0 : index
    %84 = vector.load %arg22[%c0_101, %c0_102] : memref<16x384xf32, #tpu.memory_space<vmem>>, vector<16x384xf32>
    tpu.vector_store %arg22[%c0_101, %c0_102], %83 {strides = array<i32>} : memref<16x384xf32, #tpu.memory_space<vmem>>, vector<16x384xf32>,
    %c0_103 = arith.constant 0 : index
    %c0_104 = arith.constant 0 : index
    %85 = vector.load %arg22[%c0_103, %c0_104] : memref<16x384xf32, #tpu.memory_space<vmem>>, vector<16x256xf32>
    %c0_105 = arith.constant 0 : index
    %c0_106 = arith.constant 0 : index
    %86 = vector.load %arg23[%c0_105, %c0_106] : memref<144x256xf32, #tpu.memory_space<vmem>>, vector<16x256xf32>
    tpu.vector_store %arg23[%c0_105, %c0_106], %85 {strides = array<i32>} : memref<144x256xf32, #tpu.memory_space<vmem>>, vector<16x256xf32>,
    %c0_107 = arith.constant 0 : index
    %c1_108 = arith.constant 1 : index
    %87 = vector.load %arg22[%c0_107, %c1_108] : memref<16x384xf32, #tpu.memory_space<vmem>>, vector<16x256xf32>
    %c16_109 = arith.constant 16 : index
    %c0_110 = arith.constant 0 : index
    %88 = vector.load %arg23[%c16_109, %c0_110] : memref<144x256xf32, #tpu.memory_space<vmem>>, vector<16x256xf32>
    tpu.vector_store %arg23[%c16_109, %c0_110], %87 {strides = array<i32>} : memref<144x256xf32, #tpu.memory_space<vmem>>, vector<16x256xf32>,
    %c0_111 = arith.constant 0 : index
    %c2_112 = arith.constant 2 : index
    %89 = vector.load %arg22[%c0_111, %c2_112] : memref<16x384xf32, #tpu.memory_space<vmem>>, vector<16x256xf32>
    %c32_113 = arith.constant 32 : index
    %c0_114 = arith.constant 0 : index
    %90 = vector.load %arg23[%c32_113, %c0_114] : memref<144x256xf32, #tpu.memory_space<vmem>>, vector<16x256xf32>
    tpu.vector_store %arg23[%c32_113, %c0_114], %89 {strides = array<i32>} : memref<144x256xf32, #tpu.memory_space<vmem>>, vector<16x256xf32>,
    %c0_115 = arith.constant 0 : index
    %c16_116 = arith.constant 16 : index
    %91 = vector.load %arg22[%c0_115, %c16_116] : memref<16x384xf32, #tpu.memory_space<vmem>>, vector<16x256xf32>
    %c48_117 = arith.constant 48 : index
    %c0_118 = arith.constant 0 : index
    %92 = vector.load %arg23[%c48_117, %c0_118] : memref<144x256xf32, #tpu.memory_space<vmem>>, vector<16x256xf32>
    tpu.vector_store %arg23[%c48_117, %c0_118], %91 {strides = array<i32>} : memref<144x256xf32, #tpu.memory_space<vmem>>, vector<16x256xf32>,
    %c0_119 = arith.constant 0 : index
    %c17 = arith.constant 17 : index
    %93 = vector.load %arg22[%c0_119, %c17] : memref<16x384xf32, #tpu.memory_space<vmem>>, vector<16x256xf32>
    %c64_120 = arith.constant 64 : index
    %c0_121 = arith.constant 0 : index
    %94 = vector.load %arg23[%c64_120, %c0_121] : memref<144x256xf32, #tpu.memory_space<vmem>>, vector<16x256xf32>
    tpu.vector_store %arg23[%c64_120, %c0_121], %93 {strides = array<i32>} : memref<144x256xf32, #tpu.memory_space<vmem>>, vector<16x256xf32>,
    %c0_122 = arith.constant 0 : index
    %c18 = arith.constant 18 : index
    %95 = vector.load %arg22[%c0_122, %c18] : memref<16x384xf32, #tpu.memory_space<vmem>>, vector<16x256xf32>
    %c80_123 = arith.constant 80 : index
    %c0_124 = arith.constant 0 : index
    %96 = vector.load %arg23[%c80_123, %c0_124] : memref<144x256xf32, #tpu.memory_space<vmem>>, vector<16x256xf32>
    tpu.vector_store %arg23[%c80_123, %c0_124], %95 {strides = array<i32>} : memref<144x256xf32, #tpu.memory_space<vmem>>, vector<16x256xf32>,
    %c0_125 = arith.constant 0 : index
    %c32_126 = arith.constant 32 : index
    %97 = vector.load %arg22[%c0_125, %c32_126] : memref<16x384xf32, #tpu.memory_space<vmem>>, vector<16x256xf32>
    %c96_127 = arith.constant 96 : index
    %c0_128 = arith.constant 0 : index
    %98 = vector.load %arg23[%c96_127, %c0_128] : memref<144x256xf32, #tpu.memory_space<vmem>>, vector<16x256xf32>
    tpu.vector_store %arg23[%c96_127, %c0_128], %97 {strides = array<i32>} : memref<144x256xf32, #tpu.memory_space<vmem>>, vector<16x256xf32>,
    %c0_129 = arith.constant 0 : index
    %c33 = arith.constant 33 : index
    %99 = vector.load %arg22[%c0_129, %c33] : memref<16x384xf32, #tpu.memory_space<vmem>>, vector<16x256xf32>
    %c112_130 = arith.constant 112 : index
    %c0_131 = arith.constant 0 : index
    %100 = vector.load %arg23[%c112_130, %c0_131] : memref<144x256xf32, #tpu.memory_space<vmem>>, vector<16x256xf32>
    tpu.vector_store %arg23[%c112_130, %c0_131], %99 {strides = array<i32>} : memref<144x256xf32, #tpu.memory_space<vmem>>, vector<16x256xf32>,
    %c0_132 = arith.constant 0 : index
    %c34 = arith.constant 34 : index
    %101 = vector.load %arg22[%c0_132, %c34] : memref<16x384xf32, #tpu.memory_space<vmem>>, vector<16x256xf32>
    %c128_133 = arith.constant 128 : index
    %c0_134 = arith.constant 0 : index
    %102 = vector.load %arg23[%c128_133, %c0_134] : memref<144x256xf32, #tpu.memory_space<vmem>>, vector<16x256xf32>
    tpu.vector_store %arg23[%c128_133, %c0_134], %101 {strides = array<i32>} : memref<144x256xf32, #tpu.memory_space<vmem>>, vector<16x256xf32>,
    %c0_135 = arith.constant 0 : index
    %c0_136 = arith.constant 0 : index
    %103 = vector.load %arg7[%c0_135, %c0_136] : memref<32x144xf32, #tpu.memory_space<vmem>>, vector<32x144xf32>
    %c0_137 = arith.constant 0 : index
    %c0_138 = arith.constant 0 : index
    %104 = vector.load %arg23[%c0_137, %c0_138] : memref<144x256xf32, #tpu.memory_space<vmem>>, vector<144x256xf32>
    %cst_139 = arith.constant dense<0.000000e+00> : vector<32x256xf32>
    %105 = tpu.matmul %103, %104, %cst_139 {dimension_numbers = #tpu.dot_dimension_numbers<[1], [0], [0], [1], [0, 0, 1, 1], [], []>} : vector<32x144xf32>, vector<144x256xf32>, vector<32x256xf32> -> vector<32x256xf32>
    %c0_140 = arith.constant 0 : index
    %c0_141 = arith.constant 0 : index
    %106 = vector.load %arg8[%c0_140, %c0_141] : memref<32x1xf32, #tpu.memory_space<vmem>>, vector<32x1xf32>
    %107 = vector.broadcast %106 : vector<32x1xf32> to vector<32x256xf32>
    %108 = arith.addf %105, %107 : vector<32x256xf32>
    %cst_142 = arith.constant 0.000000e+00 : f32
    %109 = vector.broadcast %cst_142 : f32 to vector<32x256xf32>
    %110 = arith.maximumf %108, %109 : vector<32x256xf32>
    %c0_143 = arith.constant 0 : index
    %c0_144 = arith.constant 0 : index
    %111 = vector.load %arg25[%c0_143, %c0_144] : memref<32x384xf32, #tpu.memory_space<vmem>>, vector<32x256xf32>
    tpu.vector_store %arg25[%c0_143, %c0_144], %110 {strides = array<i32>} : memref<32x384xf32, #tpu.memory_space<vmem>>, vector<32x256xf32>,
    %cst_145 = arith.constant 0.000000e+00 : f32
    %112 = vector.broadcast %cst_145 : f32 to vector<32x128xf32>
    %c0_146 = arith.constant 0 : index
    %c256 = arith.constant 256 : index
    %113 = vector.load %arg25[%c0_146, %c256] : memref<32x384xf32, #tpu.memory_space<vmem>>, vector<32x128xf32>
    tpu.vector_store %arg25[%c0_146, %c256], %112 {strides = array<i32>} : memref<32x384xf32, #tpu.memory_space<vmem>>, vector<32x128xf32>,
    %c0_147 = arith.constant 0 : index
    %c0_148 = arith.constant 0 : index
    %114 = vector.load %arg25[%c0_147, %c0_148] : memref<32x384xf32, #tpu.memory_space<vmem>>, vector<32x256xf32>
    %c0_149 = arith.constant 0 : index
    %c0_150 = arith.constant 0 : index
    %115 = vector.load %arg24[%c0_149, %c0_150] : memref<288x256xf32, #tpu.memory_space<vmem>>, vector<32x256xf32>
    tpu.vector_store %arg24[%c0_149, %c0_150], %114 {strides = array<i32>} : memref<288x256xf32, #tpu.memory_space<vmem>>, vector<32x256xf32>,
    %c0_151 = arith.constant 0 : index
    %c1_152 = arith.constant 1 : index
    %116 = vector.load %arg25[%c0_151, %c1_152] : memref<32x384xf32, #tpu.memory_space<vmem>>, vector<32x256xf32>
    %c32_153 = arith.constant 32 : index
    %c0_154 = arith.constant 0 : index
    %117 = vector.load %arg24[%c32_153, %c0_154] : memref<288x256xf32, #tpu.memory_space<vmem>>, vector<32x256xf32>
    tpu.vector_store %arg24[%c32_153, %c0_154], %116 {strides = array<i32>} : memref<288x256xf32, #tpu.memory_space<vmem>>, vector<32x256xf32>,
    %c0_155 = arith.constant 0 : index
    %c2_156 = arith.constant 2 : index
    %118 = vector.load %arg25[%c0_155, %c2_156] : memref<32x384xf32, #tpu.memory_space<vmem>>, vector<32x256xf32>
    %c64_157 = arith.constant 64 : index
    %c0_158 = arith.constant 0 : index
    %119 = vector.load %arg24[%c64_157, %c0_158] : memref<288x256xf32, #tpu.memory_space<vmem>>, vector<32x256xf32>
    tpu.vector_store %arg24[%c64_157, %c0_158], %118 {strides = array<i32>} : memref<288x256xf32, #tpu.memory_space<vmem>>, vector<32x256xf32>,
    %c0_159 = arith.constant 0 : index
    %c16_160 = arith.constant 16 : index
    %120 = vector.load %arg25[%c0_159, %c16_160] : memref<32x384xf32, #tpu.memory_space<vmem>>, vector<32x256xf32>
    %c96_161 = arith.constant 96 : index
    %c0_162 = arith.constant 0 : index
    %121 = vector.load %arg24[%c96_161, %c0_162] : memref<288x256xf32, #tpu.memory_space<vmem>>, vector<32x256xf32>
    tpu.vector_store %arg24[%c96_161, %c0_162], %120 {strides = array<i32>} : memref<288x256xf32, #tpu.memory_space<vmem>>, vector<32x256xf32>,
    %c0_163 = arith.constant 0 : index
    %c17_164 = arith.constant 17 : index
    %122 = vector.load %arg25[%c0_163, %c17_164] : memref<32x384xf32, #tpu.memory_space<vmem>>, vector<32x256xf32>
    %c128_165 = arith.constant 128 : index
    %c0_166 = arith.constant 0 : index
    %123 = vector.load %arg24[%c128_165, %c0_166] : memref<288x256xf32, #tpu.memory_space<vmem>>, vector<32x256xf32>
    tpu.vector_store %arg24[%c128_165, %c0_166], %122 {strides = array<i32>} : memref<288x256xf32, #tpu.memory_space<vmem>>, vector<32x256xf32>,
    %c0_167 = arith.constant 0 : index
    %c18_168 = arith.constant 18 : index
    %124 = vector.load %arg25[%c0_167, %c18_168] : memref<32x384xf32, #tpu.memory_space<vmem>>, vector<32x256xf32>
    %c160 = arith.constant 160 : index
    %c0_169 = arith.constant 0 : index
    %125 = vector.load %arg24[%c160, %c0_169] : memref<288x256xf32, #tpu.memory_space<vmem>>, vector<32x256xf32>
    tpu.vector_store %arg24[%c160, %c0_169], %124 {strides = array<i32>} : memref<288x256xf32, #tpu.memory_space<vmem>>, vector<32x256xf32>,
    %c0_170 = arith.constant 0 : index
    %c32_171 = arith.constant 32 : index
    %126 = vector.load %arg25[%c0_170, %c32_171] : memref<32x384xf32, #tpu.memory_space<vmem>>, vector<32x256xf32>
    %c192 = arith.constant 192 : index
    %c0_172 = arith.constant 0 : index
    %127 = vector.load %arg24[%c192, %c0_172] : memref<288x256xf32, #tpu.memory_space<vmem>>, vector<32x256xf32>
    tpu.vector_store %arg24[%c192, %c0_172], %126 {strides = array<i32>} : memref<288x256xf32, #tpu.memory_space<vmem>>, vector<32x256xf32>,
    %c0_173 = arith.constant 0 : index
    %c33_174 = arith.constant 33 : index
    %128 = vector.load %arg25[%c0_173, %c33_174] : memref<32x384xf32, #tpu.memory_space<vmem>>, vector<32x256xf32>
    %c224 = arith.constant 224 : index
    %c0_175 = arith.constant 0 : index
    %129 = vector.load %arg24[%c224, %c0_175] : memref<288x256xf32, #tpu.memory_space<vmem>>, vector<32x256xf32>
    tpu.vector_store %arg24[%c224, %c0_175], %128 {strides = array<i32>} : memref<288x256xf32, #tpu.memory_space<vmem>>, vector<32x256xf32>,
    %c0_176 = arith.constant 0 : index
    %c34_177 = arith.constant 34 : index
    %130 = vector.load %arg25[%c0_176, %c34_177] : memref<32x384xf32, #tpu.memory_space<vmem>>, vector<32x256xf32>
    %c256_178 = arith.constant 256 : index
    %c0_179 = arith.constant 0 : index
    %131 = vector.load %arg24[%c256_178, %c0_179] : memref<288x256xf32, #tpu.memory_space<vmem>>, vector<32x256xf32>
    tpu.vector_store %arg24[%c256_178, %c0_179], %130 {strides = array<i32>} : memref<288x256xf32, #tpu.memory_space<vmem>>, vector<32x256xf32>,
    %c0_180 = arith.constant 0 : index
    %c0_181 = arith.constant 0 : index
    %132 = vector.load %arg9[%c0_180, %c0_181] : memref<32x288xf32, #tpu.memory_space<vmem>>, vector<32x288xf32>
    %c0_182 = arith.constant 0 : index
    %c0_183 = arith.constant 0 : index
    %133 = vector.load %arg24[%c0_182, %c0_183] : memref<288x256xf32, #tpu.memory_space<vmem>>, vector<288x256xf32>
    %cst_184 = arith.constant dense<0.000000e+00> : vector<32x256xf32>
    %134 = tpu.matmul %132, %133, %cst_184 {dimension_numbers = #tpu.dot_dimension_numbers<[1], [0], [0], [1], [0, 0, 1, 1], [], []>} : vector<32x288xf32>, vector<288x256xf32>, vector<32x256xf32> -> vector<32x256xf32>
    %c0_185 = arith.constant 0 : index
    %c0_186 = arith.constant 0 : index
    %135 = vector.load %arg10[%c0_185, %c0_186] : memref<32x1xf32, #tpu.memory_space<vmem>>, vector<32x1xf32>
    %136 = vector.broadcast %135 : vector<32x1xf32> to vector<32x256xf32>
    %137 = arith.addf %134, %136 : vector<32x256xf32>
    %cst_187 = arith.constant 0.000000e+00 : f32
    %138 = vector.broadcast %cst_187 : f32 to vector<32x256xf32>
    %139 = arith.maximumf %137, %138 : vector<32x256xf32>
    %c0_188 = arith.constant 0 : index
    %c0_189 = arith.constant 0 : index
    %c0_190 = arith.constant 0 : index
    %140 = vector.load %arg17[%c0_188, %c0_189, %c0_190] : memref<1x32x384xf32, #tpu.memory_space<vmem>>, vector<1x32x256xf32>
    %141 = vector.shape_cast %140 : vector<1x32x256xf32> to vector<32x256xf32>
    %142 = vector.shape_cast %139 : vector<32x256xf32> to vector<1x32x256xf32>
    tpu.vector_store %arg17[%c0_188, %c0_189, %c0_190], %142 {strides = array<i32>} : memref<1x32x384xf32, #tpu.memory_space<vmem>>, vector<1x32x256xf32>,
    %cst_191 = arith.constant 0.000000e+00 : f32
    %143 = vector.broadcast %cst_191 : f32 to vector<32x128xf32>
    %c0_192 = arith.constant 0 : index
    %c0_193 = arith.constant 0 : index
    %c256_194 = arith.constant 256 : index
    %144 = vector.load %arg17[%c0_192, %c0_193, %c256_194] : memref<1x32x384xf32, #tpu.memory_space<vmem>>, vector<1x32x128xf32>
    %145 = vector.shape_cast %144 : vector<1x32x128xf32> to vector<32x128xf32>
    %146 = vector.shape_cast %143 : vector<32x128xf32> to vector<1x32x128xf32>
    tpu.vector_store %arg17[%c0_192, %c0_193, %c256_194], %146 {strides = array<i32>} : memref<1x32x384xf32, #tpu.memory_space<vmem>>, vector<1x32x128xf32>,
    %c0_195 = arith.constant 0 : index
    %c0_196 = arith.constant 0 : index
    %c0_197 = arith.constant 0 : index
    %147 = vector.load %arg17[%c0_195, %c0_196, %c0_197] : memref<1x32x384xf32, #tpu.memory_space<vmem>>, vector<1x32x256xf32>
    %148 = vector.shape_cast %147 : vector<1x32x256xf32> to vector<32x256xf32>
    %c0_198 = arith.constant 0 : index
    %c0_199 = arith.constant 0 : index
    %c1_200 = arith.constant 1 : index
    %149 = vector.load %arg17[%c0_198, %c0_199, %c1_200] : memref<1x32x384xf32, #tpu.memory_space<vmem>>, vector<1x32x256xf32>
    %150 = vector.shape_cast %149 : vector<1x32x256xf32> to vector<32x256xf32>
    %151 = arith.maximumf %148, %150 : vector<32x256xf32>
    %c0_201 = arith.constant 0 : index
    %c0_202 = arith.constant 0 : index
    %c16_203 = arith.constant 16 : index
    %152 = vector.load %arg17[%c0_201, %c0_202, %c16_203] : memref<1x32x384xf32, #tpu.memory_space<vmem>>, vector<1x32x256xf32>
    %153 = vector.shape_cast %152 : vector<1x32x256xf32> to vector<32x256xf32>
    %154 = arith.maximumf %151, %153 : vector<32x256xf32>
    %c0_204 = arith.constant 0 : index
    %c0_205 = arith.constant 0 : index
    %c17_206 = arith.constant 17 : index
    %155 = vector.load %arg17[%c0_204, %c0_205, %c17_206] : memref<1x32x384xf32, #tpu.memory_space<vmem>>, vector<1x32x256xf32>
    %156 = vector.shape_cast %155 : vector<1x32x256xf32> to vector<32x256xf32>
    %157 = arith.maximumf %154, %156 : vector<32x256xf32>
    %c0_207 = arith.constant 0 : index
    %c0_208 = arith.constant 0 : index
    %158 = vector.load %arg11[%c0_207, %c0_208] : memref<256x256xf32, #tpu.memory_space<vmem>>, vector<256x256xf32>
    %cst_209 = arith.constant dense<0.000000e+00> : vector<32x256xf32>
    %159 = tpu.matmul %157, %158, %cst_209 {dimension_numbers = #tpu.dot_dimension_numbers<[1], [0], [0], [1], [0, 0, 1, 1], [], []>} : vector<32x256xf32>, vector<256x256xf32>, vector<32x256xf32> -> vector<32x256xf32>
    %c0_210 = arith.constant 0 : index
    %c0_211 = arith.constant 0 : index
    %160 = vector.load %arg26[%c0_210, %c0_211] : memref<32x256xf32, #tpu.memory_space<vmem>>, vector<32x256xf32>
    tpu.vector_store %arg26[%c0_210, %c0_211], %159 {strides = array<i32>} : memref<32x256xf32, #tpu.memory_space<vmem>>, vector<32x256xf32>,
    %c0_212 = arith.constant 0 : index
    %c0_213 = arith.constant 0 : index
    %161 = vector.load %arg26[%c0_212, %c0_213] : memref<32x256xf32, #tpu.memory_space<vmem>>, vector<32x128xf32>
    %c0_214 = arith.constant 0 : index
    %c0_215 = arith.constant 0 : index
    %162 = vector.load %arg27[%c0_214, %c0_215] : memref<288x128xf32, #tpu.memory_space<vmem>>, vector<32x128xf32>
    tpu.vector_store %arg27[%c0_214, %c0_215], %161 {strides = array<i32>} : memref<288x128xf32, #tpu.memory_space<vmem>>, vector<32x128xf32>,
    %c0_216 = arith.constant 0 : index
    %c1_217 = arith.constant 1 : index
    %163 = vector.load %arg26[%c0_216, %c1_217] : memref<32x256xf32, #tpu.memory_space<vmem>>, vector<32x128xf32>
    %c32_218 = arith.constant 32 : index
    %c0_219 = arith.constant 0 : index
    %164 = vector.load %arg27[%c32_218, %c0_219] : memref<288x128xf32, #tpu.memory_space<vmem>>, vector<32x128xf32>
    tpu.vector_store %arg27[%c32_218, %c0_219], %163 {strides = array<i32>} : memref<288x128xf32, #tpu.memory_space<vmem>>, vector<32x128xf32>,
    %c0_220 = arith.constant 0 : index
    %c2_221 = arith.constant 2 : index
    %165 = vector.load %arg26[%c0_220, %c2_221] : memref<32x256xf32, #tpu.memory_space<vmem>>, vector<32x128xf32>
    %c64_222 = arith.constant 64 : index
    %c0_223 = arith.constant 0 : index
    %166 = vector.load %arg27[%c64_222, %c0_223] : memref<288x128xf32, #tpu.memory_space<vmem>>, vector<32x128xf32>
    tpu.vector_store %arg27[%c64_222, %c0_223], %165 {strides = array<i32>} : memref<288x128xf32, #tpu.memory_space<vmem>>, vector<32x128xf32>,
    %c0_224 = arith.constant 0 : index
    %c6 = arith.constant 6 : index
    %167 = vector.load %arg26[%c0_224, %c6] : memref<32x256xf32, #tpu.memory_space<vmem>>, vector<32x128xf32>
    %c96_225 = arith.constant 96 : index
    %c0_226 = arith.constant 0 : index
    %168 = vector.load %arg27[%c96_225, %c0_226] : memref<288x128xf32, #tpu.memory_space<vmem>>, vector<32x128xf32>
    tpu.vector_store %arg27[%c96_225, %c0_226], %167 {strides = array<i32>} : memref<288x128xf32, #tpu.memory_space<vmem>>, vector<32x128xf32>,
    %c0_227 = arith.constant 0 : index
    %c7 = arith.constant 7 : index
    %169 = vector.load %arg26[%c0_227, %c7] : memref<32x256xf32, #tpu.memory_space<vmem>>, vector<32x128xf32>
    %c128_228 = arith.constant 128 : index
    %c0_229 = arith.constant 0 : index
    %170 = vector.load %arg27[%c128_228, %c0_229] : memref<288x128xf32, #tpu.memory_space<vmem>>, vector<32x128xf32>
    tpu.vector_store %arg27[%c128_228, %c0_229], %169 {strides = array<i32>} : memref<288x128xf32, #tpu.memory_space<vmem>>, vector<32x128xf32>,
    %c0_230 = arith.constant 0 : index
    %c8_231 = arith.constant 8 : index
    %171 = vector.load %arg26[%c0_230, %c8_231] : memref<32x256xf32, #tpu.memory_space<vmem>>, vector<32x128xf32>
    %c160_232 = arith.constant 160 : index
    %c0_233 = arith.constant 0 : index
    %172 = vector.load %arg27[%c160_232, %c0_233] : memref<288x128xf32, #tpu.memory_space<vmem>>, vector<32x128xf32>
    tpu.vector_store %arg27[%c160_232, %c0_233], %171 {strides = array<i32>} : memref<288x128xf32, #tpu.memory_space<vmem>>, vector<32x128xf32>,
    %c0_234 = arith.constant 0 : index
    %c12 = arith.constant 12 : index
    %173 = vector.load %arg26[%c0_234, %c12] : memref<32x256xf32, #tpu.memory_space<vmem>>, vector<32x128xf32>
    %c192_235 = arith.constant 192 : index
    %c0_236 = arith.constant 0 : index
    %174 = vector.load %arg27[%c192_235, %c0_236] : memref<288x128xf32, #tpu.memory_space<vmem>>, vector<32x128xf32>
    tpu.vector_store %arg27[%c192_235, %c0_236], %173 {strides = array<i32>} : memref<288x128xf32, #tpu.memory_space<vmem>>, vector<32x128xf32>,
    %c0_237 = arith.constant 0 : index
    %c13 = arith.constant 13 : index
    %175 = vector.load %arg26[%c0_237, %c13] : memref<32x256xf32, #tpu.memory_space<vmem>>, vector<32x128xf32>
    %c224_238 = arith.constant 224 : index
    %c0_239 = arith.constant 0 : index
    %176 = vector.load %arg27[%c224_238, %c0_239] : memref<288x128xf32, #tpu.memory_space<vmem>>, vector<32x128xf32>
    tpu.vector_store %arg27[%c224_238, %c0_239], %175 {strides = array<i32>} : memref<288x128xf32, #tpu.memory_space<vmem>>, vector<32x128xf32>,
    %c0_240 = arith.constant 0 : index
    %c14 = arith.constant 14 : index
    %177 = vector.load %arg26[%c0_240, %c14] : memref<32x256xf32, #tpu.memory_space<vmem>>, vector<32x128xf32>
    %c256_241 = arith.constant 256 : index
    %c0_242 = arith.constant 0 : index
    %178 = vector.load %arg27[%c256_241, %c0_242] : memref<288x128xf32, #tpu.memory_space<vmem>>, vector<32x128xf32>
    tpu.vector_store %arg27[%c256_241, %c0_242], %177 {strides = array<i32>} : memref<288x128xf32, #tpu.memory_space<vmem>>, vector<32x128xf32>,
    %c0_243 = arith.constant 0 : index
    %c0_244 = arith.constant 0 : index
    %179 = vector.load %arg12[%c0_243, %c0_244] : memref<64x288xf32, #tpu.memory_space<vmem>>, vector<64x288xf32>
    %c0_245 = arith.constant 0 : index
    %c0_246 = arith.constant 0 : index
    %180 = vector.load %arg27[%c0_245, %c0_246] : memref<288x128xf32, #tpu.memory_space<vmem>>, vector<288x128xf32>
    %cst_247 = arith.constant dense<0.000000e+00> : vector<64x128xf32>
    %181 = tpu.matmul %179, %180, %cst_247 {dimension_numbers = #tpu.dot_dimension_numbers<[1], [0], [0], [1], [0, 0, 1, 1], [], []>} : vector<64x288xf32>, vector<288x128xf32>, vector<64x128xf32> -> vector<64x128xf32>
    %c0_248 = arith.constant 0 : index
    %c0_249 = arith.constant 0 : index
    %182 = vector.load %arg13[%c0_248, %c0_249] : memref<64x1xf32, #tpu.memory_space<vmem>>, vector<64x1xf32>
    %183 = vector.broadcast %182 : vector<64x1xf32> to vector<64x128xf32>
    %184 = arith.addf %181, %183 : vector<64x128xf32>
    %cst_250 = arith.constant 0.000000e+00 : f32
    %185 = vector.broadcast %cst_250 : f32 to vector<64x128xf32>
    %186 = arith.maximumf %184, %185 : vector<64x128xf32>
    %c0_251 = arith.constant 0 : index
    %c0_252 = arith.constant 0 : index
    %187 = vector.load %arg29[%c0_251, %c0_252] : memref<64x256xf32, #tpu.memory_space<vmem>>, vector<64x128xf32>
    tpu.vector_store %arg29[%c0_251, %c0_252], %186 {strides = array<i32>} : memref<64x256xf32, #tpu.memory_space<vmem>>, vector<64x128xf32>,
    %cst_253 = arith.constant 0.000000e+00 : f32
    %188 = vector.broadcast %cst_253 : f32 to vector<64x128xf32>
    %c0_254 = arith.constant 0 : index
    %c128_255 = arith.constant 128 : index
    %189 = vector.load %arg29[%c0_254, %c128_255] : memref<64x256xf32, #tpu.memory_space<vmem>>, vector<64x128xf32>
    tpu.vector_store %arg29[%c0_254, %c128_255], %188 {strides = array<i32>} : memref<64x256xf32, #tpu.memory_space<vmem>>, vector<64x128xf32>,
    %c0_256 = arith.constant 0 : index
    %c0_257 = arith.constant 0 : index
    %190 = vector.load %arg29[%c0_256, %c0_257] : memref<64x256xf32, #tpu.memory_space<vmem>>, vector<64x128xf32>
    %c0_258 = arith.constant 0 : index
    %c0_259 = arith.constant 0 : index
    %191 = vector.load %arg28[%c0_258, %c0_259] : memref<576x128xf32, #tpu.memory_space<vmem>>, vector<64x128xf32>
    tpu.vector_store %arg28[%c0_258, %c0_259], %190 {strides = array<i32>} : memref<576x128xf32, #tpu.memory_space<vmem>>, vector<64x128xf32>,
    %c0_260 = arith.constant 0 : index
    %c1_261 = arith.constant 1 : index
    %192 = vector.load %arg29[%c0_260, %c1_261] : memref<64x256xf32, #tpu.memory_space<vmem>>, vector<64x128xf32>
    %c64_262 = arith.constant 64 : index
    %c0_263 = arith.constant 0 : index
    %193 = vector.load %arg28[%c64_262, %c0_263] : memref<576x128xf32, #tpu.memory_space<vmem>>, vector<64x128xf32>
    tpu.vector_store %arg28[%c64_262, %c0_263], %192 {strides = array<i32>} : memref<576x128xf32, #tpu.memory_space<vmem>>, vector<64x128xf32>,
    %c0_264 = arith.constant 0 : index
    %c2_265 = arith.constant 2 : index
    %194 = vector.load %arg29[%c0_264, %c2_265] : memref<64x256xf32, #tpu.memory_space<vmem>>, vector<64x128xf32>
    %c128_266 = arith.constant 128 : index
    %c0_267 = arith.constant 0 : index
    %195 = vector.load %arg28[%c128_266, %c0_267] : memref<576x128xf32, #tpu.memory_space<vmem>>, vector<64x128xf32>
    tpu.vector_store %arg28[%c128_266, %c0_267], %194 {strides = array<i32>} : memref<576x128xf32, #tpu.memory_space<vmem>>, vector<64x128xf32>,
    %c0_268 = arith.constant 0 : index
    %c6_269 = arith.constant 6 : index
    %196 = vector.load %arg29[%c0_268, %c6_269] : memref<64x256xf32, #tpu.memory_space<vmem>>, vector<64x128xf32>
    %c192_270 = arith.constant 192 : index
    %c0_271 = arith.constant 0 : index
    %197 = vector.load %arg28[%c192_270, %c0_271] : memref<576x128xf32, #tpu.memory_space<vmem>>, vector<64x128xf32>
    tpu.vector_store %arg28[%c192_270, %c0_271], %196 {strides = array<i32>} : memref<576x128xf32, #tpu.memory_space<vmem>>, vector<64x128xf32>,
    %c0_272 = arith.constant 0 : index
    %c7_273 = arith.constant 7 : index
    %198 = vector.load %arg29[%c0_272, %c7_273] : memref<64x256xf32, #tpu.memory_space<vmem>>, vector<64x128xf32>
    %c256_274 = arith.constant 256 : index
    %c0_275 = arith.constant 0 : index
    %199 = vector.load %arg28[%c256_274, %c0_275] : memref<576x128xf32, #tpu.memory_space<vmem>>, vector<64x128xf32>
    tpu.vector_store %arg28[%c256_274, %c0_275], %198 {strides = array<i32>} : memref<576x128xf32, #tpu.memory_space<vmem>>, vector<64x128xf32>,
    %c0_276 = arith.constant 0 : index
    %c8_277 = arith.constant 8 : index
    %200 = vector.load %arg29[%c0_276, %c8_277] : memref<64x256xf32, #tpu.memory_space<vmem>>, vector<64x128xf32>
    %c320 = arith.constant 320 : index
    %c0_278 = arith.constant 0 : index
    %201 = vector.load %arg28[%c320, %c0_278] : memref<576x128xf32, #tpu.memory_space<vmem>>, vector<64x128xf32>
    tpu.vector_store %arg28[%c320, %c0_278], %200 {strides = array<i32>} : memref<576x128xf32, #tpu.memory_space<vmem>>, vector<64x128xf32>,
    %c0_279 = arith.constant 0 : index
    %c12_280 = arith.constant 12 : index
    %202 = vector.load %arg29[%c0_279, %c12_280] : memref<64x256xf32, #tpu.memory_space<vmem>>, vector<64x128xf32>
    %c384 = arith.constant 384 : index
    %c0_281 = arith.constant 0 : index
    %203 = vector.load %arg28[%c384, %c0_281] : memref<576x128xf32, #tpu.memory_space<vmem>>, vector<64x128xf32>
    tpu.vector_store %arg28[%c384, %c0_281], %202 {strides = array<i32>} : memref<576x128xf32, #tpu.memory_space<vmem>>, vector<64x128xf32>,
    %c0_282 = arith.constant 0 : index
    %c13_283 = arith.constant 13 : index
    %204 = vector.load %arg29[%c0_282, %c13_283] : memref<64x256xf32, #tpu.memory_space<vmem>>, vector<64x128xf32>
    %c448 = arith.constant 448 : index
    %c0_284 = arith.constant 0 : index
    %205 = vector.load %arg28[%c448, %c0_284] : memref<576x128xf32, #tpu.memory_space<vmem>>, vector<64x128xf32>
    tpu.vector_store %arg28[%c448, %c0_284], %204 {strides = array<i32>} : memref<576x128xf32, #tpu.memory_space<vmem>>, vector<64x128xf32>,
    %c0_285 = arith.constant 0 : index
    %c14_286 = arith.constant 14 : index
    %206 = vector.load %arg29[%c0_285, %c14_286] : memref<64x256xf32, #tpu.memory_space<vmem>>, vector<64x128xf32>
    %c512 = arith.constant 512 : index
    %c0_287 = arith.constant 0 : index
    %207 = vector.load %arg28[%c512, %c0_287] : memref<576x128xf32, #tpu.memory_space<vmem>>, vector<64x128xf32>
    tpu.vector_store %arg28[%c512, %c0_287], %206 {strides = array<i32>} : memref<576x128xf32, #tpu.memory_space<vmem>>, vector<64x128xf32>,
    %c0_288 = arith.constant 0 : index
    %c0_289 = arith.constant 0 : index
    %208 = vector.load %arg14[%c0_288, %c0_289] : memref<64x576xf32, #tpu.memory_space<vmem>>, vector<64x576xf32>
    %c0_290 = arith.constant 0 : index
    %c0_291 = arith.constant 0 : index
    %209 = vector.load %arg28[%c0_290, %c0_291] : memref<576x128xf32, #tpu.memory_space<vmem>>, vector<576x128xf32>
    %cst_292 = arith.constant dense<0.000000e+00> : vector<64x128xf32>
    %210 = tpu.matmul %208, %209, %cst_292 {dimension_numbers = #tpu.dot_dimension_numbers<[1], [0], [0], [1], [0, 0, 1, 1], [], []>} : vector<64x576xf32>, vector<576x128xf32>, vector<64x128xf32> -> vector<64x128xf32>
    %c0_293 = arith.constant 0 : index
    %c0_294 = arith.constant 0 : index
    %211 = vector.load %arg15[%c0_293, %c0_294] : memref<64x1xf32, #tpu.memory_space<vmem>>, vector<64x1xf32>
    %212 = vector.broadcast %211 : vector<64x1xf32> to vector<64x128xf32>
    %213 = arith.addf %210, %212 : vector<64x128xf32>
    %cst_295 = arith.constant 0.000000e+00 : f32
    %214 = vector.broadcast %cst_295 : f32 to vector<64x128xf32>
    %215 = arith.maximumf %213, %214 : vector<64x128xf32>
    %c0_296 = arith.constant 0 : index
    %c0_297 = arith.constant 0 : index
    %c0_298 = arith.constant 0 : index
    %216 = vector.load %arg18[%c0_296, %c0_297, %c0_298] : memref<1x64x256xf32, #tpu.memory_space<vmem>>, vector<1x64x128xf32>
    %217 = vector.shape_cast %216 : vector<1x64x128xf32> to vector<64x128xf32>
    %218 = vector.shape_cast %215 : vector<64x128xf32> to vector<1x64x128xf32>
    tpu.vector_store %arg18[%c0_296, %c0_297, %c0_298], %218 {strides = array<i32>} : memref<1x64x256xf32, #tpu.memory_space<vmem>>, vector<1x64x128xf32>,
    %cst_299 = arith.constant 0.000000e+00 : f32
    %219 = vector.broadcast %cst_299 : f32 to vector<64x128xf32>
    %c0_300 = arith.constant 0 : index
    %c0_301 = arith.constant 0 : index
    %c128_302 = arith.constant 128 : index
    %220 = vector.load %arg18[%c0_300, %c0_301, %c128_302] : memref<1x64x256xf32, #tpu.memory_space<vmem>>, vector<1x64x128xf32>
    %221 = vector.shape_cast %220 : vector<1x64x128xf32> to vector<64x128xf32>
    %222 = vector.shape_cast %219 : vector<64x128xf32> to vector<1x64x128xf32>
    tpu.vector_store %arg18[%c0_300, %c0_301, %c128_302], %222 {strides = array<i32>} : memref<1x64x256xf32, #tpu.memory_space<vmem>>, vector<1x64x128xf32>,
    return
  }
  func.func @transform_0(%arg0: i32) -> (i32, i32, i32) {
    %c0_i32 = arith.constant 0 : i32
    %c0_i32_0 = arith.constant 0 : i32
    %c0_i32_1 = arith.constant 0 : i32
    return %arg0, %c0_i32, %c0_i32_0 : i32, i32, i32
  }
  func.func @transform_1(%arg0: i32) -> (i32, i32) {
    %c0_i32 = arith.constant 0 : i32
    %c0_i32_0 = arith.constant 0 : i32
    %c0_i32_1 = arith.constant 0 : i32
    return %c0_i32, %c0_i32_0 : i32, i32
  }
  func.func @transform_2(%arg0: i32) -> (i32, i32) {
    %c0_i32 = arith.constant 0 : i32
    %c0_i32_0 = arith.constant 0 : i32
    %c0_i32_1 = arith.constant 0 : i32
    return %c0_i32, %c0_i32_0 : i32, i32
  }
  func.func @transform_3(%arg0: i32) -> (i32, i32) {
    %c0_i32 = arith.constant 0 : i32
    %c0_i32_0 = arith.constant 0 : i32
    %c0_i32_1 = arith.constant 0 : i32
    return %c0_i32, %c0_i32_0 : i32, i32
  }
  func.func @transform_4(%arg0: i32) -> (i32, i32) {
    %c0_i32 = arith.constant 0 : i32
    %c0_i32_0 = arith.constant 0 : i32
    %c0_i32_1 = arith.constant 0 : i32
    return %c0_i32, %c0_i32_0 : i32, i32
  }
  func.func @transform_5(%arg0: i32) -> (i32, i32) {
    %c0_i32 = arith.constant 0 : i32
    %c0_i32_0 = arith.constant 0 : i32
    %c0_i32_1 = arith.constant 0 : i32
    return %c0_i32, %c0_i32_0 : i32, i32
  }
  func.func @transform_6(%arg0: i32) -> (i32, i32) {
    %c0_i32 = arith.constant 0 : i32
    %c0_i32_0 = arith.constant 0 : i32
    %c0_i32_1 = arith.constant 0 : i32
    return %c0_i32, %c0_i32_0 : i32, i32
  }
  func.func @transform_7(%arg0: i32) -> (i32, i32) {
    %c0_i32 = arith.constant 0 : i32
    %c0_i32_0 = arith.constant 0 : i32
    %c0_i32_1 = arith.constant 0 : i32
    return %c0_i32, %c0_i32_0 : i32, i32
  }
  func.func @transform_8(%arg0: i32) -> (i32, i32) {
    %c0_i32 = arith.constant 0 : i32
    %c0_i32_0 = arith.constant 0 : i32
    %c0_i32_1 = arith.constant 0 : i32
    return %c0_i32, %c0_i32_0 : i32, i32
  }
  func.func @transform_9(%arg0: i32) -> (i32, i32) {
    %c0_i32 = arith.constant 0 : i32
    %c0_i32_0 = arith.constant 0 : i32
    %c0_i32_1 = arith.constant 0 : i32
    return %c0_i32, %c0_i32_0 : i32, i32
  }
  func.func @transform_10(%arg0: i32) -> (i32, i32) {
    %c0_i32 = arith.constant 0 : i32
    %c0_i32_0 = arith.constant 0 : i32
    %c0_i32_1 = arith.constant 0 : i32
    return %c0_i32, %c0_i32_0 : i32, i32
  }
  func.func @transform_11(%arg0: i32) -> (i32, i32) {
    %c0_i32 = arith.constant 0 : i32
    %c0_i32_0 = arith.constant 0 : i32
    %c0_i32_1 = arith.constant 0 : i32
    return %c0_i32, %c0_i32_0 : i32, i32
  }
  func.func @transform_12(%arg0: i32) -> (i32, i32) {
    %c0_i32 = arith.constant 0 : i32
    %c0_i32_0 = arith.constant 0 : i32
    %c0_i32_1 = arith.constant 0 : i32
    return %c0_i32, %c0_i32_0 : i32, i32
  }
  func.func @transform_13(%arg0: i32) -> (i32, i32) {
    %c0_i32 = arith.constant 0 : i32
    %c0_i32_0 = arith.constant 0 : i32
    %c0_i32_1 = arith.constant 0 : i32
    return %c0_i32, %c0_i32_0 : i32, i32
  }
  func.func @transform_14(%arg0: i32) -> (i32, i32) {
    %c0_i32 = arith.constant 0 : i32
    %c0_i32_0 = arith.constant 0 : i32
    %c0_i32_1 = arith.constant 0 : i32
    return %c0_i32, %c0_i32_0 : i32, i32
  }
  func.func @transform_15(%arg0: i32) -> (i32, i32, i32) {
    %c0_i32 = arith.constant 0 : i32
    %c0_i32_0 = arith.constant 0 : i32
    %c0_i32_1 = arith.constant 0 : i32
    return %arg0, %c0_i32, %c0_i32_0 : i32, i32, i32
  }
  func.func @transform_16(%arg0: i32) -> (i32, i32, i32) {
    %c0_i32 = arith.constant 0 : i32
    %c0_i32_0 = arith.constant 0 : i32
    %c0_i32_1 = arith.constant 0 : i32
    return %arg0, %c0_i32, %c0_i32_0 : i32, i32, i32
  }
  func.func @transform_17(%arg0: i32) -> (i32, i32, i32) {
    %c0_i32 = arith.constant 0 : i32
    %c0_i32_0 = arith.constant 0 : i32
    %c0_i32_1 = arith.constant 0 : i32
    return %arg0, %c0_i32, %c0_i32_0 : i32, i32, i32
  }
}

</mosaic_0001>

<bundles_post_ra>
// kernel: tpu_custom_call.1
= control target key start
LH: loop header
LB: loop body
LE: loop exit
PB: predicated region body
PF: predicated region fallthrough
CT: control target
= control target key end

     0   :  { %s16117_s0 = inlined_call_operand.hbm [shape: f32[2,8,1536], index: 0, kind: input, shape index: {}]   ;;  %s16118_s1 = inlined_call_operand.hbm [shape: f32[16,72], index: 1, kind: input, shape index: {}]   ;;  %s16119_s2 = inlined_call_operand.vmem [shape: f32[16,1], index: 2, kind: input, shape index: {}]   ;;  %s16120_s3 = inlined_call_operand.hbm [shape: f32[16,144], index: 3, kind: input, shape index: {}]   ;;  %s16121_s4 = inlined_call_operand.vmem [shape: f32[16,1], index: 4, kind: input, shape index: {}]   ;;  %s16122_s5 = inlined_call_operand.hbm [shape: f32[1408,384], index: 5, kind: input, shape index: {}]   ;;  %s16123_s6 = inlined_call_operand.hbm [shape: f32[32,144], index: 6, kind: input, shape index: {}]   ;;  %s16124_s7 = inlined_call_operand.vmem [shape: f32[32,1], index: 7, kind: input, shape index: {}]   ;;  %s16125_s8 = inlined_call_operand.hbm [shape: f32[32,288], index: 8, kind: input, shape index: {}]   ;;  %s16126_s9 = inlined_call_operand.vmem [shape: f32[32,1], index: 9, kind: input, shape index: {}]   ;;  %s16127_s10 = inlined_call_operand.hbm [shape: f32[256,256], index: 10, kind: input, shape index: {}]   ;;  %s16128_s11 = inlined_call_operand.hbm [shape: f32[64,288], index: 11, kind: input, shape index: {}]   ;;  %s16129_s12 = inlined_call_operand.vmem [shape: f32[64,1], index: 12, kind: input, shape index: {}]   ;;  %s16130_s13 = inlined_call_operand.hbm [shape: f32[64,576], index: 13, kind: input, shape index: {}]   ;;  %s16131_s14 = inlined_call_operand.vmem [shape: f32[64,1], index: 14, kind: input, shape index: {}]   ;;  %s16132_s15 = inlined_call_operand.hbm [shape: f32[2,16,1536], index: 15, kind: output, shape index: {0}]   ;;  %s16133_s16 = inlined_call_operand.hbm [shape: f32[2,32,384], index: 16, kind: output, shape index: {1}]   ;;  %s16134_s17 = inlined_call_operand.hbm [shape: f32[2,64,256], index: 17, kind: output, shape index: {2}]  }
   0x1   :  { %16220 = sst [smem:[#allocation50_spill]] %s16117_s0 }
   0x2   :  { %16221 = sst [smem:[#allocation51_spill]] %s16118_s1 }
   0x3   :  { %16222 = sst [smem:[#allocation52_spill]] %s16119_s2 }
   0x4   :  { %16223 = sst [smem:[#allocation53_spill]] %s16120_s3 }
   0x5   :  { %16224 = sst [smem:[#allocation54_spill]] %s16121_s4 }
   0x6   :  { %16225 = sst [smem:[#allocation55_spill]] %s16122_s5 }
   0x7   :  { %16226 = sst [smem:[#allocation56_spill]] %s16123_s6 }
   0x8   :  { %16227 = sst [smem:[#allocation57_spill]] %s16124_s7 }
   0x9   :  { %16228 = sst [smem:[#allocation58_spill]] %s16125_s8 }
   0xa   :  { %16229 = sst [smem:[#allocation59_spill]] %s16126_s9 }
   0xb   :  { %16230 = sst [smem:[#allocation60_spill]] %s16127_s10 }
   0xc   :  { %16231 = sst [smem:[#allocation61_spill]] %s16128_s11 }
   0xd   :  { %16232 = sst [smem:[#allocation62_spill]] %s16129_s12 }
   0xe   :  { %16233 = sst [smem:[#allocation63_spill]] %s16130_s13 }
   0xf   :  { %16234 = sst [smem:[#allocation64_spill]] %s16131_s14 }
  0x10   :  { %16235 = sst [smem:[#allocation65_spill]] %s16132_s15 }
  0x11   :  { %16236 = sst [smem:[#allocation66_spill]] %s16133_s16 }
  0x12   :  { %16237 = sst [smem:[#allocation67_spill]] %s16134_s17 }
  0x13   :  { %23 = vsyncpa [#allocation14], 0 }
  0x14   :  { %25 = vsyncpa [#allocation14 + $0x1], 0 }
  0x15   :  { %26 = vsyncpa [#allocation17], 0 }
  0x16   :  { %27 = vsyncpa [#allocation20], 0 }
  0x17   :  { %28 = vsyncpa [#allocation23], 0 }
  0x18   :  { %29 = vsyncpa [#allocation26], 0 }
  0x19   :  { %30 = vsyncpa [#allocation15], 0 }
  0x1a   :  { %32 = vsyncpa [#allocation15 + $0x1], 0 }
  0x1b   :  { %33 = vsyncpa [#allocation30], 0 }
  0x1c   :  { %35 = vsyncpa [#allocation30 + $0x1], 0  ;;  %s12146_s24 = smov 0   ;;  %s12148_s25 = smov 0  }
  0x1d   :  { %s12150_s26 = smov 0   ;;  %s12152_s27 = smov 0  }
  0x1e LB: > { %s16238_s0 = sld [smem:[#allocation51_spill]]  ;;  %s12170_s18 = sadd.s32 4294967295, %s12011_s27   ;;  %s12011_s27 = sphi %s12152_s27, %s16392_s27   ;;  %s12007_s26 = sphi %s12150_s26, %s16391_s26   ;;  %s12003_s25 = sphi %s12148_s25, %s16390_s25   ;;  %s11999_s24 = sphi %s12146_s24, %s16389_s24  }
  0x1f   : > { %p9473_p0 = scmp.ge.s32.totalorder %s12011_s27, 1  ;;  %p62_p1 = scmp.eq.s32.totalorder %s12170_s18, 0 }
  0x20   : > { %p444_p2 = scmp.lt.s32.totalorder %s12011_s27, 3  ;;  %s12013_s1 = smov [#allocation16]  }
  0x21   : > { %s457_s20 = sshll.u32 %s12013_s1, 4  ;;  %s16240_s5 = sld [smem:[#allocation55_spill]]  ;;  %s458_s20 = int_to_ptr.vmem [resolvable:$true] %s457_s20 }
  0x22   : > { %p12175_p3 = pnand %p9473_p0, %p444_p2  ;;  %s12014_s29 = smov [#allocation19]  }
  0x23   : > { %s12015_s1 = smov 128   ;;  %s12016_s17 = smov 8  }
  0x24   : > { %s455_s30 = sshll.u32 %s16238_s0, 4  ;;  %p9624_p4 = pneg %p12175_p3  ;;  %s456_s30 = int_to_ptr.hbm [resolvable:$true] %s455_s30 }
  0x25   : > { %s491_s0 = sshll.u32 %s12014_s29, 4  ;;  %s12017_s15 = smov 384   ;;  %s492_s0 = int_to_ptr.vmem [resolvable:$true] %s491_s0 }
  0x26   : > { %p12187_p6 = pnand %p9624_p4, %p62_p1  ;;  %s12018_s21 = smov 24  }
  0x27   : > { %s489_s23 = sshll.u32 %s16240_s5, 4  ;;  %s16242_s8 = sld [smem:[#allocation58_spill]]  ;;  %s490_s23 = int_to_ptr.hbm [resolvable:$true] %s489_s23 }
  0x28   : > { %9627 = dma.hbm_to_vmem [thread:$0]  (!%p12187_p6), %s456_s30, 256, %s458_s20, [#allocation17], %s12015_s1, %s12015_s1, %s12016_s17  }
  0x29   : > { %9633 = dma.hbm_to_vmem [thread:$0]  (!%p12187_p6), %s490_s23, 67584, %s492_s0, [#allocation20], %s12017_s15, %s12017_s15, %s12018_s21  }
  0x2a   : > { %s12019_s14 = smov [#allocation22]   ;;  %s16243_s11 = sld [smem:[#allocation61_spill]] }
  0x2b   : > { %s522_s12 = sshll.u32 %s12019_s14, 4  ;;  %s12020_s17 = smov [#allocation25]   ;;  %s523_s12 = int_to_ptr.vmem [resolvable:$true] %s522_s12 }
  0x2c   : > { %s553_s30 = sshll.u32 %s12020_s17, 4  ;;  %s16244_s3 = sld [smem:[#allocation53_spill]]  ;;  %s554_s30 = int_to_ptr.vmem [resolvable:$true] %s553_s30 }
  0x2d   : > { %s520_s16 = sshll.u32 %s16242_s8, 4  ;;  %s12021_s5 = smov [#allocation18]   ;;  %s521_s16 = int_to_ptr.hbm [resolvable:$true] %s520_s16 }
  0x2e   : > { %9639 = dma.hbm_to_vmem [thread:$0]  (!%p12187_p6), %s521_s16, 1536, %s523_s12, [#allocation23], %s12017_s15, %s12017_s15, %s12018_s21  }
  0x2f   : > { %s474_s14 = sshll.u32 %s12021_s5, 4  ;;  %s16245_s6 = sld [smem:[#allocation56_spill]]  ;;  %s475_s14 = int_to_ptr.vmem [resolvable:$true] %s474_s14 }
  0x30   : > { %s551_s7 = sshll.u32 %s16243_s11, 4  ;;  %s12022_s12 = smov 256   ;;  %s552_s7 = int_to_ptr.hbm [resolvable:$true] %s551_s7 }
  0x31   : > { %9645 = dma.hbm_to_vmem [thread:$0]  (!%p12187_p6), %s552_s7, 3072, %s554_s30, [#allocation26], %s12017_s15, %s12017_s15, %s12018_s21  }
  0x32   : > { %s472_s0 = sshll.u32 %s16244_s3, 4  ;;  %s12023_s16 = smov 16   ;;  %s473_s0 = int_to_ptr.hbm [resolvable:$true] %s472_s0 }
  0x33   : > { %9630 = dma.hbm_to_vmem [thread:$0]  (!%p12187_p6), %s473_s0, 512, %s475_s14, [#allocation17], %s12022_s12, %s12022_s12, %s12023_s16  }
  0x34   : > { %s12024_s29 = smov [#allocation21]   ;;  %s16246_s10 = sld [smem:[#allocation60_spill]] }
  0x35   : > { %s503_s22 = sshll.u32 %s16245_s6, 4  ;;  %s505_s17 = sshll.u32 %s12024_s29, 4  ;;  %s504_s22 = int_to_ptr.hbm [resolvable:$true] %s503_s22  ;;  %s506_s17 = int_to_ptr.vmem [resolvable:$true] %s505_s17 }
  0x36   : > { %9636 = dma.hbm_to_vmem [thread:$0]  (!%p12187_p6), %s504_s22, 1024, %s506_s17, [#allocation20], %s12022_s12, %s12022_s12, %s12023_s16  }
  0x37   : > { %s16247_s13 = sld [smem:[#allocation63_spill]]  ;;  %s12025_s0 = smov [#allocation24]  }
  0x38   : > { %s539_s5 = sshll.u32 %s12025_s0, 4  ;;  %s12026_s14 = smov [#allocation27]   ;;  %s540_s5 = int_to_ptr.vmem [resolvable:$true] %s539_s5 }
  0x39   : > { %s570_s9 = sshll.u32 %s12026_s14, 4  ;;  %s12027_s1 = smov 640   ;;  %s571_s9 = int_to_ptr.vmem [resolvable:$true] %s570_s9 }
  0x3a   : > { %s537_s7 = sshll.u32 %s16246_s10, 4  ;;  %s12028_s22 = smov 40   ;;  %s538_s7 = int_to_ptr.hbm [resolvable:$true] %s537_s7 }
  0x3b   : > { %9642 = dma.hbm_to_vmem [thread:$0]  (!%p12187_p6), %s538_s7, 8192, %s540_s5, [#allocation23], %s12022_s12, %s12022_s12, %s12023_s16  }
  0x3c   : > { %s16143_s29 = sadd.s32 4294967294, %s12011_s27   ;;  %s12227_s17 = sadd.s32 1, %s12011_s27  }
  0x3d   : > { %s568_s30 = sshll.u32 %s16247_s13, 4  ;;  %s45_s20 = ssub.s32 %s12011_s27, %s12227_s17  ;;  %s569_s30 = int_to_ptr.hbm [resolvable:$true] %s568_s30 }
  0x3e   : > { %9648 = dma.hbm_to_vmem [thread:$0]  (!%p12187_p6), %s569_s30, 5120, %s571_s9, [#allocation26], %s12027_s1, %s12027_s1, %s12028_s22  }
  0x3f   : > { %s48_s23 = sadd.s32 1, %s12007_s26  ;;  %p46_p7 = scmp.eq.s32.totalorder %s45_s20, 0 }
  0x40   : > { %p55_p8 = scmp.ne.s32.totalorder %s12007_s26, %s12003_s25  ;;  %p56_p9 = scmp.eq.s32.totalorder %s12011_s27, 0 }
  0x41   : > { %p61_p10 = scmp.ne.s32.totalorder %s12003_s25, %s11999_s24  ;;  %p379_p13 = scmp.eq.s32.totalorder %s12170_s18, 1 }
  0x42   : > { %s12238_s12 = scalar_select %p46_p7, %s12007_s26, %s48_s23  }
  0x43   : > { %p57_p11 = por %p56_p9, %p55_p8  ;;  %p12242_p12 = por %p62_p1, %p61_p10 }
  0x44   : > { %p385_p0 = scmp.eq.s32.totalorder %s16143_s29, 1  ;;  %p9671_p2 = scmp.lt.s32.totalorder %s12011_s27, 2 }
  0x45   : > { %s587_s28 = sand.u32 1, %s12007_s26   ;;  %p12251_p4 = por %p379_p13, %p55_p8 }
  0x46   : > { %p12255_p6 = por %p385_p0, %p61_p10  ;;  %s9578_s21 = smul.u32 96, %s587_s28 }
  0x47   : > { %s9579_s30 = smul.u32 96, %s12011_s27  ;;  %p12260_p7 = pnand %p9671_p2, %p57_p11 }
  0x48   : > { %s16252_s9 = sld [smem:[#allocation50_spill]]  ;;  %s591_s22 = scalar_lea.vmem [#allocation13], %s9578_s21 }
  0x49   : > { %s600_s20 = sshll.u32 %s591_s22, 4  ;;  %s588_s29 = scalar_lea.sflag [#allocation14], %s587_s28  ;;  %s601_s20 = int_to_ptr.vmem [resolvable:$true] %s600_s20 }
  0x4a   : > { %p11843_p9 = pneg %p12260_p7 }
  0x4e   : > { %s596_s1 = scalar_lea.hbm %s16252_s9, %s9579_s30  ;;  %s11846_s5 = scalar_lea.hbm %s16252_s9, 192 }
  0x4f   : > { %s598_s23 = sshll.u32 %s596_s1, 4  ;;  %s599_s23 = int_to_ptr.hbm [resolvable:$true] %s598_s23 }
  0x50   : > { %s11839_s3 = sshra.s32 %s599_s23, 4  ;;  %s11840_s3 = int_to_ptr.hbm [resolvable:$true] %s11839_s3 }
  0x51   : > { %s11841_s6 = scalar_lea.hbm %s11840_s3, 96  ;;  %p11847_p13 = scmp.lt.s32.totalorder %s11840_s3, %s16252_s9 }
  0x52   : > { %p11842_p8 = scmp.ne.s32.totalorder %s11840_s3, %s11841_s6  ;;  %p11848_p0 = scmp.lt.s32.totalorder %s11846_s5, %s11841_s6 }
  0x54   : > { %p11844_p10 = pnand %p11843_p9, %p11842_p8  ;;  %p11849_p2 = por %p11848_p0, %p11847_p13 }
  0x56   : > { %p11845_p11 = pneg %p11844_p10 }
  0x58   : > { %p11850_p5 = pnand %p11849_p2, %p11845_p11 }
  0x5a   : > { %11853 = shalt.err (!%p11850_p5)
}
  0x5b   : > { %9652 = dma.hbm_to_vmem [thread:$0]  (!%p12260_p7), %s599_s23, 1536, %s601_s20, %s588_s29  }
  0x5c   : > { %609 = sbr.rel (%p12175_p3) target bundleno = 3272 (0xcc8), region = 80 }
  0x61   : > { %s12280_s28 = sand.u32 1, %s12003_s25  }
  0x62   : > { %s9580_s8 = smul.u32 96, %s12280_s28  ;;  %s612_s10 = scalar_lea.sflag [#allocation14], %s12280_s28 }
  0x64   : > { %s12286_s3 = scalar_lea.vmem [#allocation13], %s9580_s8 }
  0x65   : > { %11970 = dma.done.wait (%p12242_p12), %s612_s10, 1536  }
  0x66   : > { %11972 = vsyncadd (%p12242_p12), %s612_s10, 4294965760 }
  0x67   : > { %11974 = dma.done.wait (%p62_p1), [#allocation17], 768  }
  0x68   : > { %11976 = vsyncadd (%p62_p1), [#allocation17], 4294966528 }
  0x69   : > { %11978 = dma.done.wait (%p62_p1), [#allocation20], 68608  }
  0x6a   : > { %11980 = vsyncadd (%p62_p1), [#allocation20], 4294898688 }
  0x6b   : > { %11982 = dma.done.wait (%p62_p1), [#allocation23], 9728  }
  0x6c   : > { %11984 = vsyncadd (%p62_p1), [#allocation23], 4294957568 }
  0x6d   : > { %11986 = dma.done.wait (%p62_p1), [#allocation26], 8192  }
  0x6e   : > { %11988 = vsyncadd (%p62_p1), [#allocation26], 4294959104  ;;  %v12309_v0 = vld [vmem:[%s12286_s3 + $0x20] sm:$0xff]  ;;  %v12312_v1 = vld [vmem:[%s12286_s3 + $0x28] sm:$0xff]  ;;  %s16210_s6 = smov 127   ;;  %s16212_s19 = smov 126  }
  0x6f   : > { %v12315_v2 = vld [vmem:[%s12286_s3] sm:$0xff]  ;;  %v12319_v3 = vpack.i.bf16 %v12312_v1, %v12309_v0  ;;  %v12322_v4 = vld [vmem:[%s12286_s3 + $0x8] sm:$0xff]  ;;  %v12335_v8 = vld [vmem:[%s12286_s3 + $0x30] sm:$0xff]  ;;  %s12031_s29 = smov 92   ;;  %s12032_s16 = smov 91   ;;  %vm1197_vm0 = vcmask 457728  }
  0x70   : > { %v12326_v5 = vpack.i.bf16 %v12322_v4, %v12315_v2  ;;  %v747_v6 = vld [vmem:[%s12286_s3 + $0x40] sm:$0xff]  ;;  %v748_v7 = vld [vmem:[%s12286_s3 + $0x48] sm:$0xff]  ;;  %v12338_v9 = vld [vmem:[%s12286_s3 + $0x38] sm:$0xff]  ;;  %s12033_s21 = smov 90   ;;  %s12034_s0 = smov 56   ;;  %vm1115_vm1 = vcmask 736256  }
  0x71   : > { %9767 = vrot.lane.b32.xlu1 %v12319_v3, %s16210_s6  ;;  %v12340_v10 = vpack.i.bf16 %v748_v7, %v747_v6  ;;  %v12343_v11 = vld [vmem:[%s12286_s3 + $0x10] sm:$0xff]  ;;  %v12346_v12 = vld [vmem:[%s12286_s3 + $0x18] sm:$0xff]  ;;  %v9771_v13 = vpack.i.bf16 %v12338_v9, %v12335_v8  ;;  %s12035_s1 = smov 55   ;;  %s12036_s22 = smov 54   ;;  %vm1361_vm2 = vcmask 441344   ;;  %vm1279_vm3 = vcmask 449536  }
  0x72   : > { %9757 = vrot.lane.b32.xlu0 %v12326_v5, %s16210_s6  ;;  %v749_v14 = vld [vmem:[%s12286_s3 + $0x50] sm:$0xff]  ;;  %v750_v15 = vld [vmem:[%s12286_s3 + $0x58] sm:$0xff]  ;;  %v9761_v16 = vpack.i.bf16 %v12346_v12, %v12343_v11  ;;  %vm1033_vm4 = vcmask 744448   ;;  %vm951_vm5 = vcmask 752640   ;;  %vm869_vm6 = vcmask 1031168   ;;  %s16270_s2 = sld [smem:[#allocation52_spill]] }
  0x73   : > { %9777 = vrot.lane.b32.xlu2 %v12340_v10, %s16210_s6  ;;  %v9781_v17 = vpack.i.bf16 %v750_v15, %v749_v14  ;;  %vm787_vm7 = vcmask 1039360   ;;  %vm1508_vm8 = vcmask 588800   ;;  %vm3368_vm9 = vcmask 130048   ;;  %s9581_s30 = smul.u32 192, %s12280_s28  ;;  %s16332_s4 = sld [smem:[#allocation54_spill]] }
  0x74   : > { %s12042_s20 = smov 111   ;;  %s12043_s23 = smov 112   ;;  %vm5884_vm10 = vcmask 777216   ;;  %vm5847_vm11 = vcmask 785408   ;;  %vm5810_vm12 = vcmask 900096   ;;  %vm5773_vm13 = vcmask 908288  }
  0x75   : > { %s13448_s10 = scalar_lea.vmem [#allocation28], %s9581_s30  ;;  %s12044_s5 = smov 94   ;;  %vm5921_vm14 = vcmask 769024   ;;  %vm5736_vm15 = vcmask 916480  }
  0x76   : > { %s16204_s14 = smov 116   ;;  %s16208_s30 = smov 120  }
  0x79   : > { %9772 = vrot.lane.b32.xlu1 %v9771_v13, %s16210_s6 }
  0x7a   : > { %9762 = vrot.lane.b32.xlu0 %v9761_v16, %s16210_s6 }
  0x7b   : > { %9782 = vrot.lane.b32.xlu2 %v9781_v17, %s16210_s6 }
  0x81   : > { %9792 = vrot.lane.b32.xlu1 %v9761_v16, %s16212_s19 }
  0x82   : > { %9787 = vrot.lane.b32.xlu0 %v12326_v5, %s16212_s19 }
  0x83   : > { %9797 = vrot.lane.b32.xlu2 %v12319_v3, %s16212_s19 }
  0x89   : > { %9807 = vrot.lane.b32.xlu1 %v12340_v10, %s16212_s19 }
  0x8a   : > { %9802 = vrot.lane.b32.xlu0 %v9771_v13, %s16212_s19 }
  0x8b   : > { %9812 = vrot.lane.b32.xlu2 %v9781_v17, %s16212_s19 }
  0x91   : > { %9822 = vrot.lane.b32.xlu1 %v9761_v16, %s12031_s29 }
  0x92   : > { %9817 = vrot.lane.b32.xlu0 %v12326_v5, %s12031_s29 }
  0x93   : > { %9827 = vrot.lane.b32.xlu2 %v12319_v3, %s12031_s29 }
  0x99   : > { %9837 = vrot.lane.b32.xlu1 %v12340_v10, %s12031_s29 }
  0x9a   : > { %9832 = vrot.lane.b32.xlu0 %v9771_v13, %s12031_s29 }
  0x9b   : > { %9842 = vrot.lane.b32.xlu2 %v9781_v17, %s12031_s29 }
  0xa1   : > { %9852 = vrot.lane.b32.xlu1 %v9761_v16, %s12032_s16 }
  0xa2   : > { %9847 = vrot.lane.b32.xlu0 %v12326_v5, %s12032_s16 }
  0xa3   : > { %9857 = vrot.lane.b32.xlu2 %v12319_v3, %s12032_s16 }
  0xa9   : > { %9867 = vrot.lane.b32.xlu1 %v12340_v10, %s12032_s16 }
  0xaa   : > { %9862 = vrot.lane.b32.xlu0 %v9771_v13, %s12032_s16 }
  0xab   : > { %9872 = vrot.lane.b32.xlu2 %v9781_v17, %s12032_s16 }
  0xb1   : > { %9882 = vrot.lane.b32.xlu1 %v9761_v16, %s12033_s21 }
  0xb2   : > { %9877 = vrot.lane.b32.xlu0 %v12326_v5, %s12033_s21 }
  0xb3   : > { %9887 = vrot.lane.b32.xlu2 %v12319_v3, %s12033_s21 }
  0xb9   : > { %9897 = vrot.lane.b32.xlu1 %v12340_v10, %s12033_s21 }
  0xba   : > { %9892 = vrot.lane.b32.xlu0 %v9771_v13, %s12033_s21 }
  0xbb   : > { %9902 = vrot.lane.b32.xlu2 %v9781_v17, %s12033_s21 }
  0xc1   : > { %9912 = vrot.lane.b32.xlu1 %v9761_v16, %s12034_s0 }
  0xc2   : > { %9907 = vrot.lane.b32.xlu0 %v12326_v5, %s12034_s0 }
  0xc3   : > { %9917 = vrot.lane.b32.xlu2 %v12319_v3, %s12034_s0 }
  0xc9   : > { %9927 = vrot.lane.b32.xlu1 %v12340_v10, %s12034_s0 }
  0xca   : > { %9922 = vrot.lane.b32.xlu0 %v9771_v13, %s12034_s0 }
  0xcb   : > { %9932 = vrot.lane.b32.xlu2 %v9781_v17, %s12034_s0 }
  0xcd   : > { %v12404_v18 = vpop.permute.xlu2 %9777 }
  0xd1   : > { %9942 = vrot.lane.b32.xlu1 %v9761_v16, %s12035_s1 }
  0xd2   : > { %9937 = vrot.lane.b32.xlu0 %v12326_v5, %s12035_s1 }
  0xd3   : > { %9947 = vrot.lane.b32.xlu2 %v12319_v3, %s12035_s1 }
  0xd5   : > { %v12411_v19 = vpop.permute.xlu2 %9782 }
  0xd6   : > { %16253 = vst [vmem:[#allocation39_spill] sm:$0xff] %v12411_v19 }
  0xd9   : > { %9957 = vrot.lane.b32.xlu1 %v12340_v10, %s12035_s1 }
  0xda   : > { %9952 = vrot.lane.b32.xlu0 %v9771_v13, %s12035_s1 }
  0xdb   : > { %9962 = vrot.lane.b32.xlu2 %v9781_v17, %s12035_s1 }
  0xdd   : > { %v12417_v20 = vpop.permute.xlu2 %9797 }
  0xe1   : > { %9972 = vrot.lane.b32.xlu1 %v9761_v16, %s12036_s22 }
  0xe2   : > { %9967 = vrot.lane.b32.xlu0 %v12326_v5, %s12036_s22 }
  0xe3   : > { %v12422_v21 = vpop.permute.xlu1 %9767  ;;  %9977 = vrot.lane.b32.xlu2 %v12319_v3, %s12036_s22 }
  0xe4   : > { %v12424_v22 = vpop.permute.xlu0 %9757 }
  0xe5   : > { %v12428_v23 = vpop.permute.xlu2 %9812 }
  0xe6   : > { %16254 = vst [vmem:[#allocation40_spill] sm:$0xff] %v12428_v23 }
  0xe9   : > { %9987 = vrot.lane.b32.xlu1 %v12340_v10, %s12036_s22 }
  0xea   : > { %9982 = vrot.lane.b32.xlu0 %v9771_v13, %s12036_s22 }
  0xeb   : > { %v12433_v24 = vpop.permute.xlu1 %9772  ;;  %9992 = vrot.lane.b32.xlu2 %v9781_v17, %s12036_s22 }
  0xec   : > { %v12435_v25 = vpop.permute.xlu0 %9762 }
  0xed   : > { %v12438_v26 = vpop.permute.xlu2 %9827 }
  0xf3   : > { %v12440_v27 = vpop.permute.xlu1 %9792 }
  0xf4   : > { %v12442_v28 = vpop.permute.xlu0 %9787 }
  0xf5   : > { %v12444_v29 = vpop.permute.xlu2 %9842 }
  0xf6   : > { %16255 = vst [vmem:[#allocation41_spill] sm:$0xff] %v12444_v29 }
  0xfb   : > { %v12446_v30 = vpop.permute.xlu1 %9807 }
  0xfc   : > { %v12448_v31 = vpop.permute.xlu0 %9802 }
  0xfd   : > { %v12450_v32 = vpop.permute.xlu2 %9857 }
 0x103   : > { %v12452_v33 = vpop.permute.xlu1 %9822 }
 0x104   : > { %v12454_v34 = vpop.permute.xlu0 %9817 }
 0x105   : > { %v12456_v35 = vpop.permute.xlu2 %9872 }
 0x106   : > { %16256 = vst [vmem:[#allocation42_spill] sm:$0xff] %v12456_v35 }
 0x10b   : > { %v12458_v36 = vpop.permute.xlu1 %9837 }
 0x10c   : > { %v12460_v37 = vpop.permute.xlu0 %9832 }
 0x10d   : > { %v12464_v39 = vpop.permute.xlu2 %9887 }
 0x113   : > { %v12462_v38 = vpop.permute.xlu1 %9852 }
 0x114   : > { %v12466_v40 = vpop.permute.xlu0 %9847 }
 0x115   : > { %v12472_v43 = vpop.permute.xlu2 %9902 }
 0x11b   : > { %v12468_v41 = vpop.permute.xlu1 %9867 }
 0x11c   : > { %v12470_v42 = vpop.permute.xlu0 %9862 }
 0x11d   : > { %v12478_v46 = vpop.permute.xlu2 %9917 }
 0x123   : > { %v12474_v44 = vpop.permute.xlu1 %9882 }
 0x124   : > { %v12476_v45 = vpop.permute.xlu0 %9877 }
 0x125   : > { %v12484_v49 = vpop.permute.xlu2 %9932 }
 0x12b   : > { %v12480_v47 = vpop.permute.xlu1 %9897 }
 0x12c   : > { %v12482_v48 = vpop.permute.xlu0 %9892 }
 0x12d   : > { %v12492_v53 = vpop.permute.xlu2 %9947 }
 0x133   : > { %v12486_v50 = vpop.permute.xlu1 %9912 }
 0x134   : > { %v12488_v51 = vpop.permute.xlu0 %9907  ;;  %v9915_v5 = vunpack.i.h.bf16 %v12486_v50  ;;  %v9914_v6 = vunpack.i.l.bf16 %v12486_v50  ;;  %v9884_v50 = vunpack.i.l.bf16 %v12474_v44 }
 0x135   : > { %v12496_v57 = vpop.permute.xlu2 %9962 }
 0x13b   : > { %v12490_v52 = vpop.permute.xlu1 %9927 }
 0x13c   : > { %v12494_v54 = vpop.permute.xlu0 %9922 }
 0x13d   : > { %v12502_v60 = vpop.permute.xlu2 %9977 }
 0x13e   : > { %v16257_v19 = vunpack.i.l.bf16 %v12502_v60 }
 0x143   : > { %v9943_v55 = vpop.permute.xlu1 %9942 }
 0x144   : > { %v9938_v56 = vpop.permute.xlu0 %9937  ;;  %v9945_v13 = vunpack.i.h.bf16 %v9943_v55  ;;  %v9944_v14 = vunpack.i.l.bf16 %v9943_v55  ;;  %v9910_v55 = vunpack.i.h.bf16 %v12488_v51 }
 0x145   : > { %v9940_v61 = vunpack.i.h.bf16 %v9938_v56  ;;  %v9939_v62 = vunpack.i.l.bf16 %v9938_v56 }
 0x146   : > { %v1282_v35 = vsel %vm1279_vm3, %v9944_v14, %v9945_v13 }
 0x14b   : > { %v12498_v58 = vpop.permute.xlu1 %9957 }
 0x14c   : > { %v12500_v59 = vpop.permute.xlu0 %9952 }
 0x153   : > { %v9973_v10 = vpop.permute.xlu1 %9972 }
 0x154   : > { %v9975_v15 = vunpack.i.h.bf16 %v9973_v10  ;;  %v9974_v16 = vunpack.i.l.bf16 %v9973_v10  ;;  %v9968_v17 = vpop.permute.xlu0 %9967  ;;  %v9909_v10 = vunpack.i.l.bf16 %v12488_v51  ;;  %v9880_v51 = vunpack.i.h.bf16 %v12476_v45 }
 0x155   : > { %v9970_v63 = vunpack.i.h.bf16 %v9968_v17  ;;  %v9969_v3 = vunpack.i.l.bf16 %v9968_v17  ;;  %v9885_v17 = vunpack.i.h.bf16 %v12474_v44  ;;  %v9855_v44 = vunpack.i.h.bf16 %v12462_v38 }
 0x156   : > { %v1364_v7 = vsel %vm1361_vm2, %v9974_v16, %v9975_v15  ;;  %v1365_v23 = vsel %vm1361_vm2, %v9975_v15, %v16257_v19  ;;  %v16258_v19 = vunpack.i.l.bf16 %v12492_v53 }
 0x157   : > { %v1362_v29 = vsel %vm1361_vm2, %v9969_v3, %v9970_v63  ;;  %v1363_v56 = vsel %vm1361_vm2, %v9970_v63, %v9974_v16  ;;  %1568 = vmatpush.msra.mxu2 %v1364_v7  ;;  %1591 = vmatpush.msra.mxu3 %v1365_v23  ;;  %v9879_v3 = vunpack.i.l.bf16 %v12476_v45  ;;  %v1280_v63 = vsel %vm1279_vm3, %v9939_v62, %v9940_v61 }
 0x158   : > { %1522 = vmatpush.msra.mxu0 %v1362_v29  ;;  %1545 = vmatpush.msra.mxu1 %v1363_v56  ;;  %v1283_v15 = vsel %vm1279_vm3, %v9945_v13, %v16258_v19  ;;  %v1281_v23 = vsel %vm1279_vm3, %v9940_v61, %v9944_v14  ;;  %v9854_v29 = vunpack.i.l.bf16 %v12462_v38  ;;  %v1200_v7 = vsel %vm1197_vm0, %v9914_v6, %v9915_v5 }
 0x159   : > { %1569 = vmatpush.msra.mxu2 %v1282_v35  ;;  %1592 = vmatpush.msra.mxu3 %v1283_v15  ;;  %v16259_v13 = vunpack.i.l.bf16 %v12478_v46  ;;  %v9850_v45 = vunpack.i.h.bf16 %v12466_v40  ;;  %v9849_v62 = vunpack.i.l.bf16 %v12466_v40  ;;  %v1198_v35 = vsel %vm1197_vm0, %v9909_v10, %v9910_v55 }
 0x15a   : > { %1523 = vmatpush.msra.mxu0 %v1280_v63  ;;  %1546 = vmatpush.msra.mxu1 %v1281_v23  ;;  %v1199_v61 = vsel %vm1197_vm0, %v9910_v55, %v9914_v6  ;;  %v9825_v38 = vunpack.i.h.bf16 %v12452_v33  ;;  %v9824_v14 = vunpack.i.l.bf16 %v12452_v33  ;;  %v1118_v56 = vsel %vm1115_vm1, %v9884_v50, %v9885_v17 }
 0x15b   : > { %v1201_v16 = vsel %vm1197_vm0, %v9915_v5, %v16259_v13  ;;  %1570 = vmatpush.msra.mxu2 %v1200_v7  ;;  %v16260_v5 = vunpack.i.l.bf16 %v12464_v39  ;;  %v9820_v40 = vunpack.i.h.bf16 %v12454_v34  ;;  %v9819_v15 = vunpack.i.l.bf16 %v12454_v34 }
 0x15c   : > { %1593 = vmatpush.msra.mxu3 %v1201_v16  ;;  %1524 = vmatpush.msra.mxu0 %v1198_v35  ;;  %v1116_v10 = vsel %vm1115_vm1, %v9879_v3, %v9880_v51  ;;  %v1117_v6 = vsel %vm1115_vm1, %v9880_v51, %v9884_v50  ;;  %v9795_v33 = vunpack.i.h.bf16 %v12440_v27  ;;  %v9794_v55 = vunpack.i.l.bf16 %v12440_v27 }
 0x15d   : > { %1547 = vmatpush.msra.mxu1 %v1199_v61  ;;  %v1119_v19 = vsel %vm1115_vm1, %v9885_v17, %v16260_v5  ;;  %1571 = vmatpush.msra.mxu2 %v1118_v56  ;;  %v1036_v63 = vsel %vm1033_vm4, %v9854_v29, %v9855_v44  ;;  %v16261_v17 = vunpack.i.l.bf16 %v12450_v32  ;;  %v9790_v34 = vunpack.i.h.bf16 %v12442_v28  ;;  %v12576_v56 = vpop.permute.xlu1 %9987 }
 0x15e   : > { %1594 = vmatpush.msra.mxu3 %v1119_v19  ;;  %1525 = vmatpush.msra.mxu0 %v1116_v10  ;;  %v9789_v3 = vunpack.i.l.bf16 %v12442_v28  ;;  %v1034_v50 = vsel %vm1033_vm4, %v9849_v62, %v9850_v45  ;;  %v1035_v51 = vsel %vm1033_vm4, %v9850_v45, %v9854_v29  ;;  %v9765_v27 = vunpack.i.h.bf16 %v12435_v25 }
 0x15f   : > { %1548 = vmatpush.msra.mxu1 %v1117_v6  ;;  %v1037_v23 = vsel %vm1033_vm4, %v9855_v44, %v16261_v17  ;;  %1572 = vmatpush.msra.mxu2 %v1036_v63  ;;  %v9764_v7 = vunpack.i.l.bf16 %v12435_v25  ;;  %v954_v13 = vsel %vm951_vm5, %v9824_v14, %v9825_v38  ;;  %v16262_v44 = vunpack.i.l.bf16 %v12438_v26  ;;  %v12588_v17 = vld [vmem:[#allocation16] sm:$0xff] }
 0x160   : > { %1595 = vmatpush.msra.mxu3 %v1037_v23  ;;  %1526 = vmatpush.msra.mxu0 %v1034_v50  ;;  %v9760_v28 = vunpack.i.h.bf16 %v12424_v22  ;;  %v9759_v62 = vunpack.i.l.bf16 %v12424_v22  ;;  %v952_v29 = vsel %vm951_vm5, %v9819_v15, %v9820_v40  ;;  %v953_v45 = vsel %vm951_vm5, %v9820_v40, %v9824_v14  ;;  %v9983_v22 = vpop.permute.xlu0 %9982 }
 0x161   : > { %1549 = vmatpush.msra.mxu1 %v1035_v51  ;;  %v955_v16 = vsel %vm951_vm5, %v9825_v38, %v16262_v44  ;;  %1573 = vmatpush.msra.mxu2 %v954_v13  ;;  %v9769_v25 = vunpack.i.l.bf16 %v12422_v21  ;;  %v872_v35 = vsel %vm869_vm6, %v9794_v55, %v9795_v33  ;;  %v16263_v61 = vunpack.i.l.bf16 %v12417_v20 }
 0x162   : > { %1596 = vmatpush.msra.mxu3 %v955_v16  ;;  %1527 = vmatpush.msra.mxu0 %v952_v29  ;;  %v870_v5 = vsel %vm869_vm6, %v9789_v3, %v9790_v34  ;;  %v871_v14 = vsel %vm869_vm6, %v9790_v34, %v9794_v55  ;;  %v790_v19 = vsel %vm787_vm7, %v9764_v7, %v9765_v27  ;;  %v9985_v15 = vunpack.i.h.bf16 %v9983_v22 }
 0x163   : > { %1550 = vmatpush.msra.mxu1 %v953_v45  ;;  %v873_v38 = vsel %vm869_vm6, %v9795_v33, %v16263_v61  ;;  %1574 = vmatpush.msra.mxu2 %v872_v35  ;;  %v791_v40 = vsel %vm787_vm7, %v9765_v27, %v9769_v25  ;;  %v9989_v10 = vunpack.i.l.bf16 %v12576_v56  ;;  %v788_v6 = vsel %vm787_vm7, %v9759_v62, %v9760_v28 }
 0x164   : > { %1597 = vmatpush.msra.mxu3 %v873_v38  ;;  %1528 = vmatpush.msra.mxu0 %v870_v5  ;;  %v789_v33 = vsel %vm787_vm7, %v9760_v28, %v9764_v7  ;;  %v9980_v55 = vunpack.i.h.bf16 %v12502_v60  ;;  %v9984_v63 = vunpack.i.l.bf16 %v9983_v22  ;;  %v9950_v23 = vunpack.i.h.bf16 %v12492_v53 }
 0x165   : > { %1551 = vmatpush.msra.mxu1 %v871_v14  ;;  %1575 = vmatpush.msra.mxu2 %v790_v19  ;;  %v9954_v34 = vunpack.i.l.bf16 %v12500_v59  ;;  %v9959_v3 = vunpack.i.l.bf16 %v12498_v58  ;;  %v9955_v50 = vunpack.i.h.bf16 %v12500_v59  ;;  %v16264_v59 = vunpack.i.l.bf16 %v12502_v60 }
 0x166   : > { %1598 = vmatpush.msra.mxu3 %v791_v40  ;;  %1529 = vmatpush.msra.mxu0 %v788_v6  ;;  %v1367_v27 = vsel %vm1361_vm2, %v9980_v55, %v9984_v63  ;;  %v9929_v7 = vunpack.i.l.bf16 %v12490_v52  ;;  %v9925_v13 = vunpack.i.h.bf16 %v12494_v54  ;;  %v9890_v44 = vunpack.i.h.bf16 %v12464_v39 }
 0x167   : > { %1552 = vmatpush.msra.mxu1 %v789_v33  ;;  %1576 = vmatpush.msra.mxu2 %v12343_v11  ;;  %v1368_v11 = vsel %vm1361_vm2, %v9984_v63, %v9985_v15  ;;  %v1366_v51 = vsel %vm1361_vm2, %v16264_v59, %v9980_v55  ;;  %v9894_v16 = vunpack.i.l.bf16 %v12482_v48  ;;  %v16265_v28 = vunpack.i.l.bf16 %v12492_v53  ;;  %v12646_v33 = vld [vmem:[#allocation16 + $0x8] sm:$0xff] }
 0x168   : > { %1599 = vmatpush.msra.mxu3 %v12346_v12  ;;  %1530 = vmatpush.msra.mxu0 %v12315_v2  ;;  %v1369_v12 = vsel %vm1361_vm2, %v9985_v15, %v9989_v10  ;;  %v9920_v2 = vunpack.i.h.bf16 %v12478_v46  ;;  %v1285_v62 = vsel %vm1279_vm3, %v9950_v23, %v9954_v34  ;;  %v9899_v29 = vunpack.i.l.bf16 %v12480_v47 }
 0x169   : > { %1553 = vmatpush.msra.mxu1 %v12322_v4  ;;  %9494 = vmatmul.msk.f32.vlgmr.msra.gmra.mxu0 %vm1508_vm8, %v12588_v17  ;;  %v9924_v4 = vunpack.i.l.bf16 %v12494_v54  ;;  %v1284_v60 = vsel %vm1279_vm3, %v16265_v28, %v9950_v23  ;;  %v9895_v45 = vunpack.i.h.bf16 %v12482_v48  ;;  %v1286_v54 = vsel %vm1279_vm3, %v9954_v34, %v9955_v50 }
 0x16a   : > { %9496 = vmatmul.msk.f32.vlgmr.msra.gmra.mxu1 %vm1508_vm8, %v12588_v17  ;;  %9498 = vmatmul.msk.f32.vlgmr.msra.gmra.mxu2 %vm1508_vm8, %v12588_v17  ;;  %v1287_v35 = vsel %vm1279_vm3, %v9955_v50, %v9959_v3  ;;  %v16266_v53 = vunpack.i.l.bf16 %v12478_v46  ;;  %v9860_v22 = vunpack.i.h.bf16 %v12450_v32  ;;  %v9864_v48 = vunpack.i.l.bf16 %v12470_v42 }
 0x16b   : > { %9500 = vmatmul.msk.f32.vlgmr.msra.gmra.mxu3 %vm1508_vm8, %v12588_v17  ;;  %1614 = vmatpush.msrb.mxu0 %v1366_v51  ;;  %v1203_v38 = vsel %vm1197_vm0, %v9920_v2, %v9924_v4  ;;  %v1204_v5 = vsel %vm1197_vm0, %v9924_v4, %v9925_v13  ;;  %v1205_v14 = vsel %vm1197_vm0, %v9925_v13, %v9929_v7  ;;  %v9869_v19 = vunpack.i.l.bf16 %v12468_v41 }
 0x16c   : > { %1637 = vmatpush.msrb.mxu1 %v1367_v27  ;;  %1660 = vmatpush.msrb.mxu2 %v1368_v11  ;;  %v1202_v61 = vsel %vm1197_vm0, %v16266_v53, %v9920_v2  ;;  %v9865_v46 = vunpack.i.h.bf16 %v12470_v42  ;;  %v16267_v40 = vunpack.i.l.bf16 %v12464_v39  ;;  %v1121_v6 = vsel %vm1115_vm1, %v9890_v44, %v9894_v16 }
 0x16d   : > { %1683 = vmatpush.msrb.mxu3 %v1369_v12  ;;  %1615 = vmatpush.msrb.mxu0 %v1284_v60  ;;  %v1122_v55 = vsel %vm1115_vm1, %v9894_v16, %v9895_v45  ;;  %v1123_v63 = vsel %vm1115_vm1, %v9895_v45, %v9899_v29  ;;  %v9830_v42 = vunpack.i.h.bf16 %v12438_v26  ;;  %v9835_v39 = vunpack.i.h.bf16 %v12460_v37 }
 0x16e   : > { %1638 = vmatpush.msrb.mxu1 %v1285_v62  ;;  %1661 = vmatpush.msrb.mxu2 %v1286_v54  ;;  %v1120_v15 = vsel %vm1115_vm1, %v16267_v40, %v9890_v44  ;;  %v9834_v23 = vunpack.i.l.bf16 %v12460_v37  ;;  %v16268_v34 = vunpack.i.l.bf16 %v12450_v32  ;;  %v1039_v11 = vsel %vm1033_vm4, %v9860_v22, %v9864_v48  ;;  %v1496_v44 = vld [vmem:[%s16270_s2] sm:$0xff]  ;;  %v9993_v54 = vpop.permute.xlu2 %9992 }
 0x16f   : > { %1684 = vmatpush.msrb.mxu3 %v1287_v35  ;;  %1616 = vmatpush.msrb.mxu0 %v1202_v61  ;;  %v9839_v12 = vunpack.i.l.bf16 %v12458_v36  ;;  %v1040_v2 = vsel %vm1033_vm4, %v9864_v48, %v9865_v46  ;;  %v1041_v37 = vsel %vm1033_vm4, %v9865_v46, %v9869_v19  ;;  %v9800_v4 = vunpack.i.h.bf16 %v12417_v20 }
 0x170   : > { %1639 = vmatpush.msrb.mxu1 %v1203_v38  ;;  %1662 = vmatpush.msrb.mxu2 %v1204_v5  ;;  %v1038_v50 = vsel %vm1033_vm4, %v16268_v34, %v9860_v22  ;;  %v9804_v59 = vunpack.i.l.bf16 %v12448_v31  ;;  %v9809_v32 = vunpack.i.l.bf16 %v12446_v30  ;;  %v9805_v51 = vunpack.i.h.bf16 %v12448_v31 }
 0x171   : > { %1685 = vmatpush.msrb.mxu3 %v1205_v14  ;;  %1617 = vmatpush.msrb.mxu0 %v1120_v15  ;;  %v16269_v27 = vunpack.i.l.bf16 %v12438_v26  ;;  %v9770_v16 = vunpack.i.h.bf16 %v12422_v21  ;;  %v9774_v28 = vunpack.i.l.bf16 %v12433_v24  ;;  %v12037_v60 = vmov 0  }
 0x172   : > { %1640 = vmatpush.msrb.mxu1 %v1121_v6  ;;  %1663 = vmatpush.msrb.mxu2 %v1122_v55  ;;  %v957_v31 = vsel %vm951_vm5, %v9830_v42, %v9834_v23  ;;  %v958_v62 = vsel %vm951_vm5, %v9834_v23, %v9835_v39  ;;  %v9775_v26 = vunpack.i.h.bf16 %v12433_v24  ;;  %v959_v45 = vsel %vm951_vm5, %v9835_v39, %v9839_v12 }
 0x173   : > { %1686 = vmatpush.msrb.mxu3 %v1123_v63  ;;  %9499 = vmatmul.msk.f32.gmra.mxu2 %vm1508_vm8, %v12646_v33  ;;  %v956_v13 = vsel %vm951_vm5, %v16269_v27, %v9830_v42  ;;  %v16271_v35 = vunpack.i.l.bf16 %v12417_v20  ;;  %v875_v61 = vsel %vm869_vm6, %v9800_v4, %v9804_v59  ;;  %v9779_v38 = vunpack.i.l.bf16 %v12404_v18 }
 0x174   : > { %9501 = vmatmul.msk.f32.gmra.mxu3 %vm1508_vm8, %v12646_v33  ;;  %1618 = vmatpush.msrb.mxu0 %v1038_v50  ;;  %v876_v24 = vsel %vm869_vm6, %v9804_v59, %v9805_v51  ;;  %v877_v22 = vsel %vm869_vm6, %v9805_v51, %v9809_v32  ;;  %v9990_v48 = vunpack.i.h.bf16 %v12576_v56  ;;  %v9994_v5 = vunpack.i.l.bf16 %v9993_v54  ;;  %v16273_v59 = vld [vmem:[#allocation41_spill] sm:$0xff] }
 0x175   : > { %1641 = vmatpush.msrb.mxu1 %v1039_v11  ;;  %1664 = vmatpush.msrb.mxu2 %v1040_v2  ;;  %v874_v53 = vsel %vm869_vm6, %v16271_v35, %v9800_v4  ;;  %v792_v20 = vsel %vm787_vm7, %v9769_v25, %v9770_v16  ;;  %v793_v14 = vsel %vm787_vm7, %v9770_v16, %v9774_v28  ;;  %v9995_v46 = vunpack.i.h.bf16 %v9993_v54  ;;  %v16272_v11 = vld [vmem:[#allocation42_spill] sm:$0xff] }
 0x176   : > { %1687 = vmatpush.msrb.mxu3 %v1041_v37  ;;  %9495 = vmatmul.msk.f32.gmra.mxu0 %vm1508_vm8, %v12646_v33  ;;  %v794_v40 = vsel %vm787_vm7, %v9774_v28, %v9775_v26  ;;  %v795_v15 = vsel %vm787_vm7, %v9775_v26, %v9779_v38  ;;  %v9964_v21 = vunpack.i.l.bf16 %v12496_v57  ;;  %v9960_v25 = vunpack.i.h.bf16 %v12498_v58 }
 0x177   : > { %9497 = vmatmul.msk.f32.gmra.mxu1 %vm1508_vm8, %v12646_v33  ;;  %9996 = vset.pattern.permute.xlu0 %v12037_v60  ;;  %v1370_v6 = vsel %vm1361_vm2, %v9989_v10, %v9990_v48  ;;  %v1371_v55 = vsel %vm1361_vm2, %v9990_v48, %v9994_v5  ;;  %v9965_v63 = vunpack.i.h.bf16 %v12496_v57  ;;  %v1497_v57 = vld [vmem:[%s16270_s2 + $0x8] sm:$0xff]  ;;  %v9904_v56 = vunpack.i.l.bf16 %v12472_v43  ;;  %v727_v48 = vld [vmem:[%s12286_s3 + $0x50] sm:$0xff] }
 0x178   : > { %1619 = vmatpush.msrb.mxu0 %v956_v13  ;;  %1642 = vmatpush.msrb.mxu1 %v957_v31  ;;  %v9900_v10 = vunpack.i.h.bf16 %v12480_v47  ;;  %v1288_v42 = vsel %vm1279_vm3, %v9959_v3, %v9960_v25  ;;  %v1289_v39 = vsel %vm1279_vm3, %v9960_v25, %v9964_v21  ;;  %v9870_v58 = vunpack.i.h.bf16 %v12468_v41  ;;  %v16274_v13 = vld [vmem:[#allocation40_spill] sm:$0xff] }
 0x179   : > { %1665 = vmatpush.msrb.mxu2 %v958_v62  ;;  %1688 = vmatpush.msrb.mxu3 %v959_v45  ;;  %v1290_v23 = vsel %vm1279_vm3, %v9964_v21, %v9965_v63  ;;  %v9874_v2 = vunpack.i.l.bf16 %v16272_v11  ;;  %v9840_v37 = vunpack.i.h.bf16 %v12458_v36  ;;  %v9845_v51 = vunpack.i.h.bf16 %v16273_v59 }
 0x17a   : > { %1500 = vperm.xlu0 %9996, %v1496_v44   ;;  %1620 = vmatpush.msrb.mxu0 %v874_v53  ;;  %v9844_v27 = vunpack.i.l.bf16 %v16273_v59  ;;  %v9810_v47 = vunpack.i.h.bf16 %v12446_v30  ;;  %v9815_v44 = vunpack.i.h.bf16 %v16274_v13  ;;  %v9814_v16 = vunpack.i.l.bf16 %v16274_v13  ;;  %v726_v30 = vld [vmem:[%s12286_s3 + $0x48] sm:$0xff] }
 0x17b   : > { %1643 = vmatpush.msrb.mxu1 %v875_v61  ;;  %1666 = vmatpush.msrb.mxu2 %v876_v24  ;;  %v1043_v28 = vsel %vm1033_vm4, %v9870_v58, %v9874_v2  ;;  %v9780_v31 = vunpack.i.h.bf16 %v12404_v18  ;;  %v960_v41 = vsel %vm951_vm5, %v9839_v12, %v9840_v37  ;;  %v725_v61 = vld [vmem:[%s12286_s3 + $0x40] sm:$0xff]  ;;  %s16373_s3 = sld [smem:[#allocation57_spill]] }
 0x17c   : > { %1689 = vmatpush.msrb.mxu3 %v877_v22  ;;  %1621 = vmatpush.msrb.mxu0 %v792_v20  ;;  %v961_v45 = vsel %vm951_vm5, %v9840_v37, %v9844_v27  ;;  %v962_v54 = vsel %vm951_vm5, %v9844_v27, %v9845_v51  ;;  %v878_v36 = vsel %vm869_vm6, %v9809_v32, %v9810_v47 }
 0x17d   : > { %1644 = vmatpush.msrb.mxu1 %v793_v14  ;;  %1667 = vmatpush.msrb.mxu2 %v794_v40  ;;  %v879_v12 = vsel %vm869_vm6, %v9810_v47, %v9814_v16  ;;  %v880_v35 = vsel %vm869_vm6, %v9814_v16, %v9815_v44  ;;  %v796_v53 = vsel %vm787_vm7, %v9779_v38, %v9780_v31 }
 0x17e   : > { %1690 = vmatpush.msrb.mxu3 %v795_v15  ;;  %1622 = vmatpush.msrb.mxu0 %v12309_v0  ;;  %v1372_v0 = vsel %vm1361_vm2, %v9994_v5, %v9995_v46 }
 0x17f   : > { %1645 = vmatpush.msrb.mxu1 %v12312_v1  ;;  %1668 = vmatpush.msrb.mxu2 %v12335_v8  ;;  %v9934_v1 = vunpack.i.l.bf16 %v12484_v49  ;;  %v9930_v8 = vunpack.i.h.bf16 %v12490_v52  ;;  %v1124_v52 = vsel %vm1115_vm1, %v9899_v29, %v9900_v10  ;;  %v1042_v29 = vsel %vm1033_vm4, %v9869_v19, %v9870_v58  ;;  %v16275_v19 = vld [vmem:[#allocation39_spill] sm:$0xff] }
 0x180   : > { %1691 = vmatpush.msrb.mxu3 %v12338_v9  ;;  %9502 = vmatmul.msk.f32.vlgmr.msrb.gmra.mxu0 %vm1508_vm8, %v12588_v17  ;;  %v9935_v9 = vunpack.i.h.bf16 %v12484_v49  ;;  %v9905_v49 = vunpack.i.h.bf16 %v12472_v43  ;;  %v9875_v43 = vunpack.i.h.bf16 %v16272_v11  ;;  %v9785_v62 = vunpack.i.h.bf16 %v16275_v19 }
 0x181   : > { %9504 = vmatmul.msk.f32.vlgmr.msrb.gmra.mxu1 %vm1508_vm8, %v12588_v17  ;;  %9506 = vmatmul.msk.f32.vlgmr.msrb.gmra.mxu2 %vm1508_vm8, %v12588_v17  ;;  %v1206_v34 = vsel %vm1197_vm0, %v9929_v7, %v9930_v8  ;;  %v1207_v50 = vsel %vm1197_vm0, %v9930_v8, %v9934_v1  ;;  %v1125_v7 = vsel %vm1115_vm1, %v9900_v10, %v9904_v56  ;;  %v9784_v26 = vunpack.i.l.bf16 %v16275_v19 }
 0x182   : > { %9508 = vmatmul.msk.f32.vlgmr.msrb.gmra.mxu3 %vm1508_vm8, %v12588_v17  ;;  %1706 = vmatpush.msra.mxu0 %v1370_v6  ;;  %v1208_v3 = vsel %vm1197_vm0, %v9934_v1, %v9935_v9  ;;  %v1126_v4 = vsel %vm1115_vm1, %v9904_v56, %v9905_v49 }
 0x183   : > { %1729 = vmatpush.msra.mxu1 %v1371_v55  ;;  %1752 = vmatpush.msra.mxu2 %v1372_v0  ;;  %v797_v24 = vsel %vm787_vm7, %v9780_v31, %v9784_v26  ;;  %v798_v22 = vsel %vm787_vm7, %v9784_v26, %v9785_v62 }
 0x184   : > { %9997 = vset.pattern.permute.xlu1 %v12037_v60  ;;  %1707 = vmatpush.msra.mxu0 %v1288_v42 }
 0x185   : > { %1730 = vmatpush.msra.mxu1 %v1289_v39  ;;  %1753 = vmatpush.msra.mxu2 %v1290_v23 }
 0x186   : > { %1505 = vperm.xlu1 %9997, %v1497_v57   ;;  %1708 = vmatpush.msra.mxu0 %v1206_v34 }
 0x187   : > { %1731 = vmatpush.msra.mxu1 %v1207_v50  ;;  %1754 = vmatpush.msra.mxu2 %v1208_v3 }
 0x188   : > { %10778 = vset.pattern.permute.xlu2 %v12037_v60  ;;  %1709 = vmatpush.msra.mxu0 %v1124_v52  ;;  %v1044_v60 = vsel %vm1033_vm4, %v9874_v2, %v9875_v43 }
 0x189   : > { %1732 = vmatpush.msra.mxu1 %v1125_v7  ;;  %1755 = vmatpush.msra.mxu2 %v1126_v4 }
 0x18a   : > { %9503 = vmatmul.msk.f32.gmra.mxu0 %vm1508_vm8, %v12646_v33  ;;  %9505 = vmatmul.msk.f32.gmra.mxu1 %vm1508_vm8, %v12646_v33 }
 0x18b   : > { %9507 = vmatmul.msk.f32.gmra.mxu2 %vm1508_vm8, %v12646_v33  ;;  %9509 = vmatmul.msk.f32.gmra.mxu3 %vm1508_vm8, %v12646_v33 }
 0x18c   : > { %1710 = vmatpush.msra.mxu0 %v1042_v29  ;;  %1733 = vmatpush.msra.mxu1 %v1043_v28 }
 0x18d   : > { %1756 = vmatpush.msra.mxu2 %v1044_v60 }
 0x18e   : > { %1711 = vmatpush.msra.mxu0 %v960_v41  ;;  %1734 = vmatpush.msra.mxu1 %v961_v45 }
 0x18f   : > { %1757 = vmatpush.msra.mxu2 %v962_v54 }
 0x190   : > { %1712 = vmatpush.msra.mxu0 %v878_v36  ;;  %1735 = vmatpush.msra.mxu1 %v879_v12 }
 0x191   : > { %1758 = vmatpush.msra.mxu2 %v880_v35 }
 0x192   : > { %1713 = vmatpush.msra.mxu0 %v796_v53  ;;  %1736 = vmatpush.msra.mxu1 %v797_v24 }
 0x193   : > { %1759 = vmatpush.msra.mxu2 %v798_v22 }
 0x194   : > { %1714 = vmatpush.msra.mxu0 %v725_v61  ;;  %1737 = vmatpush.msra.mxu1 %v726_v30 }
 0x195   : > { %1760 = vmatpush.msra.mxu2 %v727_v48  ;;  %9510 = vmatmul.msk.f32.vlgmr.msra.gmra.mxu0 %vm1508_vm8, %v12588_v17 }
 0x196   : > { %9512 = vmatmul.msk.f32.vlgmr.msra.gmra.mxu1 %vm1508_vm8, %v12588_v17  ;;  %9514 = vmatmul.msk.f32.vlgmr.msra.gmra.mxu2 %vm1508_vm8, %v12588_v17 }
 0x19d   : > { %9511 = vmatmul.msk.f32.gmra.mxu0 %vm1508_vm8, %v12646_v33 }
 0x19e   : > { %9513 = vmatmul.msk.f32.gmra.mxu1 %vm1508_vm8, %v12646_v33  ;;  %9515 = vmatmul.msk.f32.gmra.mxu2 %vm1508_vm8, %v12646_v33  ;;  %vm7594_vm8 = vcmask 990208  }
 0x1e6   : > { %v1532_v18 = vpop.f32.mrf.mxu0 }
 0x1e7   : > { %v1555_v32 = vpop.f32.mrf.mxu1 }
 0x1ec   : > { %v12810_v38 = vpop.permute.xlu0 %1500 }
 0x1ed   : > { %v12813_v5 = vadd.f32 %v1532_v18, %v12810_v38  ;;  %v12816_v20 = vadd.f32 %v1555_v32, %v12810_v38  ;;  %v1578_v17 = vpop.f32.mrf.mxu2 }
 0x1ee   : > { %v1601_v14 = vpop.f32.mrf.mxu3  ;;  %v1579_v15 = vadd.f32 %v1578_v17, %v12810_v38 }
 0x1ef   : > { %v16149_v46 = vmax.f32 %v12813_v5, 0.0  ;;  %v16148_v40 = vmax.f32 %v12816_v20, 0.0  ;;  %v1602_v33 = vadd.f32 %v1601_v14, %v12810_v38 }
 0x1f0   : > { %v12829_v25 = vmax.f32 %v1579_v15, 0.0 }
 0x1f1   : > { %v10018_v21 = vpack.i.bf16 %v16148_v40, %v16149_v46  ;;  %v12831_v6 = vmax.f32 %v1602_v33, 0.0 }
 0x1f3   : > { %10019 = vrot.lane.b32.xlu1 %v10018_v21, %s12035_s1  ;;  %10004 = vrot.lane.b32.xlu0 %v10018_v21, %s16212_s19  ;;  %v1535_v55 = vpop.f32.mrf.mxu0  ;;  %v10038_v9 = vpack.i.bf16 %v12831_v6, %v12829_v25 }
 0x1f4   : > { %9999 = vrot.lane.b32.xlu2 %v10018_v21, %s16210_s6  ;;  %v1558_v63 = vpop.f32.mrf.mxu1 }
 0x1f6   : > { %v1581_v10 = vpop.f32.mrf.mxu2 }
 0x1f7   : > { %v1604_v42 = vpop.f32.mrf.mxu3 }
 0x1f8   : > { %v12833_v0 = vpop.permute.xlu1 %1505 }
 0x1f9   : > { %v1536_v1 = vadd.f32 %v1535_v55, %v12833_v0  ;;  %v1559_v8 = vadd.f32 %v1558_v63, %v12833_v0  ;;  %v1582_v49 = vadd.f32 %v1581_v10, %v12833_v0  ;;  %v1605_v23 = vadd.f32 %v1604_v42, %v12833_v0 }
 0x1fb   : > { %10039 = vrot.lane.b32.xlu1 %v10038_v9, %s16210_s6  ;;  %10009 = vrot.lane.b32.xlu0 %v10018_v21, %s12031_s29  ;;  %v12841_v57 = vmax.f32 %v1536_v1, 0.0  ;;  %v12843_v56 = vmax.f32 %v1559_v8, 0.0  ;;  %v12853_v34 = vmax.f32 %v1582_v49, 0.0  ;;  %v12855_v50 = vmax.f32 %v1605_v23, 0.0 }
 0x1fc   : > { %10029 = vrot.lane.b32.xlu2 %v10018_v21, %s12033_s21 }
 0x1fd   : > { %v10093_v39 = vpack.i.bf16 %v12843_v56, %v12841_v57  ;;  %v10128_v58 = vpack.i.bf16 %v12855_v50, %v12853_v34  ;;  %v1624_v3 = vpop.f32.mrf.mxu0  ;;  %v10148_v52 = vpack.i.bf16 %v12831_v6, %v12855_v50  ;;  %v10123_v16 = vpack.i.bf16 %v12853_v34, %v12843_v56 }
 0x1fe   : > { %v1647_v11 = vpop.f32.mrf.mxu1  ;;  %v1625_v43 = vadd.f32 %v1624_v3, %v12810_v38  ;;  %v10143_v61 = vpack.i.bf16 %v12829_v25, %v12853_v34 }
 0x1ff   : > { %v1648_v2 = vadd.f32 %v1647_v11, %v12810_v38 }
 0x200   : > { %v12869_v7 = vmax.f32 %v1625_v43, 0.0 }
 0x201   : > { %v12871_v37 = vmax.f32 %v1648_v2, 0.0 }
 0x202   : > { %16276 = vst [vmem:[#allocation42_spill] sm:$0xff] %v12869_v7  ;;  %v10168_v29 = vpack.i.bf16 %v12841_v57, %v12869_v7 }
 0x203   : > { %10044 = vrot.lane.b32.xlu1 %v10038_v9, %s16212_s19  ;;  %10014 = vrot.lane.b32.xlu0 %v10018_v21, %s12032_s16  ;;  %16277 = vst [vmem:[#allocation41_spill] sm:$0xff] %v12871_v37  ;;  %v10153_v4 = vpack.i.bf16 %v12871_v37, %v12869_v7 }
 0x204   : > { %10094 = vrot.lane.b32.xlu2 %v10093_v39, %s12034_s0  ;;  %v1670_v60 = vpop.f32.mrf.mxu2 }
 0x205   : > { %v1693_v31 = vpop.f32.mrf.mxu3  ;;  %v1671_v41 = vadd.f32 %v1670_v60, %v12810_v38 }
 0x206   : > { %v1694_v19 = vadd.f32 %v1693_v31, %v12810_v38 }
 0x207   : > { %v1627_v59 = vpop.f32.mrf.mxu0  ;;  %v1650_v51 = vpop.f32.mrf.mxu1  ;;  %v12910_v62 = vmax.f32 %v1671_v41, 0.0 }
 0x208   : > { %v1628_v27 = vadd.f32 %v1627_v59, %v12833_v0  ;;  %v1651_v47 = vadd.f32 %v1650_v51, %v12833_v0  ;;  %v12912_v26 = vmax.f32 %v1694_v19, 0.0 }
 0x209   : > { %16280 = vst [vmem:[#allocation43_spill] sm:$0xff] %v12910_v62 }
 0x20a   : > { %v12891_v13 = vmax.f32 %v1628_v27, 0.0  ;;  %v12893_v44 = vmax.f32 %v1651_v47, 0.0  ;;  %16281 = vst [vmem:[#allocation44_spill] sm:$0xff] %v12912_v26  ;;  %v10173_v54 = vpack.i.bf16 %v12912_v26, %v12910_v62 }
 0x20b   : > { %10049 = vrot.lane.b32.xlu1 %v10038_v9, %s12031_s29  ;;  %10024 = vrot.lane.b32.xlu0 %v10018_v21, %s12034_s0 }
 0x20c   : > { %10129 = vrot.lane.b32.xlu2 %v10128_v58, %s12035_s1  ;;  %16278 = vst [vmem:[#allocation40_spill] sm:$0xff] %v12891_v13  ;;  %v10188_v28 = vpack.i.bf16 %v12893_v44, %v12891_v13  ;;  %v12920_v36 = vpack.i.bf16 %v12869_v7, %v12891_v13  ;;  %v10218_v55 = vpack.i.bf16 %v12891_v13, %v12855_v50 }
 0x20d   : > { %16279 = vst [vmem:[#allocation39_spill] sm:$0xff] %v12893_v44 }
 0x20e   : > { %v1673_v12 = vpop.f32.mrf.mxu2  ;;  %v1696_v10 = vpop.f32.mrf.mxu3 }
 0x20f   : > { %v1674_v53 = vadd.f32 %v1673_v12, %v12833_v0  ;;  %v1697_v49 = vadd.f32 %v1696_v10, %v12833_v0 }
 0x211   : > { %v12935_v24 = vmax.f32 %v1674_v53, 0.0  ;;  %v12986_v3 = vmax.f32 %v1697_v49, 0.0 }
 0x212   : > { %v1716_v48 = vpop.f32.mrf.mxu0 }
 0x213   : > { %10054 = vrot.lane.b32.xlu1 %v10038_v9, %s12032_s16  ;;  %10034 = vrot.lane.b32.xlu0 %v10018_v21, %s12036_s22  ;;  %16282 = vst [vmem:[#allocation45_spill] sm:$0xff] %v12935_v24  ;;  %v12941_v30 = vpack.i.bf16 %v12910_v62, %v12935_v24  ;;  %v1739_v17 = vpop.f32.mrf.mxu1  ;;  %v1717_v15 = vadd.f32 %v1716_v48, %v12810_v38 }
 0x214   : > { %10149 = vrot.lane.b32.xlu2 %v10148_v52, %s12036_s22  ;;  %v1740_v33 = vadd.f32 %v1739_v17, %v12810_v38  ;;  %v12958_v21 = vpack.i.bf16 %v12871_v37, %v12893_v44  ;;  %16284 = vst [vmem:[#allocation47_spill] sm:$0xff] %v12986_v3  ;;  %v13122_v37 = vld [vmem:[#allocation18 + $0x8] sm:$0xff] }
 0x215   : > { %v12967_v63 = vmax.f32 %v1717_v15, 0.0 }
 0x216   : > { %v12969_v1 = vmax.f32 %v1740_v33, 0.0 }
 0x217   : > { %16283 = vst [vmem:[#allocation46_spill] sm:$0xff] %v12967_v63 }
 0x218   : > { %v10273_v23 = vpack.i.bf16 %v12969_v1, %v12967_v63 }
 0x21a   : > { %v1719_v59 = vpop.f32.mrf.mxu0 }
 0x21b   : > { %10059 = vrot.lane.b32.xlu1 %v10038_v9, %s12035_s1  ;;  %10074 = vrot.lane.b32.xlu0 %v10093_v39, %s16210_s6  ;;  %v1742_v47 = vpop.f32.mrf.mxu1 }
 0x21c   : > { %10154 = vrot.lane.b32.xlu2 %v10153_v4, %s16210_s6 }
 0x223   : > { %10064 = vrot.lane.b32.xlu1 %v10038_v9, %s12034_s0  ;;  %10079 = vrot.lane.b32.xlu0 %v10093_v39, %s16212_s19 }
 0x224   : > { %10159 = vrot.lane.b32.xlu2 %v10153_v4, %s16212_s19 }
 0x22b   : > { %10069 = vrot.lane.b32.xlu1 %v10038_v9, %s12033_s21  ;;  %10084 = vrot.lane.b32.xlu0 %v10093_v39, %s12031_s29 }
 0x22c   : > { %10164 = vrot.lane.b32.xlu2 %v10153_v4, %s12031_s29 }
 0x233   : > { %10099 = vrot.lane.b32.xlu1 %v10093_v39, %s12033_s21  ;;  %10089 = vrot.lane.b32.xlu0 %v10093_v39, %s12035_s1 }
 0x234   : > { %10169 = vrot.lane.b32.xlu2 %v10168_v29, %s12032_s16 }
 0x23b   : > { %10104 = vrot.lane.b32.xlu1 %v10093_v39, %s12036_s22  ;;  %10124 = vrot.lane.b32.xlu0 %v10123_v16, %s12032_s16  ;;  %v1762_v39 = vpop.f32.mrf.mxu2  ;;  %v1720_v16 = vadd.f32 %v1719_v59, %v12833_v0 }
 0x23c   : > { %10189 = vrot.lane.b32.xlu2 %v10188_v28, %s16210_s6 }
 0x23d   : > { %v13013_v60 = vmax.f32 %v1720_v16, 0.0 }
 0x23f   : > { %16286 = vst [vmem:[#allocation49_spill] sm:$0xff] %v13013_v60 }
 0x243   : > { %10109 = vrot.lane.b32.xlu1 %v10128_v58, %s16210_s6  ;;  %10134 = vrot.lane.b32.xlu0 %v10128_v58, %s12034_s0  ;;  %v1765_v17 = vpop.f32.mrf.mxu2 }
 0x244   : > { %10194 = vrot.lane.b32.xlu2 %v10188_v28, %s16212_s19  ;;  %v1766_v15 = vadd.f32 %v1765_v17, %v12833_v0 }
 0x246   : > { %v13044_v10 = vmax.f32 %v1766_v15, 0.0 }
 0x248   : > { %v10338_v49 = vpack.i.bf16 0.0, %v13044_v10 }
 0x24b   : > { %10114 = vrot.lane.b32.xlu1 %v10128_v58, %s16212_s19  ;;  %10139 = vrot.lane.b32.xlu0 %v10128_v58, %s12033_s21 }
 0x24c   : > { %10199 = vrot.lane.b32.xlu2 %v10188_v28, %s12031_s29  ;;  %v1743_v28 = vadd.f32 %v1742_v47, %v12833_v0 }
 0x24e   : > { %v12914_v45 = vpop.permute.xlu2 %9999  ;;  %v13015_v31 = vmax.f32 %v1743_v28, 0.0 }
 0x250   : > { %v10303_v12 = vpack.i.bf16 %v13015_v31, %v13013_v60 }
 0x253   : > { %10119 = vrot.lane.b32.xlu1 %v10128_v58, %s12031_s29  ;;  %10174 = vrot.lane.b32.xlu0 %v10173_v54, %s16210_s6  ;;  %v1763_v58 = vadd.f32 %v1762_v39, %v12810_v38  ;;  %v10233_v38 = vpack.i.bf16 %v12986_v3, %v12935_v24 }
 0x254   : > { %10204 = vrot.lane.b32.xlu2 %v12920_v36, %s12035_s1 }
 0x255   : > { %v12992_v2 = vmax.f32 %v1763_v58, 0.0 }
 0x256   : > { %v12926_v35 = vpop.permute.xlu2 %10029 }
 0x257   : > { %16285 = vst [vmem:[#allocation48_spill] sm:$0xff] %v12992_v2  ;;  %v10288_v4 = vpack.i.bf16 0.0, %v12992_v2 }
 0x25b   : > { %10144 = vrot.lane.b32.xlu1 %v10143_v61, %s12036_s22  ;;  %10179 = vrot.lane.b32.xlu0 %v10173_v54, %s16212_s19 }
 0x25c   : > { %10209 = vrot.lane.b32.xlu2 %v12920_v36, %s12034_s0 }
 0x25e   : > { %v12937_v22 = vpop.permute.xlu2 %10094 }
 0x25f   : > { %v10096_v62 = vunpack.i.l.bf16 %v12937_v22 }
 0x263   : > { %10249 = vrot.lane.b32.xlu1 %v12941_v30, %s12035_s1  ;;  %10184 = vrot.lane.b32.xlu0 %v10173_v54, %s12031_s29 }
 0x264   : > { %10214 = vrot.lane.b32.xlu2 %v12920_v36, %s12033_s21 }
 0x265   : > { %v12948_v18 = vpop.permute.xlu1 %10019  ;;  %v12950_v32 = vpop.permute.xlu0 %10004 }
 0x266   : > { %v12952_v14 = vpop.permute.xlu2 %10129  ;;  %v10022_v15 = vunpack.i.h.bf16 %v12948_v18  ;;  %v10021_v40 = vunpack.i.l.bf16 %v12948_v18 }
 0x267   : > { %v16156_v16 = vunpack.i.l.bf16 %v12952_v14 }
 0x268   : > { %v2926_v18 = vsel %vm1279_vm3, %v10021_v40, %v10022_v15 }
 0x26b   : > { %10259 = vrot.lane.b32.xlu1 %v12958_v21, %s12033_s21  ;;  %10219 = vrot.lane.b32.xlu0 %v10218_v55, %s12032_s16 }
 0x26c   : > { %10229 = vrot.lane.b32.xlu2 %v12958_v21, %s12034_s0 }
 0x26d   : > { %v12971_v8 = vpop.permute.xlu1 %10039  ;;  %v12973_v9 = vpop.permute.xlu0 %10009 }
 0x26e   : > { %v12975_v42 = vpop.permute.xlu2 %10149 }
 0x273   : > { %10274 = vrot.lane.b32.xlu1 %v10273_v23, %s16210_s6  ;;  %10224 = vrot.lane.b32.xlu0 %v12958_v21, %s12035_s1 }
 0x274   : > { %10269 = vrot.lane.b32.xlu2 %v12941_v30, %s12033_s21 }
 0x275   : > { %v12988_v11 = vpop.permute.xlu1 %10044  ;;  %v12990_v43 = vpop.permute.xlu0 %10014 }
 0x276   : > { %v12994_v52 = vpop.permute.xlu2 %10154  ;;  %v16289_v44 = vunpack.i.h.bf16 %v12990_v43 }
 0x27b   : > { %10279 = vrot.lane.b32.xlu1 %v10273_v23, %s16212_s19  ;;  %10234 = vrot.lane.b32.xlu0 %v10233_v38, %s16210_s6 }
 0x27c   : > { %10289 = vrot.lane.b32.xlu2 %v10288_v4, %s16210_s6 }
 0x27d   : > { %v13002_v51 = vpop.permute.xlu1 %10049  ;;  %v13004_v27 = vpop.permute.xlu0 %10024 }
 0x27e   : > { %v13006_v29 = vpop.permute.xlu2 %10159 }
 0x283   : > { %10284 = vrot.lane.b32.xlu1 %v10273_v23, %s12031_s29  ;;  %10239 = vrot.lane.b32.xlu0 %v10233_v38, %s16212_s19 }
 0x284   : > { %10294 = vrot.lane.b32.xlu2 %v10288_v4, %s16212_s19 }
 0x285   : > { %v13017_v41 = vpop.permute.xlu1 %10054  ;;  %v13019_v19 = vpop.permute.xlu0 %10034 }
 0x286   : > { %v13021_v54 = vpop.permute.xlu2 %10164 }
 0x28b   : > { %10304 = vrot.lane.b32.xlu1 %v10303_v12, %s16210_s6  ;;  %10244 = vrot.lane.b32.xlu0 %v10233_v38, %s12031_s29  ;;  %v13061_v38 = vpack.i.bf16 %v12912_v26, %v12986_v3  ;;  %v10097_v26 = vunpack.i.h.bf16 %v12937_v22  ;;  %v10026_v3 = vunpack.i.l.bf16 %v13004_v27 }
 0x28c   : > { %10299 = vrot.lane.b32.xlu2 %v10288_v4, %s12031_s29  ;;  %v13065_v4 = vpack.i.bf16 %v12967_v63, %v13013_v60 }
 0x28d   : > { %v13028_v53 = vpop.permute.xlu1 %10059  ;;  %v13030_v61 = vpop.permute.xlu0 %10074 }
 0x28e   : > { %v13032_v48 = vpop.permute.xlu2 %10169  ;;  %v16155_v46 = vunpack.i.l.bf16 %v13028_v53 }
 0x290   : > { %v2927_v22 = vsel %vm1279_vm3, %v10022_v15, %v16155_v46  ;;  %v10036_v46 = vunpack.i.l.bf16 %v13019_v19 }
 0x293   : > { %10309 = vrot.lane.b32.xlu1 %v10303_v12, %s16212_s19  ;;  %10254 = vrot.lane.b32.xlu0 %v12941_v30, %s12034_s0 }
 0x294   : > { %10324 = vrot.lane.b32.xlu2 %v12941_v30, %s12032_s16 }
 0x295   : > { %v13040_v33 = vpop.permute.xlu1 %10064  ;;  %v13042_v55 = vpop.permute.xlu0 %10079 }
 0x296   : > { %v13046_v39 = vpop.permute.xlu2 %10189  ;;  %v16168_v13 = vunpack.i.h.bf16 %v13042_v55 }
 0x29b   : > { %10314 = vrot.lane.b32.xlu1 %v10303_v12, %s12031_s29  ;;  %10264 = vrot.lane.b32.xlu0 %v12958_v21, %s12032_s16 }
 0x29c   : > { %10339 = vrot.lane.b32.xlu2 %v10338_v49, %s16210_s6 }
 0x29d   : > { %v13053_v0 = vpop.permute.xlu1 %10069  ;;  %v13055_v23 = vpop.permute.xlu0 %10084 }
 0x29e   : > { %v13057_v58 = vpop.permute.xlu2 %10194 }
 0x2a3   : > { %10319 = vrot.lane.b32.xlu1 %v13061_v38, %s12035_s1  ;;  %10329 = vrot.lane.b32.xlu0 %v13065_v4, %s12035_s1 }
 0x2a4   : > { %10344 = vrot.lane.b32.xlu2 %v10338_v49, %s16212_s19 }
 0x2a5   : > { %v13072_v59 = vpop.permute.xlu1 %10099  ;;  %v10090_v47 = vpop.permute.xlu0 %10089 }
 0x2a6   : > { %v10092_v28 = vunpack.i.h.bf16 %v10090_v47  ;;  %v10091_v12 = vunpack.i.l.bf16 %v10090_v47  ;;  %v13075_v17 = vpop.permute.xlu2 %10199  ;;  %v16160_v47 = vunpack.i.h.bf16 %v13004_v27  ;;  %v16287_v24 = vunpack.i.h.bf16 %v13072_v59 }
 0x2a8   : > { %v2937_v63 = vsel %vm1279_vm3, %v10091_v12, %v10092_v28  ;;  %v2938_v60 = vsel %vm1279_vm3, %v10092_v28, %v16156_v16  ;;  %v2775_v12 = vsel %vm1197_vm0, %v10096_v62, %v10097_v26  ;;  %v16161_v16 = vunpack.i.h.bf16 %v12926_v35 }
 0x2a9   : > { %3375 = vmatpush.msra.mxu3 %v2937_v63  ;;  %3421 = vmatpush.msrb.mxu1 %v2938_v60  ;;  %v10101_v60 = vunpack.i.l.bf16 %v13072_v59  ;;  %v10031_v63 = vunpack.i.l.bf16 %v12926_v35 }
 0x2ab   : > { %10334 = vrot.lane.b32.xlu1 %v12920_v36, %s12036_s22  ;;  %10359 = vrot.lane.b32.xlu0 %v13065_v4, %s12034_s0 }
 0x2ac   : > { %3376 = vmatpush.msra.mxu3 %v2926_v18  ;;  %10349 = vrot.lane.b32.xlu2 %v10338_v49, %s12031_s29 }
 0x2ad   : > { %3422 = vmatpush.msrb.mxu1 %v2927_v22  ;;  %v13099_v28 = vpop.permute.xlu1 %10104  ;;  %v13101_v36 = vpop.permute.xlu0 %10124  ;;  %v2764_v22 = vsel %vm1197_vm0, %v10026_v3, %v16160_v47  ;;  %v16288_v3 = vunpack.i.h.bf16 %v13019_v19 }
 0x2ae   : > { %v16159_v40 = vunpack.i.h.bf16 %v13099_v28  ;;  %v10106_v18 = vunpack.i.l.bf16 %v13099_v28  ;;  %v13106_v49 = vpop.permute.xlu2 %10204  ;;  %3377 = vmatpush.msra.mxu3 %v2775_v12  ;;  %v2613_v12 = vsel %vm1115_vm1, %v10101_v60, %v16287_v24  ;;  %v16165_v15 = vunpack.i.l.bf16 %v13101_v36 }
 0x2af   : > { %v10016_v24 = vunpack.i.l.bf16 %v12990_v43  ;;  %v10172_v60 = vunpack.i.h.bf16 %v13032_v48 }
 0x2b0   : > { %3378 = vmatpush.msra.mxu3 %v2764_v22  ;;  %v3099_v62 = vsel %vm1361_vm2, %v10106_v18, %v16159_v40  ;;  %v3088_v18 = vsel %vm1361_vm2, %v10036_v46, %v16288_v3  ;;  %v10086_v3 = vunpack.i.l.bf16 %v13055_v23  ;;  %v13169_v22 = vld [vmem:[#allocation18 + $0x18] sm:$0xff] }
 0x2b1   : > { %3412 = vmatpush.msrb.mxu2 %v3099_v62  ;;  %v2602_v62 = vsel %vm1115_vm1, %v10031_v63, %v16161_v16  ;;  %v2451_v63 = vsel %vm1033_vm4, %v10172_v60, %v16165_v15  ;;  %v10011_v16 = vunpack.i.l.bf16 %v12973_v9  ;;  %v2440_v46 = vsel %vm1033_vm4, %v10016_v24, %v16289_v44 }
 0x2b2   : > { %3379 = vmatpush.msra.mxu3 %v2613_v12  ;;  %v10081_v60 = vunpack.i.l.bf16 %v13042_v55 }
 0x2b3   : > { %10364 = vrot.lane.b32.xlu1 %v13061_v38, %s12033_s21  ;;  %10374 = vrot.lane.b32.xlu0 %v13061_v38, %s12032_s16 }
 0x2b4   : > { %3413 = vmatpush.msrb.mxu2 %v3088_v18  ;;  %10354 = vrot.lane.b32.xlu2 %v13061_v38, %s12034_s0 }
 0x2b5   : > { %3380 = vmatpush.msra.mxu3 %v2602_v62  ;;  %v13139_v12 = vpop.permute.xlu1 %10109  ;;  %v13141_v40 = vpop.permute.xlu0 %10134  ;;  %9516 = vmatmul.msk.f32.vlgmr.msrb.gmra.mxu2 %vm3368_vm9, %v13122_v37  ;;  %v16167_v62 = vunpack.i.h.bf16 %v12973_v9 }
 0x2b6   : > { %v16166_v18 = vunpack.i.l.bf16 %v13141_v40  ;;  %v13148_v47 = vpop.permute.xlu2 %10209 }
 0x2b7   : > { %3381 = vmatpush.msra.mxu3 %v2451_v63  ;;  %v16290_v63 = vunpack.i.h.bf16 %v13055_v23 }
 0x2b8   : > { %v2776_v7 = vsel %vm1197_vm0, %v10097_v26, %v16166_v18  ;;  %v10006_v26 = vunpack.i.l.bf16 %v12950_v32 }
 0x2b9   : > { %3382 = vmatpush.msra.mxu3 %v2440_v46  ;;  %3423 = vmatpush.msrb.mxu1 %v2776_v7  ;;  %v2289_v15 = vsel %vm951_vm5, %v10086_v3, %v16290_v63  ;;  %v2278_v7 = vsel %vm951_vm5, %v10011_v16, %v16167_v62  ;;  %v10076_v63 = vunpack.i.l.bf16 %v13030_v61  ;;  %v16171_v16 = vunpack.i.h.bf16 %v12914_v45 }
 0x2ba   : > { %v16294_v62 = vunpack.i.h.bf16 %v13072_v59  ;;  %v16174_v59 = vunpack.i.l.bf16 %v13017_v41 }
 0x2bb   : > { %3383 = vmatpush.msra.mxu3 %v2289_v15  ;;  %10379 = vrot.lane.b32.xlu1 %v12958_v21, %s12036_s22  ;;  %v16291_v15 = vunpack.i.l.bf16 %v13040_v33  ;;  %v16292_v21 = vunpack.i.h.bf16 %v13004_v27  ;;  %v2127_v27 = vsel %vm869_vm6, %v10081_v60, %v16168_v13  ;;  %v13212_v13 = vpack.i.bf16 %v12969_v1, %v13015_v31 }
 0x2bc   : > { %10389 = vrot.lane.b32.xlu0 %v12941_v30, %s12036_s22  ;;  %10369 = vrot.lane.b32.xlu2 %v13065_v4, %s12033_s21  ;;  %v16169_v30 = vunpack.i.h.bf16 %v13030_v61 }
 0x2bd   : > { %v2765_v24 = vsel %vm1197_vm0, %v16292_v21, %v16291_v15  ;;  %3384 = vmatpush.msra.mxu3 %v2278_v7  ;;  %v13185_v46 = vpop.permute.xlu1 %10114  ;;  %v13187_v3 = vpop.permute.xlu0 %10139  ;;  %9517 = vmatmul.msk.f32.gmra.mxu2 %vm3368_vm9, %v13169_v22  ;;  %v10001_v7 = vunpack.i.l.bf16 %v12914_v45  ;;  %v16293_v21 = vunpack.i.h.bf16 %v12950_v32 }
 0x2be   : > { %3424 = vmatpush.msrb.mxu1 %v2765_v24  ;;  %v16170_v18 = vunpack.i.l.bf16 %v13187_v3  ;;  %v13192_v44 = vpop.permute.xlu2 %10214  ;;  %v1965_v15 = vsel %vm787_vm7, %v10076_v63, %v16169_v30  ;;  %v16296_v63 = vunpack.i.h.bf16 %v12926_v35 }
 0x2bf   : > { %3385 = vmatpush.msra.mxu3 %v2127_v27  ;;  %v2116_v24 = vsel %vm869_vm6, %v10006_v26, %v16293_v21  ;;  %v16172_v27 = vunpack.i.h.bf16 %v13101_v36  ;;  %v16295_v26 = vunpack.i.l.bf16 %v13053_v0 }
 0x2c0   : > { %v2614_v60 = vsel %vm1115_vm1, %v16294_v62, %v16170_v18  ;;  %v1954_v62 = vsel %vm787_vm7, %v10001_v7, %v16171_v16  ;;  %v16297_v7 = vunpack.i.l.bf16 %v13101_v36  ;;  %v16299_v16 = vunpack.i.h.bf16 %v13055_v23 }
 0x2c1   : > { %3386 = vmatpush.msra.mxu3 %v2116_v24  ;;  %3425 = vmatpush.msrb.mxu1 %v2614_v60  ;;  %v16178_v23 = vunpack.i.l.bf16 %v13185_v46 }
 0x2c2   : > { %v2452_v35 = vsel %vm1033_vm4, %v16297_v7, %v16172_v27  ;;  %v16177_v7 = vunpack.i.h.bf16 %v13141_v40  ;;  %v16300_v27 = vmax.f32 %v12813_v5, 0.0  ;;  %v16303_v5 = vunpack.i.l.bf16 %v13028_v53 }
 0x2c3   : > { %3387 = vmatpush.msra.mxu3 %v1965_v15  ;;  %10394 = vrot.lane.b32.xlu1 %v13212_v13, %s12035_s1  ;;  %v2603_v15 = vsel %vm1115_vm1, %v16296_v63, %v16295_v26  ;;  %v16176_v26 = vunpack.i.h.bf16 %v13028_v53  ;;  %v16298_v63 = vunpack.i.h.bf16 %v12990_v43 }
 0x2c4   : > { %10404 = vrot.lane.b32.xlu0 %v13212_v13, %s12034_s0  ;;  %10384 = vrot.lane.b32.xlu2 %v13065_v4, %s12032_s16 }
 0x2c5   : > { %3388 = vmatpush.msra.mxu3 %v1954_v62  ;;  %3426 = vmatpush.msrb.mxu1 %v2603_v15  ;;  %v13234_v24 = vpop.permute.xlu1 %10119  ;;  %v13236_v60 = vpop.permute.xlu0 %10174  ;;  %v16175_v62 = vunpack.i.l.bf16 %v13002_v51  ;;  %v2441_v15 = vsel %vm1033_vm4, %v16298_v63, %v16174_v59  ;;  %v13269_v63 = vpack.i.bf16 %v12992_v2, %v13044_v10 }
 0x2c6   : > { %v16173_v30 = vunpack.i.l.bf16 %v13234_v24  ;;  %v13239_v18 = vpop.permute.xlu2 %10229 }
 0x2c7   : > { %3389 = vmatpush.msra.mxu3 %v12841_v57  ;;  %3427 = vmatpush.msrb.mxu1 %v2452_v35  ;;  %v16301_v57 = vunpack.i.h.bf16 %v12952_v14  ;;  %v16302_v35 = vunpack.i.l.bf16 %v12952_v14 }
 0x2c8   : > { %v2290_v21 = vsel %vm951_vm5, %v16299_v16, %v16173_v30  ;;  %v16179_v16 = vunpack.i.h.bf16 %v13040_v33 }
 0x2c9   : > { %3390 = vmatpush.msra.mxu3 %v16300_v27  ;;  %3428 = vmatpush.msrb.mxu1 %v2441_v15  ;;  %v2939_v43 = vsel %vm1279_vm3, %v16302_v35, %v16301_v57  ;;  %v2928_v27 = vsel %vm1279_vm3, %v16303_v5, %v16176_v26  ;;  %v16304_v57 = vunpack.i.h.bf16 %v12973_v9  ;;  %v13288_v35 = vld [vmem:[#allocation18] sm:$0xff]  ;;  %v16305_v5 = vunpack.i.l.bf16 %v13141_v40 }
 0x2ca   : > { %3391 = vmatmul.f32.vlgmr.msra.gmra.mxu3 %v13288_v35  ;;  %v16309_v9 = vunpack.i.h.bf16 %v12950_v32  ;;  %v10206_v32 = vunpack.i.l.bf16 %v13106_v49 }
 0x2cb   : > { %3467 = vmatpush.msrb.mxu3 %v2939_v43  ;;  %3429 = vmatpush.msrb.mxu1 %v2290_v21  ;;  %v2279_v21 = vsel %vm951_vm5, %v16304_v57, %v16175_v62  ;;  %v16308_v57 = vunpack.i.l.bf16 %v12988_v11 }
 0x2cc   : > { %10409 = vrot.lane.b32.xlu1 %v13269_v63, %s12034_s0  ;;  %10419 = vrot.lane.b32.xlu0 %v13269_v63, %s12033_s21 }
 0x2cd   : > { %3468 = vmatpush.msrb.mxu3 %v2928_v27  ;;  %10399 = vrot.lane.b32.xlu2 %v13269_v63, %s12035_s1  ;;  %v2777_v27 = vsel %vm1197_vm0, %v16305_v5, %v16177_v7  ;;  %v10145_v30 = vpop.permute.xlu1 %10144  ;;  %v13298_v59 = vpop.permute.xlu0 %10179  ;;  %v16307_v5 = vunpack.i.l.bf16 %v13040_v33 }
 0x2ce   : > { %3430 = vmatpush.msrb.mxu1 %v2279_v21  ;;  %v10146_v62 = vunpack.i.l.bf16 %v10145_v30  ;;  %v13302_v26 = vpop.permute.xlu2 %10269  ;;  %v16306_v21 = vunpack.i.h.bf16 %v13042_v55  ;;  %v2117_v55 = vsel %vm869_vm6, %v16309_v9, %v16308_v57  ;;  %v16315_v9 = vunpack.i.h.bf16 %v13030_v61 }
 0x2cf   : > { %3469 = vmatpush.msrb.mxu3 %v2777_v27  ;;  %v2766_v7 = vsel %vm1197_vm0, %v16307_v5, %v16179_v16  ;;  %v10147_v27 = vunpack.i.h.bf16 %v10145_v30  ;;  %v10041_v5 = vunpack.i.l.bf16 %v12971_v8  ;;  %v16312_v30 = vunpack.i.h.bf16 %v13187_v3 }
 0x2d0   : > { %v2128_v43 = vsel %vm869_vm6, %v16306_v21, %v16178_v23  ;;  %v16310_v21 = vunpack.i.h.bf16 %v13099_v28  ;;  %v16311_v23 = vunpack.i.l.bf16 %v12975_v42  ;;  %v16314_v28 = vunpack.i.l.bf16 %v13139_v12 }
 0x2d1   : > { %3431 = vmatpush.msrb.mxu1 %v2128_v43  ;;  %3470 = vmatpush.msrb.mxu3 %v2766_v7  ;;  %v16313_v7 = vunpack.i.l.bf16 %v13187_v3  ;;  %v16318_v61 = vunpack.i.h.bf16 %v13019_v19 }
 0x2d2   : > { %v3100_v43 = vsel %vm1361_vm2, %v16310_v21, %v10146_v62  ;;  %v3101_v15 = vsel %vm1361_vm2, %v10146_v62, %v16311_v23  ;;  %v1966_v57 = vsel %vm787_vm7, %v16315_v9, %v16314_v28  ;;  %v16180_v62 = vunpack.i.h.bf16 %v12975_v42 }
 0x2d3   : > { %3432 = vmatpush.msrb.mxu1 %v2117_v55  ;;  %v2615_v16 = vsel %vm1115_vm1, %v16313_v7, %v16312_v30  ;;  %3458 = vmatpush.msra.mxu2 %v3100_v43  ;;  %v16316_v23 = vunpack.i.h.bf16 %v13053_v0  ;;  %v16317_v55 = vunpack.i.l.bf16 %v13053_v0  ;;  %v13353_v43 = vld [vmem:[#allocation18 + $0x10] sm:$0xff]  ;;  %v16319_v30 = vunpack.i.h.bf16 %v12914_v45 }
 0x2d4   : > { %3471 = vmatpush.msrb.mxu3 %v2615_v16  ;;  %3504 = vmatpush.msrb.mxu0 %v3101_v15  ;;  %v10207_v16 = vunpack.i.h.bf16 %v13106_v49  ;;  %v3089_v15 = vsel %vm1361_vm2, %v16318_v61, %v10147_v27  ;;  %v10211_v9 = vunpack.i.l.bf16 %v13148_v47  ;;  %v16322_v61 = vmax.f32 %v12816_v20, 0.0 }
 0x2d5   : > { %3433 = vmatpush.msrb.mxu1 %v1966_v57  ;;  %v2604_v21 = vsel %vm1115_vm1, %v16317_v55, %v16316_v23  ;;  %10424 = vrot.lane.b32.xlu1 %v13212_v13, %s12032_s16  ;;  %v1955_v7 = vsel %vm787_vm7, %v16319_v30, %v10041_v5  ;;  %v13365_v28 = vpop.permute.xlu1 %10249  ;;  %v13367_v19 = vpop.permute.xlu0 %10184  ;;  %v16320_v57 = vunpack.i.h.bf16 %v12952_v14  ;;  %v16321_v55 = vunpack.i.h.bf16 %v13028_v53 }
 0x2d6   : > { %3472 = vmatpush.msrb.mxu3 %v2604_v21  ;;  %10434 = vrot.lane.b32.xlu0 %v13061_v38, %s12036_s22  ;;  %v3090_v38 = vsel %vm1361_vm2, %v10147_v27, %v16180_v62  ;;  %v13375_v23 = vpop.permute.xlu2 %10289  ;;  %v10212_v27 = vunpack.i.h.bf16 %v13148_v47  ;;  %v10216_v14 = vunpack.i.l.bf16 %v13192_v44  ;;  %v16324_v30 = vunpack.i.h.bf16 %v13040_v33 }
 0x2d7   : > { %3459 = vmatpush.msra.mxu2 %v3089_v15  ;;  %10414 = vrot.lane.b32.xlu2 %v13212_v13, %s12033_s21  ;;  %v2940_v45 = vsel %vm1279_vm3, %v16320_v57, %v10206_v32  ;;  %v2929_v21 = vsel %vm1279_vm3, %v16321_v55, %v10207_v16  ;;  %v10217_v15 = vunpack.i.h.bf16 %v13192_v44  ;;  %v12038_v20 = vmov 0.0  }
 0x2d8   : > { %3434 = vmatpush.msrb.mxu1 %v1955_v7  ;;  %3505 = vmatpush.msrb.mxu0 %v3090_v38  ;;  %v2767_v7 = vsel %vm1197_vm0, %v16324_v30, %v10212_v27  ;;  %v16325_v33 = vunpack.i.h.bf16 %v13187_v3  ;;  %v16327_v3 = vunpack.i.h.bf16 %v13101_v36  ;;  %v16328_v36 = vunpack.i.l.bf16 %v13017_v41  ;;  %3925 = vst [vmem:[%s13448_s10 + $0x58] sm:$0xff] %v12038_v20 }
 0x2d9   : > { %3513 = vmatpush.msrb.mxu2 %v2940_v45  ;;  %3394 = vmatmul.f32.gmra.mxu3 %v13353_v43  ;;  %3926 = vst [vmem:[%s13448_s10 + $0xb8] sm:$0xff] %v12038_v20 }
 0x2da   : > { %3435 = vmatpush.msrb.mxu1 %v12843_v56  ;;  %9518 = vmatmul.msk.f32.vlgmr.msra.gmra.mxu2 %vm3368_vm9, %v13122_v37  ;;  %v16323_v56 = vunpack.i.h.bf16 %v13141_v40  ;;  %v2616_v57 = vsel %vm1115_vm1, %v16325_v33, %v10216_v14 }
 0x2db   : > { %3514 = vmatpush.msrb.mxu2 %v2929_v21  ;;  %9520 = vmatmul.msk.f32.vlgmr.msrb.gmra.mxu0 %vm3368_vm9, %v13122_v37 }
 0x2dc   : > { %3436 = vmatpush.msrb.mxu1 %v16322_v61  ;;  %v2778_v53 = vsel %vm1197_vm0, %v16323_v56, %v10211_v9  ;;  %v10057_v61 = vunpack.i.h.bf16 %v13017_v41  ;;  %v16181_v56 = vunpack.i.l.bf16 %v13032_v48 }
 0x2dd   : > { %3515 = vmatpush.msrb.mxu2 %v2778_v53  ;;  %10439 = vrot.lane.b32.xlu1 %v13269_v63, %s12032_s16  ;;  %v13410_v40 = vpop.permute.xlu1 %10259  ;;  %v13412_v38 = vpop.permute.xlu0 %10219  ;;  %v16326_v53 = vunpack.i.h.bf16 %v13053_v0  ;;  %v10052_v0 = vunpack.i.h.bf16 %v13002_v51 }
 0x2de   : > { %10449 = vrot.lane.b32.xlu0 %v12038_v20, %s12034_s0  ;;  %3437 = vmatmul.f32.vlgmr.msrb.gmra.mxu1 %v13288_v35  ;;  %v16182_v45 = vunpack.i.h.bf16 %v13412_v38  ;;  %v10221_v55 = vunpack.i.l.bf16 %v13412_v38  ;;  %v13421_v21 = vpop.permute.xlu2 %10294  ;;  %v2443_v41 = vsel %vm1033_vm4, %v10057_v61, %v16181_v56  ;;  %v10196_v56 = vunpack.i.l.bf16 %v13057_v58  ;;  %s16375_s0 = sld [smem:[#allocation62_spill]] }
 0x2df   : > { %3516 = vmatpush.msrb.mxu2 %v2767_v7  ;;  %10429 = vrot.lane.b32.xlu2 %v12038_v20, %s12035_s1  ;;  %v2605_v30 = vsel %vm1115_vm1, %v16326_v53, %v10217_v15  ;;  %v16183_v53 = vunpack.i.l.bf16 %v13021_v54  ;;  %s16374_s1 = sld [smem:[#allocation59_spill]] }
 0x2e0   : > { %v2453_v7 = vsel %vm1033_vm4, %v16327_v3, %v10221_v55  ;;  %v2454_v33 = vsel %vm1033_vm4, %v10221_v55, %v16182_v45  ;;  %v2442_v55 = vsel %vm1033_vm4, %v16328_v36, %v10057_v61  ;;  %v10117_v3 = vunpack.i.h.bf16 %v13185_v46 }
 0x2e1   : > { %3517 = vmatpush.msrb.mxu2 %v2616_v57  ;;  %v10122_v57 = vunpack.i.h.bf16 %v13234_v24  ;;  %3473 = vmatpush.msrb.mxu3 %v2453_v7  ;;  %v16329_v36 = vunpack.i.l.bf16 %v13234_v24  ;;  %v16330_v24 = vunpack.i.l.bf16 %v13002_v51  ;;  %v16331_v51 = vunpack.i.l.bf16 %v13185_v46 }
 0x2e2   : > { %9519 = vmatmul.msk.f32.gmra.mxu2 %vm3368_vm9, %v13169_v22  ;;  %v16333_v46 = vunpack.i.l.bf16 %v12988_v11 }
 0x2e3   : > { %3518 = vmatpush.msrb.mxu2 %v2605_v30  ;;  %9521 = vmatmul.msk.f32.gmra.mxu0 %vm3368_vm9, %v13169_v22  ;;  %v10201_v30 = vunpack.i.l.bf16 %v13075_v17 }
 0x2e4   : > { %3474 = vmatpush.msrb.mxu3 %v2442_v55 }
 0x2e5   : > { %3519 = vmatpush.msrb.mxu2 %v2454_v33  ;;  %10454 = vrot.lane.b32.xlu1 %v12038_v20, %s12033_s21  ;;  %v13464_v7 = vpop.permute.xlu1 %10274  ;;  %v13466_v33 = vpop.permute.xlu0 %10224  ;;  %v2292_v61 = vsel %vm951_vm5, %v10122_v57, %v10201_v30  ;;  %s16378_s21 = smov 120  }
 0x2e6   : > { %10464 = vrot.lane.b32.xlu0 %v13212_v13, %s12036_s22  ;;  %v2291_v13 = vsel %vm951_vm5, %v16329_v36, %v10122_v57  ;;  %v16184_v55 = vunpack.i.l.bf16 %v13466_v33  ;;  %v13472_v62 = vpop.permute.xlu2 %10299  ;;  %3440 = vmatmul.f32.gmra.mxu1 %v13353_v43  ;;  %v2280_v36 = vsel %vm951_vm5, %v16330_v24, %v10052_v0  ;;  %v10227_v45 = vunpack.i.h.bf16 %v13466_v33 }
 0x2e7   : > { %10444 = vrot.lane.b32.xlu2 %v13065_v4, %s12036_s22  ;;  %3520 = vmatpush.msrb.mxu2 %v2443_v41  ;;  %v10047_v4 = vunpack.i.h.bf16 %v12988_v11  ;;  %v10161_v41 = vunpack.i.l.bf16 %v13006_v29  ;;  %v2281_v57 = vsel %vm951_vm5, %v10052_v0, %v16183_v53  ;;  %v2129_v24 = vsel %vm869_vm6, %v16331_v51, %v10117_v3 }
 0x2e8   : > { %3475 = vmatpush.msrb.mxu3 %v2291_v13  ;;  %v2941_v13 = vsel %vm1279_vm3, %v10206_v32, %v16184_v55  ;;  %v10231_v0 = vunpack.i.l.bf16 %v13239_v18  ;;  %v2130_v53 = vsel %vm869_vm6, %v10117_v3, %v10196_v56  ;;  %v10042_v32 = vunpack.i.h.bf16 %v12971_v8  ;;  %v3357_v8 = vld [vmem:[%s16332_s4 + $0x8] sm:$0xff] }
 0x2e9   : > { %3521 = vmatpush.msrb.mxu2 %v2292_v61  ;;  %v10112_v61 = vunpack.i.h.bf16 %v13139_v12  ;;  %3559 = vmatpush.msra.mxu1 %v2941_v13  ;;  %v2118_v13 = vsel %vm869_vm6, %v16333_v46, %v10047_v4  ;;  %v10191_v51 = vunpack.i.l.bf16 %v13046_v39  ;;  %v2119_v3 = vsel %vm869_vm6, %v10047_v4, %v10161_v41 }
 0x2ea   : > { %3476 = vmatpush.msrb.mxu3 %v2280_v36  ;;  %v3356_v36 = vld [vmem:[%s16332_s4] sm:$0xff]  ;;  %v16334_v46 = vunpack.i.l.bf16 %v13139_v12  ;;  %v1956_v12 = vsel %vm787_vm7, %v10041_v5, %v10042_v32  ;;  %v16192_v4 = vunpack.i.h.bf16 %v13410_v40 }
 0x2eb   : > { %3522 = vmatpush.msrb.mxu2 %v2281_v57  ;;  %v10156_v57 = vunpack.i.l.bf16 %v12994_v52  ;;  %v1968_v49 = vsel %vm787_vm7, %v10112_v61, %v10191_v51 }
 0x2ec   : > { %3477 = vmatpush.msrb.mxu3 %v2129_v24  ;;  %v10232_v24 = vunpack.i.h.bf16 %v13239_v18  ;;  %v2606_v47 = vsel %vm1115_vm1, %v10217_v15, %v16192_v4  ;;  %v16197_v4 = vunpack.i.h.bf16 %v13365_v28 }
 0x2ed   : > { %3523 = vmatpush.msrb.mxu2 %v2130_v53  ;;  %10469 = vrot.lane.b32.xlu1 %v13269_v63, %s12036_s22  ;;  %v2930_v63 = vsel %vm1279_vm3, %v10207_v16, %v10227_v45  ;;  %v13521_v11 = vpop.permute.xlu1 %10279  ;;  %v13523_v53 = vpop.permute.xlu0 %10234  ;;  %v2779_v16 = vsel %vm1197_vm0, %v10211_v9, %v10231_v0 }
 0x2ee   : > { %3360 = vperm.xlu0 %9996, %v3356_v36   ;;  %3478 = vmatpush.msrb.mxu3 %v2118_v13  ;;  %v1967_v36 = vsel %vm787_vm7, %v16334_v46, %v10112_v61  ;;  %v10261_v13 = vunpack.i.l.bf16 %v13410_v40  ;;  %v13529_v55 = vpop.permute.xlu2 %10324  ;;  %v1957_v61 = vsel %vm787_vm7, %v10042_v32, %v10156_v57  ;;  %v2768_v9 = vsel %vm1197_vm0, %v10212_v27, %v10232_v24 }
 0x2ef   : > { %3524 = vmatpush.msrb.mxu2 %v2119_v3  ;;  %3560 = vmatpush.msra.mxu1 %v2930_v63  ;;  %v10326_v18 = vunpack.i.l.bf16 %v13529_v55 }
 0x2f0   : > { %3479 = vmatpush.msrb.mxu3 %v1967_v36  ;;  %10459 = vrot.lane.b32.xlu2 %v12038_v20, %s12032_s16  ;;  %v2617_v5 = vsel %vm1115_vm1, %v10216_v14, %v10261_v13 }
 0x2f1   : > { %3525 = vmatpush.msrb.mxu2 %v1968_v49  ;;  %3561 = vmatpush.msra.mxu1 %v2779_v16  ;;  %v16186_v49 = vunpack.i.h.bf16 %v13075_v17  ;;  %v16335_v16 = vunpack.i.h.bf16 %v13412_v38 }
 0x2f2   : > { %3480 = vmatpush.msrb.mxu3 %v1956_v12 }
 0x2f3   : > { %3526 = vmatpush.msrb.mxu2 %v1957_v61  ;;  %3562 = vmatpush.msra.mxu1 %v2768_v9  ;;  %v16187_v61 = vunpack.i.h.bf16 %v13021_v54  ;;  %v16336_v9 = vunpack.i.l.bf16 %v13032_v48  ;;  %v2293_v38 = vsel %vm951_vm5, %v10201_v30, %v16186_v49  ;;  %v16337_v48 = vunpack.i.l.bf16 %v13021_v54 }
 0x2f4   : > { %3481 = vmatpush.msrb.mxu3 %v12853_v34 }
 0x2f5   : > { %3527 = vmatpush.msrb.mxu2 %v12855_v50  ;;  %3563 = vmatpush.msra.mxu1 %v2617_v5  ;;  %v13570_v34 = vpop.permute.xlu1 %10284  ;;  %v13572_v27 = vpop.permute.xlu0 %10239  ;;  %v16188_v5 = vunpack.i.h.bf16 %v13057_v58 }
 0x2f6   : > { %3365 = vperm.xlu1 %9997, %v3357_v8   ;;  %3482 = vmatpush.msrb.mxu3 %v12829_v25  ;;  %v13576_v50 = vpop.permute.xlu2 %10339 }
 0x2f7   : > { %3528 = vmatpush.msrb.mxu2 %v12831_v6  ;;  %3564 = vmatpush.msra.mxu1 %v2606_v47  ;;  %v2131_v30 = vsel %vm869_vm6, %v10196_v56, %v16188_v5 }
 0x2f8   : > { %3483 = vmatmul.f32.vlgmr.msrb.gmra.mxu3 %v13288_v35  ;;  %3529 = vmatmul.f32.vlgmr.msrb.gmra.mxu2 %v13288_v35 }
 0x2f9   : > { %10474 = vrot.lane.b32.xlu2 %v12038_v20, %s12036_s22  ;;  %s12041_s22 = smov 110  }
 0x2fd   : > { %v13580_v25 = vpop.permute.xlu1 %10304  ;;  %v13582_v44 = vpop.permute.xlu0 %10244 }
 0x2fe   : > { %v13586_v6 = vpop.permute.xlu2 %10344 }
 0x300   : > { %3486 = vmatmul.f32.gmra.mxu3 %v13353_v43  ;;  %3532 = vmatmul.f32.gmra.mxu2 %v13353_v43 }
 0x305   : > { %v13588_v14 = vpop.permute.xlu1 %10309  ;;  %v13590_v15 = vpop.permute.xlu0 %10254 }
 0x306   : > { %v13592_v32 = vpop.permute.xlu2 %10349 }
 0x30d   : > { %v13594_v3 = vpop.permute.xlu1 %10314  ;;  %v13596_v63 = vpop.permute.xlu0 %10264 }
 0x30e   : > { %v16191_v20 = vunpack.i.h.bf16 %v13596_v63  ;;  %v16185_v46 = vunpack.i.l.bf16 %v13596_v63  ;;  %v13600_v36 = vpop.permute.xlu2 %10354  ;;  %v16345_v2 = vunpack.i.h.bf16 %v13596_v63 }
 0x310   : > { %v2455_v12 = vsel %vm1033_vm4, %v16335_v16, %v16185_v46  ;;  %v2444_v8 = vsel %vm1033_vm4, %v16336_v9, %v16191_v20  ;;  %v2282_v9 = vsel %vm951_vm5, %v16337_v48, %v16187_v61  ;;  %v16341_v20 = vld [vmem:[#allocation42_spill] sm:$0xff] }
 0x311   : > { %3565 = vmatpush.msra.mxu1 %v2455_v12  ;;  %v16189_v12 = vunpack.i.h.bf16 %v13006_v29 }
 0x313   : > { %3566 = vmatpush.msra.mxu1 %v2444_v8  ;;  %v16190_v8 = vunpack.i.h.bf16 %v13046_v39  ;;  %v2120_v49 = vsel %vm869_vm6, %v10161_v41, %v16189_v12 }
 0x315   : > { %v13620_v47 = vpop.permute.xlu1 %10319  ;;  %v13622_v16 = vpop.permute.xlu0 %10329  ;;  %3567 = vmatpush.msra.mxu1 %v2293_v38  ;;  %v16193_v38 = vunpack.i.h.bf16 %v12994_v52  ;;  %v1969_v48 = vsel %vm787_vm7, %v10191_v51, %v16190_v8  ;;  %v16339_v51 = vld [vmem:[#allocation40_spill] sm:$0xff] }
 0x316   : > { %v13625_v46 = vpop.permute.xlu2 %10369 }
 0x317   : > { %3568 = vmatpush.msra.mxu1 %v2282_v9  ;;  %v1958_v41 = vsel %vm787_vm7, %v10156_v57, %v16193_v38  ;;  %v16195_v57 = vunpack.i.l.bf16 %v13590_v15 }
 0x319   : > { %3569 = vmatpush.msra.mxu1 %v2131_v30 }
 0x31b   : > { %3570 = vmatpush.msra.mxu1 %v2120_v49  ;;  %v16338_v49 = vunpack.i.l.bf16 %v12975_v42 }
 0x31d   : > { %v10335_v9 = vpop.permute.xlu1 %10334  ;;  %v13649_v61 = vpop.permute.xlu0 %10359  ;;  %3571 = vmatpush.msra.mxu1 %v1969_v48  ;;  %v10251_v48 = vunpack.i.l.bf16 %v13365_v28 }
 0x31e   : > { %v10337_v56 = vunpack.i.h.bf16 %v10335_v9  ;;  %v10336_v30 = vunpack.i.l.bf16 %v10335_v9  ;;  %v13651_v5 = vpop.permute.xlu2 %10384  ;;  %v16340_v9 = vunpack.i.h.bf16 %v12975_v42 }
 0x31f   : > { %3572 = vmatpush.msra.mxu1 %v1958_v41 }
 0x320   : > { %v3102_v12 = vsel %vm1361_vm2, %v16338_v49, %v10336_v30  ;;  %v3091_v8 = vsel %vm1361_vm2, %v16340_v9, %v10337_v56  ;;  %v2780_v9 = vsel %vm1197_vm0, %v10231_v0, %v16195_v57  ;;  %v10322_v57 = vunpack.i.h.bf16 %v13620_v47 }
 0x321   : > { %3550 = vmatpush.msra.mxu0 %v3102_v12  ;;  %3573 = vmatpush.msra.mxu1 %v16339_v51  ;;  %v16342_v12 = vunpack.i.l.bf16 %v13466_v33 }
 0x323   : > { %3551 = vmatpush.msra.mxu0 %v3091_v8  ;;  %3574 = vmatpush.msra.mxu1 %v16341_v20  ;;  %v2942_v41 = vsel %vm1279_vm3, %v16342_v12, %v10251_v48  ;;  %v16194_v20 = vunpack.i.h.bf16 %v13590_v15  ;;  %v2931_v8 = vsel %vm1279_vm3, %v10227_v45, %v16197_v4  ;;  %v16196_v12 = vunpack.i.l.bf16 %v13302_v26 }
 0x324   : > { %9522 = vmatmul.msk.f32.vlgmr.msra.gmra.mxu0 %vm3368_vm9, %v13122_v37  ;;  %3575 = vmatmul.f32.vlgmr.msra.gmra.mxu1 %v13288_v35  ;;  %v16198_v45 = vunpack.i.h.bf16 %v13302_v26  ;;  %v16344_v4 = vunpack.i.l.bf16 %v13596_v63  ;;  %v16348_v63 = vunpack.i.h.bf16 %v13075_v17 }
 0x325   : > { %3605 = vmatpush.msrb.mxu0 %v2942_v41  ;;  %v13675_v42 = vpop.permute.xlu1 %10364  ;;  %v13677_v49 = vpop.permute.xlu0 %10374  ;;  %v2769_v33 = vsel %vm1197_vm0, %v10232_v24, %v16194_v20  ;;  %v2618_v0 = vsel %vm1115_vm1, %v10261_v13, %v16196_v12  ;;  %v10327_v20 = vunpack.i.h.bf16 %v13529_v55  ;;  %v10321_v12 = vunpack.i.l.bf16 %v13620_v47 }
 0x326   : > { %v10356_v47 = vunpack.i.l.bf16 %v13600_v36 }
 0x327   : > { %v13685_v51 = vpop.permute.xlu2 %10399  ;;  %3606 = vmatpush.msrb.mxu0 %v2931_v8 }
 0x329   : > { %3607 = vmatpush.msrb.mxu0 %v2780_v9 }
 0x32b   : > { %3608 = vmatpush.msrb.mxu0 %v2769_v33  ;;  %v16343_v33 = vunpack.i.h.bf16 %v13410_v40  ;;  %v2456_v40 = vsel %vm1033_vm4, %v16344_v4, %v10326_v18  ;;  %v2445_v4 = vsel %vm1033_vm4, %v16345_v2, %v10327_v20  ;;  %v16347_v2 = vunpack.i.l.bf16 %v13582_v44 }
 0x32c   : > { %9523 = vmatmul.msk.f32.gmra.mxu0 %vm3368_vm9, %v13169_v22  ;;  %3578 = vmatmul.f32.gmra.mxu1 %v13353_v43 }
 0x32d   : > { %3609 = vmatpush.msrb.mxu0 %v2618_v0  ;;  %v10380_v41 = vpop.permute.xlu1 %10379  ;;  %v2607_v38 = vsel %vm1115_vm1, %v16343_v33, %v16198_v45  ;;  %v10331_v45 = vunpack.i.l.bf16 %v13622_v16  ;;  %v10186_v0 = vunpack.i.l.bf16 %v13367_v19 }
 0x32e   : > { %v10382_v8 = vunpack.i.h.bf16 %v10380_v41  ;;  %v10381_v24 = vunpack.i.l.bf16 %v10380_v41  ;;  %v13708_v9 = vpop.permute.xlu0 %10389 }
 0x32f   : > { %v16200_v13 = vunpack.i.l.bf16 %v13708_v9  ;;  %3610 = vmatpush.msrb.mxu0 %v2607_v38 }
 0x330   : > { %v3103_v33 = vsel %vm1361_vm2, %v10336_v30, %v10381_v24  ;;  %v3092_v30 = vsel %vm1361_vm2, %v10337_v56, %v10382_v8  ;;  %v2294_v56 = vsel %vm951_vm5, %v16348_v63, %v16347_v2  ;;  %v16350_v63 = vunpack.i.h.bf16 %v13365_v28 }
 0x331   : > { %v13720_v41 = vpop.permute.xlu2 %10414  ;;  %3611 = vmatpush.msrb.mxu0 %v2456_v40  ;;  %3596 = vmatpush.msra.mxu3 %v3103_v33  ;;  %v3104_v38 = vsel %vm1361_vm2, %v10381_v24, %v16200_v13  ;;  %v10332_v40 = vunpack.i.h.bf16 %v13622_v16  ;;  %v16346_v33 = vunpack.i.h.bf16 %v13708_v9  ;;  %v10241_v13 = vunpack.i.l.bf16 %v13572_v27 }
 0x332   : > { %3642 = vmatpush.msra.mxu2 %v3104_v38  ;;  %v2943_v38 = vsel %vm1279_vm3, %v10251_v48, %v10321_v12  ;;  %v16349_v48 = vunpack.i.h.bf16 %v13021_v54  ;;  %v16351_v54 = vunpack.i.h.bf16 %v13057_v58  ;;  %v16353_v58 = vunpack.i.h.bf16 %v13006_v29 }
 0x333   : > { %3612 = vmatpush.msrb.mxu0 %v2445_v4  ;;  %3597 = vmatpush.msra.mxu3 %v3092_v30  ;;  %v3093_v24 = vsel %vm1361_vm2, %v10382_v8, %v16346_v33  ;;  %v10361_v4 = vunpack.i.l.bf16 %v13649_v61  ;;  %v2944_v8 = vsel %vm1279_vm3, %v10321_v12, %v10331_v45  ;;  %v10181_v33 = vunpack.i.l.bf16 %v13298_v59 }
 0x334   : > { %3643 = vmatpush.msra.mxu2 %v3093_v24  ;;  %9524 = vmatmul.msk.f32.vlgmr.msra.gmra.mxu3 %vm3368_vm9, %v13122_v37  ;;  %v10357_v24 = vunpack.i.h.bf16 %v13600_v36  ;;  %v2283_v2 = vsel %vm951_vm5, %v16349_v48, %v10186_v0  ;;  %v10362_v12 = vunpack.i.h.bf16 %v13649_v61  ;;  %v2933_v36 = vsel %vm1279_vm3, %v10322_v57, %v10332_v40 }
 0x335   : > { %3613 = vmatpush.msrb.mxu0 %v2294_v56  ;;  %3651 = vmatpush.msrb.mxu3 %v2943_v38  ;;  %v13758_v30 = vpop.permute.xlu1 %10394  ;;  %v2932_v56 = vsel %vm1279_vm3, %v16350_v63, %v10322_v57  ;;  %v10236_v38 = vunpack.i.l.bf16 %v13523_v53  ;;  %v2132_v28 = vsel %vm869_vm6, %v16351_v54, %v10241_v13  ;;  %v16352_v48 = vunpack.i.l.bf16 %v13590_v15 }
 0x336   : > { %3697 = vmatpush.msrb.mxu2 %v2944_v8  ;;  %v13762_v17 = vpop.permute.xlu0 %10404  ;;  %v10366_v8 = vunpack.i.l.bf16 %v13675_v42  ;;  %v2782_v57 = vsel %vm1197_vm0, %v10356_v47, %v10361_v4  ;;  %v10176_v63 = vunpack.i.l.bf16 %v13236_v60  ;;  %v2121_v54 = vsel %vm869_vm6, %v16353_v58, %v10181_v33 }
 0x337   : > { %3614 = vmatpush.msrb.mxu0 %v2283_v2  ;;  %3652 = vmatpush.msrb.mxu3 %v2932_v56  ;;  %v2781_v2 = vsel %vm1197_vm0, %v16352_v48, %v10356_v47  ;;  %v10367_v56 = vunpack.i.h.bf16 %v13675_v42  ;;  %v2771_v42 = vsel %vm1197_vm0, %v10357_v24, %v10362_v12  ;;  %v16355_v29 = vunpack.i.h.bf16 %v13046_v39 }
 0x338   : > { %3698 = vmatpush.msrb.mxu2 %v2933_v36  ;;  %v16356_v47 = vunpack.i.l.bf16 %v13302_v26  ;;  %v10372_v58 = vunpack.i.h.bf16 %v13625_v46 }
 0x339   : > { %3615 = vmatpush.msrb.mxu0 %v2132_v28  ;;  %3653 = vmatpush.msrb.mxu3 %v2781_v2  ;;  %v13791_v36 = vpop.permute.xlu2 %10429  ;;  %v16354_v28 = vunpack.i.h.bf16 %v13590_v15  ;;  %v10371_v2 = vunpack.i.l.bf16 %v13625_v46  ;;  %v1970_v15 = vsel %vm787_vm7, %v16355_v29, %v10236_v38  ;;  %v16358_v29 = vunpack.i.h.bf16 %v13302_v26  ;;  %v16359_v26 = vld [vmem:[#allocation39_spill] sm:$0xff] }
 0x33a   : > { %3699 = vmatpush.msrb.mxu2 %v2782_v57  ;;  %v2619_v57 = vsel %vm1115_vm1, %v16356_v47, %v10366_v8  ;;  %v10386_v47 = vunpack.i.l.bf16 %v13651_v5  ;;  %v10317_v46 = vunpack.i.h.bf16 %v13594_v3 }
 0x33b   : > { %v2770_v48 = vsel %vm1197_vm0, %v16354_v28, %v10357_v24  ;;  %3616 = vmatpush.msrb.mxu0 %v2121_v54  ;;  %v10376_v54 = vunpack.i.l.bf16 %v13677_v49  ;;  %v2620_v24 = vsel %vm1115_vm1, %v10366_v8, %v10371_v2  ;;  %v2609_v8 = vsel %vm1115_vm1, %v10367_v56, %v10372_v58  ;;  %9526 = vmatmul.msk.f32.vlgmr.msra.gmra.mxu2 %vm3368_vm9, %v13122_v37 }
 0x33c   : > { %3654 = vmatpush.msrb.mxu3 %v2770_v48  ;;  %3700 = vmatpush.msrb.mxu2 %v2771_v42  ;;  %v16357_v48 = vunpack.i.h.bf16 %v12994_v52  ;;  %v16201_v52 = vunpack.i.l.bf16 %v13594_v3 }
 0x33d   : > { %9525 = vmatmul.msk.f32.gmra.mxu3 %vm3368_vm9, %v13169_v22  ;;  %3617 = vmatpush.msrb.mxu0 %v1970_v15  ;;  %v2608_v15 = vsel %vm1115_vm1, %v16358_v29, %v10367_v56  ;;  %v2458_v56 = vsel %vm1033_vm4, %v10376_v54, %v10386_v47  ;;  %v10286_v29 = vunpack.i.l.bf16 %v13570_v34 }
 0x33e   : > { %3655 = vmatpush.msrb.mxu3 %v2619_v57  ;;  %v13820_v28 = vpop.permute.xlu1 %10409  ;;  %3701 = vmatpush.msrb.mxu2 %v2620_v24  ;;  %v13822_v39 = vpop.permute.xlu0 %10419  ;;  %v1959_v42 = vsel %vm787_vm7, %v16357_v48, %v10176_v63  ;;  %v10377_v57 = vunpack.i.h.bf16 %v13677_v49  ;;  %v10247_v24 = vunpack.i.h.bf16 %v13582_v44  ;;  %v16202_v48 = vunpack.i.h.bf16 %v13651_v5 }
 0x33f   : > { %3618 = vmatpush.msrb.mxu0 %v1959_v42  ;;  %v2457_v49 = vsel %vm1033_vm4, %v10326_v18, %v10376_v54  ;;  %v10187_v42 = vunpack.i.h.bf16 %v13367_v19  ;;  %v10242_v54 = vunpack.i.h.bf16 %v13572_v27  ;;  %v10177_v27 = vunpack.i.h.bf16 %v13236_v60 }
 0x340   : > { %3656 = vmatpush.msrb.mxu3 %v2608_v15  ;;  %3702 = vmatpush.msrb.mxu2 %v2609_v8  ;;  %v16360_v15 = vld [vmem:[#allocation41_spill] sm:$0xff]  ;;  %v2446_v37 = vsel %vm1033_vm4, %v10327_v20, %v10377_v57  ;;  %v2447_v18 = vsel %vm1033_vm4, %v10377_v57, %v16202_v48  ;;  %v2296_v20 = vsel %vm951_vm5, %v10247_v24, %v16201_v52  ;;  %v10182_v57 = vunpack.i.h.bf16 %v13298_v59 }
 0x341   : > { %3619 = vmatpush.msrb.mxu0 %v16359_v26  ;;  %v13858_v8 = vpop.permute.xlu2 %10444  ;;  %v10311_v26 = vunpack.i.l.bf16 %v13588_v14  ;;  %v10237_v52 = vunpack.i.h.bf16 %v13523_v53  ;;  %v2133_v19 = vsel %vm869_vm6, %v10241_v13, %v10242_v54  ;;  %v10402_v53 = vunpack.i.h.bf16 %v13685_v51 }
 0x342   : > { %3657 = vmatpush.msrb.mxu3 %v2457_v49  ;;  %3703 = vmatpush.msrb.mxu2 %v2458_v56  ;;  %v16361_v49 = vunpack.i.l.bf16 %v13582_v44  ;;  %v10446_v44 = vunpack.i.l.bf16 %v13858_v8  ;;  %v10447_v13 = vunpack.i.h.bf16 %v13858_v8  ;;  %v10282_v8 = vunpack.i.h.bf16 %v13521_v11 }
 0x343   : > { %3620 = vmatpush.msrb.mxu0 %v16360_v15  ;;  %9527 = vmatmul.msk.f32.gmra.mxu2 %vm3368_vm9, %v13169_v22  ;;  %v10396_v22 = vunpack.i.l.bf16 %v13758_v30 }
 0x344   : > { %3658 = vmatpush.msrb.mxu3 %v2446_v37  ;;  %3704 = vmatpush.msrb.mxu2 %v2447_v18  ;;  %v2295_v55 = vsel %vm951_vm5, %v16361_v49, %v10247_v24  ;;  %v2284_v37 = vsel %vm951_vm5, %v10186_v0, %v10187_v42  ;;  %v10281_v18 = vunpack.i.l.bf16 %v13521_v11  ;;  %v2285_v24 = vsel %vm951_vm5, %v10187_v42, %v10286_v29 }
 0x345   : > { %3621 = vmatmul.f32.vlgmr.msrb.gmra.mxu0 %v13288_v35  ;;  %v2134_v0 = vsel %vm869_vm6, %v10242_v54, %v10311_v26  ;;  %v16362_v42 = vunpack.i.l.bf16 %v13708_v9  ;;  %v2122_v54 = vsel %vm869_vm6, %v10181_v33, %v10182_v57  ;;  %v1971_v33 = vsel %vm787_vm7, %v10236_v38, %v10237_v52 }
 0x346   : > { %3659 = vmatpush.msrb.mxu3 %v2295_v55  ;;  %3705 = vmatpush.msrb.mxu2 %v2296_v20  ;;  %v13881_v55 = vpop.f32.mrf.mxu2  ;;  %v10411_v38 = vunpack.i.l.bf16 %v13820_v28 }
 0x347   : > { %v13869_v56 = vpop.permute.xlu1 %10424 }
 0x348   : > { %v10435_v15 = vpop.permute.xlu0 %10434  ;;  %3660 = vmatpush.msrb.mxu3 %v2284_v37  ;;  %3706 = vmatpush.msrb.mxu2 %v2285_v24  ;;  %v10306_v37 = vunpack.i.l.bf16 %v13580_v25  ;;  %v10276_v24 = vunpack.i.l.bf16 %v13464_v7 }
 0x349   : > { %v10436_v49 = vunpack.i.l.bf16 %v10435_v15  ;;  %v10437_v48 = vunpack.i.h.bf16 %v10435_v15 }
 0x34a   : > { %3661 = vmatpush.msrb.mxu3 %v2133_v19  ;;  %3707 = vmatpush.msrb.mxu2 %v2134_v0  ;;  %v16363_v19 = vunpack.i.h.bf16 %v13708_v9  ;;  %v1972_v9 = vsel %vm787_vm7, %v10237_v52, %v10306_v37  ;;  %v1960_v52 = vsel %vm787_vm7, %v10176_v63, %v10177_v27  ;;  %v16364_v63 = vld [vmem:[#allocation45_spill] sm:$0xff] }
 0x34b   : > { %v3105_v20 = vsel %vm1361_vm2, %v16362_v42, %v10436_v49  ;;  %v3106_v15 = vsel %vm1361_vm2, %v10436_v49, %v10446_v44  ;;  %v2123_v49 = vsel %vm869_vm6, %v10182_v57, %v10281_v18  ;;  %v10397_v42 = vunpack.i.h.bf16 %v13758_v30 }
 0x34c   : > { %3688 = vmatpush.msrb.mxu1 %v3105_v20  ;;  %3734 = vmatpush.msra.mxu0 %v3106_v15  ;;  %v3094_v0 = vsel %vm1361_vm2, %v16363_v19, %v10437_v48  ;;  %v10401_v20 = vunpack.i.l.bf16 %v13685_v51  ;;  %v3095_v59 = vsel %vm1361_vm2, %v10437_v48, %v10447_v13  ;;  %v10406_v57 = vunpack.i.l.bf16 %v13762_v17 }
 0x34d   : > { %3662 = vmatpush.msrb.mxu3 %v2122_v54  ;;  %3708 = vmatpush.msrb.mxu2 %v2123_v49  ;;  %v2945_v15 = vsel %vm1279_vm3, %v10331_v45, %v10396_v22  ;;  %v10407_v49 = vunpack.i.h.bf16 %v13762_v17  ;;  %v1961_v45 = vsel %vm787_vm7, %v10177_v27, %v10276_v24  ;;  %v2934_v19 = vsel %vm1279_vm3, %v10332_v40, %v10397_v42  ;;  %v16365_v27 = vld [vmem:[#allocation47_spill] sm:$0xff] }
 0x34e   : > { %3624 = vmatmul.f32.gmra.mxu0 %v13353_v43  ;;  %3689 = vmatpush.msrb.mxu1 %v3094_v0  ;;  %v2946_v48 = vsel %vm1279_vm3, %v10396_v22, %v10401_v20  ;;  %v10412_v0 = vunpack.i.h.bf16 %v13820_v28  ;;  %v2935_v60 = vsel %vm1279_vm3, %v10397_v42, %v10402_v53  ;;  %v10416_v17 = vunpack.i.l.bf16 %v13720_v41  ;;  %v13955_v16 = vpop.f32.mrf.mxu2 }
 0x34f   : > { %v13920_v30 = vpop.permute.xlu1 %10439  ;;  %3735 = vmatpush.msra.mxu0 %v3095_v59  ;;  %3663 = vmatpush.msrb.mxu3 %v1971_v33  ;;  %v2783_v22 = vsel %vm1197_vm0, %v10361_v4, %v10406_v57  ;;  %v10421_v40 = vunpack.i.l.bf16 %v13822_v39  ;;  %v2784_v42 = vsel %vm1197_vm0, %v10406_v57, %v10411_v38  ;;  %v10417_v59 = vunpack.i.h.bf16 %v13720_v41  ;;  %v16366_v33 = vld [vmem:[#allocation43_spill] sm:$0xff] }
 0x350   : > { %v13929_v54 = vpop.permute.xlu0 %10449  ;;  %3709 = vmatpush.msrb.mxu2 %v1972_v9  ;;  %3743 = vmatpush.msra.mxu1 %v2945_v15  ;;  %v2772_v4 = vsel %vm1197_vm0, %v10362_v12, %v10407_v49  ;;  %v10422_v9 = vunpack.i.h.bf16 %v13822_v39  ;;  %v16367_v15 = vld [vmem:[#allocation44_spill] sm:$0xff]  ;;  %v10426_v41 = vunpack.i.l.bf16 %v13869_v56  ;;  %v2621_v61 = vsel %vm1115_vm1, %v10371_v2, %v10416_v17 }
 0x351   : > { %3789 = vmatpush.msrb.mxu0 %v2946_v48  ;;  %3664 = vmatpush.msrb.mxu3 %v1960_v52  ;;  %v2773_v48 = vsel %vm1197_vm0, %v10407_v49, %v10412_v0  ;;  %v10441_v57 = vunpack.i.l.bf16 %v13920_v30  ;;  %v2622_v49 = vsel %vm1115_vm1, %v10416_v17, %v10421_v40  ;;  %v2610_v2 = vsel %vm1115_vm1, %v10372_v58, %v10417_v59 }
 0x352   : > { %3710 = vmatpush.msrb.mxu2 %v1961_v45  ;;  %3744 = vmatpush.msra.mxu1 %v2934_v19  ;;  %v2611_v17 = vsel %vm1115_vm1, %v10417_v59, %v10422_v9  ;;  %v2459_v58 = vsel %vm1033_vm4, %v10386_v47, %v10426_v41  ;;  %v10351_v47 = vunpack.i.l.bf16 %v13592_v32  ;;  %v10346_v51 = vunpack.i.l.bf16 %v13586_v6 }
 0x353   : > { %3790 = vmatpush.msrb.mxu0 %v2935_v60  ;;  %3665 = vmatpush.msrb.mxu3 %v16364_v63  ;;  %v10431_v60 = vunpack.i.l.bf16 %v13791_v36  ;;  %v10427_v63 = vunpack.i.h.bf16 %v13869_v56 }
 0x354   : > { %3711 = vmatpush.msrb.mxu2 %v16365_v27  ;;  %3745 = vmatpush.msra.mxu1 %v2783_v22  ;;  %v13993_v22 = vld [vmem:[#allocation18 + $0x8] sm:$0xff]  ;;  %v3392_v27 = vpop.f32.mrf.mxu3 }
 0x355   : > { %3791 = vmatpush.msrb.mxu0 %v2784_v42  ;;  %3666 = vmatpush.msrb.mxu3 %v16366_v33  ;;  %v10432_v33 = vunpack.i.h.bf16 %v13791_v36 }
 0x356   : > { %3712 = vmatpush.msrb.mxu2 %v16367_v15  ;;  %3746 = vmatpush.msra.mxu1 %v2772_v4  ;;  %v10287_v4 = vunpack.i.h.bf16 %v13570_v34  ;;  %v16368_v15 = vunpack.i.h.bf16 %v13651_v5 }
 0x357   : > { %v13972_v52 = vpop.permute.xlu1 %10454  ;;  %3792 = vmatpush.msrb.mxu0 %v2773_v48  ;;  %3667 = vmatmul.f32.vlgmr.msrb.gmra.mxu3 %v13288_v35  ;;  %v2947_v48 = vsel %vm1279_vm3, %v10401_v20, %v10431_v60  ;;  %v16369_v20 = vunpack.i.l.bf16 %v13594_v3 }
 0x358   : > { %v13979_v12 = vpop.permute.xlu0 %10464  ;;  %3713 = vmatmul.f32.vlgmr.msrb.gmra.mxu2 %v13288_v35  ;;  %3747 = vmatpush.msra.mxu1 %v2621_v61  ;;  %v10442_v35 = vunpack.i.h.bf16 %v13920_v30  ;;  %v2448_v36 = vsel %vm1033_vm4, %v16368_v15, %v10427_v63  ;;  %v10301_v61 = vunpack.i.l.bf16 %v13472_v62  ;;  %v2936_v15 = vsel %vm1279_vm3, %v10402_v53, %v10432_v33 }
 0x359   : > { %v10467_v45 = vunpack.i.h.bf16 %v13979_v12  ;;  %v10466_v19 = vunpack.i.l.bf16 %v13979_v12  ;;  %3793 = vmatpush.msrb.mxu0 %v2622_v49  ;;  %9528 = vmatmul.msk.f32.vlgmr.msrb.gmra.mxu1 %vm3368_vm9, %v13993_v22  ;;  %v2297_v60 = vsel %vm951_vm5, %v16369_v20, %v10317_v46  ;;  %v10307_v33 = vunpack.i.h.bf16 %v13580_v25 }
 0x35a   : > { %3748 = vmatpush.msra.mxu1 %v2610_v2  ;;  %9530 = vmatmul.msk.f32.vlgmr.msra.gmra.mxu0 %vm3368_vm9, %v13993_v22  ;;  %v2449_v49 = vsel %vm1033_vm4, %v10427_v63, %v10442_v35  ;;  %v10312_v2 = vunpack.i.h.bf16 %v13588_v14  ;;  %v10452_v63 = vunpack.i.h.bf16 %v13929_v54  ;;  %v10277_v14 = vunpack.i.h.bf16 %v13464_v7 }
 0x35b   : > { %v3107_v56 = vsel %vm1361_vm2, %v10446_v44, %v10466_v19  ;;  %3794 = vmatpush.msrb.mxu0 %v2611_v17  ;;  %v3438_v42 = vpop.f32.mrf.mxu1  ;;  %v2460_v44 = vsel %vm1033_vm4, %v10426_v41, %v10441_v57  ;;  %v3096_v59 = vsel %vm1361_vm2, %v10447_v13, %v10467_v45  ;;  %v10451_v13 = vunpack.i.l.bf16 %v13929_v54 }
 0x35c   : > { %3780 = vmatpush.msra.mxu3 %v3107_v56  ;;  %3749 = vmatpush.msra.mxu1 %v2459_v58  ;;  %v2298_v17 = vsel %vm951_vm5, %v10317_v46, %v10351_v47  ;;  %v2286_v54 = vsel %vm951_vm5, %v10286_v29, %v10287_v4  ;;  %v10296_v29 = vunpack.i.l.bf16 %v13421_v21  ;;  %v10347_v30 = vunpack.i.h.bf16 %v13586_v6 }
 0x35d   : > { %3795 = vmatpush.msrb.mxu0 %v2460_v44  ;;  %v3461_v41 = vpop.f32.mrf.mxu2  ;;  %v14047_v44 = vpop.permute.xlu2 %10459  ;;  %v2785_v34 = vsel %vm1197_vm0, %v10411_v38, %v10451_v13  ;;  %v2136_v38 = vsel %vm869_vm6, %v10312_v2, %v10346_v51  ;;  %v2124_v13 = vsel %vm869_vm6, %v10281_v18, %v10282_v8  ;;  %vm7774_vm3 = vcmask 932864  }
 0x35e   : > { %3781 = vmatpush.msra.mxu3 %v3096_v59  ;;  %3750 = vmatpush.msra.mxu1 %v2448_v36  ;;  %v2125_v11 = vsel %vm869_vm6, %v10282_v8, %v10296_v29  ;;  %v10461_v18 = vunpack.i.l.bf16 %v14047_v44  ;;  %v10291_v8 = vunpack.i.l.bf16 %v13375_v23 }
 0x35f   : > { %v14033_v5 = vpop.permute.xlu1 %10469  ;;  %3796 = vmatpush.msrb.mxu0 %v2449_v49  ;;  %3670 = vmatmul.f32.gmra.mxu3 %v13353_v43 }
 0x360   : > { %3835 = vmatpush.msrb.mxu3 %v2947_v48  ;;  %v10471_v56 = vunpack.i.l.bf16 %v14033_v5  ;;  %v14044_v58 = vpop.permute.xlu0 %3360  ;;  %3716 = vmatmul.f32.gmra.mxu2 %v13353_v43  ;;  %v10472_v46 = vunpack.i.h.bf16 %v14033_v5  ;;  %v2287_v43 = vsel %vm951_vm5, %v10287_v4, %v10301_v61  ;;  %v10456_v4 = vunpack.i.l.bf16 %v13972_v52  ;;  %v11592_v5 = vld [vmem:[#allocation18 + $0x10] sm:$0xff] }
 0x361   : > { %3751 = vmatpush.msra.mxu1 %v2297_v60  ;;  %v3393_v59 = vadd.f32 %v3392_v27, %v14044_v58  ;;  %v3439_v3 = vadd.f32 %v3438_v42, %v14044_v58  ;;  %3797 = vmatpush.msrb.mxu0 %v2298_v17  ;;  %v2774_v48 = vsel %vm1197_vm0, %v10412_v0, %v10452_v63  ;;  %v3395_v0 = vpop.f32.mrf.mxu3  ;;  %v10462_v63 = vunpack.i.h.bf16 %v14047_v44 }
 0x362   : > { %3836 = vmatpush.msrb.mxu3 %v2936_v15  ;;  %v3108_v27 = vsel %vm1361_vm2, %v10466_v19, %v10471_v56  ;;  %v2135_v19 = vsel %vm869_vm6, %v10311_v26, %v10312_v2  ;;  %v10457_v26 = vunpack.i.h.bf16 %v13972_v52  ;;  %v3097_v28 = vsel %vm1361_vm2, %v10467_v45, %v10472_v46 }
 0x363   : > { %v3416_v53 = vadd.f32 %v13881_v55, %v3393_v59  ;;  %3752 = vmatpush.msra.mxu1 %v2286_v54  ;;  %v3462_v42 = vadd.f32 %v3461_v41, %v3439_v3  ;;  %3826 = vmatpush.msra.mxu2 %v3108_v27  ;;  %v14084_v41 = vld [vmem:[#allocation18 + $0x18] sm:$0xff]  ;;  %v3441_v49 = vpop.f32.mrf.mxu1  ;;  %v10341_v2 = vunpack.i.l.bf16 %v13576_v50  ;;  %v1973_v52 = vsel %vm787_vm7, %v10306_v37, %v10307_v33 }
 0x364   : > { %3798 = vmatpush.msrb.mxu0 %v2287_v43  ;;  %3837 = vmatpush.msrb.mxu3 %v2785_v34  ;;  %v2623_v12 = vsel %vm1115_vm1, %v10421_v40, %v10456_v4  ;;  %v1962_v40 = vsel %vm787_vm7, %v10276_v24, %v10277_v14  ;;  %v2612_v59 = vsel %vm1115_vm1, %v10422_v9, %v10457_v26  ;;  %v16370_v43 = vld [vmem:[#allocation49_spill] sm:$0xff]  ;;  %v11591_v34 = vld [vmem:[#allocation18] sm:$0xff]  ;;  %v10297_v4 = vunpack.i.h.bf16 %v13421_v21 }
 0x365   : > { %v14076_v55 = vmax.f32 %v3416_v53, 0.0  ;;  %v3882_v36 = vmax.f32 %v3462_v42, 0.0  ;;  %3753 = vmatpush.msra.mxu1 %v2135_v19  ;;  %9531 = vmatmul.msk.f32.gmra.mxu0 %vm3368_vm9, %v14084_v41  ;;  %v3464_v20 = vpop.f32.mrf.mxu2  ;;  %v10475_v60 = vpop.permute.xlu2 %10474  ;;  %v1974_v17 = vsel %vm787_vm7, %v10307_v33, %v10341_v2  ;;  %v1963_v44 = vsel %vm787_vm7, %v10277_v14, %v10291_v8 }
 0x366   : > { %3799 = vmatpush.msrb.mxu0 %v2136_v38  ;;  %3838 = vmatpush.msrb.mxu3 %v2774_v48  ;;  %v10476_v24 = vunpack.i.l.bf16 %v10475_v60  ;;  %v2461_v39 = vsel %vm1033_vm4, %v10441_v57, %v10461_v18  ;;  %v10477_v27 = vunpack.i.h.bf16 %v10475_v60  ;;  %v2450_v53 = vsel %vm1033_vm4, %v10442_v35, %v10462_v63  ;;  %v16371_v57 = vld [vmem:[#allocation46_spill] sm:$0xff]  ;;  %v4375_v60 = vld [vmem:[#allocation19 + $0x120] sm:$0xff] }
 0x367   : > { %3903 = vst [vmem:[%s13448_s10] sm:$0xff] %v14076_v55  ;;  %3754 = vmatpush.msra.mxu1 %v2124_v13  ;;  %3827 = vmatpush.msra.mxu2 %v3097_v28  ;;  %v10488_v3 = vpack.i.bf16 %v3882_v36, %v14076_v55  ;;  %v10302_v42 = vunpack.i.h.bf16 %v13472_v62  ;;  %v10292_v62 = vunpack.i.h.bf16 %v13375_v23  ;;  %v4366_v63 = vld [vmem:[#allocation19 + $0xd8] sm:$0xff]  ;;  %vm6850_vm0 = vcmask 261120  }
 0x368   : > { %3904 = vst [vmem:[%s13448_s10 + $0x8] sm:$0xff] %v3882_v36  ;;  %3800 = vmatpush.msrb.mxu0 %v2125_v11  ;;  %9529 = vmatmul.msk.f32.gmra.mxu1 %vm3368_vm9, %v14084_v41  ;;  %v14114_v45 = vpop.permute.xlu1 %3365  ;;  %v3098_v33 = vsel %vm1361_vm2, %v10472_v46, %v10477_v27  ;;  %v3507_v46 = vpop.f32.mrf.mxu0  ;;  %v16372_v36 = vld [vmem:[#allocation48_spill] sm:$0xff]  ;;  %vm7549_vm1 = vcmask 998400  }
 0x369   : > { %3755 = vmatpush.msra.mxu1 %v1973_v52  ;;  %3839 = vmatpush.msrb.mxu3 %v2623_v12  ;;  %v3396_v25 = vadd.f32 %v3395_v0, %v14114_v45  ;;  %v3442_v37 = vadd.f32 %v3441_v49, %v14114_v45  ;;  %v4381_v12 = vld [vmem:[#allocation19 + $0x150] sm:$0xff] }
 0x36a   : > { %3801 = vmatpush.msrb.mxu0 %v1974_v17  ;;  %9532 = vmatmul.msk.f32.vlgmr.msra.gmra.mxu3 %vm3368_vm9, %v13993_v22  ;;  %v4372_v17 = vld [vmem:[#allocation19 + $0x108] sm:$0xff] }
 0x36b   : > { %v3419_v15 = vadd.f32 %v13955_v16, %v3396_v25  ;;  %3756 = vmatpush.msra.mxu1 %v1962_v40  ;;  %3840 = vmatpush.msrb.mxu3 %v2612_v59  ;;  %v3465_v7 = vadd.f32 %v3464_v20, %v3442_v37  ;;  %v10352_v16 = vunpack.i.h.bf16 %v13592_v32  ;;  %v10342_v32 = vunpack.i.h.bf16 %v13576_v50  ;;  %v4378_v20 = vld [vmem:[#allocation19 + $0x138] sm:$0xff]  ;;  %v4369_v25 = vld [vmem:[#allocation19 + $0xf0] sm:$0xff] }
 0x36c   : > { %3802 = vmatpush.msrb.mxu0 %v1963_v44  ;;  %9534 = vmatmul.msk.f32.vlgmr.msra.gmra.mxu2 %vm3368_vm9, %v13993_v22 }
 0x36d   : > { %v14142_v9 = vmax.f32 %v3419_v15, 0.0  ;;  %v3893_v54 = vmax.f32 %v3465_v7, 0.0  ;;  %3757 = vmatpush.msra.mxu1 %v16370_v43  ;;  %3841 = vmatpush.msrb.mxu3 %v2461_v39  ;;  %v2299_v35 = vsel %vm951_vm5, %v10351_v47, %v10352_v16  ;;  %v2137_v47 = vsel %vm869_vm6, %v10346_v51, %v10347_v30  ;;  %v4360_v7 = vld [vmem:[#allocation19 + $0xa8] sm:$0xff]  ;;  %v4357_v39 = vld [vmem:[#allocation19 + $0x90] sm:$0xff]  ;;  %v4354_v43 = vld [vmem:[#allocation19 + $0x78] sm:$0xff] }
 0x36e   : > { %3803 = vmatpush.msrb.mxu0 %v13015_v31  ;;  %10489 = vrot.lane.b32.xlu1 %v10488_v3, %s12032_s16  ;;  %v3109_v31 = vsel %vm1361_vm2, %v10471_v56, %v10476_v24  ;;  %v2288_v56 = vsel %vm951_vm5, %v10301_v61, %v10302_v42  ;;  %v2126_v61 = vsel %vm869_vm6, %v10296_v29, %v10297_v4  ;;  %v4342_v4 = vld [vmem:[#allocation19 + $0x18] sm:$0xff]  ;;  %vm7729_vm2 = vcmask 941056  }
 0x36f   : > { %3914 = vst [vmem:[%s13448_s10 + $0x60] sm:$0xff] %v14142_v9  ;;  %3758 = vmatpush.msra.mxu1 %v16371_v57  ;;  %3842 = vmatpush.msrb.mxu3 %v2450_v53  ;;  %v1975_v6 = vsel %vm787_vm7, %v10341_v2, %v10342_v32  ;;  %v1964_v51 = vsel %vm787_vm7, %v10291_v8, %v10292_v62  ;;  %v4351_v53 = vld [vmem:[#allocation19 + $0x60] sm:$0xff] }
 0x370   : > { %3915 = vst [vmem:[%s13448_s10 + $0x68] sm:$0xff] %v3893_v54  ;;  %3804 = vmatpush.msrb.mxu0 %v12969_v1  ;;  %3759 = vmatmul.f32.vlgmr.msra.gmra.mxu1 %v11591_v34  ;;  %v10503_v1 = vpack.i.bf16 %v3893_v54, %v14142_v9  ;;  %v3510_v38 = vpop.f32.mrf.mxu0  ;;  %v4339_v32 = vld [vmem:[#allocation19] sm:$0xff] }
 0x371   : > { %3805 = vmatmul.f32.vlgmr.msrb.gmra.mxu0 %v11591_v34  ;;  %3872 = vmatpush.msrb.mxu1 %v3109_v31  ;;  %v4348_v31 = vld [vmem:[#allocation19 + $0x48] sm:$0xff] }
 0x372   : > { %3843 = vmatpush.msrb.mxu3 %v2299_v35  ;;  %10484 = vrot.lane.b32.xlu0 %v10488_v3, %s12031_s29 }
 0x373   : > { %3873 = vmatpush.msrb.mxu1 %v3098_v33  ;;  %10479 = vrot.lane.b32.xlu2 %v10488_v3, %s16210_s6  ;;  %v4363_v3 = vld [vmem:[#allocation19 + $0xc0] sm:$0xff]  ;;  %v4345_v33 = vld [vmem:[#allocation19 + $0x30] sm:$0xff] }
 0x374   : > { %3844 = vmatpush.msrb.mxu3 %v2288_v56  ;;  %9535 = vmatmul.msk.f32.gmra.mxu2 %vm3368_vm9, %v14084_v41 }
 0x375   : > { %9533 = vmatmul.msk.f32.gmra.mxu3 %vm3368_vm9, %v14084_v41 }
 0x376   : > { %3845 = vmatpush.msrb.mxu3 %v2137_v47  ;;  %10504 = vrot.lane.b32.xlu1 %v10503_v1, %s12032_s16 }
 0x378   : > { %3846 = vmatpush.msrb.mxu3 %v2126_v61  ;;  %3762 = vmatmul.f32.gmra.mxu1 %v11592_v5 }
 0x379   : > { %3808 = vmatmul.f32.gmra.mxu0 %v11592_v5 }
 0x37a   : > { %3847 = vmatpush.msrb.mxu3 %v1975_v6  ;;  %10499 = vrot.lane.b32.xlu0 %v10503_v1, %s12031_s29 }
 0x37b   : > { %10494 = vrot.lane.b32.xlu2 %v10503_v1, %s16210_s6  ;;  %v3484_v21 = vpop.f32.mrf.mxu3 }
 0x37c   : > { %3848 = vmatpush.msrb.mxu3 %v1964_v51  ;;  %v3485_v29 = vadd.f32 %v3484_v21, %v14044_v58 }
 0x37e   : > { %3849 = vmatpush.msrb.mxu3 %v13044_v10  ;;  %v3508_v50 = vadd.f32 %v3507_v46, %v3485_v29 }
 0x380   : > { %v14196_v19 = vmax.f32 %v3508_v50, 0.0  ;;  %3850 = vmatpush.msrb.mxu3 %v16372_v36  ;;  %9536 = vmatmul.msk.f32.vlgmr.msrb.gmra.mxu1 %vm3368_vm9, %v13993_v22  ;;  %v3530_v22 = vpop.f32.mrf.mxu2 }
 0x381   : > { %3851 = vmatmul.f32.vlgmr.msrb.gmra.mxu3 %v11591_v34  ;;  %v3531_v26 = vadd.f32 %v3530_v22, %v14044_v58 }
 0x382   : > { %3905 = vst [vmem:[%s13448_s10 + $0x10] sm:$0xff] %v14196_v19 }
 0x383   : > { %v3487_v23 = vpop.f32.mrf.mxu3 }
 0x384   : > { %v3488_v48 = vadd.f32 %v3487_v23, %v14114_v45 }
 0x386   : > { %v14204_v14 = vadd.f32 %v3510_v38, %v3488_v48 }
 0x388   : > { %v3894_v10 = vmax.f32 %v14204_v14, 0.0  ;;  %9537 = vmatmul.msk.f32.gmra.mxu1 %vm3368_vm9, %v14084_v41  ;;  %v3533_v49 = vpop.f32.mrf.mxu2  ;;  %v4384_v41 = vld [vmem:[#allocation19 + $0x168] sm:$0xff] }
 0x389   : > { %3854 = vmatmul.f32.gmra.mxu3 %v11592_v5  ;;  %v3534_v2 = vadd.f32 %v3533_v49, %v14114_v45  ;;  %4867 = vmatpush.msrb.mxu2 %v4384_v41 }
 0x38a   : > { %3916 = vst [vmem:[%s13448_s10 + $0x70] sm:$0xff] %v3894_v10 }
 0x38b   : > { %4868 = vmatpush.msrb.mxu2 %v4381_v12 }
 0x38d   : > { %4869 = vmatpush.msrb.mxu2 %v4378_v20 }
 0x38f   : > { %4870 = vmatpush.msrb.mxu2 %v4375_v60 }
 0x391   : > { %4871 = vmatpush.msrb.mxu2 %v4372_v17 }
 0x393   : > { %4872 = vmatpush.msrb.mxu2 %v4369_v25 }
 0x395   : > { %4873 = vmatpush.msrb.mxu2 %v4366_v63 }
 0x397   : > { %4874 = vmatpush.msrb.mxu2 %v4363_v3 }
 0x399   : > { %4875 = vmatpush.msrb.mxu2 %v4360_v7 }
 0x39b   : > { %4876 = vmatpush.msrb.mxu2 %v4357_v39 }
 0x39d   : > { %4877 = vmatpush.msrb.mxu2 %v4354_v43 }
 0x39f   : > { %4878 = vmatpush.msrb.mxu2 %v4351_v53 }
 0x3a1   : > { %v3553_v13 = vpop.f32.mrf.mxu0  ;;  %v3576_v8 = vpop.f32.mrf.mxu1  ;;  %4879 = vmatpush.msrb.mxu2 %v4348_v31 }
 0x3a2   : > { %v3554_v28 = vadd.f32 %v3553_v13, %v3531_v26  ;;  %v3577_v37 = vadd.f32 %v3576_v8, %v14044_v58 }
 0x3a3   : > { %4880 = vmatpush.msrb.mxu2 %v4345_v33 }
 0x3a4   : > { %v14213_v0 = vmax.f32 %v3554_v28, 0.0 }
 0x3a5   : > { %4881 = vmatpush.msrb.mxu2 %v4342_v4 }
 0x3a6   : > { %3906 = vst [vmem:[%s13448_s10 + $0x18] sm:$0xff] %v14213_v0 }
 0x3a7   : > { %4882 = vmatpush.msrb.mxu2 %v4339_v32 }
 0x3a9   : > { %v3556_v11 = vpop.f32.mrf.mxu0  ;;  %v3579_v44 = vpop.f32.mrf.mxu1 }
 0x3aa   : > { %v14218_v18 = vadd.f32 %v3556_v11, %v3534_v2  ;;  %v3580_v16 = vadd.f32 %v3579_v44, %v14114_v45 }
 0x3ac   : > { %v3895_v52 = vmax.f32 %v14218_v18, 0.0 }
 0x3ae   : > { %3917 = vst [vmem:[%s13448_s10 + $0x78] sm:$0xff] %v3895_v52 }
 0x3b7   : > { %v3599_v40 = vpop.f32.mrf.mxu3 }
 0x3b8   : > { %v3600_v59 = vadd.f32 %v3599_v40, %v3577_v37 }
 0x3ba   : > { %v14225_v15 = vmax.f32 %v3600_v59, 0.0 }
 0x3bc   : > { %3907 = vst [vmem:[%s13448_s10 + $0x20] sm:$0xff] %v14225_v15  ;;  %v10518_v24 = vpack.i.bf16 %v14225_v15, %v14213_v0 }
 0x3be   : > { %10519 = vrot.lane.b32.xlu1 %v10518_v24, %s12031_s29  ;;  %10509 = vrot.lane.b32.xlu2 %v10518_v24, %s16210_s6  ;;  %v3645_v30 = vpop.f32.mrf.mxu2 }
 0x3c0   : > { %v3602_v54 = vpop.f32.mrf.mxu3 }
 0x3c1   : > { %v3603_v27 = vadd.f32 %v3602_v54, %v3580_v16 }
 0x3c2   : > { %v3622_v57 = vpop.f32.mrf.mxu0 }
 0x3c3   : > { %v3896_v42 = vmax.f32 %v3603_v27, 0.0  ;;  %v3623_v34 = vadd.f32 %v3622_v57, %v14044_v58 }
 0x3c5   : > { %3918 = vst [vmem:[%s13448_s10 + $0x80] sm:$0xff] %v3896_v42  ;;  %v3646_v35 = vadd.f32 %v3645_v30, %v3623_v34  ;;  %v10548_v46 = vpack.i.bf16 %v3896_v42, %v3895_v52 }
 0x3c6   : > { %v3648_v61 = vpop.f32.mrf.mxu2 }
 0x3c7   : > { %v3886_v1 = vmax.f32 %v3646_v35, 0.0 }
 0x3c9   : > { %3908 = vst [vmem:[%s13448_s10 + $0x28] sm:$0xff] %v3886_v1  ;;  %v10533_v56 = vpack.i.bf16 %v3886_v1, %v14196_v19 }
 0x3cb   : > { %v3625_v47 = vpop.f32.mrf.mxu0  ;;  %10534 = vrot.lane.b32.xlu1 %v10533_v56, %s12032_s16  ;;  %10514 = vrot.lane.b32.xlu0 %v10533_v56, %s16210_s6 }
 0x3cc   : > { %v3626_v62 = vadd.f32 %v3625_v47, %v14114_v45  ;;  %10524 = vrot.lane.b32.xlu2 %v10533_v56, %s12031_s29 }
 0x3cd   : > { %v14248_v51 = vpop.permute.xlu2 %10479 }
 0x3ce   : > { %v3649_v5 = vadd.f32 %v3648_v61, %v3626_v62  ;;  %v10482_v26 = vunpack.i.h.bf16 %v14248_v51  ;;  %v10481_v14 = vunpack.i.l.bf16 %v14248_v51 }
 0x3d0   : > { %v3897_v6 = vmax.f32 %v3649_v5, 0.0  ;;  %v4045_v11 = vsel %vm787_vm7, %v10481_v14, %v10482_v26 }
 0x3d1   : > { %v4089_v40 = vmax.f32 %v14076_v55, %v4045_v11  ;;  %v4480_v11 = vld [vmem:[#allocation19 + $0x468] sm:$0xff] }
 0x3d2   : > { %3919 = vst [vmem:[%s13448_s10 + $0x88] sm:$0xff] %v3897_v6  ;;  %v10563_v36 = vpack.i.bf16 %v3897_v6, %v3894_v10  ;;  %4913 = vmatpush.msra.mxu1 %v4480_v11 }
 0x3d3   : > { %10549 = vrot.lane.b32.xlu1 %v10548_v46, %s12031_s29  ;;  %10529 = vrot.lane.b32.xlu0 %v10518_v24, %s12032_s16 }
 0x3d4   : > { %10539 = vrot.lane.b32.xlu2 %v10548_v46, %s16210_s6 }
 0x3d5   : > { %v14264_v2 = vpop.permute.xlu2 %10494 }
 0x3d6   : > { %v3691_v50 = vpop.f32.mrf.mxu1  ;;  %v10497_v3 = vunpack.i.h.bf16 %v14264_v2  ;;  %v10496_v44 = vunpack.i.l.bf16 %v14264_v2 }
 0x3d7   : > { %v3737_v21 = vpop.f32.mrf.mxu0 }
 0x3d8   : > { %v4056_v53 = vsel %vm787_vm7, %v10496_v44, %v10497_v3  ;;  %v4522_v44 = vld [vmem:[#allocation19 + $0x5b8] sm:$0xff] }
 0x3d9   : > { %v4100_v56 = vmax.f32 %v14142_v9, %v4056_v53  ;;  %v4423_v53 = vld [vmem:[#allocation19 + $0x2a0] sm:$0xff] }
 0x3da   : > { %v3668_v29 = vpop.f32.mrf.mxu3 }
 0x3db   : > { %v3669_v23 = vadd.f32 %v3668_v29, %v14044_v58  ;;  %v3714_v38 = vpop.f32.mrf.mxu2  ;;  %10564 = vrot.lane.b32.xlu1 %v10563_v36, %s12032_s16  ;;  %10544 = vrot.lane.b32.xlu0 %v10563_v36, %s16210_s6 }
 0x3dc   : > { %v3715_v48 = vadd.f32 %v3714_v38, %v14044_v58  ;;  %10554 = vrot.lane.b32.xlu2 %v10563_v36, %s12031_s29 }
 0x3dd   : > { %v14256_v22 = vadd.f32 %v3691_v50, %v3669_v23 }
 0x3de   : > { %v3738_v13 = vadd.f32 %v3737_v21, %v3715_v48 }
 0x3df   : > { %v3887_v10 = vmax.f32 %v14256_v22, 0.0 }
 0x3e0   : > { %v14262_v28 = vpop.permute.xlu1 %10489  ;;  %v3888_v49 = vmax.f32 %v3738_v13, 0.0  ;;  %v4432_v13 = vld [vmem:[#allocation19 + $0x2e8] sm:$0xff] }
 0x3e1   : > { %3909 = vst [vmem:[%s13448_s10 + $0x30] sm:$0xff] %v3887_v10  ;;  %v10492_v20 = vunpack.i.h.bf16 %v14262_v28  ;;  %v10491_v25 = vunpack.i.l.bf16 %v14262_v28  ;;  %4890 = vmatpush.msra.mxu0 %v4432_v13  ;;  %v4504_v13 = vld [vmem:[#allocation19 + $0x528] sm:$0xff] }
 0x3e2   : > { %3910 = vst [vmem:[%s13448_s10 + $0x38] sm:$0xff] %v3888_v49  ;;  %v3671_v18 = vpop.f32.mrf.mxu3  ;;  %v3740_v41 = vpop.f32.mrf.mxu0 }
 0x3e3   : > { %v3672_v52 = vadd.f32 %v3671_v18, %v14114_v45  ;;  %v3717_v12 = vpop.f32.mrf.mxu2  ;;  %10559 = vrot.lane.b32.xlu0 %v10548_v46, %s12032_s16  ;;  %v4273_v55 = vsel %vm1033_vm4, %v10491_v25, %v10492_v20  ;;  %v4528_v18 = vld [vmem:[#allocation19 + $0x5e8] sm:$0xff]  ;;  %v4573_v25 = vld [vmem:[#allocation19 + $0x750] sm:$0xff] }
 0x3e4   : > { %v14273_v8 = vpop.permute.xlu0 %10484  ;;  %v3718_v60 = vadd.f32 %v3717_v12, %v14114_v45  ;;  %4936 = vmatpush.msra.mxu3 %v4528_v18 }
 0x3e5   : > { %v3694_v17 = vpop.f32.mrf.mxu1  ;;  %v10487_v37 = vunpack.i.h.bf16 %v14273_v8  ;;  %v10486_v63 = vunpack.i.l.bf16 %v14273_v8 }
 0x3e6   : > { %v14281_v59 = vadd.f32 %v3694_v17, %v3672_v52  ;;  %v14285_v7 = vadd.f32 %v3740_v41, %v3718_v60  ;;  %v4477_v52 = vld [vmem:[#allocation19 + $0x450] sm:$0xff] }
 0x3e7   : > { %v4159_v24 = vsel %vm951_vm5, %v10486_v63, %v10487_v37  ;;  %v4525_v17 = vld [vmem:[#allocation19 + $0x5d0] sm:$0xff]  ;;  %v4426_v63 = vld [vmem:[#allocation19 + $0x2b8] sm:$0xff]  ;;  %4914 = vmatpush.msra.mxu1 %v4477_v52 }
 0x3e8   : > { %v3898_v39 = vmax.f32 %v14281_v59, 0.0  ;;  %v4203_v16 = vmax.f32 %v4089_v40, %v4159_v24  ;;  %v3899_v54 = vmax.f32 %v14285_v7, 0.0  ;;  %v14298_v43 = vpop.permute.xlu1 %10504  ;;  %v4474_v40 = vld [vmem:[#allocation19 + $0x438] sm:$0xff]  ;;  %4937 = vmatpush.msra.mxu3 %v4525_v17  ;;  %v4411_v7 = vld [vmem:[#allocation19 + $0x240] sm:$0xff]  ;;  %v4453_v52 = vld [vmem:[#allocation19 + $0x390] sm:$0xff] }
 0x3e9   : > { %v10507_v34 = vunpack.i.h.bf16 %v14298_v43  ;;  %v10506_v31 = vunpack.i.l.bf16 %v14298_v43  ;;  %v4570_v24 = vld [vmem:[#allocation19 + $0x738] sm:$0xff]  ;;  %4915 = vmatpush.msra.mxu1 %v4474_v40  ;;  %v4555_v59 = vld [vmem:[#allocation19 + $0x6c0] sm:$0xff] }
 0x3ea   : > { %3920 = vst [vmem:[%s13448_s10 + $0x90] sm:$0xff] %v3898_v39  ;;  %v14300_v27 = vmax.f32 %v4203_v16, %v4273_v55  ;;  %4938 = vmatpush.msra.mxu3 %v4522_v44  ;;  %v4402_v17 = vld [vmem:[#allocation19 + $0x1f8] sm:$0xff]  ;;  %v4399_v44 = vld [vmem:[#allocation19 + $0x1e0] sm:$0xff] }
 0x3eb   : > { %3921 = vst [vmem:[%s13448_s10 + $0x98] sm:$0xff] %v3899_v54  ;;  %v4284_v46 = vsel %vm1033_vm4, %v10506_v31, %v10507_v34  ;;  %v4519_v31 = vld [vmem:[#allocation19 + $0x5a0] sm:$0xff]  ;;  %v4498_v40 = vld [vmem:[#allocation19 + $0x4f8] sm:$0xff] }
 0x3ec   : > { %v14308_v42 = vpop.permute.xlu0 %10499  ;;  %4883 = vmatmul.f32.vlgmr.msrb.gmra.mxu2 %v14300_v27  ;;  %4939 = vmatpush.msra.mxu3 %v4519_v31  ;;  %v11593_v31 = vld [vmem:[%s13448_s10 + $0x58] sm:$0xff] }
 0x3ed   : > { %v3760_v57 = vpop.f32.mrf.mxu1  ;;  %v10502_v30 = vunpack.i.h.bf16 %v14308_v42  ;;  %v10501_v35 = vunpack.i.l.bf16 %v14308_v42  ;;  %v3783_v33 = vpop.f32.mrf.mxu3 }
 0x3ee   : > { %v3761_v1 = vadd.f32 %v3760_v57, %v14044_v58  ;;  %v3806_v4 = vpop.f32.mrf.mxu0  ;;  %v4471_v57 = vld [vmem:[#allocation19 + $0x420] sm:$0xff] }
 0x3ef   : > { %v3807_v32 = vadd.f32 %v3806_v4, %v14044_v58  ;;  %v3829_v47 = vpop.f32.mrf.mxu2  ;;  %v4170_v62 = vsel %vm951_vm5, %v10501_v35, %v10502_v30  ;;  %4916 = vmatpush.msra.mxu1 %v4471_v57  ;;  %v4567_v35 = vld [vmem:[#allocation19 + $0x720] sm:$0xff]  ;;  %v4516_v4 = vld [vmem:[#allocation19 + $0x588] sm:$0xff] }
 0x3f0   : > { %v3784_v61 = vadd.f32 %v3783_v33, %v3761_v1  ;;  %v4214_v5 = vmax.f32 %v4100_v56, %v4170_v62  ;;  %v4420_v33 = vld [vmem:[#allocation19 + $0x288] sm:$0xff]  ;;  %v4465_v62 = vld [vmem:[#allocation19 + $0x3f0] sm:$0xff]  ;;  %4940 = vmatpush.msra.mxu3 %v4516_v4 }
 0x3f1   : > { %v3830_v6 = vadd.f32 %v3829_v47, %v3807_v32  ;;  %v4468_v1 = vld [vmem:[#allocation19 + $0x408] sm:$0xff]  ;;  %v4417_v32 = vld [vmem:[#allocation19 + $0x270] sm:$0xff] }
 0x3f2   : > { %v3889_v21 = vmax.f32 %v3784_v61, 0.0  ;;  %v14324_v29 = vmax.f32 %v4214_v5, %v4284_v46  ;;  %v4564_v56 = vld [vmem:[#allocation19 + $0x708] sm:$0xff]  ;;  %4917 = vmatpush.msra.mxu1 %v4468_v1  ;;  %v4513_v61 = vld [vmem:[#allocation19 + $0x570] sm:$0xff] }
 0x3f3   : > { %v3890_v50 = vmax.f32 %v3830_v6, 0.0  ;;  %v4561_v5 = vld [vmem:[#allocation19 + $0x6f0] sm:$0xff]  ;;  %4941 = vmatpush.msra.mxu3 %v4513_v61  ;;  %v4396_v57 = vld [vmem:[#allocation19 + $0x1c8] sm:$0xff]  ;;  %v4390_v61 = vld [vmem:[#allocation19 + $0x198] sm:$0xff] }
 0x3f4   : > { %3911 = vst [vmem:[%s13448_s10 + $0x40] sm:$0xff] %v3889_v21  ;;  %4886 = vmatmul.f32.gmra.mxu2 %v14324_v29  ;;  %v10578_v9 = vpack.i.bf16 %v3889_v21, %v3888_v49  ;;  %v4576_v49 = vld [vmem:[#allocation19 + $0x768] sm:$0xff]  ;;  %4918 = vmatpush.msra.mxu1 %v4465_v62  ;;  %v4414_v21 = vld [vmem:[#allocation19 + $0x258] sm:$0xff]  ;;  %v4537_v62 = vld [vmem:[#allocation19 + $0x630] sm:$0xff] }
 0x3f5   : > { %3912 = vst [vmem:[%s13448_s10 + $0x48] sm:$0xff] %v3890_v50  ;;  %v3763_v36 = vpop.f32.mrf.mxu1  ;;  %v10573_v23 = vpack.i.bf16 %v3890_v50, %v3887_v10  ;;  %v4429_v10 = vld [vmem:[#allocation19 + $0x2d0] sm:$0xff]  ;;  %4959 = vmatpush.msra.mxu2 %v4576_v49  ;;  %v4492_v1 = vld [vmem:[#allocation19 + $0x4c8] sm:$0xff] }
 0x3f6   : > { %v3764_v38 = vadd.f32 %v3763_v36, %v14114_v45  ;;  %v3809_v48 = vpop.f32.mrf.mxu0  ;;  %10579 = vrot.lane.b32.xlu1 %v10578_v9, %s12031_s29  ;;  %10569 = vrot.lane.b32.xlu2 %v10578_v9, %s16210_s6  ;;  %v4462_v36 = vld [vmem:[#allocation19 + $0x3d8] sm:$0xff]  ;;  %v4405_v49 = vld [vmem:[#allocation19 + $0x210] sm:$0xff]  ;;  %v4540_v4 = vld [vmem:[#allocation19 + $0x648] sm:$0xff] }
 0x3f7   : > { %v3810_v22 = vadd.f32 %v3809_v48, %v14114_v45  ;;  %v3832_v14 = vpop.f32.mrf.mxu2  ;;  %10574 = vrot.lane.b32.xlu0 %v10573_v23, %s16210_s6  ;;  %4891 = vmatpush.msra.mxu0 %v4429_v10  ;;  %v4459_v48 = vld [vmem:[#allocation19 + $0x3c0] sm:$0xff] }
 0x3f8   : > { %v3786_v41 = vpop.f32.mrf.mxu3  ;;  %4960 = vmatpush.msra.mxu2 %v4573_v25  ;;  %4919 = vmatpush.msra.mxu1 %v4462_v36  ;;  %v4483_v36 = vld [vmem:[#allocation19 + $0x480] sm:$0xff] }
 0x3f9   : > { %v3787_v12 = vadd.f32 %v3786_v41, %v3764_v38  ;;  %v3833_v60 = vadd.f32 %v3832_v14, %v3810_v22  ;;  %4892 = vmatpush.msra.mxu0 %v4426_v63  ;;  %v4558_v38 = vld [vmem:[#allocation19 + $0x6d8] sm:$0xff]  ;;  %v4408_v22 = vld [vmem:[#allocation19 + $0x228] sm:$0xff] }
 0x3fa   : > { %4961 = vmatpush.msra.mxu2 %v4570_v24  ;;  %4920 = vmatpush.msra.mxu1 %v4459_v48  ;;  %v4456_v14 = vld [vmem:[#allocation19 + $0x3a8] sm:$0xff]  ;;  %v4450_v63 = vld [vmem:[#allocation19 + $0x378] sm:$0xff] }
 0x3fb   : > { %v3900_v16 = vmax.f32 %v3787_v12, 0.0  ;;  %v3901_v55 = vmax.f32 %v3833_v60, 0.0  ;;  %4893 = vmatpush.msra.mxu0 %v4423_v53  ;;  %v4552_v41 = vld [vmem:[#allocation19 + $0x6a8] sm:$0xff]  ;;  %v4501_v12 = vld [vmem:[#allocation19 + $0x510] sm:$0xff]  ;;  %v4543_v53 = vld [vmem:[#allocation19 + $0x660] sm:$0xff] }
 0x3fc   : > { %4962 = vmatpush.msra.mxu2 %v4567_v35  ;;  %4921 = vmatpush.msra.mxu1 %v4456_v14  ;;  %v4549_v60 = vld [vmem:[#allocation19 + $0x690] sm:$0xff]  ;;  %v4768_v48 = vld [vmem:[#allocation19 + $0xd68] sm:$0xff]  ;;  %v4618_v14 = vld [vmem:[#allocation19 + $0x8b8] sm:$0xff] }
 0x3fd   : > { %3922 = vst [vmem:[%s13448_s10 + $0xa0] sm:$0xff] %v3900_v16  ;;  %v3875_v47 = vpop.f32.mrf.mxu1  ;;  %4894 = vmatpush.msra.mxu0 %v4420_v33  ;;  %v10608_v46 = vpack.i.bf16 %v3900_v16, %v3899_v54  ;;  %v4447_v16 = vld [vmem:[#allocation19 + $0x360] sm:$0xff]  ;;  %v4444_v33 = vld [vmem:[#allocation19 + $0x348] sm:$0xff] }
 0x3fe   : > { %3923 = vst [vmem:[%s13448_s10 + $0xa8] sm:$0xff] %v3901_v55  ;;  %10594 = vrot.lane.b32.xlu1 %v10573_v23, %s12032_s16  ;;  %10584 = vrot.lane.b32.xlu2 %v10573_v23, %s12031_s29  ;;  %v4510_v23 = vld [vmem:[#allocation19 + $0x558] sm:$0xff] }
 0x3ff   : > { %10589 = vrot.lane.b32.xlu0 %v10578_v9, %s12032_s16  ;;  %4963 = vmatpush.msra.mxu2 %v4564_v56  ;;  %v10603_v9 = vpack.i.bf16 %v3901_v55, %v3898_v39  ;;  %v4495_v55 = vld [vmem:[#allocation19 + $0x4e0] sm:$0xff]  ;;  %v4393_v56 = vld [vmem:[#allocation19 + $0x1b0] sm:$0xff] }
 0x400   : > { %4895 = vmatpush.msra.mxu0 %v4417_v32  ;;  %4942 = vmatpush.msra.mxu3 %v4510_v23  ;;  %v4441_v32 = vld [vmem:[#allocation19 + $0x330] sm:$0xff]  ;;  %v4531_v23 = vld [vmem:[#allocation19 + $0x600] sm:$0xff] }
 0x401   : > { %4964 = vmatpush.msra.mxu2 %v4561_v5  ;;  %4922 = vmatpush.msra.mxu1 %v4453_v52  ;;  %v4438_v5 = vld [vmem:[#allocation19 + $0x318] sm:$0xff]  ;;  %v4759_v52 = vld [vmem:[#allocation19 + $0xd20] sm:$0xff] }
 0x402   : > { %4896 = vmatpush.msra.mxu0 %v4414_v21  ;;  %v4387_v21 = vld [vmem:[#allocation19 + $0x180] sm:$0xff] }
 0x403   : > { %4965 = vmatpush.msra.mxu2 %v4558_v38  ;;  %4923 = vmatpush.msra.mxu1 %v4450_v63  ;;  %v4624_v38 = vld [vmem:[#allocation19 + $0x8e8] sm:$0xff]  ;;  %v4609_v63 = vld [vmem:[#allocation19 + $0x870] sm:$0xff] }
 0x404   : > { %v3852_v6 = vpop.f32.mrf.mxu3  ;;  %4897 = vmatpush.msra.mxu0 %v4411_v7  ;;  %v4672_v7 = vld [vmem:[#allocation19 + $0xa68] sm:$0xff] }
 0x405   : > { %v3853_v50 = vadd.f32 %v3852_v6, %v14044_v58  ;;  %v4507_v58 = vld [vmem:[#allocation19 + $0x540] sm:$0xff]  ;;  %4966 = vmatpush.msra.mxu2 %v4555_v59  ;;  %v3878_v18 = vpop.f32.mrf.mxu1  ;;  %4924 = vmatpush.msra.mxu1 %v4447_v16  ;;  %v4486_v6 = vld [vmem:[#allocation19 + $0x498] sm:$0xff]  ;;  %v4669_v59 = vld [vmem:[#allocation19 + $0xa50] sm:$0xff] }
 0x406   : > { %10609 = vrot.lane.b32.xlu1 %v10608_v46, %s12031_s29  ;;  %10599 = vrot.lane.b32.xlu2 %v10608_v46, %s16210_s6  ;;  %v4654_v16 = vld [vmem:[#allocation19 + $0x9d8] sm:$0xff] }
 0x407   : > { %v3876_v54 = vadd.f32 %v3875_v47, %v3853_v50  ;;  %10604 = vrot.lane.b32.xlu0 %v10603_v9, %s16210_s6  ;;  %4943 = vmatpush.msra.mxu3 %v4507_v58  ;;  %v4489_v47 = vld [vmem:[#allocation19 + $0x4b0] sm:$0xff]  ;;  %v4435_v50 = vld [vmem:[#allocation19 + $0x300] sm:$0xff] }
 0x408   : > { %4898 = vmatpush.msra.mxu0 %v4408_v22  ;;  %4967 = vmatpush.msra.mxu2 %v4552_v41  ;;  %v4621_v58 = vld [vmem:[#allocation19 + $0x8d0] sm:$0xff]  ;;  %v4615_v41 = vld [vmem:[#allocation19 + $0x8a0] sm:$0xff] }
 0x409   : > { %v3891_v39 = vmax.f32 %v3876_v54, 0.0  ;;  %4944 = vmatpush.msra.mxu3 %v4504_v13  ;;  %4925 = vmatpush.msra.mxu1 %v4444_v33  ;;  %v4720_v54 = vld [vmem:[#allocation19 + $0xbe8] sm:$0xff]  ;;  %v4765_v22 = vld [vmem:[#allocation19 + $0xd50] sm:$0xff]  ;;  %v4666_v13 = vld [vmem:[#allocation19 + $0xa38] sm:$0xff] }
 0x40a   : > { %4899 = vmatpush.msra.mxu0 %v4405_v49  ;;  %4968 = vmatpush.msra.mxu2 %v4549_v60  ;;  %v4663_v49 = vld [vmem:[#allocation19 + $0xa20] sm:$0xff]  ;;  %v4660_v60 = vld [vmem:[#allocation19 + $0xa08] sm:$0xff] }
 0x40b   : > { %3913 = vst [vmem:[%s13448_s10 + $0x50] sm:$0xff] %v3891_v39  ;;  %4945 = vmatpush.msra.mxu3 %v4501_v12  ;;  %v10638_v35 = vpack.i.bf16 %v11593_v31, %v3891_v39  ;;  %4926 = vmatpush.msra.mxu1 %v4441_v32  ;;  %v4717_v39 = vld [vmem:[#allocation19 + $0xbd0] sm:$0xff]  ;;  %v4612_v12 = vld [vmem:[#allocation19 + $0x888] sm:$0xff]  ;;  %v4747_v33 = vld [vmem:[#allocation19 + $0xcc0] sm:$0xff] }
 0x40c   : > { %v3855_v11 = vpop.f32.mrf.mxu3  ;;  %4900 = vmatpush.msra.mxu0 %v4402_v17  ;;  %v4708_v17 = vld [vmem:[#allocation19 + $0xb88] sm:$0xff] }
 0x40d   : > { %v3856_v10 = vadd.f32 %v3855_v11, %v14114_v45  ;;  %v4546_v45 = vld [vmem:[#allocation19 + $0x678] sm:$0xff]  ;;  %4946 = vmatpush.msra.mxu3 %v4498_v40  ;;  %4927 = vmatpush.msra.mxu1 %v4438_v5  ;;  %v4657_v40 = vld [vmem:[#allocation19 + $0x9f0] sm:$0xff]  ;;  %v4744_v32 = vld [vmem:[#allocation19 + $0xca8] sm:$0xff] }
 0x40e   : > { %10624 = vrot.lane.b32.xlu1 %v10603_v9, %s12032_s16  ;;  %10614 = vrot.lane.b32.xlu2 %v10603_v9, %s12031_s29  ;;  %v4714_v11 = vld [vmem:[#allocation19 + $0xbb8] sm:$0xff] }
 0x40f   : > { %v3879_v25 = vadd.f32 %v3878_v18, %v3856_v10  ;;  %10619 = vrot.lane.b32.xlu0 %v10608_v46, %s12032_s16  ;;  %4969 = vmatpush.msra.mxu2 %v4546_v45  ;;  %v4534_v46 = vld [vmem:[#allocation19 + $0x618] sm:$0xff]  ;;  %v4711_v10 = vld [vmem:[#allocation19 + $0xba0] sm:$0xff]  ;;  %v4705_v45 = vld [vmem:[#allocation19 + $0xb70] sm:$0xff] }
 0x410   : > { %4901 = vmatpush.msra.mxu0 %v4399_v44  ;;  %4947 = vmatpush.msra.mxu3 %v4495_v55  ;;  %v4762_v18 = vld [vmem:[#allocation19 + $0xd38] sm:$0xff]  ;;  %v4753_v44 = vld [vmem:[#allocation19 + $0xcf0] sm:$0xff] }
 0x411   : > { %v3902_v24 = vmax.f32 %v3879_v25, 0.0  ;;  %4970 = vmatpush.msra.mxu2 %v4543_v53  ;;  %4928 = vmatpush.msra.mxu1 %v4435_v50  ;;  %v4756_v25 = vld [vmem:[#allocation19 + $0xd08] sm:$0xff]  ;;  %v4702_v55 = vld [vmem:[#allocation19 + $0xb58] sm:$0xff] }
 0x412   : > { %4902 = vmatpush.msra.mxu0 %v4396_v57  ;;  %4948 = vmatpush.msra.mxu3 %v4492_v1  ;;  %v4750_v53 = vld [vmem:[#allocation19 + $0xcd8] sm:$0xff]  ;;  %v4603_v57 = vld [vmem:[#allocation19 + $0x840] sm:$0xff]  ;;  %v4600_v1 = vld [vmem:[#allocation19 + $0x828] sm:$0xff] }
 0x413   : > { %3924 = vst [vmem:[%s13448_s10 + $0xb0] sm:$0xff] %v3902_v24  ;;  %4971 = vmatpush.msra.mxu2 %v4540_v4  ;;  %v10653_v9 = vpack.i.bf16 %v11593_v31, %v3902_v24  ;;  %5005 = vmatpush.msrb.mxu1 %v4672_v7  ;;  %v4606_v24 = vld [vmem:[#allocation19 + $0x858] sm:$0xff]  ;;  %v4651_v31 = vld [vmem:[#allocation19 + $0x9c0] sm:$0xff]  ;;  %v4648_v4 = vld [vmem:[#allocation19 + $0x9a8] sm:$0xff] }
 0x414   : > { %4903 = vmatpush.msra.mxu0 %v4393_v56  ;;  %4949 = vmatpush.msra.mxu3 %v4489_v47  ;;  %v4696_v56 = vld [vmem:[#allocation19 + $0xb28] sm:$0xff]  ;;  %v4597_v47 = vld [vmem:[#allocation19 + $0x810] sm:$0xff]  ;;  %v4690_v50 = vld [vmem:[#allocation19 + $0xaf8] sm:$0xff] }
 0x415   : > { %4972 = vmatpush.msra.mxu2 %v4537_v62  ;;  %5006 = vmatpush.msrb.mxu1 %v4669_v59  ;;  %v4645_v62 = vld [vmem:[#allocation19 + $0x990] sm:$0xff]  ;;  %v4735_v7 = vld [vmem:[#allocation19 + $0xc60] sm:$0xff] }
 0x416   : > { %10639 = vrot.lane.b32.xlu1 %v10638_v35, %s12032_s16  ;;  %10629 = vrot.lane.b32.xlu2 %v10638_v35, %s16210_s6 }
 0x417   : > { %10634 = vrot.lane.b32.xlu0 %v10638_v35, %s12031_s29  ;;  %4904 = vmatpush.msra.mxu0 %v4390_v61  ;;  %v4699_v35 = vld [vmem:[#allocation19 + $0xb40] sm:$0xff]  ;;  %v4693_v61 = vld [vmem:[#allocation19 + $0xb10] sm:$0xff] }
 0x418   : > { %4950 = vmatpush.msra.mxu3 %v4486_v6  ;;  %4973 = vmatpush.msra.mxu2 %v4534_v46  ;;  %v14360_v5 = vpop.permute.xlu2 %10509  ;;  %v4741_v6 = vld [vmem:[#allocation19 + $0xc90] sm:$0xff]  ;;  %v4594_v46 = vld [vmem:[#allocation19 + $0x7f8] sm:$0xff] }
 0x419   : > { %4905 = vmatpush.msra.mxu0 %v4387_v21  ;;  %5007 = vmatpush.msrb.mxu1 %v4666_v13  ;;  %v4642_v21 = vld [vmem:[#allocation19 + $0x978] sm:$0xff]  ;;  %v4681_v13 = vld [vmem:[#allocation19 + $0xab0] sm:$0xff] }
 0x41a   : > { %4951 = vmatpush.msra.mxu3 %v4483_v36  ;;  %4974 = vmatpush.msra.mxu2 %v4531_v23  ;;  %v4591_v36 = vld [vmem:[#allocation19 + $0x7e0] sm:$0xff] }
 0x41b   : > { %4982 = vmatpush.msrb.mxu0 %v4624_v38  ;;  %5008 = vmatpush.msrb.mxu1 %v4663_v49  ;;  %v4639_v23 = vld [vmem:[#allocation19 + $0x960] sm:$0xff]  ;;  %v4630_v49 = vld [vmem:[#allocation19 + $0x918] sm:$0xff] }
 0x41c   : > { %5028 = vmatpush.msrb.mxu3 %v4720_v54  ;;  %5051 = vmatpush.msrb.mxu2 %v4768_v48  ;;  %v4687_v38 = vld [vmem:[#allocation19 + $0xae0] sm:$0xff]  ;;  %v4588_v54 = vld [vmem:[#allocation19 + $0x7c8] sm:$0xff] }
 0x41d   : > { %4983 = vmatpush.msrb.mxu0 %v4621_v58  ;;  %5009 = vmatpush.msrb.mxu1 %v4660_v60  ;;  %v4636_v48 = vld [vmem:[#allocation19 + $0x948] sm:$0xff]  ;;  %v4627_v60 = vld [vmem:[#allocation19 + $0x900] sm:$0xff] }
 0x41e   : > { %10654 = vrot.lane.b32.xlu1 %v10653_v9, %s12032_s16  ;;  %10644 = vrot.lane.b32.xlu2 %v10653_v9, %s16210_s6  ;;  %v4684_v58 = vld [vmem:[#allocation19 + $0xac8] sm:$0xff]  ;;  %s16203_s16 = smov 96  }
 0x41f   : > { %10649 = vrot.lane.b32.xlu0 %v10653_v9, %s12031_s29  ;;  %5029 = vmatpush.msrb.mxu3 %v4717_v39  ;;  %v4738_v9 = vld [vmem:[#allocation19 + $0xc78] sm:$0xff]  ;;  %v4732_v39 = vld [vmem:[#allocation19 + $0xc48] sm:$0xff]  ;;  %s12039_s29 = smov 95  }
 0x420   : > { %5052 = vmatpush.msrb.mxu2 %v4765_v22  ;;  %4984 = vmatpush.msrb.mxu0 %v4618_v14  ;;  %v4585_v22 = vld [vmem:[#allocation19 + $0x7b0] sm:$0xff] }
 0x421   : > { %5030 = vmatpush.msrb.mxu3 %v4714_v11  ;;  %5010 = vmatpush.msrb.mxu1 %v4657_v40  ;;  %v4633_v14 = vld [vmem:[#allocation19 + $0x930] sm:$0xff] }
 0x422   : > { %5053 = vmatpush.msrb.mxu2 %v4762_v18  ;;  %4985 = vmatpush.msrb.mxu0 %v4615_v41  ;;  %v4729_v18 = vld [vmem:[#allocation19 + $0xc30] sm:$0xff]  ;;  %v4582_v41 = vld [vmem:[#allocation19 + $0x798] sm:$0xff] }
 0x423   : > { %5031 = vmatpush.msrb.mxu3 %v4711_v10  ;;  %5011 = vmatpush.msrb.mxu1 %v4654_v16  ;;  %v4678_v10 = vld [vmem:[#allocation19 + $0xa98] sm:$0xff] }
 0x424   : > { %5054 = vmatpush.msrb.mxu2 %v4759_v52  ;;  %4986 = vmatpush.msrb.mxu0 %v4612_v12  ;;  %v4726_v52 = vld [vmem:[#allocation19 + $0xc18] sm:$0xff]  ;;  %v4579_v12 = vld [vmem:[#allocation19 + $0x780] sm:$0xff] }
 0x425   : > { %5032 = vmatpush.msrb.mxu3 %v4708_v17  ;;  %5012 = vmatpush.msrb.mxu1 %v4651_v31  ;;  %v4675_v17 = vld [vmem:[#allocation19 + $0xa80] sm:$0xff] }
 0x426   : > { %5055 = vmatpush.msrb.mxu2 %v4756_v25  ;;  %4987 = vmatpush.msrb.mxu0 %v4609_v63  ;;  %v14364_v11 = vpop.permute.xlu2 %10524  ;;  %v4723_v25 = vld [vmem:[#allocation19 + $0xc00] sm:$0xff]  ;;  %v10512_v63 = vunpack.i.h.bf16 %v14360_v5 }
 0x427   : > { %5033 = vmatpush.msrb.mxu3 %v4705_v45  ;;  %5013 = vmatpush.msrb.mxu1 %v4648_v4 }
 0x428   : > { %5056 = vmatpush.msrb.mxu2 %v4753_v44  ;;  %4988 = vmatpush.msrb.mxu0 %v4606_v24  ;;  %v10511_v44 = vunpack.i.l.bf16 %v14360_v5  ;;  %v10526_v24 = vunpack.i.l.bf16 %v14364_v11  ;;  %v10527_v5 = vunpack.i.h.bf16 %v14364_v11 }
 0x429   : > { %5034 = vmatpush.msrb.mxu3 %v4702_v55  ;;  %5014 = vmatpush.msrb.mxu1 %v4645_v62 }
 0x42a   : > { %5057 = vmatpush.msrb.mxu2 %v4750_v53  ;;  %4989 = vmatpush.msrb.mxu0 %v4603_v57  ;;  %v4160_v62 = vsel %vm951_vm5, %v10487_v37, %v10526_v24 }
 0x42b   : > { %5035 = vmatpush.msrb.mxu3 %v4699_v35  ;;  %5015 = vmatpush.msrb.mxu1 %v4642_v21  ;;  %v3928_v35 = vld [vmem:[%s13448_s10 + $0x8] sm:$0xff] }
 0x42c   : > { %5058 = vmatpush.msrb.mxu2 %v4747_v33  ;;  %4990 = vmatpush.msrb.mxu0 %v4600_v1 }
 0x42d   : > { %5036 = vmatpush.msrb.mxu3 %v4696_v56  ;;  %5016 = vmatpush.msrb.mxu1 %v4639_v23 }
 0x42e   : > { %5059 = vmatpush.msrb.mxu2 %v4744_v32  ;;  %4991 = vmatpush.msrb.mxu0 %v4597_v47  ;;  %v14386_v56 = vpop.permute.xlu2 %10539  ;;  %v4048_v47 = vsel %vm787_vm7, %v10511_v44, %v10512_v63 }
 0x42f   : > { %5037 = vmatpush.msrb.mxu3 %v4693_v61  ;;  %5017 = vmatpush.msrb.mxu1 %v4636_v48  ;;  %v4092_v21 = vmax.f32 %v14213_v0, %v4048_v47 }
 0x430   : > { %5060 = vmatpush.msrb.mxu2 %v4741_v6  ;;  %4992 = vmatpush.msrb.mxu0 %v4594_v46  ;;  %v14362_v59 = vpop.permute.xlu1 %10519 }
 0x431   : > { %5038 = vmatpush.msrb.mxu3 %v4690_v50  ;;  %5018 = vmatpush.msrb.mxu1 %v4633_v14  ;;  %v10522_v53 = vunpack.i.h.bf16 %v14362_v59  ;;  %v10521_v57 = vunpack.i.l.bf16 %v14362_v59  ;;  %v4864_v14 = vld [vmem:[#allocation19 + $0x1068] sm:$0xff] }
 0x432   : > { %5061 = vmatpush.msrb.mxu2 %v4738_v9  ;;  %4993 = vmatpush.msrb.mxu0 %v4591_v36 }
 0x433   : > { %5039 = vmatpush.msrb.mxu3 %v4687_v38  ;;  %5019 = vmatpush.msrb.mxu1 %v4630_v49  ;;  %v4162_v6 = vsel %vm951_vm5, %v10521_v57, %v10522_v53  ;;  %v4161_v50 = vsel %vm951_vm5, %v10526_v24, %v10521_v57  ;;  %v4861_v49 = vld [vmem:[#allocation19 + $0x1050] sm:$0xff]  ;;  %v4379_v57 = vld [vmem:[#allocation19 + $0x140] sm:$0xff] }
 0x434   : > { %5062 = vmatpush.msrb.mxu2 %v4735_v7  ;;  %4994 = vmatpush.msrb.mxu0 %v4588_v54  ;;  %v4206_v38 = vmax.f32 %v4092_v21, %v4162_v6  ;;  %v4813_v7 = vld [vmem:[#allocation19 + $0xed0] sm:$0xff]  ;;  %v4804_v21 = vld [vmem:[#allocation19 + $0xe88] sm:$0xff] }
 0x435   : > { %5040 = vmatpush.msrb.mxu3 %v4684_v58  ;;  %5020 = vmatpush.msrb.mxu1 %v4627_v60  ;;  %v10542_v60 = vunpack.i.h.bf16 %v14386_v56 }
 0x436   : > { %5063 = vmatpush.msrb.mxu2 %v4732_v39  ;;  %4995 = vmatpush.msrb.mxu0 %v4585_v22 }
 0x437   : > { %5041 = vmatpush.msrb.mxu3 %v4681_v13  ;;  %v4385_v13 = vld [vmem:[#allocation19 + $0x170] sm:$0xff] }
 0x438   : > { %5064 = vmatpush.msrb.mxu2 %v4729_v18  ;;  %4996 = vmatpush.msrb.mxu0 %v4582_v41  ;;  %v4433_v18 = vld [vmem:[#allocation19 + $0x2f0] sm:$0xff]  ;;  %v14421_v41 = vpop.permute.xlu2 %10554 }
 0x439   : > { %5042 = vmatpush.msrb.mxu3 %v4678_v10  ;;  %v4810_v10 = vld [vmem:[#allocation19 + $0xeb8] sm:$0xff]  ;;  %v10556_v24 = vunpack.i.l.bf16 %v14421_v41 }
 0x43a   : > { %5065 = vmatpush.msrb.mxu2 %v4726_v52  ;;  %4997 = vmatpush.msrb.mxu0 %v4579_v12  ;;  %v4382_v52 = vld [vmem:[#allocation19 + $0x158] sm:$0xff] }
 0x43b   : > { %5043 = vmatpush.msrb.mxu3 %v4675_v17  ;;  %v4430_v12 = vld [vmem:[#allocation19 + $0x2d8] sm:$0xff] }
 0x43c   : > { %5066 = vmatpush.msrb.mxu2 %v4723_v25 }
 0x43d   : > { %v14367_v40 = vpop.permute.xlu1 %10534  ;;  %v14369_v45 = vpop.permute.xlu0 %10514 }
 0x43e   : > { %v10517_v16 = vunpack.i.h.bf16 %v14369_v45  ;;  %v10516_v55 = vunpack.i.l.bf16 %v14369_v45  ;;  %v10536_v31 = vunpack.i.l.bf16 %v14367_v40  ;;  %v10537_v36 = vunpack.i.h.bf16 %v14367_v40 }
 0x440   : > { %v4046_v33 = vsel %vm787_vm7, %v10482_v26, %v10516_v55  ;;  %v4047_v1 = vsel %vm787_vm7, %v10516_v55, %v10511_v44  ;;  %v4049_v4 = vsel %vm787_vm7, %v10512_v63, %v10517_v16  ;;  %v4274_v46 = vsel %vm1033_vm4, %v10492_v20, %v10536_v31  ;;  %v4858_v63 = vld [vmem:[#allocation19 + $0x1038] sm:$0xff] }
 0x441   : > { %v4090_v32 = vmax.f32 %v3928_v35, %v4046_v33  ;;  %v4091_v61 = vmax.f32 %v14196_v19, %v4047_v1  ;;  %v4093_v51 = vmax.f32 %v14225_v15, %v4049_v4  ;;  %v4816_v19 = vld [vmem:[#allocation19 + $0xee8] sm:$0xff]  ;;  %v4163_v15 = vsel %vm951_vm5, %v10522_v53, %v10527_v5  ;;  %v4807_v1 = vld [vmem:[#allocation19 + $0xea0] sm:$0xff] }
 0x442   : > { %v10541_v44 = vunpack.i.l.bf16 %v14386_v56  ;;  %v4855_v4 = vld [vmem:[#allocation19 + $0x1020] sm:$0xff] }
 0x443   : > { %v4204_v26 = vmax.f32 %v4090_v32, %v4160_v62  ;;  %v4205_v0 = vmax.f32 %v4091_v61, %v4161_v50  ;;  %v4207_v20 = vmax.f32 %v4093_v51, %v4163_v15  ;;  %v3939_v61 = vld [vmem:[%s13448_s10 + $0x68] sm:$0xff] }
 0x444   : > { %v4376_v51 = vld [vmem:[#allocation19 + $0x128] sm:$0xff]  ;;  %v4059_v2 = vsel %vm787_vm7, %v10541_v44, %v10542_v60 }
 0x445   : > { %v14401_v8 = vpop.permute.xlu1 %10549  ;;  %v10530_v37 = vpop.permute.xlu0 %10529  ;;  %v14403_v9 = vmax.f32 %v4204_v26, %v4274_v46  ;;  %v4424_v26 = vld [vmem:[#allocation19 + $0x2a8] sm:$0xff]  ;;  %v3940_v46 = vld [vmem:[%s13448_s10 + $0x70] sm:$0xff] }
 0x446   : > { %v10532_v23 = vunpack.i.h.bf16 %v10530_v37  ;;  %v10531_v28 = vunpack.i.l.bf16 %v10530_v37  ;;  %v10552_v35 = vunpack.i.h.bf16 %v14401_v8  ;;  %v10551_v33 = vunpack.i.l.bf16 %v14401_v8  ;;  %v4852_v50 = vld [vmem:[#allocation19 + $0x1008] sm:$0xff]  ;;  %v3942_v8 = vld [vmem:[%s13448_s10 + $0x80] sm:$0xff]  ;;  %v4373_v37 = vld [vmem:[#allocation19 + $0x110] sm:$0xff] }
 0x447   : > { %4906 = vmatmul.f32.vlgmr.msra.gmra.mxu0 %v14403_v9 }
 0x448   : > { %v4277_v54 = vsel %vm1033_vm4, %v10532_v23, %v10537_v36  ;;  %v4275_v48 = vsel %vm1033_vm4, %v10536_v31, %v10531_v28  ;;  %v4276_v58 = vsel %vm1033_vm4, %v10531_v28, %v10532_v23  ;;  %5074 = vmatpush.msra.mxu0 %v4816_v19  ;;  %v4427_v31 = vld [vmem:[#allocation19 + $0x2c0] sm:$0xff]  ;;  %v4421_v19 = vld [vmem:[#allocation19 + $0x290] sm:$0xff] }
 0x449   : > { %v14415_v59 = vmax.f32 %v4205_v0, %v4275_v48  ;;  %v14417_v39 = vmax.f32 %v4206_v38, %v4276_v58  ;;  %v14419_v22 = vmax.f32 %v4207_v20, %v4277_v54  ;;  %v4801_v38 = vld [vmem:[#allocation19 + $0xe70] sm:$0xff]  ;;  %v10557_v20 = vunpack.i.h.bf16 %v14421_v41  ;;  %v4370_v54 = vld [vmem:[#allocation19 + $0xf8] sm:$0xff] }
 0x44a   : > { %5075 = vmatpush.msra.mxu0 %v4813_v7  ;;  %v4849_v0 = vld [vmem:[#allocation19 + $0xff0] sm:$0xff]  ;;  %v3941_v7 = vld [vmem:[%s13448_s10 + $0x78] sm:$0xff] }
 0x44b   : > { %4929 = vmatmul.f32.vlgmr.msra.gmra.mxu1 %v14415_v59  ;;  %4952 = vmatmul.f32.vlgmr.msra.gmra.mxu3 %v14417_v39 }
 0x44c   : > { %4975 = vmatmul.f32.vlgmr.msra.gmra.mxu2 %v14419_v22  ;;  %5097 = vmatpush.msra.mxu1 %v4864_v14  ;;  %v4172_v14 = vsel %vm951_vm5, %v10556_v24, %v10551_v33 }
 0x44d   : > { %v14427_v17 = vpop.permute.xlu1 %10564  ;;  %v14429_v25 = vpop.permute.xlu0 %10544  ;;  %5120 = vmatpush.msra.mxu3 %v4385_v13  ;;  %5143 = vmatpush.msra.mxu2 %v4433_v18  ;;  %v4103_v13 = vmax.f32 %v3941_v7, %v4059_v2  ;;  %v4418_v18 = vld [vmem:[#allocation19 + $0x278] sm:$0xff]  ;;  %v4780_v7 = vld [vmem:[#allocation19 + $0xdc8] sm:$0xff] }
 0x44e   : > { %v10547_v55 = vunpack.i.h.bf16 %v14429_v25  ;;  %v10546_v53 = vunpack.i.l.bf16 %v14429_v25  ;;  %5098 = vmatpush.msra.mxu1 %v4861_v49  ;;  %5076 = vmatpush.msra.mxu0 %v4810_v10  ;;  %v10566_v56 = vunpack.i.l.bf16 %v14427_v17  ;;  %v4798_v49 = vld [vmem:[#allocation19 + $0xe58] sm:$0xff]  ;;  %v10567_v43 = vunpack.i.h.bf16 %v14427_v17  ;;  %v4508_v17 = vld [vmem:[#allocation19 + $0x548] sm:$0xff] }
 0x44f   : > { %5121 = vmatpush.msra.mxu3 %v4382_v52  ;;  %5144 = vmatpush.msra.mxu2 %v4430_v12  ;;  %v4174_v52 = vsel %vm951_vm5, %v10552_v35, %v10557_v20  ;;  %v4846_v12 = vld [vmem:[#allocation19 + $0xfd8] sm:$0xff] }
 0x450   : > { %v4057_v32 = vsel %vm787_vm7, %v10497_v3, %v10546_v53  ;;  %v4058_v47 = vsel %vm787_vm7, %v10546_v53, %v10541_v44  ;;  %v4060_v62 = vsel %vm787_vm7, %v10542_v60, %v10547_v55  ;;  %5099 = vmatpush.msra.mxu1 %v4858_v63  ;;  %v4171_v3 = vsel %vm951_vm5, %v10502_v30, %v10556_v24  ;;  %v4367_v24 = vld [vmem:[#allocation19 + $0xe0] sm:$0xff]  ;;  %v4358_v2 = vld [vmem:[#allocation19 + $0x98] sm:$0xff] }
 0x451   : > { %v4101_v6 = vmax.f32 %v3939_v61, %v4057_v32  ;;  %5122 = vmatpush.msra.mxu3 %v4379_v57  ;;  %5145 = vmatpush.msra.mxu2 %v4427_v31  ;;  %v4102_v23 = vmax.f32 %v3940_v46, %v4058_v47  ;;  %v4104_v28 = vmax.f32 %v3942_v8, %v4060_v62  ;;  %v4415_v53 = vld [vmem:[#allocation19 + $0x260] sm:$0xff]  ;;  %v14466_v57 = vpop.permute.xlu2 %10569  ;;  %v4412_v61 = vld [vmem:[#allocation19 + $0x248] sm:$0xff]  ;;  %v4409_v46 = vld [vmem:[#allocation19 + $0x230] sm:$0xff] }
 0x452   : > { %5077 = vmatpush.msra.mxu0 %v4807_v1  ;;  %5100 = vmatpush.msra.mxu1 %v4855_v4  ;;  %v4285_v42 = vsel %vm1033_vm4, %v10507_v34, %v10566_v56  ;;  %v4173_v30 = vsel %vm951_vm5, %v10551_v33, %v10552_v35  ;;  %v4795_v47 = vld [vmem:[#allocation19 + $0xe40] sm:$0xff]  ;;  %v4786_v8 = vld [vmem:[#allocation19 + $0xdf8] sm:$0xff] }
 0x453   : > { %v4215_v15 = vmax.f32 %v4101_v6, %v4171_v3  ;;  %5123 = vmatpush.msra.mxu3 %v4376_v51  ;;  %5146 = vmatpush.msra.mxu2 %v4424_v26  ;;  %v4216_v60 = vmax.f32 %v4102_v23, %v4172_v14  ;;  %v4217_v63 = vmax.f32 %v4103_v13, %v4173_v30  ;;  %v4843_v62 = vld [vmem:[#allocation19 + $0xfc0] sm:$0xff]  ;;  %v4792_v51 = vld [vmem:[#allocation19 + $0xe28] sm:$0xff]  ;;  %v4361_v6 = vld [vmem:[#allocation19 + $0xb0] sm:$0xff] }
 0x454   : > { %5078 = vmatpush.msra.mxu0 %v4804_v21  ;;  %5101 = vmatpush.msra.mxu1 %v4852_v50  ;;  %v4218_v44 = vmax.f32 %v4104_v28, %v4174_v52  ;;  %v4840_v26 = vld [vmem:[#allocation19 + $0xfa8] sm:$0xff]  ;;  %v4789_v21 = vld [vmem:[#allocation19 + $0xe10] sm:$0xff]  ;;  %v4406_v3 = vld [vmem:[#allocation19 + $0x218] sm:$0xff]  ;;  %v10572_v52 = vunpack.i.h.bf16 %v14466_v57 }
 0x455   : > { %v10560_v48 = vpop.permute.xlu0 %10559  ;;  %v14458_v58 = vmax.f32 %v4215_v15, %v4285_v42  ;;  %5124 = vmatpush.msra.mxu3 %v4373_v37  ;;  %5147 = vmatpush.msra.mxu2 %v4421_v19  ;;  %v4837_v50 = vld [vmem:[#allocation19 + $0xf90] sm:$0xff]  ;;  %v4834_v37 = vld [vmem:[#allocation19 + $0xf78] sm:$0xff]  ;;  %v4355_v19 = vld [vmem:[#allocation19 + $0x80] sm:$0xff] }
 0x456   : > { %v10562_v10 = vunpack.i.h.bf16 %v10560_v48  ;;  %v10561_v34 = vunpack.i.l.bf16 %v10560_v48  ;;  %5079 = vmatpush.msra.mxu0 %v4801_v38  ;;  %5102 = vmatpush.msra.mxu1 %v4849_v0  ;;  %v4403_v15 = vld [vmem:[#allocation19 + $0x200] sm:$0xff]  ;;  %v4352_v0 = vld [vmem:[#allocation19 + $0x68] sm:$0xff]  ;;  %v4397_v48 = vld [vmem:[#allocation19 + $0x1d0] sm:$0xff] }
 0x457   : > { %4909 = vmatmul.f32.gmra.mxu0 %v14458_v58  ;;  %5125 = vmatpush.msra.mxu3 %v4370_v54  ;;  %v4783_v23 = vld [vmem:[#allocation19 + $0xde0] sm:$0xff]  ;;  %v4400_v42 = vld [vmem:[#allocation19 + $0x1e8] sm:$0xff]  ;;  %v4349_v54 = vld [vmem:[#allocation19 + $0x50] sm:$0xff] }
 0x458   : > { %v4286_v31 = vsel %vm1033_vm4, %v10566_v56, %v10561_v34  ;;  %v4287_v33 = vsel %vm1033_vm4, %v10561_v34, %v10562_v10  ;;  %v4288_v35 = vsel %vm1033_vm4, %v10562_v10, %v10567_v43  ;;  %5148 = vmatpush.msra.mxu2 %v4418_v18  ;;  %5080 = vmatpush.msra.mxu0 %v4798_v49  ;;  %v4364_v56 = vld [vmem:[#allocation19 + $0xc8] sm:$0xff]  ;;  %v4831_v38 = vld [vmem:[#allocation19 + $0xf60] sm:$0xff]  ;;  %v4777_v14 = vld [vmem:[#allocation19 + $0xdb0] sm:$0xff] }
 0x459   : > { %v14473_v1 = vmax.f32 %v4216_v60, %v4286_v31  ;;  %v14475_v4 = vmax.f32 %v4217_v63, %v4287_v33  ;;  %v14477_v32 = vmax.f32 %v4218_v44, %v4288_v35  ;;  %5103 = vmatpush.msra.mxu1 %v4846_v12  ;;  %5126 = vmatpush.msra.mxu3 %v4367_v24  ;;  %v14482_v28 = vpop.permute.xlu2 %10584  ;;  %v4828_v30 = vld [vmem:[#allocation19 + $0xf48] sm:$0xff]  ;;  %v4825_v18 = vld [vmem:[#allocation19 + $0xf30] sm:$0xff]  ;;  %v4346_v49 = vld [vmem:[#allocation19 + $0x38] sm:$0xff]  ;;  %v10571_v12 = vunpack.i.l.bf16 %v14466_v57 }
 0x45a   : > { %5149 = vmatpush.msra.mxu2 %v4415_v53  ;;  %5081 = vmatpush.msra.mxu0 %v4795_v47  ;;  %v4394_v34 = vld [vmem:[#allocation19 + $0x1b8] sm:$0xff]  ;;  %v4343_v53 = vld [vmem:[#allocation19 + $0x20] sm:$0xff] }
 0x45b   : > { %4932 = vmatmul.f32.gmra.mxu1 %v14473_v1  ;;  %4955 = vmatmul.f32.gmra.mxu3 %v14475_v4  ;;  %v4774_v44 = vld [vmem:[#allocation19 + $0xd98] sm:$0xff]  ;;  %v4391_v31 = vld [vmem:[#allocation19 + $0x1a0] sm:$0xff]  ;;  %v4052_v45 = vsel %vm787_vm7, %v10571_v12, %v10572_v52 }
 0x45c   : > { %4978 = vmatmul.f32.gmra.mxu2 %v14477_v32  ;;  %5104 = vmatpush.msra.mxu1 %v4843_v62  ;;  %v4822_v24 = vld [vmem:[#allocation19 + $0xf18] sm:$0xff]  ;;  %v4771_v62 = vld [vmem:[#allocation19 + $0xd80] sm:$0xff] }
 0x45d   : > { %5127 = vmatpush.msra.mxu3 %v4364_v56  ;;  %5150 = vmatpush.msra.mxu2 %v4412_v61  ;;  %v4819_v56 = vld [vmem:[#allocation19 + $0xf00] sm:$0xff]  ;;  %v10586_v61 = vunpack.i.l.bf16 %v14482_v28 }
 0x45e   : > { %5082 = vmatpush.msra.mxu0 %v4792_v51  ;;  %5105 = vmatpush.msra.mxu1 %v4840_v26  ;;  %v4340_v26 = vld [vmem:[#allocation19 + $0x8] sm:$0xff] }
 0x45f   : > { %5128 = vmatpush.msra.mxu3 %v4361_v6  ;;  %5151 = vmatpush.msra.mxu2 %v4409_v46  ;;  %v4388_v6 = vld [vmem:[#allocation19 + $0x188] sm:$0xff] }
 0x460   : > { %5083 = vmatpush.msra.mxu0 %v4789_v21  ;;  %5106 = vmatpush.msra.mxu1 %v4837_v50  ;;  %v3933_v21 = vld [vmem:[%s13448_s10 + $0x30] sm:$0xff]  ;;  %v3935_v50 = vld [vmem:[%s13448_s10 + $0x40] sm:$0xff] }
 0x461   : > { %5129 = vmatpush.msra.mxu3 %v4358_v2  ;;  %5152 = vmatpush.msra.mxu2 %v4406_v3  ;;  %v14499_v46 = vpop.permute.xlu2 %10599 }
 0x462   : > { %5084 = vmatpush.msra.mxu0 %v4786_v8  ;;  %5107 = vmatpush.msra.mxu1 %v4834_v37  ;;  %v10587_v8 = vunpack.i.h.bf16 %v14482_v28 }
 0x463   : > { %5130 = vmatpush.msra.mxu3 %v4355_v19  ;;  %5153 = vmatpush.msra.mxu2 %v4403_v15 }
 0x464   : > { %5085 = vmatpush.msra.mxu0 %v4783_v23  ;;  %5108 = vmatpush.msra.mxu1 %v4831_v38  ;;  %v11594_v23 = vld [vmem:[%s13448_s10 + $0x38] sm:$0xff] }
 0x465   : > { %5131 = vmatpush.msra.mxu3 %v4352_v0  ;;  %5154 = vmatpush.msra.mxu2 %v4400_v42  ;;  %v4096_v38 = vmax.f32 %v11594_v23, %v4052_v45  ;;  %v4164_v0 = vsel %vm951_vm5, %v10527_v5, %v10586_v61  ;;  %v4619_v23 = vld [vmem:[#allocation19 + $0x8c0] sm:$0xff] }
 0x466   : > { %5086 = vmatpush.msra.mxu0 %v4780_v7  ;;  %5109 = vmatpush.msra.mxu1 %v4828_v30 }
 0x467   : > { %5132 = vmatpush.msra.mxu3 %v4349_v54  ;;  %5155 = vmatpush.msra.mxu2 %v4397_v48 }
 0x468   : > { %v10580_v13 = vpop.permute.xlu1 %10579  ;;  %5087 = vmatpush.msra.mxu0 %v4777_v14  ;;  %5110 = vmatpush.msra.mxu1 %v4825_v18 }
 0x469   : > { %v14484_v10 = vpop.permute.xlu0 %10574  ;;  %5133 = vmatpush.msra.mxu3 %v4346_v49  ;;  %v10582_v33 = vunpack.i.h.bf16 %v10580_v13  ;;  %v10581_v35 = vunpack.i.l.bf16 %v10580_v13  ;;  %5156 = vmatpush.msra.mxu2 %v4394_v34 }
 0x46a   : > { %v10577_v60 = vunpack.i.h.bf16 %v14484_v10  ;;  %v10576_v63 = vunpack.i.l.bf16 %v14484_v10  ;;  %5088 = vmatpush.msra.mxu0 %v4774_v44  ;;  %5111 = vmatpush.msra.mxu1 %v4822_v24  ;;  %v4454_v10 = vld [vmem:[#allocation19 + $0x398] sm:$0xff] }
 0x46b   : > { %5134 = vmatpush.msra.mxu3 %v4343_v53  ;;  %5157 = vmatpush.msra.mxu2 %v4391_v31  ;;  %v4166_v37 = vsel %vm951_vm5, %v10581_v35, %v10582_v33  ;;  %v4165_v54 = vsel %vm951_vm5, %v10586_v61, %v10581_v35  ;;  %v4167_v48 = vsel %vm951_vm5, %v10582_v33, %v10587_v8  ;;  %v4529_v31 = vld [vmem:[#allocation19 + $0x5f0] sm:$0xff]  ;;  %v10602_v61 = vunpack.i.h.bf16 %v14499_v46 }
 0x46c   : > { %v4050_v57 = vsel %vm787_vm7, %v10517_v16, %v10576_v63  ;;  %v4051_v47 = vsel %vm787_vm7, %v10576_v63, %v10571_v12  ;;  %v4053_v51 = vsel %vm787_vm7, %v10572_v52, %v10577_v60  ;;  %v3932_v16 = vld [vmem:[%s13448_s10 + $0x28] sm:$0xff]  ;;  %5089 = vmatpush.msra.mxu0 %v4771_v62  ;;  %5112 = vmatpush.msra.mxu1 %v4819_v56  ;;  %v4577_v33 = vld [vmem:[#allocation19 + $0x770] sm:$0xff]  ;;  %v4478_v62 = vld [vmem:[#allocation19 + $0x458] sm:$0xff] }
 0x46d   : > { %v4094_v2 = vmax.f32 %v3932_v16, %v4050_v57  ;;  %v4095_v3 = vmax.f32 %v3933_v21, %v4051_v47  ;;  %v4097_v19 = vmax.f32 %v3935_v50, %v4053_v51  ;;  %5135 = vmatpush.msra.mxu3 %v4340_v26  ;;  %5158 = vmatpush.msra.mxu2 %v4388_v6  ;;  %v4625_v35 = vld [vmem:[#allocation19 + $0x8f0] sm:$0xff]  ;;  %v14536_v57 = vpop.permute.xlu2 %10614  ;;  %v4526_v56 = vld [vmem:[#allocation19 + $0x5d8] sm:$0xff]  ;;  %v10601_v51 = vunpack.i.l.bf16 %v14499_v46  ;;  %v4475_v50 = vld [vmem:[#allocation19 + $0x440] sm:$0xff] }
 0x46e   : > { %v4210_v18 = vmax.f32 %v4096_v38, %v4166_v37  ;;  %v4574_v6 = vld [vmem:[#allocation19 + $0x758] sm:$0xff]  ;;  %v4523_v46 = vld [vmem:[#allocation19 + $0x5c0] sm:$0xff]  ;;  %v4472_v38 = vld [vmem:[#allocation19 + $0x428] sm:$0xff] }
 0x46f   : > { %v4208_v49 = vmax.f32 %v4094_v2, %v4164_v0  ;;  %v4209_v5 = vmax.f32 %v4095_v3, %v4165_v54  ;;  %v4211_v63 = vmax.f32 %v4097_v19, %v4167_v48  ;;  %v4622_v21 = vld [vmem:[#allocation19 + $0x8d8] sm:$0xff]  ;;  %v4571_v37 = vld [vmem:[#allocation19 + $0x740] sm:$0xff]  ;;  %v4063_v0 = vsel %vm787_vm7, %v10601_v51, %v10602_v61  ;;  %v4520_v54 = vld [vmem:[#allocation19 + $0x5a8] sm:$0xff] }
 0x470   : > { %v14506_v15 = vpop.permute.xlu1 %10594  ;;  %v4568_v48 = vld [vmem:[#allocation19 + $0x728] sm:$0xff] }
 0x471   : > { %v10597_v42 = vunpack.i.h.bf16 %v14506_v15  ;;  %v10596_v7 = vunpack.i.l.bf16 %v14506_v15  ;;  %v10590_v30 = vpop.permute.xlu0 %10589 }
 0x472   : > { %v10592_v14 = vunpack.i.h.bf16 %v10590_v30  ;;  %v10591_v13 = vunpack.i.l.bf16 %v10590_v30 }
 0x473   : > { %v4278_v11 = vsel %vm1033_vm4, %v10537_v36, %v10596_v7  ;;  %v4481_v36 = vld [vmem:[#allocation19 + $0x470] sm:$0xff] }
 0x474   : > { %v4281_v34 = vsel %vm1033_vm4, %v10592_v14, %v10597_v42  ;;  %v4279_v52 = vsel %vm1033_vm4, %v10596_v7, %v10591_v13  ;;  %v4280_v12 = vsel %vm1033_vm4, %v10591_v13, %v10592_v14  ;;  %v14526_v44 = vmax.f32 %v4208_v49, %v4278_v11  ;;  %v3943_v14 = vld [vmem:[%s13448_s10 + $0x88] sm:$0xff]  ;;  %v4469_v13 = vld [vmem:[#allocation19 + $0x410] sm:$0xff] }
 0x475   : > { %v14528_v24 = vmax.f32 %v4209_v5, %v4279_v52  ;;  %v14530_v53 = vmax.f32 %v4210_v18, %v4280_v12  ;;  %v14532_v40 = vmax.f32 %v4211_v63, %v4281_v34  ;;  %v10616_v7 = vunpack.i.l.bf16 %v14536_v57  ;;  %v3944_v18 = vld [vmem:[%s13448_s10 + $0x90] sm:$0xff]  ;;  %v3945_v34 = vld [vmem:[%s13448_s10 + $0x98] sm:$0xff] }
 0x476   : > { %4998 = vmatmul.f32.vlgmr.msrb.gmra.mxu0 %v14526_v44  ;;  %v4517_v11 = vld [vmem:[#allocation19 + $0x590] sm:$0xff]  ;;  %v10617_v12 = vunpack.i.h.bf16 %v14536_v57  ;;  %v4580_v57 = vld [vmem:[#allocation19 + $0x788] sm:$0xff] }
 0x477   : > { %5021 = vmatmul.f32.vlgmr.msrb.gmra.mxu1 %v14528_v24  ;;  %5044 = vmatmul.f32.vlgmr.msrb.gmra.mxu3 %v14530_v53  ;;  %v4565_v49 = vld [vmem:[#allocation19 + $0x710] sm:$0xff] }
 0x478   : > { %5067 = vmatmul.f32.vlgmr.msrb.gmra.mxu2 %v14532_v40  ;;  %v14540_v47 = vpop.permute.xlu1 %10609  ;;  %5166 = vmatpush.msrb.mxu0 %v4481_v36  ;;  %v4613_v63 = vld [vmem:[#allocation19 + $0x890] sm:$0xff] }
 0x479   : > { %5189 = vmatpush.msrb.mxu1 %v4529_v31  ;;  %v14544_v26 = vpop.permute.xlu0 %10604  ;;  %5212 = vmatpush.msrb.mxu3 %v4577_v33  ;;  %v10612_v2 = vunpack.i.h.bf16 %v14540_v47  ;;  %v10611_v3 = vunpack.i.l.bf16 %v14540_v47  ;;  %v4466_v31 = vld [vmem:[#allocation19 + $0x3f8] sm:$0xff] }
 0x47a   : > { %5235 = vmatpush.msrb.mxu2 %v4625_v35  ;;  %v10607_v45 = vunpack.i.h.bf16 %v14544_v26  ;;  %v10606_v16 = vunpack.i.l.bf16 %v14544_v26  ;;  %5167 = vmatpush.msrb.mxu0 %v4478_v62  ;;  %v4107_v35 = vmax.f32 %v3945_v34, %v4063_v0  ;;  %v3946_v62 = vld [vmem:[%s13448_s10 + $0xa0] sm:$0xff] }
 0x47b   : > { %5190 = vmatpush.msrb.mxu1 %v4526_v56  ;;  %5213 = vmatpush.msrb.mxu3 %v4574_v6  ;;  %v4177_v52 = vsel %vm951_vm5, %v10611_v3, %v10612_v2  ;;  %v4514_v6 = vld [vmem:[#allocation19 + $0x578] sm:$0xff]  ;;  %v4176_v0 = vsel %vm951_vm5, %v10616_v7, %v10611_v3  ;;  %v4460_v3 = vld [vmem:[#allocation19 + $0x3c8] sm:$0xff]  ;;  %v4487_v26 = vld [vmem:[#allocation19 + $0x4a0] sm:$0xff] }
 0x47c   : > { %v4061_v19 = vsel %vm787_vm7, %v10547_v55, %v10606_v16  ;;  %v4062_v30 = vsel %vm787_vm7, %v10606_v16, %v10601_v51  ;;  %5236 = vmatpush.msrb.mxu2 %v4622_v21  ;;  %5168 = vmatpush.msrb.mxu0 %v4475_v50  ;;  %v4064_v25 = vsel %vm787_vm7, %v10602_v61, %v10607_v45  ;;  %v4616_v55 = vld [vmem:[#allocation19 + $0x8a8] sm:$0xff]  ;;  %v4562_v16 = vld [vmem:[#allocation19 + $0x6f8] sm:$0xff] }
 0x47d   : > { %5191 = vmatpush.msrb.mxu1 %v4523_v46  ;;  %5214 = vmatpush.msrb.mxu3 %v4571_v37  ;;  %v4105_v5 = vmax.f32 %v3943_v14, %v4061_v19  ;;  %v4106_v33 = vmax.f32 %v3944_v18, %v4062_v30  ;;  %v4175_v21 = vsel %vm951_vm5, %v10557_v20, %v10616_v7  ;;  %v10630_v46 = vpop.permute.xlu2 %10629 }
 0x47e   : > { %5237 = vmatpush.msrb.mxu2 %v4619_v23  ;;  %5169 = vmatpush.msrb.mxu0 %v4472_v38  ;;  %v4108_v50 = vmax.f32 %v3946_v62, %v4064_v25  ;;  %v4610_v23 = vld [vmem:[#allocation19 + $0x878] sm:$0xff]  ;;  %v4463_v38 = vld [vmem:[#allocation19 + $0x3e0] sm:$0xff]  ;;  %v4221_v30 = vmax.f32 %v4107_v35, %v4177_v52  ;;  %v4178_v20 = vsel %vm951_vm5, %v10612_v2, %v10617_v12  ;;  %v10631_v18 = vunpack.i.l.bf16 %v10630_v46  ;;  %v4505_v35 = vld [vmem:[#allocation19 + $0x530] sm:$0xff] }
 0x47f   : > { %5192 = vmatpush.msrb.mxu1 %v4520_v54  ;;  %5215 = vmatpush.msrb.mxu3 %v4568_v48  ;;  %v4511_v54 = vld [vmem:[#allocation19 + $0x560] sm:$0xff]  ;;  %v4219_v14 = vmax.f32 %v4105_v5, %v4175_v21  ;;  %v4220_v7 = vmax.f32 %v4106_v33, %v4176_v0  ;;  %v10632_v2 = vunpack.i.h.bf16 %v10630_v46  ;;  %v4604_v5 = vld [vmem:[#allocation19 + $0x848] sm:$0xff]  ;;  %v4553_v62 = vld [vmem:[#allocation19 + $0x6b0] sm:$0xff] }
 0x480   : > { %v14566_v36 = vpop.permute.xlu1 %10624  ;;  %5238 = vmatpush.msrb.mxu2 %v4616_v55  ;;  %5170 = vmatpush.msrb.mxu0 %v4469_v13  ;;  %v4559_v48 = vld [vmem:[#allocation19 + $0x6e0] sm:$0xff]  ;;  %v4054_v33 = vsel %vm787_vm7, %v10577_v60, %v10631_v18  ;;  %v3936_v46 = vld [vmem:[%s13448_s10 + $0x48] sm:$0xff]  ;;  %v4502_v60 = vld [vmem:[#allocation19 + $0x518] sm:$0xff] }
 0x481   : > { %v10627_v56 = vunpack.i.h.bf16 %v14566_v36  ;;  %v10626_v61 = vunpack.i.l.bf16 %v14566_v36  ;;  %v10620_v51 = vpop.permute.xlu0 %10619  ;;  %5193 = vmatpush.msrb.mxu1 %v4517_v11  ;;  %5216 = vmatpush.msrb.mxu3 %v4565_v49  ;;  %v4607_v25 = vld [vmem:[#allocation19 + $0x860] sm:$0xff]  ;;  %v4222_v49 = vmax.f32 %v4108_v50, %v4178_v20 }
 0x482   : > { %v10622_v37 = vunpack.i.h.bf16 %v10620_v51  ;;  %v10621_v19 = vunpack.i.l.bf16 %v10620_v51  ;;  %5239 = vmatpush.msrb.mxu2 %v4613_v63  ;;  %5171 = vmatpush.msrb.mxu0 %v4466_v31  ;;  %v4457_v31 = vld [vmem:[#allocation19 + $0x3b0] sm:$0xff]  ;;  %v4055_v51 = vsel %vm787_vm7, %v10631_v18, %v10632_v2  ;;  %v4547_v20 = vld [vmem:[#allocation19 + $0x680] sm:$0xff]  ;;  %v4544_v18 = vld [vmem:[#allocation19 + $0x668] sm:$0xff] }
 0x483   : > { %v4289_v41 = vsel %vm1033_vm4, %v10567_v43, %v10626_v61  ;;  %5194 = vmatpush.msrb.mxu1 %v4514_v6  ;;  %5217 = vmatpush.msrb.mxu3 %v4562_v16  ;;  %v4556_v43 = vld [vmem:[#allocation19 + $0x6c8] sm:$0xff]  ;;  %v4601_v6 = vld [vmem:[#allocation19 + $0x830] sm:$0xff]  ;;  %v4667_v36 = vld [vmem:[#allocation19 + $0xa40] sm:$0xff] }
 0x484   : > { %v4290_v55 = vsel %vm1033_vm4, %v10626_v61, %v10621_v19  ;;  %v4291_v13 = vsel %vm1033_vm4, %v10621_v19, %v10622_v37  ;;  %5240 = vmatpush.msrb.mxu2 %v4610_v23  ;;  %5172 = vmatpush.msrb.mxu0 %v4463_v38  ;;  %v14585_v11 = vmax.f32 %v4219_v14, %v4289_v41  ;;  %v3937_v19 = vld [vmem:[%s13448_s10 + $0x50] sm:$0xff]  ;;  %v4499_v41 = vld [vmem:[#allocation19 + $0x500] sm:$0xff] }
 0x485   : > { %v4292_v47 = vsel %vm1033_vm4, %v10622_v37, %v10627_v56  ;;  %5195 = vmatpush.msrb.mxu1 %v4511_v54  ;;  %5218 = vmatpush.msrb.mxu3 %v4559_v48  ;;  %v14590_v34 = vmax.f32 %v4220_v7, %v4290_v55  ;;  %v14592_v52 = vmax.f32 %v4221_v30, %v4291_v13  ;;  %v4550_v37 = vld [vmem:[#allocation19 + $0x698] sm:$0xff]  ;;  %v4451_v54 = vld [vmem:[#allocation19 + $0x380] sm:$0xff]  ;;  %v4448_v13 = vld [vmem:[#allocation19 + $0x368] sm:$0xff] }
 0x486   : > { %5241 = vmatpush.msrb.mxu2 %v4607_v25  ;;  %5173 = vmatpush.msrb.mxu0 %v4460_v3  ;;  %v14594_v63 = vmax.f32 %v4222_v49, %v4292_v47  ;;  %v4098_v23 = vmax.f32 %v3936_v46, %v4054_v33  ;;  %v4598_v30 = vld [vmem:[#allocation19 + $0x818] sm:$0xff]  ;;  %v4099_v48 = vmax.f32 %v3937_v19, %v4055_v51  ;;  %v10645_v25 = vpop.permute.xlu2 %10644  ;;  %v4595_v55 = vld [vmem:[#allocation19 + $0x800] sm:$0xff]  ;;  %v4445_v47 = vld [vmem:[#allocation19 + $0x350] sm:$0xff] }
 0x487   : > { %5196 = vmatpush.msrb.mxu1 %v4508_v17  ;;  %5219 = vmatpush.msrb.mxu3 %v4556_v43  ;;  %v4592_v17 = vld [vmem:[#allocation19 + $0x7e8] sm:$0xff]  ;;  %v10646_v43 = vunpack.i.l.bf16 %v10645_v25  ;;  %v4493_v33 = vld [vmem:[#allocation19 + $0x4d0] sm:$0xff]  ;;  %v4535_v19 = vld [vmem:[#allocation19 + $0x620] sm:$0xff] }
 0x488   : > { %5242 = vmatpush.msrb.mxu2 %v4604_v5  ;;  %5001 = vmatmul.f32.gmra.mxu0 %v14585_v11  ;;  %v10640_v16 = vpop.permute.xlu1 %10639  ;;  %v10647_v5 = vunpack.i.h.bf16 %v10645_v25 }
 0x489   : > { %v10635_v61 = vpop.permute.xlu0 %10634  ;;  %5024 = vmatmul.f32.gmra.mxu1 %v14590_v34  ;;  %5047 = vmatmul.f32.gmra.mxu3 %v14592_v52  ;;  %v10641_v14 = vunpack.i.l.bf16 %v10640_v16  ;;  %v10642_v3 = vunpack.i.h.bf16 %v10640_v16  ;;  %v4065_v16 = vsel %vm787_vm7, %v10607_v45, %v10646_v43 }
 0x48a   : > { %v10637_v21 = vunpack.i.h.bf16 %v10635_v61  ;;  %v10636_v50 = vunpack.i.l.bf16 %v10635_v61  ;;  %5070 = vmatmul.f32.gmra.mxu2 %v14594_v63  ;;  %5174 = vmatpush.msrb.mxu0 %v4457_v31  ;;  %v4589_v61 = vld [vmem:[#allocation19 + $0x7d0] sm:$0xff] }
 0x48b   : > { %5197 = vmatpush.msrb.mxu1 %v4505_v35  ;;  %5220 = vmatpush.msrb.mxu3 %v4553_v62  ;;  %v4282_v49 = vsel %vm1033_vm4, %v10597_v42, %v10641_v14  ;;  %v4283_v31 = vsel %vm1033_vm4, %v10641_v14, %v10642_v3  ;;  %v4541_v35 = vld [vmem:[#allocation19 + $0x650] sm:$0xff] }
 0x48c   : > { %v4168_v38 = vsel %vm951_vm5, %v10587_v8, %v10636_v50  ;;  %v4169_v0 = vsel %vm951_vm5, %v10636_v50, %v10637_v21  ;;  %5243 = vmatpush.msrb.mxu2 %v4601_v6  ;;  %5175 = vmatpush.msrb.mxu0 %v4454_v10  ;;  %v4496_v8 = vld [vmem:[#allocation19 + $0x4e8] sm:$0xff]  ;;  %v4442_v6 = vld [vmem:[#allocation19 + $0x338] sm:$0xff]  ;;  %v4066_v10 = vsel %vm787_vm7, %v10646_v43, %v10647_v5 }
 0x48d   : > { %v4212_v7 = vmax.f32 %v4098_v23, %v4168_v38  ;;  %5198 = vmatpush.msrb.mxu1 %v4502_v60  ;;  %5221 = vmatpush.msrb.mxu3 %v4550_v37  ;;  %v4213_v28 = vmax.f32 %v4099_v48, %v4169_v0  ;;  %v4490_v21 = vld [vmem:[#allocation19 + $0x4b8] sm:$0xff]  ;;  %v4439_v37 = vld [vmem:[#allocation19 + $0x320] sm:$0xff]  ;;  %v3947_v23 = vld [vmem:[%s13448_s10 + $0xa8] sm:$0xff] }
 0x48e   : > { %5244 = vmatpush.msrb.mxu2 %v4598_v30  ;;  %5176 = vmatpush.msrb.mxu0 %v4451_v54  ;;  %v4538_v50 = vld [vmem:[#allocation19 + $0x638] sm:$0xff]  ;;  %v4583_v38 = vld [vmem:[#allocation19 + $0x7a0] sm:$0xff]  ;;  %v4436_v0 = vld [vmem:[#allocation19 + $0x308] sm:$0xff]  ;;  %v4109_v30 = vmax.f32 %v3947_v23, %v4065_v16 }
 0x48f   : > { %5199 = vmatpush.msrb.mxu1 %v4499_v41  ;;  %5222 = vmatpush.msrb.mxu3 %v4547_v20  ;;  %v14614_v62 = vmax.f32 %v4212_v7, %v4282_v49  ;;  %v14617_v51 = vmax.f32 %v4213_v28, %v4283_v31  ;;  %v4586_v60 = vld [vmem:[#allocation19 + $0x7b8] sm:$0xff]  ;;  %v3948_v54 = vld [vmem:[%s13448_s10 + $0xb0] sm:$0xff]  ;;  %v4484_v41 = vld [vmem:[#allocation19 + $0x488] sm:$0xff] }
 0x490   : > { %5245 = vmatpush.msrb.mxu2 %v4595_v55  ;;  %5177 = vmatpush.msrb.mxu0 %v4448_v13  ;;  %v10655_v46 = vpop.permute.xlu1 %10654  ;;  %v4532_v20 = vld [vmem:[#allocation19 + $0x608] sm:$0xff]  ;;  %v4110_v25 = vmax.f32 %v3948_v54, %v4066_v10  ;;  %v4673_v7 = vld [vmem:[#allocation19 + $0xa70] sm:$0xff]  ;;  %v4718_v43 = vld [vmem:[#allocation19 + $0xbd8] sm:$0xff] }
 0x491   : > { %v10650_v2 = vpop.permute.xlu0 %10649  ;;  %5200 = vmatpush.msrb.mxu1 %v4496_v8  ;;  %5223 = vmatpush.msrb.mxu3 %v4544_v18  ;;  %v10656_v14 = vunpack.i.l.bf16 %v10655_v46  ;;  %v10657_v3 = vunpack.i.h.bf16 %v10655_v46  ;;  %v4721_v55 = vld [vmem:[#allocation19 + $0xbf0] sm:$0xff]  ;;  %v4670_v18 = vld [vmem:[#allocation19 + $0xa58] sm:$0xff]  ;;  %v4703_v23 = vld [vmem:[#allocation19 + $0xb60] sm:$0xff] }
 0x492   : > { %5246 = vmatpush.msrb.mxu2 %v4592_v17  ;;  %5136 = vmatmul.f32.vlgmr.msra.gmra.mxu3 %v14300_v27  ;;  %v10651_v15 = vunpack.i.l.bf16 %v10650_v2  ;;  %v10652_v42 = vunpack.i.h.bf16 %v10650_v2  ;;  %v4769_v13 = vld [vmem:[#allocation19 + $0xd70] sm:$0xff]  ;;  %v4766_v49 = vld [vmem:[#allocation19 + $0xd58] sm:$0xff]  ;;  %v4748_v54 = vld [vmem:[#allocation19 + $0xcc8] sm:$0xff] }
 0x493   : > { %5159 = vmatmul.f32.vlgmr.msra.gmra.mxu2 %v14403_v9  ;;  %5178 = vmatpush.msrb.mxu0 %v4445_v47  ;;  %v4817_v8 = vld [vmem:[#allocation19 + $0xef0] sm:$0xff]  ;;  %v4293_v17 = vsel %vm1033_vm4, %v10627_v56, %v10656_v14  ;;  %v4294_v2 = vsel %vm1033_vm4, %v10656_v14, %v10657_v3  ;;  %v4814_v5 = vld [vmem:[#allocation19 + $0xed8] sm:$0xff]  ;;  %v4715_v56 = vld [vmem:[#allocation19 + $0xbc0] sm:$0xff]  ;;  %vm7684_vm4 = vcmask 949248  }
 0x494   : > { %5201 = vmatpush.msrb.mxu1 %v4493_v33  ;;  %5224 = vmatpush.msrb.mxu3 %v4541_v35  ;;  %v4179_v45 = vsel %vm951_vm5, %v10617_v12, %v10651_v15  ;;  %v4180_v48 = vsel %vm951_vm5, %v10651_v15, %v10652_v42  ;;  %v4763_v33 = vld [vmem:[#allocation19 + $0xd40] sm:$0xff]  ;;  %v4712_v15 = vld [vmem:[#allocation19 + $0xba8] sm:$0xff]  ;;  %v4661_v16 = vld [vmem:[#allocation19 + $0xa10] sm:$0xff]  ;;  %vm7639_vm5 = vcmask 982016  }
 0x495   : > { %5247 = vmatpush.msrb.mxu2 %v4589_v61  ;;  %5090 = vmatmul.f32.vlgmr.msra.gmra.mxu0 %v14614_v62  ;;  %v4223_v12 = vmax.f32 %v4109_v30, %v4179_v45  ;;  %v4224_v28 = vmax.f32 %v4110_v25, %v4180_v48  ;;  %v4811_v35 = vld [vmem:[#allocation19 + $0xec0] sm:$0xff]  ;;  %v4664_v61 = vld [vmem:[#allocation19 + $0xa28] sm:$0xff]  ;;  %v4805_v10 = vld [vmem:[#allocation19 + $0xe90] sm:$0xff] }
 0x496   : > { %5113 = vmatmul.f32.vlgmr.msra.gmra.mxu1 %v14617_v51  ;;  %5179 = vmatpush.msrb.mxu0 %v4442_v6  ;;  %v4760_v42 = vld [vmem:[#allocation19 + $0xd28] sm:$0xff]  ;;  %v4658_v46 = vld [vmem:[#allocation19 + $0x9f8] sm:$0xff]  ;;  %v4751_v45 = vld [vmem:[#allocation19 + $0xce0] sm:$0xff] }
 0x497   : > { %5202 = vmatpush.msrb.mxu1 %v4490_v21  ;;  %5225 = vmatpush.msrb.mxu3 %v4538_v50  ;;  %v14635_v47 = vmax.f32 %v4223_v12, %v4293_v17  ;;  %v14639_v31 = vmax.f32 %v4224_v28, %v4294_v2  ;;  %v4808_v6 = vld [vmem:[#allocation19 + $0xea8] sm:$0xff]  ;;  %v4709_v21 = vld [vmem:[#allocation19 + $0xb90] sm:$0xff]  ;;  %v4646_v3 = vld [vmem:[#allocation19 + $0x998] sm:$0xff] }
 0x498   : > { %5248 = vmatpush.msrb.mxu2 %v4586_v60  ;;  %5180 = vmatpush.msrb.mxu0 %v4439_v37  ;;  %v4757_v50 = vld [vmem:[#allocation19 + $0xd10] sm:$0xff]  ;;  %v4706_v60 = vld [vmem:[#allocation19 + $0xb78] sm:$0xff]  ;;  %v4700_v30 = vld [vmem:[#allocation19 + $0xb48] sm:$0xff] }
 0x499   : > { %5203 = vmatpush.msrb.mxu1 %v4487_v26  ;;  %5226 = vmatpush.msrb.mxu3 %v4535_v19  ;;  %v4754_v37 = vld [vmem:[#allocation19 + $0xcf8] sm:$0xff]  ;;  %v4655_v19 = vld [vmem:[#allocation19 + $0x9e0] sm:$0xff]  ;;  %v4796_v48 = vld [vmem:[#allocation19 + $0xe48] sm:$0xff] }
 0x49a   : > { %5249 = vmatpush.msrb.mxu2 %v4583_v38  ;;  %5181 = vmatpush.msrb.mxu0 %v4436_v0  ;;  %v4802_v26 = vld [vmem:[#allocation19 + $0xe78] sm:$0xff]  ;;  %v4799_v38 = vld [vmem:[#allocation19 + $0xe60] sm:$0xff]  ;;  %v4652_v0 = vld [vmem:[#allocation19 + $0x9c8] sm:$0xff] }
 0x49b   : > { %5204 = vmatpush.msrb.mxu1 %v4484_v41  ;;  %5227 = vmatpush.msrb.mxu3 %v4532_v20  ;;  %v4649_v14 = vld [vmem:[#allocation19 + $0x9b0] sm:$0xff]  ;;  %v4790_v12 = vld [vmem:[#allocation19 + $0xe18] sm:$0xff]  ;;  %v4739_v28 = vld [vmem:[#allocation19 + $0xc80] sm:$0xff] }
 0x49c   : > { %5250 = vmatpush.msrb.mxu2 %v4580_v57  ;;  %5258 = vmatpush.msra.mxu0 %v4673_v7  ;;  %v4697_v41 = vld [vmem:[#allocation19 + $0xb30] sm:$0xff]  ;;  %v4694_v57 = vld [vmem:[#allocation19 + $0xb18] sm:$0xff]  ;;  %v4688_v17 = vld [vmem:[#allocation19 + $0xae8] sm:$0xff] }
 0x49d   : > { %5281 = vmatpush.msra.mxu1 %v4721_v55  ;;  %5304 = vmatpush.msra.mxu3 %v4769_v13  ;;  %v4745_v20 = vld [vmem:[#allocation19 + $0xcb0] sm:$0xff]  ;;  %v4742_v7 = vld [vmem:[#allocation19 + $0xc98] sm:$0xff]  ;;  %v4643_v55 = vld [vmem:[#allocation19 + $0x980] sm:$0xff] }
 0x49e   : > { %5327 = vmatpush.msra.mxu2 %v4817_v8  ;;  %5139 = vmatmul.f32.gmra.mxu3 %v14324_v29  ;;  %v4793_v25 = vld [vmem:[#allocation19 + $0xe30] sm:$0xff]  ;;  %v4691_v13 = vld [vmem:[#allocation19 + $0xb00] sm:$0xff] }
 0x49f   : > { %5162 = vmatmul.f32.gmra.mxu2 %v14458_v58  ;;  %5259 = vmatpush.msra.mxu0 %v4670_v18  ;;  %v4787_v8 = vld [vmem:[#allocation19 + $0xe00] sm:$0xff]  ;;  %v4640_v18 = vld [vmem:[#allocation19 + $0x968] sm:$0xff]  ;;  %v4637_v2 = vld [vmem:[#allocation19 + $0x950] sm:$0xff] }
 0x4a0   : > { %5282 = vmatpush.msra.mxu1 %v4718_v43  ;;  %5305 = vmatpush.msra.mxu3 %v4766_v49  ;;  %v4736_v43 = vld [vmem:[#allocation19 + $0xc68] sm:$0xff] }
 0x4a1   : > { %5328 = vmatpush.msra.mxu2 %v4814_v5  ;;  %5093 = vmatmul.f32.gmra.mxu0 %v14635_v47  ;;  %v4784_v49 = vld [vmem:[#allocation19 + $0xde8] sm:$0xff]  ;;  %v4685_v5 = vld [vmem:[#allocation19 + $0xad0] sm:$0xff] }
 0x4a2   : > { %5116 = vmatmul.f32.gmra.mxu1 %v14639_v31  ;;  %5260 = vmatpush.msra.mxu0 %v4667_v36  ;;  %v4733_v36 = vld [vmem:[#allocation19 + $0xc50] sm:$0xff] }
 0x4a3   : > { %5283 = vmatpush.msra.mxu1 %v4715_v56  ;;  %5306 = vmatpush.msra.mxu3 %v4763_v33  ;;  %v4781_v56 = vld [vmem:[#allocation19 + $0xdd0] sm:$0xff]  ;;  %v4634_v33 = vld [vmem:[#allocation19 + $0x938] sm:$0xff] }
 0x4a4   : > { %5329 = vmatpush.msra.mxu2 %v4811_v35  ;;  %5261 = vmatpush.msra.mxu0 %v4664_v61  ;;  %v4682_v35 = vld [vmem:[#allocation19 + $0xab8] sm:$0xff] }
 0x4a5   : > { %5284 = vmatpush.msra.mxu1 %v4712_v15  ;;  %5307 = vmatpush.msra.mxu3 %v4760_v42  ;;  %v4730_v61 = vld [vmem:[#allocation19 + $0xc38] sm:$0xff]  ;;  %v4631_v42 = vld [vmem:[#allocation19 + $0x920] sm:$0xff] }
 0x4a6   : > { %5330 = vmatpush.msra.mxu2 %v4808_v6  ;;  %5262 = vmatpush.msra.mxu0 %v4661_v16  ;;  %v4778_v15 = vld [vmem:[#allocation19 + $0xdb8] sm:$0xff]  ;;  %v4679_v6 = vld [vmem:[#allocation19 + $0xaa0] sm:$0xff] }
 0x4a7   : > { %5285 = vmatpush.msra.mxu1 %v4709_v21  ;;  %5308 = vmatpush.msra.mxu3 %v4757_v50  ;;  %v4727_v16 = vld [vmem:[#allocation19 + $0xc20] sm:$0xff]  ;;  %v4628_v50 = vld [vmem:[#allocation19 + $0x908] sm:$0xff] }
 0x4a8   : > { %5331 = vmatpush.msra.mxu2 %v4805_v10  ;;  %5228 = vmatmul.f32.vlgmr.msrb.gmra.mxu3 %v14419_v22  ;;  %v4775_v21 = vld [vmem:[#allocation19 + $0xda0] sm:$0xff]  ;;  %v4676_v10 = vld [vmem:[#allocation19 + $0xa88] sm:$0xff] }
 0x4a9   : > { %5251 = vmatmul.f32.vlgmr.msrb.gmra.mxu2 %v14526_v44  ;;  %5263 = vmatpush.msra.mxu0 %v4658_v46  ;;  %v4724_v46 = vld [vmem:[#allocation19 + $0xc08] sm:$0xff] }
 0x4aa   : > { %5286 = vmatpush.msra.mxu1 %v4706_v60  ;;  %5309 = vmatpush.msra.mxu3 %v4754_v37  ;;  %v4772_v60 = vld [vmem:[#allocation19 + $0xd88] sm:$0xff]  ;;  %v4865_v37 = vld [vmem:[#allocation19 + $0x1070] sm:$0xff] }
 0x4ab   : > { %5332 = vmatpush.msra.mxu2 %v4802_v26  ;;  %5182 = vmatmul.f32.vlgmr.msrb.gmra.mxu0 %v14415_v59  ;;  %v4386_v26 = vld [vmem:[#allocation19 + $0x178] sm:$0xff] }
 0x4ac   : > { %5205 = vmatmul.f32.vlgmr.msrb.gmra.mxu1 %v14417_v39  ;;  %5264 = vmatpush.msra.mxu0 %v4655_v19  ;;  %v4434_v19 = vld [vmem:[#allocation19 + $0x2f8] sm:$0xff] }
 0x4ad   : > { %5287 = vmatpush.msra.mxu1 %v4703_v23  ;;  %5310 = vmatpush.msra.mxu3 %v4751_v45  ;;  %v4482_v23 = vld [vmem:[#allocation19 + $0x478] sm:$0xff] }
 0x4ae   : > { %5333 = vmatpush.msra.mxu2 %v4799_v38  ;;  %5265 = vmatpush.msra.mxu0 %v4652_v0  ;;  %v4862_v45 = vld [vmem:[#allocation19 + $0x1058] sm:$0xff]  ;;  %v4383_v38 = vld [vmem:[#allocation19 + $0x160] sm:$0xff] }
 0x4af   : > { %5288 = vmatpush.msra.mxu1 %v4700_v30  ;;  %5311 = vmatpush.msra.mxu3 %v4748_v54  ;;  %v4431_v0 = vld [vmem:[#allocation19 + $0x2e0] sm:$0xff] }
 0x4b0   : > { %5334 = vmatpush.msra.mxu2 %v4796_v48  ;;  %5266 = vmatpush.msra.mxu0 %v4649_v14  ;;  %v4479_v30 = vld [vmem:[#allocation19 + $0x460] sm:$0xff]  ;;  %v4380_v48 = vld [vmem:[#allocation19 + $0x148] sm:$0xff] }
 0x4b1   : > { %5289 = vmatpush.msra.mxu1 %v4697_v41  ;;  %5312 = vmatpush.msra.mxu3 %v4745_v20  ;;  %v4859_v54 = vld [vmem:[#allocation19 + $0x1040] sm:$0xff]  ;;  %v4428_v14 = vld [vmem:[#allocation19 + $0x2c8] sm:$0xff] }
 0x4b2   : > { %5335 = vmatpush.msra.mxu2 %v4793_v25  ;;  %5231 = vmatmul.f32.gmra.mxu3 %v14477_v32  ;;  %v4476_v41 = vld [vmem:[#allocation19 + $0x448] sm:$0xff]  ;;  %v4377_v25 = vld [vmem:[#allocation19 + $0x130] sm:$0xff] }
 0x4b3   : > { %5254 = vmatmul.f32.gmra.mxu2 %v14585_v11  ;;  %5267 = vmatpush.msra.mxu0 %v4646_v3  ;;  %v4856_v20 = vld [vmem:[#allocation19 + $0x1028] sm:$0xff]  ;;  %v4425_v3 = vld [vmem:[#allocation19 + $0x2b0] sm:$0xff] }
 0x4b4   : > { %5290 = vmatpush.msra.mxu1 %v4694_v57  ;;  %5313 = vmatpush.msra.mxu3 %v4742_v7  ;;  %v4473_v57 = vld [vmem:[#allocation19 + $0x430] sm:$0xff] }
 0x4b5   : > { %5336 = vmatpush.msra.mxu2 %v4790_v12  ;;  %5185 = vmatmul.f32.gmra.mxu0 %v14473_v1  ;;  %v4853_v7 = vld [vmem:[#allocation19 + $0x1010] sm:$0xff]  ;;  %v4374_v12 = vld [vmem:[#allocation19 + $0x118] sm:$0xff] }
 0x4b6   : > { %5208 = vmatmul.f32.gmra.mxu1 %v14475_v4  ;;  %5268 = vmatpush.msra.mxu0 %v4643_v55  ;;  %v4422_v55 = vld [vmem:[#allocation19 + $0x298] sm:$0xff] }
 0x4b7   : > { %5291 = vmatpush.msra.mxu1 %v4691_v13  ;;  %5314 = vmatpush.msra.mxu3 %v4739_v28  ;;  %v4470_v13 = vld [vmem:[#allocation19 + $0x418] sm:$0xff] }
 0x4b8   : > { %5337 = vmatpush.msra.mxu2 %v4787_v8  ;;  %5269 = vmatpush.msra.mxu0 %v4640_v18  ;;  %v4850_v28 = vld [vmem:[#allocation19 + $0xff8] sm:$0xff]  ;;  %v4371_v8 = vld [vmem:[#allocation19 + $0x100] sm:$0xff] }
 0x4b9   : > { %5292 = vmatpush.msra.mxu1 %v4688_v17  ;;  %5315 = vmatpush.msra.mxu3 %v4736_v43  ;;  %v4419_v18 = vld [vmem:[#allocation19 + $0x280] sm:$0xff] }
 0x4ba   : > { %5338 = vmatpush.msra.mxu2 %v4784_v49  ;;  %5270 = vmatpush.msra.mxu0 %v4637_v2  ;;  %v4467_v17 = vld [vmem:[#allocation19 + $0x400] sm:$0xff]  ;;  %v4368_v49 = vld [vmem:[#allocation19 + $0xe8] sm:$0xff] }
 0x4bb   : > { %5293 = vmatpush.msra.mxu1 %v4685_v5  ;;  %5316 = vmatpush.msra.mxu3 %v4733_v36  ;;  %v4847_v43 = vld [vmem:[#allocation19 + $0xfe0] sm:$0xff]  ;;  %v4416_v2 = vld [vmem:[#allocation19 + $0x268] sm:$0xff] }
 0x4bc   : > { %5339 = vmatpush.msra.mxu2 %v4781_v56  ;;  %5271 = vmatpush.msra.mxu0 %v4634_v33  ;;  %v4464_v5 = vld [vmem:[#allocation19 + $0x3e8] sm:$0xff]  ;;  %v4365_v56 = vld [vmem:[#allocation19 + $0xd0] sm:$0xff] }
 0x4bd   : > { %5294 = vmatpush.msra.mxu1 %v4682_v35  ;;  %5317 = vmatpush.msra.mxu3 %v4730_v61  ;;  %v4844_v36 = vld [vmem:[#allocation19 + $0xfc8] sm:$0xff]  ;;  %v4413_v33 = vld [vmem:[#allocation19 + $0x250] sm:$0xff] }
 0x4be   : > { %5340 = vmatpush.msra.mxu2 %v4778_v15  ;;  %5272 = vmatpush.msra.mxu0 %v4631_v42  ;;  %v4461_v35 = vld [vmem:[#allocation19 + $0x3d0] sm:$0xff]  ;;  %v4362_v15 = vld [vmem:[#allocation19 + $0xb8] sm:$0xff] }
 0x4bf   : > { %5295 = vmatpush.msra.mxu1 %v4679_v6  ;;  %5318 = vmatpush.msra.mxu3 %v4727_v16  ;;  %v4841_v61 = vld [vmem:[#allocation19 + $0xfb0] sm:$0xff]  ;;  %v4410_v42 = vld [vmem:[#allocation19 + $0x238] sm:$0xff] }
 0x4c0   : > { %5341 = vmatpush.msra.mxu2 %v4775_v21  ;;  %5273 = vmatpush.msra.mxu0 %v4628_v50  ;;  %v4458_v6 = vld [vmem:[#allocation19 + $0x3b8] sm:$0xff]  ;;  %v4359_v21 = vld [vmem:[#allocation19 + $0xa0] sm:$0xff] }
 0x4c1   : > { %5296 = vmatpush.msra.mxu1 %v4676_v10  ;;  %5319 = vmatpush.msra.mxu3 %v4724_v46  ;;  %v4838_v16 = vld [vmem:[#allocation19 + $0xf98] sm:$0xff]  ;;  %v4407_v50 = vld [vmem:[#allocation19 + $0x220] sm:$0xff] }
 0x4c2   : > { %5342 = vmatpush.msra.mxu2 %v4772_v60  ;;  %5274 = vmatmul.f32.vlgmr.msra.gmra.mxu0 %v14528_v24  ;;  %v4455_v10 = vld [vmem:[#allocation19 + $0x3a0] sm:$0xff]  ;;  %v4356_v60 = vld [vmem:[#allocation19 + $0x88] sm:$0xff] }
 0x4c3   : > { %5297 = vmatmul.f32.vlgmr.msra.gmra.mxu1 %v14530_v53  ;;  %5320 = vmatmul.f32.vlgmr.msra.gmra.mxu3 %v14532_v40  ;;  %v4835_v46 = vld [vmem:[#allocation19 + $0xf80] sm:$0xff] }
 0x4c4   : > { %5343 = vmatmul.f32.vlgmr.msra.gmra.mxu2 %v14614_v62  ;;  %5350 = vmatpush.msrb.mxu0 %v4865_v37  ;;  %v4404_v37 = vld [vmem:[#allocation19 + $0x208] sm:$0xff] }
 0x4c5   : > { %5373 = vmatpush.msrb.mxu1 %v4386_v26  ;;  %5396 = vmatpush.msrb.mxu3 %v4434_v19  ;;  %v4452_v26 = vld [vmem:[#allocation19 + $0x388] sm:$0xff] }
 0x4c6   : > { %5419 = vmatpush.msrb.mxu2 %v4482_v23  ;;  %5351 = vmatpush.msrb.mxu0 %v4862_v45  ;;  %v4832_v19 = vld [vmem:[#allocation19 + $0xf68] sm:$0xff]  ;;  %v4353_v23 = vld [vmem:[#allocation19 + $0x70] sm:$0xff] }
 0x4c7   : > { %5374 = vmatpush.msrb.mxu1 %v4383_v38  ;;  %5397 = vmatpush.msrb.mxu3 %v4431_v0  ;;  %v4401_v45 = vld [vmem:[#allocation19 + $0x1f0] sm:$0xff] }
 0x4c8   : > { %5420 = vmatpush.msrb.mxu2 %v4479_v30  ;;  %5352 = vmatpush.msrb.mxu0 %v4859_v54  ;;  %v4449_v38 = vld [vmem:[#allocation19 + $0x370] sm:$0xff]  ;;  %v4350_v30 = vld [vmem:[#allocation19 + $0x58] sm:$0xff] }
 0x4c9   : > { %5375 = vmatpush.msrb.mxu1 %v4380_v48  ;;  %5398 = vmatpush.msrb.mxu3 %v4428_v14  ;;  %v4829_v0 = vld [vmem:[#allocation19 + $0xf50] sm:$0xff]  ;;  %v4398_v54 = vld [vmem:[#allocation19 + $0x1d8] sm:$0xff] }
 0x4ca   : > { %5421 = vmatpush.msrb.mxu2 %v4476_v41  ;;  %5353 = vmatpush.msrb.mxu0 %v4856_v20  ;;  %v4446_v48 = vld [vmem:[#allocation19 + $0x358] sm:$0xff]  ;;  %v4347_v41 = vld [vmem:[#allocation19 + $0x40] sm:$0xff] }
 0x4cb   : > { %5376 = vmatpush.msrb.mxu1 %v4377_v25  ;;  %5399 = vmatpush.msrb.mxu3 %v4425_v3  ;;  %v4826_v14 = vld [vmem:[#allocation19 + $0xf38] sm:$0xff]  ;;  %v4395_v20 = vld [vmem:[#allocation19 + $0x1c0] sm:$0xff] }
 0x4cc   : > { %5422 = vmatpush.msrb.mxu2 %v4473_v57  ;;  %5277 = vmatmul.f32.gmra.mxu0 %v14590_v34  ;;  %v4443_v25 = vld [vmem:[#allocation19 + $0x340] sm:$0xff]  ;;  %v4344_v57 = vld [vmem:[#allocation19 + $0x28] sm:$0xff] }
 0x4cd   : > { %5300 = vmatmul.f32.gmra.mxu1 %v14592_v52  ;;  %5323 = vmatmul.f32.gmra.mxu3 %v14594_v63  ;;  %v4823_v3 = vld [vmem:[#allocation19 + $0xf20] sm:$0xff] }
 0x4ce   : > { %5346 = vmatmul.f32.gmra.mxu2 %v14635_v47  ;;  %5354 = vmatpush.msrb.mxu0 %v4853_v7  ;;  %v4392_v7 = vld [vmem:[#allocation19 + $0x1a8] sm:$0xff] }
 0x4cf   : > { %5377 = vmatpush.msrb.mxu1 %v4374_v12  ;;  %5400 = vmatpush.msrb.mxu3 %v4422_v55  ;;  %v4440_v12 = vld [vmem:[#allocation19 + $0x328] sm:$0xff] }
 0x4d0   : > { %5423 = vmatpush.msrb.mxu2 %v4470_v13  ;;  %5355 = vmatpush.msrb.mxu0 %v4850_v28  ;;  %v4820_v55 = vld [vmem:[#allocation19 + $0xf08] sm:$0xff]  ;;  %v4341_v13 = vld [vmem:[#allocation19 + $0x10] sm:$0xff] }
 0x4d1   : > { %5378 = vmatpush.msrb.mxu1 %v4371_v8  ;;  %5401 = vmatpush.msrb.mxu3 %v4419_v18  ;;  %v4389_v28 = vld [vmem:[#allocation19 + $0x190] sm:$0xff]  ;;  %v4530_v18 = vld [vmem:[#allocation19 + $0x5f8] sm:$0xff] }
 0x4d2   : > { %5424 = vmatpush.msrb.mxu2 %v4467_v17  ;;  %5356 = vmatpush.msrb.mxu0 %v4847_v43  ;;  %v4437_v8 = vld [vmem:[#allocation19 + $0x310] sm:$0xff]  ;;  %v4578_v17 = vld [vmem:[#allocation19 + $0x778] sm:$0xff] }
 0x4d3   : > { %5379 = vmatpush.msrb.mxu1 %v4368_v49  ;;  %5402 = vmatpush.msrb.mxu3 %v4416_v2  ;;  %v4626_v43 = vld [vmem:[#allocation19 + $0x8f8] sm:$0xff]  ;;  %v4527_v2 = vld [vmem:[#allocation19 + $0x5e0] sm:$0xff] }
 0x4d4   : > { %5425 = vmatpush.msrb.mxu2 %v4464_v5  ;;  %5357 = vmatpush.msrb.mxu0 %v4844_v36  ;;  %v4674_v49 = vld [vmem:[#allocation19 + $0xa78] sm:$0xff]  ;;  %v4575_v5 = vld [vmem:[#allocation19 + $0x760] sm:$0xff] }
 0x4d5   : > { %5380 = vmatpush.msrb.mxu1 %v4365_v56  ;;  %5403 = vmatpush.msrb.mxu3 %v4413_v33  ;;  %v4623_v36 = vld [vmem:[#allocation19 + $0x8e0] sm:$0xff]  ;;  %v4524_v33 = vld [vmem:[#allocation19 + $0x5c8] sm:$0xff] }
 0x4d6   : > { %5426 = vmatpush.msrb.mxu2 %v4461_v35  ;;  %5358 = vmatpush.msrb.mxu0 %v4841_v61  ;;  %v4671_v56 = vld [vmem:[#allocation19 + $0xa60] sm:$0xff]  ;;  %v4572_v35 = vld [vmem:[#allocation19 + $0x748] sm:$0xff] }
 0x4d7   : > { %5381 = vmatpush.msrb.mxu1 %v4362_v15  ;;  %5404 = vmatpush.msrb.mxu3 %v4410_v42  ;;  %v4620_v61 = vld [vmem:[#allocation19 + $0x8c8] sm:$0xff]  ;;  %v4521_v15 = vld [vmem:[#allocation19 + $0x5b0] sm:$0xff] }
 0x4d8   : > { %5427 = vmatpush.msrb.mxu2 %v4458_v6  ;;  %5359 = vmatpush.msrb.mxu0 %v4838_v16  ;;  %v4617_v42 = vld [vmem:[#allocation19 + $0x8b0] sm:$0xff]  ;;  %v4518_v6 = vld [vmem:[#allocation19 + $0x598] sm:$0xff] }
 0x4d9   : > { %5382 = vmatpush.msrb.mxu1 %v4359_v21  ;;  %5405 = vmatpush.msrb.mxu3 %v4407_v50  ;;  %v4566_v16 = vld [vmem:[#allocation19 + $0x718] sm:$0xff] }
 0x4da   : > { %5428 = vmatpush.msrb.mxu2 %v4455_v10  ;;  %5360 = vmatpush.msrb.mxu0 %v4835_v46  ;;  %v4614_v21 = vld [vmem:[#allocation19 + $0x898] sm:$0xff]  ;;  %v4515_v10 = vld [vmem:[#allocation19 + $0x580] sm:$0xff] }
 0x4db   : > { %5383 = vmatpush.msrb.mxu1 %v4356_v60  ;;  %5406 = vmatpush.msrb.mxu3 %v4404_v37  ;;  %v4662_v50 = vld [vmem:[#allocation19 + $0xa18] sm:$0xff]  ;;  %v4563_v46 = vld [vmem:[#allocation19 + $0x700] sm:$0xff] }
 0x4dc   : > { %5429 = vmatpush.msrb.mxu2 %v4452_v26  ;;  %5361 = vmatpush.msrb.mxu0 %v4832_v19  ;;  %v4611_v60 = vld [vmem:[#allocation19 + $0x880] sm:$0xff]  ;;  %v4512_v26 = vld [vmem:[#allocation19 + $0x568] sm:$0xff] }
 0x4dd   : > { %5384 = vmatpush.msrb.mxu1 %v4353_v23  ;;  %5407 = vmatpush.msrb.mxu3 %v4401_v45  ;;  %v4659_v37 = vld [vmem:[#allocation19 + $0xa00] sm:$0xff]  ;;  %v4560_v19 = vld [vmem:[#allocation19 + $0x6e8] sm:$0xff]  ;;  %v4509_v45 = vld [vmem:[#allocation19 + $0x550] sm:$0xff] }
 0x4de   : > { %5430 = vmatpush.msrb.mxu2 %v4449_v38  ;;  %5362 = vmatpush.msrb.mxu0 %v4829_v0  ;;  %v4608_v23 = vld [vmem:[#allocation19 + $0x868] sm:$0xff]  ;;  %v4605_v38 = vld [vmem:[#allocation19 + $0x850] sm:$0xff]  ;;  %v14670_v0 = vpop.f32.mrf.mxu0 }
 0x4df   : > { %5385 = vmatpush.msrb.mxu1 %v4350_v30  ;;  %5408 = vmatpush.msrb.mxu3 %v4398_v54  ;;  %v4653_v30 = vld [vmem:[#allocation19 + $0x9d0] sm:$0xff]  ;;  %v4506_v54 = vld [vmem:[#allocation19 + $0x538] sm:$0xff] }
 0x4e0   : > { %5431 = vmatpush.msrb.mxu2 %v4446_v48  ;;  %5363 = vmatpush.msrb.mxu0 %v4826_v14  ;;  %v4554_v48 = vld [vmem:[#allocation19 + $0x6b8] sm:$0xff] }
 0x4e1   : > { %5386 = vmatpush.msrb.mxu1 %v4347_v41  ;;  %5409 = vmatpush.msrb.mxu3 %v4395_v20  ;;  %v4602_v14 = vld [vmem:[#allocation19 + $0x838] sm:$0xff]  ;;  %v4503_v20 = vld [vmem:[#allocation19 + $0x520] sm:$0xff] }
 0x4e2   : > { %5432 = vmatpush.msrb.mxu2 %v4443_v25  ;;  %5364 = vmatpush.msrb.mxu0 %v4823_v3  ;;  %v4650_v41 = vld [vmem:[#allocation19 + $0x9b8] sm:$0xff]  ;;  %v4551_v25 = vld [vmem:[#allocation19 + $0x6a0] sm:$0xff] }
 0x4e3   : > { %5387 = vmatpush.msrb.mxu1 %v4344_v57  ;;  %5410 = vmatpush.msrb.mxu3 %v4392_v7  ;;  %v4599_v3 = vld [vmem:[#allocation19 + $0x820] sm:$0xff]  ;;  %v4500_v7 = vld [vmem:[#allocation19 + $0x508] sm:$0xff] }
 0x4e4   : > { %5433 = vmatpush.msrb.mxu2 %v4440_v12  ;;  %5365 = vmatpush.msrb.mxu0 %v4820_v55  ;;  %v4647_v57 = vld [vmem:[#allocation19 + $0x9a0] sm:$0xff]  ;;  %v4548_v12 = vld [vmem:[#allocation19 + $0x688] sm:$0xff] }
 0x4e5   : > { %5388 = vmatpush.msrb.mxu1 %v4341_v13  ;;  %5411 = vmatpush.msrb.mxu3 %v4389_v28  ;;  %v4596_v55 = vld [vmem:[#allocation19 + $0x808] sm:$0xff]  ;;  %v14672_v13 = vpop.f32.mrf.mxu1 }
 0x4e6   : > { %5434 = vmatpush.msrb.mxu2 %v4437_v8  ;;  %5366 = vmatmul.f32.vlgmr.msrb.gmra.mxu0 %v14617_v51  ;;  %v4644_v28 = vld [vmem:[#allocation19 + $0x988] sm:$0xff]  ;;  %v4497_v8 = vld [vmem:[#allocation19 + $0x4f0] sm:$0xff] }
 0x4e7   : > { %5389 = vmatmul.f32.vlgmr.msrb.gmra.mxu1 %v14300_v27  ;;  %5412 = vmatmul.f32.vlgmr.msrb.gmra.mxu3 %v14403_v9  ;;  %v4668_v27 = vld [vmem:[#allocation19 + $0xa48] sm:$0xff]  ;;  %v4569_v9 = vld [vmem:[#allocation19 + $0x730] sm:$0xff] }
 0x4e8   : > { %5435 = vmatmul.f32.vlgmr.msrb.gmra.mxu2 %v14415_v59  ;;  %5442 = vmatpush.msra.mxu0 %v4530_v18  ;;  %v4665_v59 = vld [vmem:[#allocation19 + $0xa30] sm:$0xff] }
 0x4e9   : > { %5465 = vmatpush.msra.mxu1 %v4578_v17  ;;  %5488 = vmatpush.msra.mxu3 %v4626_v43  ;;  %v4545_v18 = vld [vmem:[#allocation19 + $0x670] sm:$0xff]  ;;  %v14674_v43 = vpop.f32.mrf.mxu0 }
 0x4ea   : > { %5511 = vmatpush.msra.mxu2 %v4674_v49  ;;  %5443 = vmatpush.msra.mxu0 %v4527_v2  ;;  %v4593_v17 = vld [vmem:[#allocation19 + $0x7f0] sm:$0xff]  ;;  %v4494_v2 = vld [vmem:[#allocation19 + $0x4d8] sm:$0xff] }
 0x4eb   : > { %5466 = vmatpush.msra.mxu1 %v4575_v5  ;;  %5489 = vmatpush.msra.mxu3 %v4623_v36  ;;  %v4641_v49 = vld [vmem:[#allocation19 + $0x970] sm:$0xff]  ;;  %v4542_v5 = vld [vmem:[#allocation19 + $0x658] sm:$0xff] }
 0x4ec   : > { %5512 = vmatpush.msra.mxu2 %v4671_v56  ;;  %5444 = vmatpush.msra.mxu0 %v4524_v33  ;;  %v4590_v36 = vld [vmem:[#allocation19 + $0x7d8] sm:$0xff] }
 0x4ed   : > { %5467 = vmatpush.msra.mxu1 %v4572_v35  ;;  %5490 = vmatpush.msra.mxu3 %v4620_v61  ;;  %v4638_v33 = vld [vmem:[#allocation19 + $0x958] sm:$0xff]  ;;  %v4491_v35 = vld [vmem:[#allocation19 + $0x4c0] sm:$0xff] }
 0x4ee   : > { %5513 = vmatpush.msra.mxu2 %v4668_v27  ;;  %5445 = vmatpush.msra.mxu0 %v4521_v15  ;;  %v4539_v61 = vld [vmem:[#allocation19 + $0x640] sm:$0xff]  ;;  %v14676_v15 = vpop.f32.mrf.mxu3 }
 0x4ef   : > { %5468 = vmatpush.msra.mxu1 %v4569_v9  ;;  %5491 = vmatpush.msra.mxu3 %v4617_v42  ;;  %v4587_v27 = vld [vmem:[#allocation19 + $0x7c0] sm:$0xff]  ;;  %v4488_v42 = vld [vmem:[#allocation19 + $0x4a8] sm:$0xff] }
 0x4f0   : > { %5514 = vmatpush.msra.mxu2 %v4665_v59  ;;  %5369 = vmatmul.f32.gmra.mxu0 %v14639_v31  ;;  %v4635_v9 = vld [vmem:[#allocation19 + $0x940] sm:$0xff]  ;;  %v4536_v59 = vld [vmem:[#allocation19 + $0x628] sm:$0xff] }
 0x4f1   : > { %5392 = vmatmul.f32.gmra.mxu1 %v14324_v29  ;;  %5415 = vmatmul.f32.gmra.mxu3 %v14458_v58  ;;  %v4656_v29 = vld [vmem:[#allocation19 + $0x9e8] sm:$0xff]  ;;  %v4557_v58 = vld [vmem:[#allocation19 + $0x6d0] sm:$0xff] }
 0x4f2   : > { %5438 = vmatmul.f32.gmra.mxu2 %v14473_v1  ;;  %5446 = vmatpush.msra.mxu0 %v4518_v6  ;;  %v14668_v1 = vpop.f32.mrf.mxu2  ;;  %v4584_v6 = vld [vmem:[#allocation19 + $0x7a8] sm:$0xff] }
 0x4f3   : > { %5469 = vmatpush.msra.mxu1 %v4566_v16  ;;  %5492 = vmatpush.msra.mxu3 %v4614_v21  ;;  %v4933_v16 = vpop.f32.mrf.mxu1  ;;  %v4632_v21 = vld [vmem:[#allocation19 + $0x928] sm:$0xff] }
 0x4f4   : > { %5515 = vmatpush.msra.mxu2 %v4662_v50  ;;  %5447 = vmatpush.msra.mxu0 %v4515_v10  ;;  %v4485_v50 = vld [vmem:[#allocation19 + $0x490] sm:$0xff] }
 0x4f5   : > { %5470 = vmatpush.msra.mxu1 %v4563_v46  ;;  %5493 = vmatpush.msra.mxu3 %v4611_v60  ;;  %v4533_v10 = vld [vmem:[#allocation19 + $0x610] sm:$0xff] }
 0x4f6   : > { %5516 = vmatpush.msra.mxu2 %v4659_v37  ;;  %5448 = vmatpush.msra.mxu0 %v4512_v26  ;;  %v4581_v46 = vld [vmem:[#allocation19 + $0x790] sm:$0xff]  ;;  %v14678_v37 = vpop.f32.mrf.mxu0 }
 0x4f7   : > { %5471 = vmatpush.msra.mxu1 %v4560_v19  ;;  %5494 = vmatpush.msra.mxu3 %v4608_v23  ;;  %v4629_v60 = vld [vmem:[#allocation19 + $0x910] sm:$0xff]  ;;  %v4722_v19 = vld [vmem:[#allocation19 + $0xbf8] sm:$0xff] }
 0x4f8   : > { %5517 = vmatpush.msra.mxu2 %v4656_v29  ;;  %5449 = vmatpush.msra.mxu0 %v4509_v45  ;;  %v4770_v23 = vld [vmem:[#allocation19 + $0xd78] sm:$0xff]  ;;  %v4956_v45 = vpop.f32.mrf.mxu3 }
 0x4f9   : > { %5472 = vmatpush.msra.mxu1 %v4557_v58  ;;  %5495 = vmatpush.msra.mxu3 %v4605_v38  ;;  %v4818_v29 = vld [vmem:[#allocation19 + $0xef8] sm:$0xff]  ;;  %v4719_v38 = vld [vmem:[#allocation19 + $0xbe0] sm:$0xff] }
 0x4fa   : > { %5518 = vmatpush.msra.mxu2 %v4653_v30  ;;  %5450 = vmatpush.msra.mxu0 %v4506_v54  ;;  %v4887_v56 = vpop.f32.mrf.mxu2  ;;  %v4866_v58 = vld [vmem:[#allocation19 + $0x1078] sm:$0xff]  ;;  %v4767_v30 = vld [vmem:[#allocation19 + $0xd60] sm:$0xff] }
 0x4fb   : > { %5473 = vmatpush.msra.mxu1 %v4554_v48  ;;  %5496 = vmatpush.msra.mxu3 %v4602_v14  ;;  %v4815_v54 = vld [vmem:[#allocation19 + $0xee0] sm:$0xff]  ;;  %v14686_v48 = vpop.f32.mrf.mxu1 }
 0x4fc   : > { %5519 = vmatpush.msra.mxu2 %v4650_v41  ;;  %5451 = vmatpush.msra.mxu0 %v4503_v20  ;;  %v4863_v14 = vld [vmem:[#allocation19 + $0x1060] sm:$0xff]  ;;  %v4911_v41 = vadd.f32 %v14674_v43, %v4887_v56  ;;  %v4812_v20 = vld [vmem:[#allocation19 + $0xec8] sm:$0xff]  ;;  %v4710_v43 = vld [vmem:[#allocation19 + $0xb98] sm:$0xff] }
 0x4fd   : > { %5474 = vmatpush.msra.mxu1 %v4551_v25  ;;  %5497 = vmatpush.msra.mxu3 %v4599_v3  ;;  %v4713_v25 = vld [vmem:[#allocation19 + $0xbb0] sm:$0xff]  ;;  %v4908_v3 = vadd.f32 %v14670_v0, %v14668_v1  ;;  %v4758_v0 = vld [vmem:[#allocation19 + $0xd18] sm:$0xff]  ;;  %v4755_v56 = vld [vmem:[#allocation19 + $0xd00] sm:$0xff] }
 0x4fe   : > { %5520 = vmatpush.msra.mxu2 %v4647_v57  ;;  %5452 = vmatpush.msra.mxu0 %v4500_v7  ;;  %v4934_v57 = vadd.f32 %v4933_v16, %v4911_v41  ;;  %v4761_v7 = vld [vmem:[#allocation19 + $0xd30] sm:$0xff]  ;;  %v4788_v41 = vld [vmem:[#allocation19 + $0xe08] sm:$0xff] }
 0x4ff   : > { %5475 = vmatpush.msra.mxu1 %v4548_v12  ;;  %5498 = vmatpush.msra.mxu3 %v4596_v55  ;;  %v4809_v12 = vld [vmem:[#allocation19 + $0xeb0] sm:$0xff] }
 0x500   : > { %5521 = vmatpush.msra.mxu2 %v4644_v28  ;;  %5453 = vmatpush.msra.mxu0 %v4497_v8  ;;  %v4857_v28 = vld [vmem:[#allocation19 + $0x1030] sm:$0xff]  ;;  %v4931_v8 = vadd.f32 %v14672_v13, %v4908_v3  ;;  %v4854_v13 = vld [vmem:[#allocation19 + $0x1018] sm:$0xff] }
 0x501   : > { %5476 = vmatpush.msra.mxu1 %v4545_v18  ;;  %5499 = vmatpush.msra.mxu3 %v4593_v17  ;;  %v4957_v18 = vadd.f32 %v4956_v45, %v4934_v57  ;;  %v14692_v17 = vpop.f32.mrf.mxu3  ;;  %v4797_v16 = vld [vmem:[#allocation19 + $0xe50] sm:$0xff]  ;;  %v4743_v45 = vld [vmem:[#allocation19 + $0xca0] sm:$0xff] }
 0x502   : > { %5522 = vmatpush.msra.mxu2 %v4641_v49  ;;  %5454 = vmatpush.msra.mxu0 %v4494_v2  ;;  %v14680_v26 = vpop.f32.mrf.mxu2  ;;  %v4954_v1 = vadd.f32 %v14676_v15, %v4931_v8  ;;  %v4806_v49 = vld [vmem:[#allocation19 + $0xe98] sm:$0xff]  ;;  %v4707_v2 = vld [vmem:[#allocation19 + $0xb80] sm:$0xff]  ;;  %v4833_v57 = vld [vmem:[#allocation19 + $0xf70] sm:$0xff] }
 0x503   : > { %5477 = vmatpush.msra.mxu1 %v4542_v5  ;;  %5500 = vmatpush.msra.mxu3 %v4590_v36 }
 0x504   : > { %5523 = vmatpush.msra.mxu2 %v4638_v33  ;;  %5455 = vmatpush.msra.mxu0 %v4491_v35  ;;  %v4803_v33 = vld [vmem:[#allocation19 + $0xe80] sm:$0xff] }
 0x505   : > { %5478 = vmatpush.msra.mxu1 %v4539_v61  ;;  %5501 = vmatpush.msra.mxu3 %v4587_v27  ;;  %v4851_v35 = vld [vmem:[#allocation19 + $0x1000] sm:$0xff]  ;;  %v4704_v61 = vld [vmem:[#allocation19 + $0xb68] sm:$0xff]  ;;  %v4977_v27 = vadd.f32 %v14680_v26, %v4954_v1 }
 0x506   : > { %5524 = vmatpush.msra.mxu2 %v4635_v9  ;;  %5456 = vmatpush.msra.mxu0 %v4488_v42  ;;  %v5025_v5 = vpop.f32.mrf.mxu1  ;;  %v4701_v42 = vld [vmem:[#allocation19 + $0xb50] sm:$0xff]  ;;  %v4779_v1 = vld [vmem:[#allocation19 + $0xdc0] sm:$0xff] }
 0x507   : > { %5479 = vmatpush.msra.mxu1 %v4536_v59  ;;  %5502 = vmatpush.msra.mxu3 %v4584_v6  ;;  %v5000_v59 = vadd.f32 %v14678_v37, %v4977_v27  ;;  %v4749_v6 = vld [vmem:[#allocation19 + $0xcd0] sm:$0xff] }
 0x508   : > { %5525 = vmatpush.msra.mxu2 %v4632_v21  ;;  %5457 = vmatpush.msra.mxu0 %v4485_v50  ;;  %v4845_v21 = vld [vmem:[#allocation19 + $0xfd0] sm:$0xff]  ;;  %v4698_v50 = vld [vmem:[#allocation19 + $0xb38] sm:$0xff] }
 0x509   : > { %5480 = vmatpush.msra.mxu1 %v4533_v10  ;;  %5503 = vmatpush.msra.mxu3 %v4581_v46  ;;  %v4746_v46 = vld [vmem:[#allocation19 + $0xcb8] sm:$0xff]  ;;  %v5023_v37 = vadd.f32 %v14686_v48, %v5000_v59  ;;  %v4773_v27 = vld [vmem:[#allocation19 + $0xd90] sm:$0xff] }
 0x50a   : > { %5526 = vmatpush.msra.mxu2 %v4629_v60  ;;  %5458 = vmatmul.f32.vlgmr.msra.gmra.mxu0 %v14417_v39  ;;  %v4716_v39 = vld [vmem:[#allocation19 + $0xbc8] sm:$0xff]  ;;  %v4979_v55 = vpop.f32.mrf.mxu2  ;;  %v4794_v60 = vld [vmem:[#allocation19 + $0xe38] sm:$0xff] }
 0x50b   : > { %5481 = vmatmul.f32.vlgmr.msra.gmra.mxu1 %v14419_v22  ;;  %5504 = vmatmul.f32.vlgmr.msra.gmra.mxu3 %v14526_v44  ;;  %v4764_v22 = vld [vmem:[#allocation19 + $0xd48] sm:$0xff]  ;;  %v4980_v36 = vadd.f32 %v4979_v55, %v4957_v18  ;;  %v4734_v55 = vld [vmem:[#allocation19 + $0xc58] sm:$0xff] }
 0x50c   : > { %5527 = vmatmul.f32.vlgmr.msra.gmra.mxu2 %v14528_v24  ;;  %5534 = vmatpush.msrb.mxu0 %v4722_v19  ;;  %v4860_v44 = vld [vmem:[#allocation19 + $0x1048] sm:$0xff]  ;;  %v5002_v24 = vpop.f32.mrf.mxu0  ;;  %v5048_v10 = vpop.f32.mrf.mxu3  ;;  %v4842_v19 = vld [vmem:[#allocation19 + $0xfb8] sm:$0xff] }
 0x50d   : > { %5557 = vmatpush.msrb.mxu1 %v4770_v23  ;;  %5580 = vmatpush.msrb.mxu3 %v4818_v29  ;;  %v5003_v15 = vadd.f32 %v5002_v24, %v4980_v36  ;;  %v4695_v23 = vld [vmem:[#allocation19 + $0xb20] sm:$0xff]  ;;  %v4785_v24 = vld [vmem:[#allocation19 + $0xdf0] sm:$0xff]  ;;  %v4830_v18 = vld [vmem:[#allocation19 + $0xf58] sm:$0xff] }
 0x50e   : > { %5603 = vmatpush.msrb.mxu2 %v4866_v58  ;;  %5535 = vmatpush.msrb.mxu0 %v4719_v38  ;;  %v4791_v58 = vld [vmem:[#allocation19 + $0xe20] sm:$0xff]  ;;  %v4776_v36 = vld [vmem:[#allocation19 + $0xda8] sm:$0xff] }
 0x50f   : > { %5558 = vmatpush.msrb.mxu1 %v4767_v30  ;;  %5581 = vmatpush.msrb.mxu3 %v4815_v54  ;;  %v5026_v26 = vadd.f32 %v5025_v5, %v5003_v15  ;;  %v4839_v30 = vld [vmem:[#allocation19 + $0xfa0] sm:$0xff]  ;;  %v4692_v54 = vld [vmem:[#allocation19 + $0xb08] sm:$0xff] }
 0x510   : > { %5604 = vmatpush.msrb.mxu2 %v4863_v14  ;;  %5536 = vmatpush.msrb.mxu0 %v4716_v39  ;;  %v5046_v14 = vadd.f32 %v14692_v17, %v5023_v37  ;;  %v4740_v39 = vld [vmem:[#allocation19 + $0xc88] sm:$0xff]  ;;  %v4683_v17 = vld [vmem:[#allocation19 + $0xac0] sm:$0xff] }
 0x511   : > { %5559 = vmatpush.msrb.mxu1 %v4764_v22  ;;  %5582 = vmatpush.msrb.mxu3 %v4812_v20  ;;  %v5049_v38 = vadd.f32 %v5048_v10, %v5026_v26  ;;  %v4836_v22 = vld [vmem:[#allocation19 + $0xf88] sm:$0xff]  ;;  %v4689_v20 = vld [vmem:[#allocation19 + $0xaf0] sm:$0xff] }
 0x512   : > { %5605 = vmatpush.msrb.mxu2 %v4860_v44  ;;  %5537 = vmatpush.msrb.mxu0 %v4713_v25  ;;  %v5068_v9 = vpop.f32.mrf.mxu2  ;;  %v4737_v25 = vld [vmem:[#allocation19 + $0xc70] sm:$0xff]  ;;  %v4728_v5 = vld [vmem:[#allocation19 + $0xc28] sm:$0xff] }
 0x513   : > { %5560 = vmatpush.msrb.mxu1 %v4761_v7  ;;  %5583 = vmatpush.msrb.mxu3 %v4809_v12  ;;  %v5114_v29 = vpop.f32.mrf.mxu1  ;;  %v4686_v7 = vld [vmem:[#allocation19 + $0xad8] sm:$0xff]  ;;  %v5069_v12 = vadd.f32 %v5068_v9, %v5046_v14 }
 0x514   : > { %5606 = vmatpush.msrb.mxu2 %v4857_v28  ;;  %5461 = vmatmul.f32.gmra.mxu0 %v14475_v4  ;;  %v14699_v4 = vpop.f32.mrf.mxu0  ;;  %v4782_v28 = vld [vmem:[#allocation19 + $0xdd8] sm:$0xff] }
 0x515   : > { %5484 = vmatmul.f32.gmra.mxu1 %v14477_v32  ;;  %5507 = vmatmul.f32.gmra.mxu3 %v14585_v11  ;;  %v4752_v32 = vld [vmem:[#allocation19 + $0xce8] sm:$0xff] }
 0x516   : > { %5530 = vmatmul.f32.gmra.mxu2 %v14590_v34  ;;  %5538 = vmatpush.msrb.mxu0 %v4710_v43  ;;  %v4800_v11 = vld [vmem:[#allocation19 + $0xe68] sm:$0xff]  ;;  %v4731_v43 = vld [vmem:[#allocation19 + $0xc40] sm:$0xff] }
 0x517   : > { %5561 = vmatpush.msrb.mxu1 %v4758_v0  ;;  %5584 = vmatpush.msrb.mxu3 %v4806_v49  ;;  %v4848_v34 = vld [vmem:[#allocation19 + $0xfe8] sm:$0xff]  ;;  %v5092_v0 = vadd.f32 %v14699_v4, %v5069_v12  ;;  %v4827_v49 = vld [vmem:[#allocation19 + $0xf40] sm:$0xff]  ;;  %v4725_v4 = vld [vmem:[#allocation19 + $0xc10] sm:$0xff] }
 0x518   : > { %5607 = vmatpush.msrb.mxu2 %v4854_v13  ;;  %5539 = vmatpush.msrb.mxu0 %v4707_v2  ;;  %v4680_v13 = vld [vmem:[#allocation19 + $0xaa8] sm:$0xff] }
 0x519   : > { %5562 = vmatpush.msrb.mxu1 %v4755_v56  ;;  %5585 = vmatpush.msrb.mxu3 %v4803_v33  ;;  %v4824_v33 = vld [vmem:[#allocation19 + $0xf28] sm:$0xff] }
 0x51a   : > { %5608 = vmatpush.msrb.mxu2 %v4851_v35  ;;  %5540 = vmatpush.msrb.mxu0 %v4704_v61  ;;  %v5071_v48 = vpop.f32.mrf.mxu2  ;;  %v4677_v35 = vld [vmem:[#allocation19 + $0xa90] sm:$0xff]  ;;  %v14708_v61 = vadd.f32 %v5114_v29, %v5092_v0 }
 0x51b   : > { %5563 = vmatpush.msrb.mxu1 %v4752_v32  ;;  %5586 = vmatpush.msrb.mxu3 %v4800_v11  ;;  %v5072_v3 = vadd.f32 %v5071_v48, %v5049_v38  ;;  %v4821_v32 = vld [vmem:[#allocation19 + $0xf10] sm:$0xff] }
 0x51c   : > { %5609 = vmatpush.msrb.mxu2 %v4848_v34  ;;  %5541 = vmatpush.msrb.mxu0 %v4701_v42 }
 0x51d   : > { %5564 = vmatpush.msrb.mxu1 %v4749_v6  ;;  %5587 = vmatpush.msrb.mxu3 %v4797_v16 }
 0x51e   : > { %5610 = vmatpush.msrb.mxu2 %v4845_v21  ;;  %5542 = vmatpush.msrb.mxu0 %v4698_v50  ;;  %v5094_v44 = vpop.f32.mrf.mxu0 }
 0x51f   : > { %5565 = vmatpush.msrb.mxu1 %v4746_v46  ;;  %5588 = vmatpush.msrb.mxu3 %v4794_v60  ;;  %v5095_v8 = vadd.f32 %v5094_v44, %v5072_v3  ;;  %v5117_v2 = vpop.f32.mrf.mxu1 }
 0x520   : > { %5611 = vmatpush.msrb.mxu2 %v4842_v19  ;;  %5543 = vmatpush.msrb.mxu0 %v4695_v23 }
 0x521   : > { %5566 = vmatpush.msrb.mxu1 %v4743_v45  ;;  %5589 = vmatpush.msrb.mxu3 %v4791_v58  ;;  %v14706_v56 = vadd.f32 %v5117_v2, %v5095_v8 }
 0x522   : > { %5612 = vmatpush.msrb.mxu2 %v4839_v30  ;;  %5544 = vmatpush.msrb.mxu0 %v4692_v54 }
 0x523   : > { %5567 = vmatpush.msrb.mxu1 %v4740_v39  ;;  %5590 = vmatpush.msrb.mxu3 %v4788_v41  ;;  %v14712_v11 = vpack.i.bf16 %v14708_v61, %v14706_v56 }
 0x524   : > { %5613 = vmatpush.msrb.mxu2 %v4836_v22  ;;  %5545 = vmatpush.msrb.mxu0 %v4689_v20 }
 0x525   : > { %5568 = vmatpush.msrb.mxu1 %v4737_v25  ;;  %5591 = vmatpush.msrb.mxu3 %v4785_v24 }
 0x526   : > { %5614 = vmatpush.msrb.mxu2 %v4833_v57  ;;  %5546 = vmatpush.msrb.mxu0 %v4686_v7 }
 0x527   : > { %5569 = vmatpush.msrb.mxu1 %v4734_v55  ;;  %5592 = vmatpush.msrb.mxu3 %v4782_v28 }
 0x528   : > { %5615 = vmatpush.msrb.mxu2 %v4830_v18  ;;  %5547 = vmatpush.msrb.mxu0 %v4683_v17  ;;  %v5183_v15 = vpop.f32.mrf.mxu0 }
 0x529   : > { %5570 = vmatpush.msrb.mxu1 %v4731_v43  ;;  %5593 = vmatpush.msrb.mxu3 %v4779_v1 }
 0x52a   : > { %5616 = vmatpush.msrb.mxu2 %v4827_v49  ;;  %5548 = vmatpush.msrb.mxu0 %v4680_v13 }
 0x52b   : > { %5571 = vmatpush.msrb.mxu1 %v4728_v5  ;;  %5594 = vmatpush.msrb.mxu3 %v4776_v36 }
 0x52c   : > { %5617 = vmatpush.msrb.mxu2 %v4824_v33  ;;  %5549 = vmatpush.msrb.mxu0 %v4677_v35 }
 0x52d   : > { %5572 = vmatpush.msrb.mxu1 %v4725_v4  ;;  %5595 = vmatpush.msrb.mxu3 %v4773_v27 }
 0x52e   : > { %5618 = vmatpush.msrb.mxu2 %v4821_v32  ;;  %5550 = vmatmul.f32.vlgmr.msrb.gmra.mxu0 %v14530_v53  ;;  %v5137_v53 = vpop.f32.mrf.mxu3 }
 0x52f   : > { %5573 = vmatmul.f32.vlgmr.msrb.gmra.mxu1 %v14532_v40  ;;  %5596 = vmatmul.f32.vlgmr.msrb.gmra.mxu3 %v14614_v62  ;;  %v5160_v40 = vpop.f32.mrf.mxu2 }
 0x530   : > { %5619 = vmatmul.f32.vlgmr.msrb.gmra.mxu2 %v14617_v51  ;;  %10659 = vrot.lane.b32.xlu0 %v14712_v11, %s12039_s29  ;;  %v5161_v38 = vadd.f32 %v5160_v40, %v5137_v53 }
 0x532   : > { %v5186_v34 = vpop.f32.mrf.mxu0  ;;  %v5184_v14 = vadd.f32 %v5183_v15, %v5161_v38 }
 0x536   : > { %5553 = vmatmul.f32.gmra.mxu0 %v14592_v52  ;;  %v5140_v62 = vpop.f32.mrf.mxu3  ;;  %v5206_v52 = vpop.f32.mrf.mxu1 }
 0x537   : > { %5576 = vmatmul.f32.gmra.mxu1 %v14594_v63  ;;  %5599 = vmatmul.f32.gmra.mxu3 %v14635_v47  ;;  %v5163_v51 = vpop.f32.mrf.mxu2  ;;  %v5207_v22 = vadd.f32 %v5206_v52, %v5184_v14 }
 0x538   : > { %5622 = vmatmul.f32.gmra.mxu2 %v14639_v31  ;;  %10664 = vrot.lane.b32.xlu0 %v14712_v11, %s16203_s16  ;;  %v5164_v44 = vadd.f32 %v5163_v51, %v5140_v62 }
 0x53a   : > { %v5187_v57 = vadd.f32 %v5186_v34, %v5164_v44 }
 0x53e   : > { %v5229_v9 = vpop.f32.mrf.mxu3  ;;  %v5209_v47 = vpop.f32.mrf.mxu1 }
 0x53f   : > { %v5252_v63 = vpop.f32.mrf.mxu2  ;;  %v5275_v59 = vpop.f32.mrf.mxu0  ;;  %v5230_v3 = vadd.f32 %v5229_v9, %v5207_v22  ;;  %v5210_v18 = vadd.f32 %v5209_v47, %v5187_v57 }
 0x540   : > { %10669 = vrot.lane.b32.xlu0 %v14712_v11, %s12041_s22 }
 0x541   : > { %v5253_v8 = vadd.f32 %v5252_v63, %v5230_v3 }
 0x543   : > { %v5276_v1 = vadd.f32 %v5275_v59, %v5253_v8 }
 0x546   : > { %v5232_v42 = vpop.f32.mrf.mxu3  ;;  %v5298_v6 = vpop.f32.mrf.mxu1 }
 0x547   : > { %v5255_v31 = vpop.f32.mrf.mxu2  ;;  %v5233_v13 = vadd.f32 %v5232_v42, %v5210_v18  ;;  %v5299_v33 = vadd.f32 %v5298_v6, %v5276_v1 }
 0x549   : > { %v5278_v50 = vpop.f32.mrf.mxu0  ;;  %v5256_v32 = vadd.f32 %v5255_v31, %v5233_v13 }
 0x54b   : > { %v5279_v62 = vadd.f32 %v5278_v50, %v5256_v32 }
 0x54e   : > { %v5321_v16 = vpop.f32.mrf.mxu3  ;;  %v5301_v10 = vpop.f32.mrf.mxu1 }
 0x54f   : > { %v5344_v21 = vpop.f32.mrf.mxu2  ;;  %v5322_v53 = vadd.f32 %v5321_v16, %v5299_v33  ;;  %v5302_v59 = vadd.f32 %v5301_v10, %v5279_v62 }
 0x551   : > { %v5345_v52 = vadd.f32 %v5344_v21, %v5322_v53 }
 0x556   : > { %v5324_v46 = vpop.f32.mrf.mxu3 }
 0x557   : > { %v14728_v60 = vpop.f32.mrf.mxu2  ;;  %v5325_v6 = vadd.f32 %v5324_v46, %v5302_v59  ;;  %v5979_v46 = vld [vmem:[%s16373_s3 + $0x8] sm:$0xff] }
 0x559   : > { %v5348_v21 = vadd.f32 %v14728_v60, %v5325_v6  ;;  %v5980_v60 = vld [vmem:[%s16373_s3 + $0x10] sm:$0xff] }
 0x563   : > { %v5367_v26 = vpop.f32.mrf.mxu0 }
 0x564   : > { %v5390_v19 = vpop.f32.mrf.mxu1  ;;  %v14730_v42 = vadd.f32 %v5367_v26, %v5345_v52 }
 0x56a   : > { %v5413_v23 = vpop.f32.mrf.mxu3 }
 0x56b   : > { %v5436_v29 = vpop.f32.mrf.mxu2  ;;  %v5414_v39 = vadd.f32 %v5413_v23, %v5390_v19 }
 0x56d   : > { %v5370_v37 = vpop.f32.mrf.mxu0  ;;  %v5437_v20 = vadd.f32 %v5436_v29, %v5414_v39 }
 0x56e   : > { %v5393_v45 = vpop.f32.mrf.mxu1  ;;  %v14736_v38 = vadd.f32 %v5370_v37, %v5348_v21 }
 0x574   : > { %v5416_v58 = vpop.f32.mrf.mxu3 }
 0x575   : > { %v5439_v30 = vpop.f32.mrf.mxu2  ;;  %v5417_v7 = vadd.f32 %v5416_v58, %v5393_v45 }
 0x577   : > { %v5440_v17 = vadd.f32 %v5439_v30, %v5417_v7 }
 0x587   : > { %v5459_v54 = vpop.f32.mrf.mxu0 }
 0x588   : > { %v5482_v41 = vpop.f32.mrf.mxu1  ;;  %v5460_v25 = vadd.f32 %v5459_v54, %v5437_v20 }
 0x58a   : > { %v5483_v55 = vadd.f32 %v5482_v41, %v5460_v25 }
 0x58e   : > { %v5505_v48 = vpop.f32.mrf.mxu3 }
 0x58f   : > { %v5528_v24 = vpop.f32.mrf.mxu2  ;;  %v5506_v43 = vadd.f32 %v5505_v48, %v5483_v55 }
 0x591   : > { %v5462_v12 = vpop.f32.mrf.mxu0  ;;  %v5529_v2 = vadd.f32 %v5528_v24, %v5506_v43 }
 0x592   : > { %v5485_v28 = vpop.f32.mrf.mxu1  ;;  %v5463_v0 = vadd.f32 %v5462_v12, %v5440_v17 }
 0x594   : > { %v5486_v35 = vadd.f32 %v5485_v28, %v5463_v0 }
 0x598   : > { %v5508_v49 = vpop.f32.mrf.mxu3 }
 0x599   : > { %v5531_v5 = vpop.f32.mrf.mxu2  ;;  %v5509_v40 = vadd.f32 %v5508_v49, %v5486_v35 }
 0x59b   : > { %v5532_v9 = vadd.f32 %v5531_v5, %v5509_v40 }
 0x5a2   : > { %v10660_v37 = vpop.permute.xlu0 %10659 }
 0x5a3   : > { %v10661_v22 = vunpack.i.l.bf16 %v10660_v37  ;;  %v10662_v3 = vunpack.i.h.bf16 %v10660_v37 }
 0x5aa   : > { %v10665_v54 = vpop.permute.xlu0 %10664 }
 0x5ab   : > { %v5551_v36 = vpop.f32.mrf.mxu0  ;;  %v10666_v28 = vunpack.i.l.bf16 %v10665_v54  ;;  %v10667_v13 = vunpack.i.h.bf16 %v10665_v54 }
 0x5ac   : > { %v5552_v4 = vadd.f32 %v5551_v36, %v5529_v2  ;;  %v5574_v27 = vpop.f32.mrf.mxu1 }
 0x5ae   : > { %v5575_v51 = vadd.f32 %v5574_v27, %v5552_v4 }
 0x5b2   : > { %v5597_v15 = vpop.f32.mrf.mxu3  ;;  %v10670_v39 = vpop.permute.xlu0 %10669 }
 0x5b3   : > { %v5598_v63 = vadd.f32 %v5597_v15, %v5575_v51  ;;  %v5620_v34 = vpop.f32.mrf.mxu2  ;;  %v5554_v47 = vpop.f32.mrf.mxu0  ;;  %v10671_v35 = vunpack.i.l.bf16 %v10670_v39  ;;  %v10672_v15 = vunpack.i.h.bf16 %v10670_v39 }
 0x5b4   : > { %v5555_v23 = vadd.f32 %v5554_v47, %v5532_v9  ;;  %v5577_v45 = vpop.f32.mrf.mxu1 }
 0x5b5   : > { %v5621_v19 = vadd.f32 %v5620_v34, %v5598_v63 }
 0x5b6   : > { %v5578_v31 = vadd.f32 %v5577_v45, %v5555_v23 }
 0x5b7   : > { %v10678_v29 = vpack.i.bf16 %v5621_v19, %v14730_v42 }
 0x5b9   : > { %10679 = vrot.lane.b32.xlu2 %v10678_v29, %s16203_s16  ;;  %10674 = vrot.lane.b32.xlu0 %v10678_v29, %s12039_s29 }
 0x5ba   : > { %v5600_v16 = vpop.f32.mrf.mxu3 }
 0x5bb   : > { %v5601_v50 = vadd.f32 %v5600_v16, %v5578_v31  ;;  %v5623_v58 = vpop.f32.mrf.mxu2 }
 0x5bd   : > { %v5624_v10 = vadd.f32 %v5623_v58, %v5601_v50 }
 0x5bf   : > { %v10728_v26 = vpack.i.bf16 %v5624_v10, %v14736_v38 }
 0x5c1   : > { %10729 = vrot.lane.b32.xlu1 %v10728_v26, %s16203_s16  ;;  %10684 = vrot.lane.b32.xlu2 %v10678_v29, %s12041_s22 }
 0x5c2   : > { %10704 = vrot.lane.b32.xlu0 %v14712_v11, %s12042_s20 }
 0x5c9   : > { %10734 = vrot.lane.b32.xlu1 %v10728_v26, %s12041_s22  ;;  %10689 = vrot.lane.b32.xlu2 %v10678_v29, %s12042_s20 }
 0x5ca   : > { %10714 = vrot.lane.b32.xlu0 %v14712_v11, %s12043_s23 }
 0x5d1   : > { %10739 = vrot.lane.b32.xlu1 %v10728_v26, %s12042_s20  ;;  %10694 = vrot.lane.b32.xlu2 %v10728_v26, %s12039_s29 }
 0x5d2   : > { %10724 = vrot.lane.b32.xlu0 %v14712_v11, %s16212_s19 }
 0x5d9   : > { %10744 = vrot.lane.b32.xlu1 %v10728_v26, %s12043_s23  ;;  %10699 = vrot.lane.b32.xlu2 %v10678_v29, %s12043_s23 }
 0x5da   : > { %10769 = vrot.lane.b32.xlu0 %v10678_v29, %s12044_s5 }
 0x5e1   : > { %10749 = vrot.lane.b32.xlu1 %v10728_v26, %s16212_s19  ;;  %10709 = vrot.lane.b32.xlu2 %v10678_v29, %s16212_s19 }
 0x5e2   : > { %5989 = vperm.xlu0 %9996, %v5979_v46  }
 0x5e9   : > { %10754 = vrot.lane.b32.xlu1 %v10728_v26, %s16210_s6  ;;  %10719 = vrot.lane.b32.xlu2 %v10678_v29, %s16210_s6 }
 0x5f1   : > { %10764 = vrot.lane.b32.xlu2 %v10728_v26, %s12044_s5  ;;  %10759 = vrot.lane.b32.xlu1 %v14712_v11, %s16210_s6 }
 0x5f9   : > { %10774 = vrot.lane.b32.xlu1 %v14712_v11, %s12044_s5 }
 0x601   : > { %5994 = vperm.xlu1 %9997, %v5980_v60  }
 0x613   : > { %v10680_v30 = vpop.permute.xlu2 %10679 }
 0x614   : > { %v10682_v17 = vunpack.i.h.bf16 %v10680_v30  ;;  %v10681_v43 = vunpack.i.l.bf16 %v10680_v30 }
 0x616   : > { %v5848_v36 = vsel %vm5847_vm11, %v10667_v13, %v10681_v43  ;;  %v5849_v33 = vsel %vm5847_vm11, %v10681_v43, %v10682_v17 }
 0x61b   : > { %v10685_v14 = vpop.permute.xlu2 %10684 }
 0x61c   : > { %v10687_v32 = vunpack.i.h.bf16 %v10685_v14  ;;  %v10686_v53 = vunpack.i.l.bf16 %v10685_v14 }
 0x61e   : > { %v5811_v63 = vsel %vm5810_vm12, %v10672_v15, %v10686_v53  ;;  %v5812_v34 = vsel %vm5810_vm12, %v10686_v53, %v10687_v32 }
 0x623   : > { %v14769_v41 = vpop.permute.xlu2 %10689 }
 0x624   : > { %v10692_v47 = vunpack.i.h.bf16 %v14769_v41  ;;  %v10691_v59 = vunpack.i.l.bf16 %v14769_v41 }
 0x626   : > { %v5775_v10 = vsel %vm5773_vm13, %v10691_v59, %v10692_v47  ;;  %v5978_v47 = vld [vmem:[%s16373_s3] sm:$0xff] }
 0x627   : > { %5984 = vperm.xlu2 %10778, %v5978_v47  }
 0x62b   : > { %v10695_v20 = vpop.permute.xlu2 %10694  ;;  %v10675_v48 = vpop.permute.xlu0 %10674 }
 0x62c   : > { %v10697_v44 = vunpack.i.h.bf16 %v10695_v20  ;;  %v10696_v25 = vunpack.i.l.bf16 %v10695_v20  ;;  %v10677_v24 = vunpack.i.h.bf16 %v10675_v48  ;;  %v10676_v11 = vunpack.i.l.bf16 %v10675_v48 }
 0x62e   : > { %v5887_v57 = vsel %vm5884_vm10, %v10661_v22, %v10696_v25  ;;  %v5888_v7 = vsel %vm5884_vm10, %v10696_v25, %v10697_v44  ;;  %v5885_v12 = vsel %vm5884_vm10, %v10662_v3, %v10676_v11  ;;  %v5886_v55 = vsel %vm5884_vm10, %v10676_v11, %v10677_v24 }
 0x62f   : > { %6014 = vmatpush.msra.mxu0 %v5887_v57  ;;  %6072 = vmatpush.msra.mxu3 %v5888_v7  ;;  %v5935_v7 = vld [vmem:[#allocation21 + $0x8] sm:$0xff] }
 0x631   : > { %6015 = vmatpush.msra.mxu0 %v5885_v12  ;;  %6073 = vmatpush.msra.mxu3 %v5886_v55 }
 0x633   : > { %v10730_v8 = vpop.permute.xlu1 %10729  ;;  %v14775_v18 = vpop.permute.xlu2 %10699 }
 0x634   : > { %v10732_v1 = vunpack.i.h.bf16 %v10730_v8  ;;  %v10731_v0 = vunpack.i.l.bf16 %v10730_v8  ;;  %v10705_v49 = vpop.permute.xlu0 %10704  ;;  %v10702_v26 = vunpack.i.h.bf16 %v14775_v18  ;;  %v10701_v46 = vunpack.i.l.bf16 %v14775_v18 }
 0x635   : > { %v10707_v6 = vunpack.i.h.bf16 %v10705_v49  ;;  %v10706_v29 = vunpack.i.l.bf16 %v10705_v49 }
 0x636   : > { %v5850_v2 = vsel %vm5847_vm11, %v10666_v28, %v10731_v0  ;;  %v5851_v5 = vsel %vm5847_vm11, %v10731_v0, %v10732_v1  ;;  %v5738_v57 = vsel %vm5736_vm15, %v10701_v46, %v10702_v26 }
 0x637   : > { %6016 = vmatpush.msra.mxu0 %v5850_v2  ;;  %6074 = vmatpush.msra.mxu3 %v5851_v5  ;;  %v5774_v58 = vsel %vm5773_vm13, %v10707_v6, %v10691_v59  ;;  %v5937_v5 = vld [vmem:[#allocation21 + $0x18] sm:$0xff]  ;;  %v5936_v59 = vld [vmem:[#allocation21 + $0x10] sm:$0xff]  ;;  %v5981_v6 = vld [vmem:[%s16373_s3 + $0x18] sm:$0xff] }
 0x638   : > { %5999 = vperm.xlu2 %10778, %v5981_v6   ;;  %v6828_v6 = vld [vmem:[%s16374_s1 + $0x10] sm:$0xff] }
 0x639   : > { %6017 = vmatpush.msra.mxu0 %v5848_v36  ;;  %6075 = vmatpush.msra.mxu3 %v5849_v33 }
 0x63b   : > { %v10735_v4 = vpop.permute.xlu1 %10734  ;;  %v14781_v27 = vpop.permute.xlu2 %10709 }
 0x63c   : > { %v10737_v40 = vunpack.i.h.bf16 %v10735_v4  ;;  %v10736_v62 = vunpack.i.l.bf16 %v10735_v4  ;;  %v10715_v51 = vpop.permute.xlu0 %10714  ;;  %v10712_v55 = vunpack.i.h.bf16 %v14781_v27  ;;  %v10711_v28 = vunpack.i.l.bf16 %v14781_v27 }
 0x63d   : > { %v10717_v60 = vunpack.i.h.bf16 %v10715_v51  ;;  %v10716_v37 = vunpack.i.l.bf16 %v10715_v51  ;;  %v5934_v51 = vld [vmem:[#allocation21] sm:$0xff] }
 0x63e   : > { %v5813_v52 = vsel %vm5810_vm12, %v10671_v35, %v10736_v62  ;;  %v5814_v9 = vsel %vm5810_vm12, %v10736_v62, %v10737_v40  ;;  %v5701_v2 = vsel %vm869_vm6, %v10711_v28, %v10712_v55  ;;  %v5939_v40 = vld [vmem:[#allocation21 + $0x28] sm:$0xff] }
 0x63f   : > { %6018 = vmatpush.msra.mxu0 %v5813_v52  ;;  %6076 = vmatpush.msra.mxu3 %v5814_v9  ;;  %v5737_v3 = vsel %vm5736_vm15, %v10717_v60, %v10701_v46 }
 0x641   : > { %6019 = vmatpush.msra.mxu0 %v5811_v63  ;;  %6077 = vmatpush.msra.mxu3 %v5812_v34  ;;  %v5941_v34 = vld [vmem:[#allocation21 + $0x38] sm:$0xff] }
 0x643   : > { %v10740_v19 = vpop.permute.xlu1 %10739  ;;  %v14789_v23 = vpop.permute.xlu2 %10719 }
 0x644   : > { %v10742_v45 = vunpack.i.h.bf16 %v10740_v19  ;;  %v10741_v31 = vunpack.i.l.bf16 %v10740_v19  ;;  %v10725_v16 = vpop.permute.xlu0 %10724  ;;  %v10722_v33 = vunpack.i.h.bf16 %v14789_v23  ;;  %v10721_v35 = vunpack.i.l.bf16 %v14789_v23 }
 0x645   : > { %v10727_v18 = vunpack.i.h.bf16 %v10725_v16  ;;  %v10726_v17 = vunpack.i.l.bf16 %v10725_v16 }
 0x646   : > { %v5776_v21 = vsel %vm5773_vm13, %v10706_v29, %v10741_v31  ;;  %v5777_v50 = vsel %vm5773_vm13, %v10741_v31, %v10742_v45  ;;  %v5665_v53 = vsel %vm787_vm7, %v10721_v35, %v10722_v33  ;;  %v5940_v29 = vld [vmem:[#allocation21 + $0x30] sm:$0xff]  ;;  %v14852_v45 = vld [vmem:[%s13448_s10 + $0x58] sm:$0xff] }
 0x647   : > { %6020 = vmatpush.msra.mxu0 %v5776_v21  ;;  %6078 = vmatpush.msra.mxu3 %v5777_v50  ;;  %v5700_v13 = vsel %vm869_vm6, %v10727_v18, %v10711_v28  ;;  %v14856_v31 = vpack.i.bf16 %v14852_v45, %v14852_v45 }
 0x649   : > { %6021 = vmatpush.msra.mxu0 %v5774_v58  ;;  %6079 = vmatpush.msra.mxu3 %v5775_v10 }
 0x64a   : > { %10780 = vrot.lane.b32.xlu2 %v14856_v31, %s12043_s23 }
 0x64b   : > { %v10745_v30 = vpop.permute.xlu1 %10744  ;;  %v14797_v54 = vpop.permute.xlu2 %10764 }
 0x64c   : > { %v10747_v14 = vunpack.i.h.bf16 %v10745_v30  ;;  %v10746_v39 = vunpack.i.l.bf16 %v10745_v30  ;;  %v10767_v41 = vunpack.i.h.bf16 %v14797_v54  ;;  %v10766_v22 = vunpack.i.l.bf16 %v14797_v54  ;;  %v14801_v20 = vpop.permute.xlu0 %10769 }
 0x64d   : > { %v10772_v48 = vunpack.i.h.bf16 %v14801_v20  ;;  %v10771_v44 = vunpack.i.l.bf16 %v14801_v20 }
 0x64e   : > { %v5739_v25 = vsel %vm5736_vm15, %v10716_v37, %v10746_v39  ;;  %v5740_v24 = vsel %vm5736_vm15, %v10746_v39, %v10747_v14  ;;  %v5925_v11 = vsel %vm5921_vm14, %v10766_v22, %v10767_v41 }
 0x64f   : > { %6022 = vmatpush.msra.mxu0 %v5739_v25  ;;  %6080 = vmatpush.msra.mxu3 %v5740_v24  ;;  %v5923_v12 = vsel %vm5921_vm14, %v10771_v44, %v10772_v48 }
 0x650   : > { %6115 = vmatpush.msra.mxu2 %v5925_v11 }
 0x651   : > { %6023 = vmatpush.msra.mxu0 %v5737_v3  ;;  %6081 = vmatpush.msra.mxu3 %v5738_v57 }
 0x652   : > { %6116 = vmatpush.msra.mxu2 %v5923_v12 }
 0x653   : > { %v10750_v8 = vpop.permute.xlu1 %10749  ;;  %9542 = vmatmul.msk.f32.vlgmr.msra.gmra.mxu2 %vm3368_vm9, %v5935_v7 }
 0x654   : > { %v10752_v43 = vunpack.i.h.bf16 %v10750_v8  ;;  %v10751_v1 = vunpack.i.l.bf16 %v10750_v8  ;;  %v5990_v10 = vpop.permute.xlu0 %5989 }
 0x656   : > { %v5702_v0 = vsel %vm869_vm6, %v10726_v17, %v10751_v1  ;;  %v5703_v49 = vsel %vm869_vm6, %v10751_v1, %v10752_v43 }
 0x657   : > { %6024 = vmatpush.msra.mxu0 %v5702_v0  ;;  %6082 = vmatpush.msra.mxu3 %v5703_v49 }
 0x659   : > { %6025 = vmatpush.msra.mxu0 %v5700_v13  ;;  %6083 = vmatpush.msra.mxu3 %v5701_v2 }
 0x65b   : > { %v10755_v36 = vpop.permute.xlu1 %10754  ;;  %9543 = vmatmul.msk.f32.gmra.mxu2 %vm3368_vm9, %v5937_v5 }
 0x65c   : > { %v10757_v4 = vunpack.i.h.bf16 %v10755_v36  ;;  %v10756_v27 = vunpack.i.l.bf16 %v10755_v36 }
 0x65e   : > { %v5667_v32 = vsel %vm787_vm7, %v10756_v27, %v10757_v4 }
 0x65f   : > { %6084 = vmatpush.msra.mxu3 %v5667_v32 }
 0x661   : > { %6085 = vmatpush.msra.mxu3 %v5665_v53 }
 0x663   : > { %v10760_v62 = vpop.permute.xlu1 %10759  ;;  %6086 = vmatpush.msra.mxu3 %v14736_v38  ;;  %9544 = vmatmul.msk.f32.gmra.mxu2 %vm3368_vm9, %v5939_v40 }
 0x664   : > { %v10762_v15 = vunpack.i.h.bf16 %v10760_v62  ;;  %v10761_v52 = vunpack.i.l.bf16 %v10760_v62 }
 0x665   : > { %6087 = vmatpush.msra.mxu3 %v14730_v42 }
 0x666   : > { %6088 = vmatmul.f32.vlgmr.msra.gmra.mxu3 %v5934_v51  ;;  %v5666_v9 = vsel %vm787_vm7, %v10761_v52, %v10756_v27  ;;  %v5664_v63 = vsel %vm787_vm7, %v10762_v15, %v10721_v35 }
 0x667   : > { %6026 = vmatpush.msra.mxu0 %v5666_v9 }
 0x669   : > { %6027 = vmatpush.msra.mxu0 %v5664_v63 }
 0x66b   : > { %v10775_v38 = vpop.permute.xlu1 %10774  ;;  %6028 = vmatpush.msra.mxu0 %v14706_v56  ;;  %9545 = vmatmul.msk.f32.gmra.mxu2 %vm3368_vm9, %v5941_v34 }
 0x66c   : > { %v10777_v19 = vunpack.i.h.bf16 %v10775_v38  ;;  %v10776_v42 = vunpack.i.l.bf16 %v10775_v38 }
 0x66d   : > { %6029 = vmatpush.msra.mxu0 %v14708_v61  ;;  %v5938_v61 = vld [vmem:[#allocation21 + $0x20] sm:$0xff] }
 0x66e   : > { %6030 = vmatmul.f32.vlgmr.msra.gmra.mxu0 %v5934_v51  ;;  %6091 = vmatmul.f32.gmra.mxu3 %v5936_v59  ;;  %v5924_v23 = vsel %vm5921_vm14, %v10776_v42, %v10766_v22  ;;  %v5922_v56 = vsel %vm5921_vm14, %v10777_v19, %v10771_v44 }
 0x66f   : > { %6057 = vmatpush.msra.mxu1 %v5924_v23 }
 0x671   : > { %6058 = vmatpush.msra.mxu1 %v5922_v56 }
 0x672   : > { %9538 = vmatmul.msk.f32.vlgmr.msra.gmra.mxu1 %vm3368_vm9, %v5935_v7 }
 0x673   : > { %v5995_v24 = vpop.permute.xlu1 %5994 }
 0x676   : > { %6033 = vmatmul.f32.gmra.mxu0 %v5936_v59  ;;  %6094 = vmatmul.f32.gmra.mxu3 %v5938_v61 }
 0x67a   : > { %9539 = vmatmul.msk.f32.gmra.mxu1 %vm3368_vm9, %v5937_v5 }
 0x67e   : > { %6036 = vmatmul.f32.gmra.mxu0 %v5938_v61  ;;  %6097 = vmatmul.f32.gmra.mxu3 %v5940_v29 }
 0x681   : > { %v5985_v11 = vpop.permute.xlu2 %5984 }
 0x682   : > { %9540 = vmatmul.msk.f32.gmra.mxu1 %vm3368_vm9, %v5939_v40 }
 0x686   : > { %6039 = vmatmul.f32.gmra.mxu0 %v5940_v29 }
 0x68a   : > { %9541 = vmatmul.msk.f32.gmra.mxu1 %vm3368_vm9, %v5941_v34 }
 0x692   : > { %v6000_v17 = vpop.permute.xlu2 %5999 }
 0x6a4   : > { %v14932_v59 = vpop.permute.xlu2 %10780 }
 0x6d6   : > { %v6118_v16 = vpop.f32.mrf.mxu2 }
 0x6de   : > { %v6121_v46 = vpop.f32.mrf.mxu2 }
 0x6e6   : > { %v6124_v7 = vpop.f32.mrf.mxu2 }
 0x6e9   : > { %v6089_v21 = vpop.f32.mrf.mxu3 }
 0x6ea   : > { %v6090_v13 = vadd.f32 %v6089_v21, %v5985_v11  ;;  %v6827_v21 = vld [vmem:[%s16374_s1 + $0x8] sm:$0xff] }
 0x6eb   : > { %v6031_v50 = vpop.f32.mrf.mxu0 }
 0x6ec   : > { %v6032_v49 = vadd.f32 %v6031_v50, %v5985_v11  ;;  %v14881_v33 = vadd.f32 %v6118_v16, %v6090_v13 }
 0x6ee   : > { %v6131_v32 = vmax.f32 %v14881_v33, 0.0  ;;  %v6127_v15 = vpop.f32.mrf.mxu2 }
 0x6ef   : > { %v6060_v58 = vpop.f32.mrf.mxu1 }
 0x6f0   : > { %v14883_v35 = vadd.f32 %v6060_v58, %v6032_v49 }
 0x6f1   : > { %v6092_v26 = vpop.f32.mrf.mxu3 }
 0x6f2   : > { %v6093_v60 = vadd.f32 %v6092_v26, %v5990_v10  ;;  %v6130_v53 = vmax.f32 %v14883_v35, 0.0 }
 0x6f3   : > { %v6034_v37 = vpop.f32.mrf.mxu0 }
 0x6f4   : > { %v6122_v30 = vadd.f32 %v6121_v46, %v6093_v60  ;;  %v6035_v54 = vadd.f32 %v6034_v37, %v5990_v10  ;;  %v10824_v51 = vpack.i.bf16 %v6131_v32, %v6130_v53  ;;  %v6826_v60 = vld [vmem:[%s16374_s1] sm:$0xff] }
 0x6f6   : > { %v14860_v14 = vmax.f32 %v6122_v30, 0.0 }
 0x6f7   : > { %v6063_v39 = vpop.f32.mrf.mxu1 }
 0x6f8   : > { %v6064_v41 = vadd.f32 %v6063_v39, %v6035_v54  ;;  %v10829_v22 = vpack.i.bf16 %v14852_v45, %v14860_v14  ;;  %v6829_v39 = vld [vmem:[%s16374_s1 + $0x18] sm:$0xff] }
 0x6f9   : > { %v6095_v48 = vpop.f32.mrf.mxu3 }
 0x6fa   : > { %v14864_v20 = vmax.f32 %v6064_v41, 0.0  ;;  %10830 = vrot.lane.b32.xlu2 %v10829_v22, %s16210_s6  ;;  %v6096_v3 = vadd.f32 %v6095_v48, %v5995_v24 }
 0x6fb   : > { %v6037_v44 = vpop.f32.mrf.mxu0 }
 0x6fc   : > { %v10784_v25 = vpack.i.bf16 %v14864_v20, %v14852_v45  ;;  %v6038_v57 = vadd.f32 %v6037_v44, %v5995_v24  ;;  %v6125_v28 = vadd.f32 %v6124_v7, %v6096_v3  ;;  %v10839_v63 = vpack.i.bf16 %v14860_v14, %v14864_v20 }
 0x6fd   : > { %v10783_v7 = vunpack.i.h.bf16 %v14932_v59 }
 0x6fe   : > { %10785 = vrot.lane.b32.xlu1 %v10784_v25, %s16210_s6  ;;  %v14873_v43 = vmax.f32 %v6125_v28, 0.0 }
 0x6ff   : > { %v6066_v12 = vpop.f32.mrf.mxu1 }
 0x700   : > { %v6067_v55 = vadd.f32 %v6066_v12, %v6038_v57  ;;  %v10782_v12 = vunpack.i.l.bf16 %v14932_v59 }
 0x701   : > { %v6098_v40 = vpop.f32.mrf.mxu3 }
 0x702   : > { %10835 = vrot.lane.b32.xlu2 %v10829_v22, %s16212_s19  ;;  %v14871_v18 = vmax.f32 %v6067_v55, 0.0  ;;  %v6099_v62 = vadd.f32 %v6098_v40, %v6000_v17 }
 0x703   : > { %v6040_v8 = vpop.f32.mrf.mxu0 }
 0x704   : > { %v6041_v1 = vadd.f32 %v6040_v8, %v6000_v17  ;;  %v10864_v5 = vpack.i.bf16 %v14873_v43, %v14871_v18  ;;  %v6128_v52 = vadd.f32 %v6127_v15, %v6099_v62 }
 0x706   : > { %10790 = vrot.lane.b32.xlu1 %v10784_v25, %s16212_s19  ;;  %v14901_v9 = vmax.f32 %v6128_v52, 0.0 }
 0x707   : > { %v6069_v0 = vpop.f32.mrf.mxu1 }
 0x708   : > { %v6070_v2 = vadd.f32 %v6069_v0, %v6041_v1  ;;  %v10884_v34 = vpack.i.bf16 %v14852_v45, %v14901_v9  ;;  %v10914_v47 = vpack.i.bf16 %v14873_v43, %v14901_v9 }
 0x70a   : > { %v14878_v36 = vmax.f32 %v6070_v2, 0.0  ;;  %10865 = vrot.lane.b32.xlu2 %v10864_v5, %s12043_s23 }
 0x70c   : > { %v10799_v4 = vpack.i.bf16 %v14878_v36, %v14871_v18  ;;  %v10794_v27 = vpack.i.bf16 %v14878_v36, %v14852_v45  ;;  %v10889_v38 = vpack.i.bf16 %v14901_v9, %v14878_v36 }
 0x70e   : > { %10800 = vrot.lane.b32.xlu0 %v10799_v4, %s16212_s19  ;;  %10795 = vrot.lane.b32.xlu1 %v10794_v27, %s16210_s6 }
 0x712   : > { %10870 = vrot.lane.b32.xlu2 %v10864_v5, %s12039_s29 }
 0x716   : > { %10825 = vrot.lane.b32.xlu1 %v10824_v51, %s16203_s16  ;;  %10805 = vrot.lane.b32.xlu0 %v10824_v51, %s16210_s6 }
 0x71a   : > { %10875 = vrot.lane.b32.xlu2 %v10864_v5, %s16203_s16 }
 0x71e   : > { %10840 = vrot.lane.b32.xlu1 %v10839_v63, %s12043_s23  ;;  %10810 = vrot.lane.b32.xlu0 %v10824_v51, %s16212_s19 }
 0x722   : > { %10885 = vrot.lane.b32.xlu2 %v10884_v34, %s16210_s6 }
 0x726   : > { %10845 = vrot.lane.b32.xlu1 %v10839_v63, %s12039_s29  ;;  %10815 = vrot.lane.b32.xlu0 %v10824_v51, %s12043_s23 }
 0x72a   : > { %10905 = vrot.lane.b32.xlu2 %v14856_v31, %s12043_s23 }
 0x72e   : > { %10855 = vrot.lane.b32.xlu1 %v10839_v63, %s12041_s22  ;;  %10820 = vrot.lane.b32.xlu0 %v10824_v51, %s12039_s29 }
 0x732   : > { %10915 = vrot.lane.b32.xlu2 %v10914_v47, %s16212_s19 }
 0x736   : > { %10890 = vrot.lane.b32.xlu1 %v10889_v38, %s12043_s23  ;;  %10850 = vrot.lane.b32.xlu0 %v10839_v63, %s16203_s16 }
 0x73a   : > { %10930 = vrot.lane.b32.xlu2 %v10889_v38, %s12041_s22 }
 0x73e   : > { %10920 = vrot.lane.b32.xlu1 %v10889_v38, %s16203_s16  ;;  %10860 = vrot.lane.b32.xlu0 %v10864_v5, %s16210_s6 }
 0x742   : > { %10935 = vrot.lane.b32.xlu2 %v14856_v31, %s16212_s19 }
 0x746   : > { %10925 = vrot.lane.b32.xlu1 %v10839_v63, %s12042_s20  ;;  %10880 = vrot.lane.b32.xlu0 %v10864_v5, %s12041_s22 }
 0x74a   : > { %10955 = vrot.lane.b32.xlu2 %v14856_v31, %s12039_s29 }
 0x74e   : > { %10945 = vrot.lane.b32.xlu1 %v10889_v38, %s12042_s20  ;;  %10895 = vrot.lane.b32.xlu0 %v10889_v38, %s12039_s29 }
 0x752   : > { %10970 = vrot.lane.b32.xlu2 %v14856_v31, %s12041_s22 }
 0x754   : > { %v14938_v19 = vpop.permute.xlu2 %10830 }
 0x756   : > { %10950 = vrot.lane.b32.xlu1 %v14856_v31, %s12039_s29  ;;  %10900 = vrot.lane.b32.xlu0 %v10824_v51, %s12041_s22  ;;  %s16379_s29 = smov 115  }
 0x75a   : > { %10980 = vrot.lane.b32.xlu2 %v10864_v5, %s12044_s5 }
 0x75c   : > { %v14944_v42 = vpop.permute.xlu2 %10835 }
 0x75e   : > { %10965 = vrot.lane.b32.xlu1 %v14856_v31, %s16203_s16  ;;  %10910 = vrot.lane.b32.xlu0 %v10864_v5, %s12042_s20 }
 0x762   : > { %10995 = vrot.lane.b32.xlu2 %v10824_v51, %s12044_s5 }
 0x764   : > { %v10866_v23 = vpop.permute.xlu2 %10865 }
 0x765   : > { %v10868_v24 = vunpack.i.h.bf16 %v10866_v23  ;;  %v10867_v11 = vunpack.i.l.bf16 %v10866_v23 }
 0x766   : > { %10990 = vrot.lane.b32.xlu1 %v10839_v63, %s12044_s5  ;;  %10940 = vrot.lane.b32.xlu0 %v10824_v51, %s12042_s20 }
 0x767   : > { %v6362_v2 = vsel %vm5736_vm15, %v10867_v11, %v10868_v24  ;;  %v6363_v40 = vsel %vm5736_vm15, %v10868_v24, %v10783_v7 }
 0x76a   : > { %11015 = vrot.lane.b32.xlu2 %v14856_v31, %s12044_s5 }
 0x76c   : > { %v14957_v56 = vpop.permute.xlu2 %10870 }
 0x76e   : > { %11005 = vrot.lane.b32.xlu1 %v10889_v38, %s12044_s5  ;;  %10960 = vrot.lane.b32.xlu0 %v14856_v31, %s16203_s16  ;;  %s16380_s16 = smov 116  }
 0x770   : > { %v14962_v61 = vpop.permute.xlu1 %10785 }
 0x772   : > { %6842 = vperm.xlu2 %10778, %v6828_v6  }
 0x774   : > { %v14970_v16 = vpop.permute.xlu2 %10875 }
 0x776   : > { %11010 = vrot.lane.b32.xlu1 %v14856_v31, %s12042_s20  ;;  %10975 = vrot.lane.b32.xlu0 %v14856_v31, %s12041_s22  ;;  %s16214_s22 = smov 114  }
 0x778   : > { %v14968_v29 = vpop.permute.xlu1 %10790 }
 0x77c   : > { %v14981_v10 = vpop.permute.xlu2 %10885 }
 0x77d   : > { %v10888_v7 = vunpack.i.h.bf16 %v14981_v10 }
 0x77e   : > { %6837 = vperm.xlu1 %9997, %v6827_v21   ;;  %10985 = vrot.lane.b32.xlu0 %v14856_v31, %s12042_s20  ;;  %v10838_v21 = vunpack.i.h.bf16 %v14944_v42 }
 0x780   : > { %v14977_v50 = vpop.permute.xlu0 %10800  ;;  %v14979_v58 = vpop.permute.xlu1 %10795 }
 0x781   : > { %v10803_v63 = vunpack.i.h.bf16 %v14977_v50 }
 0x784   : > { %v10906_v37 = vpop.permute.xlu2 %10905 }
 0x785   : > { %v10907_v8 = vunpack.i.l.bf16 %v10906_v37  ;;  %v10908_v5 = vunpack.i.h.bf16 %v10906_v37  ;;  %v10793_v37 = vunpack.i.h.bf16 %v14968_v29 }
 0x786   : > { %11000 = vrot.lane.b32.xlu0 %v14856_v31, %s12044_s5  ;;  %s15207_s5 = scalar_lea.vmem [#allocation29], %s9580_s8  ;;  %s12045_s8 = smov 122  }
 0x787   : > { %7053 = vst [vmem:[%s15207_s5 + $0x10] sm:$0xff] %v14852_v45 }
 0x788   : > { %v14985_v26 = vpop.permute.xlu1 %10825  ;;  %v14987_v46 = vpop.permute.xlu0 %10805  ;;  %7054 = vst [vmem:[%s15207_s5 + $0x28] sm:$0xff] %v14852_v45 }
 0x789   : > { %v10828_v35 = vunpack.i.h.bf16 %v14985_v26  ;;  %7055 = vst [vmem:[%s15207_s5 + $0x40] sm:$0xff] %v14852_v45 }
 0x78a   : > { %7056 = vst [vmem:[%s15207_s5 + $0x58] sm:$0xff] %v14852_v45 }
 0x78c   : > { %v10916_v41 = vpop.permute.xlu2 %10915 }
 0x78d   : > { %v10917_v62 = vunpack.i.l.bf16 %v10916_v41  ;;  %v10918_v38 = vunpack.i.h.bf16 %v10916_v41 }
 0x78e   : > { %6832 = vperm.xlu0 %9996, %v6826_v60   ;;  %v10837_v60 = vunpack.i.l.bf16 %v14944_v42 }
 0x790   : > { %v10841_v30 = vpop.permute.xlu1 %10840  ;;  %v14992_v54 = vpop.permute.xlu0 %10810 }
 0x791   : > { %v10843_v17 = vunpack.i.h.bf16 %v10841_v30  ;;  %v10842_v1 = vunpack.i.l.bf16 %v10841_v30  ;;  %v10802_v30 = vunpack.i.l.bf16 %v14977_v50  ;;  %v10813_v41 = vunpack.i.h.bf16 %v14992_v54 }
 0x792   : > { %v10812_v24 = vunpack.i.l.bf16 %v14992_v54  ;;  %v6289_v50 = vsel %vm869_vm6, %v10837_v60, %v10838_v21 }
 0x793   : > { %v6360_v15 = vsel %vm5736_vm15, %v10842_v1, %v10843_v17  ;;  %v6361_v52 = vsel %vm5736_vm15, %v10843_v17, %v10907_v8  ;;  %v6290_v11 = vsel %vm869_vm6, %v10802_v30, %v10918_v38 }
 0x794   : > { %v15003_v25 = vpop.permute.xlu2 %10930  ;;  %v6286_v1 = vsel %vm869_vm6, %v10812_v24, %v10813_v41 }
 0x796   : > { %6847 = vperm.xlu0 %9996, %v6829_v39   ;;  %v6292_v39 = vsel %vm869_vm6, %v10803_v63, %v10917_v62  ;;  %v10872_v63 = vunpack.i.l.bf16 %v14957_v56 }
 0x798   : > { %v14997_v31 = vpop.permute.xlu1 %10845  ;;  %v10816_v22 = vpop.permute.xlu0 %10815 }
 0x799   : > { %v10818_v4 = vunpack.i.h.bf16 %v10816_v22  ;;  %v10817_v27 = vunpack.i.l.bf16 %v10816_v22  ;;  %v10847_v21 = vunpack.i.l.bf16 %v14997_v31 }
 0x79b   : > { %v6358_v23 = vsel %vm5736_vm15, %v10817_v27, %v10818_v4  ;;  %v6359_v6 = vsel %vm5736_vm15, %v10818_v4, %v10908_v5  ;;  %v10808_v27 = vunpack.i.h.bf16 %v14987_v46 }
 0x79c   : > { %v10936_v13 = vpop.permute.xlu2 %10935 }
 0x79d   : > { %v10937_v51 = vunpack.i.l.bf16 %v10936_v13  ;;  %v10938_v59 = vunpack.i.h.bf16 %v10936_v13  ;;  %v10788_v13 = vunpack.i.h.bf16 %v14962_v61 }
 0x79f   : > { %v6293_v22 = vsel %vm869_vm6, %v10917_v62, %v10937_v51  ;;  %v6291_v42 = vsel %vm869_vm6, %v10918_v38, %v10938_v59  ;;  %v10787_v51 = vunpack.i.l.bf16 %v14962_v61  ;;  %v10848_v61 = vunpack.i.h.bf16 %v14997_v31 }
 0x7a0   : > { %v14999_v48 = vpop.permute.xlu1 %10855  ;;  %v15001_v44 = vpop.permute.xlu0 %10820 }
 0x7a4   : > { %v10956_v30 = vpop.permute.xlu2 %10955 }
 0x7a8   : > { %v10891_v3 = vpop.permute.xlu1 %10890  ;;  %v15005_v57 = vpop.permute.xlu0 %10850 }
 0x7a9   : > { %v10893_v55 = vunpack.i.h.bf16 %v10891_v3  ;;  %v10892_v28 = vunpack.i.l.bf16 %v10891_v3  ;;  %v10792_v3 = vunpack.i.l.bf16 %v14968_v29 }
 0x7ab   : > { %v6364_v0 = vsel %vm5736_vm15, %v10892_v28, %v10893_v55  ;;  %v6365_v49 = vsel %vm5736_vm15, %v10893_v55, %v10782_v12  ;;  %v10887_v12 = vunpack.i.l.bf16 %v14981_v10  ;;  %v10798_v55 = vunpack.i.h.bf16 %v14979_v58 }
 0x7ac   : > { %6863 = vmatpush.msrb.mxu1 %v6364_v0  ;;  %6950 = vmatpush.msrb.mxu3 %v6365_v49  ;;  %v6288_v28 = vsel %vm869_vm6, %v10793_v37, %v10837_v60  ;;  %v6287_v0 = vsel %vm869_vm6, %v10813_v41, %v10792_v3  ;;  %v10833_v49 = vunpack.i.h.bf16 %v14938_v19  ;;  %v10832_v10 = vunpack.i.l.bf16 %v14938_v19 }
 0x7ad   : > { %v6220_v5 = vsel %vm787_vm7, %v10798_v55, %v10887_v12  ;;  %v6221_v4 = vsel %vm787_vm7, %v10887_v12, %v10888_v7  ;;  %v10822_v37 = vunpack.i.l.bf16 %v15001_v44  ;;  %v10957_v7 = vunpack.i.l.bf16 %v10956_v30  ;;  %v15097_v55 = vpop.permute.xlu2 %10970 }
 0x7ae   : > { %6864 = vmatpush.msrb.mxu1 %v6362_v2  ;;  %6951 = vmatpush.msrb.mxu3 %v6363_v40  ;;  %v10797_v2 = vunpack.i.l.bf16 %v14979_v58  ;;  %v10807_v40 = vunpack.i.l.bf16 %v14987_v46  ;;  %v6216_v58 = vsel %vm787_vm7, %v10788_v13, %v10832_v10  ;;  %v6745_v13 = vld [vmem:[#allocation22 + $0x18] sm:$0xff] }
 0x7b0   : > { %v15016_v34 = vpop.permute.xlu1 %10920  ;;  %6865 = vmatpush.msrb.mxu1 %v6360_v15  ;;  %6952 = vmatpush.msrb.mxu3 %v6361_v52  ;;  %v10861_v47 = vpop.permute.xlu0 %10860  ;;  %v6217_v15 = vsel %vm787_vm7, %v10832_v10, %v10833_v49  ;;  %v10873_v52 = vunpack.i.h.bf16 %v14957_v56  ;;  %v10823_v56 = vunpack.i.h.bf16 %v15001_v44  ;;  %v10878_v44 = vunpack.i.h.bf16 %v14970_v16 }
 0x7b1   : > { %v10863_v17 = vunpack.i.h.bf16 %v10861_v47  ;;  %v10862_v29 = vunpack.i.l.bf16 %v10861_v47  ;;  %v10922_v31 = vunpack.i.l.bf16 %v15016_v34  ;;  %v6649_v49 = vsel %vm5884_vm10, %v10848_v61, %v10957_v7 }
 0x7b2   : > { %6866 = vmatpush.msrb.mxu1 %v6358_v23  ;;  %6953 = vmatpush.msrb.mxu3 %v6359_v6  ;;  %v6214_v23 = vsel %vm787_vm7, %v10807_v40, %v10808_v27  ;;  %v6215_v6 = vsel %vm787_vm7, %v10808_v27, %v10787_v51  ;;  %v10858_v27 = vunpack.i.h.bf16 %v14999_v48  ;;  %v10857_v40 = vunpack.i.l.bf16 %v14999_v48 }
 0x7b3   : > { %v6218_v62 = vsel %vm787_vm7, %v10862_v29, %v10863_v17  ;;  %v6219_v19 = vsel %vm787_vm7, %v10863_v17, %v10797_v2  ;;  %v10933_v17 = vunpack.i.h.bf16 %v15003_v25  ;;  %v10932_v29 = vunpack.i.l.bf16 %v15003_v25 }
 0x7b4   : > { %6867 = vmatpush.msrb.mxu1 %v6292_v39  ;;  %6954 = vmatpush.msrb.mxu3 %v6293_v22  ;;  %v6650_v39 = vsel %vm5884_vm10, %v10872_v63, %v10873_v52  ;;  %v10923_v22 = vunpack.i.h.bf16 %v15016_v34 }
 0x7b6   : > { %6868 = vmatpush.msrb.mxu1 %v6290_v11  ;;  %6955 = vmatpush.msrb.mxu3 %v6291_v42  ;;  %v6646_v42 = vsel %vm5884_vm10, %v10822_v37, %v10823_v56 }
 0x7b8   : > { %v15036_v8 = vpop.permute.xlu1 %10925  ;;  %v15038_v54 = vpop.permute.xlu0 %10880  ;;  %6869 = vmatpush.msrb.mxu1 %v6288_v28  ;;  %6956 = vmatpush.msrb.mxu3 %v6289_v50  ;;  %v6580_v50 = vsel %vm5847_vm11, %v10922_v31, %v10923_v22 }
 0x7b9   : > { %v10883_v2 = vunpack.i.h.bf16 %v15038_v54 }
 0x7ba   : > { %6870 = vmatpush.msrb.mxu1 %v6286_v1  ;;  %6957 = vmatpush.msrb.mxu3 %v6287_v0 }
 0x7bc   : > { %6871 = vmatpush.msrb.mxu1 %v6220_v5  ;;  %6958 = vmatpush.msrb.mxu3 %v6221_v4  ;;  %v10882_v5 = vunpack.i.l.bf16 %v15038_v54 }
 0x7be   : > { %6872 = vmatpush.msrb.mxu1 %v6218_v62  ;;  %6959 = vmatpush.msrb.mxu3 %v6219_v19  ;;  %v6508_v62 = vsel %vm5810_vm12, %v10932_v29, %v10933_v17 }
 0x7c0   : > { %v15057_v47 = vpop.permute.xlu1 %10945  ;;  %v10896_v38 = vpop.permute.xlu0 %10895  ;;  %6873 = vmatpush.msrb.mxu1 %v6216_v58  ;;  %6960 = vmatpush.msrb.mxu3 %v6217_v15  ;;  %v6506_v58 = vsel %vm5810_vm12, %v10882_v5, %v10883_v2 }
 0x7c1   : > { %v10898_v46 = vunpack.i.h.bf16 %v10896_v38  ;;  %v10897_v59 = vunpack.i.l.bf16 %v10896_v38  ;;  %v10948_v15 = vunpack.i.h.bf16 %v15057_v47 }
 0x7c2   : > { %6874 = vmatpush.msrb.mxu1 %v6214_v23  ;;  %6961 = vmatpush.msrb.mxu3 %v6215_v6  ;;  %v6748_v23 = vld [vmem:[#allocation22 + $0x30] sm:$0xff] }
 0x7c3   : > { %v6652_v60 = vsel %vm5884_vm10, %v10897_v59, %v10898_v46  ;;  %v15134_v59 = vpop.permute.xlu2 %10980 }
 0x7c4   : > { %6875 = vmatpush.msrb.mxu1 %v14878_v36  ;;  %6892 = vmatpush.msrb.mxu0 %v6652_v60  ;;  %v6648_v36 = vsel %vm5884_vm10, %v10847_v21, %v10848_v61  ;;  %v10928_v60 = vunpack.i.h.bf16 %v15036_v8 }
 0x7c5   : > { %6962 = vmatpush.msrb.mxu3 %v14901_v9  ;;  %v6742_v9 = vld [vmem:[#allocation22] sm:$0xff] }
 0x7c6   : > { %6876 = vmatpush.msrb.mxu1 %v14871_v18  ;;  %6893 = vmatpush.msrb.mxu0 %v6650_v39  ;;  %v10877_v18 = vunpack.i.l.bf16 %v14970_v16 }
 0x7c7   : > { %6963 = vmatpush.msrb.mxu3 %v14873_v43  ;;  %v10853_v43 = vunpack.i.h.bf16 %v15005_v57 }
 0x7c8   : > { %v10951_v41 = vpop.permute.xlu1 %10950  ;;  %v15074_v24 = vpop.permute.xlu0 %10900  ;;  %6877 = vmatpush.msrb.mxu1 %v14864_v20  ;;  %6894 = vmatpush.msrb.mxu0 %v6648_v36  ;;  %v10852_v20 = vunpack.i.l.bf16 %v15005_v57  ;;  %v6578_v33 = vsel %vm5847_vm11, %v10877_v18, %v10878_v44 }
 0x7c9   : > { %v10952_v11 = vunpack.i.l.bf16 %v10951_v41  ;;  %6964 = vmatpush.msrb.mxu3 %v14860_v14  ;;  %v10953_v3 = vunpack.i.h.bf16 %v10951_v41  ;;  %v10903_v19 = vunpack.i.h.bf16 %v15074_v24  ;;  %v10902_v51 = vunpack.i.l.bf16 %v15074_v24 }
 0x7ca   : > { %6878 = vmatpush.msrb.mxu1 %v6130_v53  ;;  %6895 = vmatpush.msrb.mxu0 %v6646_v42  ;;  %v10827_v53 = vunpack.i.l.bf16 %v14985_v26  ;;  %v6576_v28 = vsel %vm5847_vm11, %v10852_v20, %v10853_v43  ;;  %v15158_v20 = vld [vmem:[#allocation22 + $0x8] sm:$0xff] }
 0x7cb   : > { %6965 = vmatpush.msrb.mxu3 %v6131_v32  ;;  %6879 = vmatmul.f32.vlgmr.msrb.gmra.mxu1 %v6742_v9  ;;  %v6653_v14 = vsel %vm5884_vm10, %v10898_v46, %v10952_v11  ;;  %v10958_v32 = vunpack.i.h.bf16 %v10956_v30  ;;  %v6651_v12 = vsel %vm5884_vm10, %v10873_v52, %v10953_v3  ;;  %v10947_v52 = vunpack.i.l.bf16 %v15057_v47  ;;  %v6751_v3 = vld [vmem:[#allocation22 + $0x48] sm:$0xff] }
 0x7cc   : > { %6966 = vmatmul.f32.vlgmr.msrb.gmra.mxu3 %v6742_v9  ;;  %6896 = vmatpush.msrb.mxu0 %v6580_v50  ;;  %v6574_v10 = vsel %vm5847_vm11, %v10827_v53, %v10828_v35  ;;  %v6504_v46 = vsel %vm5810_vm12, %v10857_v40, %v10858_v27  ;;  %v6502_v21 = vsel %vm5810_vm12, %v10902_v51, %v10903_v19  ;;  %v10983_v50 = vunpack.i.h.bf16 %v15134_v59  ;;  %v15165_v53 = vpop.permute.xlu2 %10995 }
 0x7cd   : > { %6979 = vmatpush.msra.mxu1 %v6653_v14  ;;  %v6647_v4 = vsel %vm5884_vm10, %v10823_v56, %v10958_v32  ;;  %v10927_v56 = vunpack.i.l.bf16 %v15036_v8  ;;  %v6436_v37 = vsel %vm5773_vm13, %v10947_v52, %v10948_v15  ;;  %v10982_v14 = vunpack.i.l.bf16 %v15134_v59 }
 0x7ce   : > { %6897 = vmatpush.msrb.mxu0 %v6578_v33 }
 0x7cf   : > { %6980 = vmatpush.msra.mxu1 %v6651_v12  ;;  %v6432_v9 = vsel %vm5773_vm13, %v10927_v56, %v10928_v60  ;;  %v6722_v34 = vsel %vm5921_vm14, %v10982_v14, %v10983_v50 }
 0x7d0   : > { %v15104_v1 = vpop.permute.xlu1 %10965  ;;  %v15106_v0 = vpop.permute.xlu0 %10910  ;;  %6898 = vmatpush.msrb.mxu0 %v6576_v28 }
 0x7d1   : > { %6981 = vmatpush.msra.mxu1 %v6649_v49  ;;  %v10913_v6 = vunpack.i.h.bf16 %v15106_v0  ;;  %v10912_v61 = vunpack.i.l.bf16 %v15106_v0  ;;  %v10967_v49 = vunpack.i.l.bf16 %v15104_v1 }
 0x7d2   : > { %6899 = vmatpush.msrb.mxu0 %v6574_v10  ;;  %v10998_v10 = vunpack.i.h.bf16 %v15165_v53 }
 0x7d3   : > { %6982 = vmatpush.msra.mxu1 %v6647_v4  ;;  %v6434_v31 = vsel %vm5773_vm13, %v10912_v61, %v10913_v6  ;;  %v6577_v51 = vsel %vm5847_vm11, %v10853_v43, %v10967_v49  ;;  %v6747_v61 = vld [vmem:[#allocation22 + $0x28] sm:$0xff] }
 0x7d4   : > { %6882 = vmatmul.f32.gmra.mxu1 %v6745_v13  ;;  %6969 = vmatmul.f32.gmra.mxu3 %v6745_v13  ;;  %v10997_v13 = vunpack.i.l.bf16 %v15165_v53 }
 0x7d5   : > { %6900 = vmatpush.msrb.mxu0 %v6508_v62  ;;  %v10972_v62 = vunpack.i.l.bf16 %v15097_v55 }
 0x7d6   : > { %v6718_v16 = vsel %vm5921_vm14, %v10997_v13, %v10998_v10 }
 0x7d7   : > { %6901 = vmatpush.msrb.mxu0 %v6506_v58  ;;  %v10973_v58 = vunpack.i.h.bf16 %v15097_v55  ;;  %v6509_v26 = vsel %vm5810_vm12, %v10933_v17, %v10972_v62  ;;  %v6749_v17 = vld [vmem:[#allocation22 + $0x38] sm:$0xff] }
 0x7d8   : > { %v15127_v63 = vpop.permute.xlu1 %10990  ;;  %v15129_v38 = vpop.permute.xlu0 %10940 }
 0x7d9   : > { %6902 = vmatpush.msrb.mxu0 %v6504_v46  ;;  %v10943_v30 = vunpack.i.h.bf16 %v15129_v38  ;;  %v10942_v39 = vunpack.i.l.bf16 %v15129_v38  ;;  %v10993_v28 = vunpack.i.h.bf16 %v15127_v63  ;;  %v10992_v29 = vunpack.i.l.bf16 %v15127_v63 }
 0x7db   : > { %6903 = vmatpush.msrb.mxu0 %v6502_v21  ;;  %v6430_v7 = vsel %vm5773_vm13, %v10942_v39, %v10943_v30  ;;  %v6720_v4 = vsel %vm5921_vm14, %v10992_v29, %v10993_v28 }
 0x7dc   : > { %6885 = vmatmul.f32.gmra.mxu1 %v6748_v23  ;;  %6972 = vmatmul.f32.gmra.mxu3 %v6748_v23 }
 0x7dd   : > { %6904 = vmatpush.msrb.mxu0 %v6436_v37 }
 0x7df   : > { %6905 = vmatpush.msrb.mxu0 %v6434_v31 }
 0x7e0   : > { %v15151_v36 = vpop.permute.xlu1 %11005  ;;  %v10961_v41 = vpop.permute.xlu0 %10960 }
 0x7e1   : > { %v11008_v18 = vunpack.i.h.bf16 %v15151_v36  ;;  %v11007_v11 = vunpack.i.l.bf16 %v15151_v36  ;;  %v10962_v42 = vunpack.i.l.bf16 %v10961_v41  ;;  %6906 = vmatpush.msrb.mxu0 %v6432_v9  ;;  %v10963_v33 = vunpack.i.h.bf16 %v10961_v41 }
 0x7e3   : > { %6907 = vmatpush.msrb.mxu0 %v6430_v7  ;;  %v6724_v32 = vsel %vm5921_vm14, %v11007_v11, %v11008_v18  ;;  %v6581_v12 = vsel %vm5847_vm11, %v10923_v22, %v10962_v42  ;;  %v10968_v22 = vunpack.i.h.bf16 %v15104_v1  ;;  %v6579_v5 = vsel %vm5847_vm11, %v10878_v44, %v10963_v33  ;;  %v15193_v1 = vld [vmem:[#allocation22 + $0x20] sm:$0xff]  ;;  %v15198_v44 = vld [vmem:[#allocation22 + $0x10] sm:$0xff] }
 0x7e4   : > { %6888 = vmatmul.f32.gmra.mxu1 %v6751_v3  ;;  %6908 = vmatmul.f32.vlgmr.msrb.gmra.mxu0 %v15158_v20 }
 0x7e5   : > { %6975 = vmatmul.f32.gmra.mxu3 %v6751_v3  ;;  %6933 = vmatpush.msrb.mxu2 %v6724_v32  ;;  %v6575_v52 = vsel %vm5847_vm11, %v10828_v35, %v10968_v22  ;;  %v6507_v35 = vsel %vm5810_vm12, %v10883_v2, %v10973_v58 }
 0x7e6   : > { %6983 = vmatpush.msra.mxu1 %v6581_v12 }
 0x7e7   : > { %6934 = vmatpush.msrb.mxu2 %v6722_v34 }
 0x7e8   : > { %6984 = vmatpush.msra.mxu1 %v6579_v5  ;;  %v10976_v40 = vpop.permute.xlu0 %10975  ;;  %v11011_v23 = vpop.permute.xlu1 %11010 }
 0x7e9   : > { %6935 = vmatpush.msrb.mxu2 %v6720_v4  ;;  %v10977_v57 = vunpack.i.l.bf16 %v10976_v40  ;;  %v10978_v43 = vunpack.i.h.bf16 %v10976_v40  ;;  %v11012_v56 = vunpack.i.l.bf16 %v11011_v23  ;;  %v11013_v48 = vunpack.i.h.bf16 %v11011_v23 }
 0x7ea   : > { %6985 = vmatpush.msra.mxu1 %v6577_v51 }
 0x7eb   : > { %6936 = vmatpush.msrb.mxu2 %v6718_v16  ;;  %v6505_v25 = vsel %vm5810_vm12, %v10858_v27, %v10977_v57  ;;  %v6503_v54 = vsel %vm5810_vm12, %v10903_v19, %v10978_v43  ;;  %v6433_v47 = vsel %vm5773_vm13, %v10928_v60, %v11012_v56  ;;  %v6752_v19 = vld [vmem:[#allocation22 + $0x50] sm:$0xff]  ;;  %v6431_v31 = vsel %vm5773_vm13, %v10943_v30, %v11013_v48  ;;  %v6753_v30 = vld [vmem:[#allocation22 + $0x58] sm:$0xff] }
 0x7ec   : > { %6986 = vmatpush.msra.mxu1 %v6575_v52  ;;  %6911 = vmatmul.f32.gmra.mxu0 %v15193_v1 }
 0x7ed   : > { %9546 = vmatmul.msk.f32.vlgmr.msrb.gmra.mxu2 %vm6850_vm0, %v15198_v44 }
 0x7ee   : > { %6987 = vmatpush.msra.mxu1 %v6509_v26 }
 0x7f0   : > { %6988 = vmatpush.msra.mxu1 %v6507_v35  ;;  %v10986_v55 = vpop.permute.xlu0 %10985  ;;  %v6838_v32 = vpop.permute.xlu1 %6837 }
 0x7f1   : > { %v10987_v46 = vunpack.i.l.bf16 %v10986_v55  ;;  %v10988_v21 = vunpack.i.h.bf16 %v10986_v55 }
 0x7f2   : > { %6989 = vmatpush.msra.mxu1 %v6505_v25 }
 0x7f3   : > { %v6437_v2 = vsel %vm5773_vm13, %v10948_v15, %v10987_v46  ;;  %v6435_v27 = vsel %vm5773_vm13, %v10913_v6, %v10988_v21  ;;  %v6750_v15 = vld [vmem:[#allocation22 + $0x40] sm:$0xff]  ;;  %v11016_v6 = vpop.permute.xlu2 %11015 }
 0x7f4   : > { %6990 = vmatpush.msra.mxu1 %v6503_v54  ;;  %6914 = vmatmul.f32.gmra.mxu0 %v6749_v17  ;;  %v11017_v41 = vunpack.i.l.bf16 %v11016_v6  ;;  %v11018_v8 = vunpack.i.h.bf16 %v11016_v6 }
 0x7f5   : > { %9547 = vmatmul.msk.f32.gmra.mxu2 %vm6850_vm0, %v6747_v61 }
 0x7f6   : > { %6991 = vmatpush.msra.mxu1 %v6437_v2  ;;  %v6721_v60 = vsel %vm5921_vm14, %v10993_v28, %v11017_v41  ;;  %v6719_v36 = vsel %vm5921_vm14, %v10998_v10, %v11018_v8 }
 0x7f8   : > { %6992 = vmatpush.msra.mxu1 %v6435_v27  ;;  %v11001_v37 = vpop.permute.xlu0 %11000 }
 0x7f9   : > { %v11002_v24 = vunpack.i.l.bf16 %v11001_v37  ;;  %v11003_v39 = vunpack.i.h.bf16 %v11001_v37  ;;  %v11596_v37 = vld [vmem:[%s13448_s10 + $0x58] sm:$0xff] }
 0x7fa   : > { %6993 = vmatpush.msra.mxu1 %v6433_v47 }
 0x7fb   : > { %v6725_v0 = vsel %vm5921_vm14, %v11008_v18, %v11002_v24  ;;  %v6723_v38 = vsel %vm5921_vm14, %v10983_v50, %v11003_v39  ;;  %v6843_v5 = vpop.permute.xlu2 %6842 }
 0x7fc   : > { %6994 = vmatpush.msra.mxu1 %v6431_v31  ;;  %6917 = vmatmul.f32.gmra.mxu0 %v6752_v19 }
 0x7fd   : > { %9548 = vmatmul.msk.f32.gmra.mxu2 %vm6850_vm0, %v6750_v15  ;;  %6995 = vmatmul.f32.vlgmr.msra.gmra.mxu1 %v15158_v20 }
 0x7fe   : > { %7020 = vmatpush.msra.mxu0 %v6725_v0 }
 0x800   : > { %7021 = vmatpush.msra.mxu0 %v6723_v38  ;;  %v6833_v42 = vpop.permute.xlu0 %6832 }
 0x802   : > { %7022 = vmatpush.msra.mxu0 %v6721_v60 }
 0x804   : > { %7023 = vmatpush.msra.mxu0 %v6719_v36 }
 0x805   : > { %9549 = vmatmul.msk.f32.gmra.mxu2 %vm6850_vm0, %v6753_v30  ;;  %6998 = vmatmul.f32.gmra.mxu1 %v15193_v1 }
 0x806   : > { %9550 = vmatmul.msk.f32.vlgmr.msra.gmra.mxu0 %vm6850_vm0, %v15198_v44 }
 0x808   : > { %v6848_v43 = vpop.permute.xlu0 %6847 }
 0x80d   : > { %7001 = vmatmul.f32.gmra.mxu1 %v6749_v17 }
 0x80e   : > { %9551 = vmatmul.msk.f32.gmra.mxu0 %vm6850_vm0, %v6747_v61 }
 0x815   : > { %7004 = vmatmul.f32.gmra.mxu1 %v6752_v19 }
 0x816   : > { %9552 = vmatmul.msk.f32.gmra.mxu0 %vm6850_vm0, %v6750_v15 }
 0x81e   : > { %9553 = vmatmul.msk.f32.gmra.mxu0 %vm6850_vm0, %v6753_v30 }
 0x848   : > { %v6880_v63 = vpop.f32.mrf.mxu1 }
 0x849   : > { %v6881_v3 = vadd.f32 %v6880_v63, %v6833_v42 }
 0x84f   : > { %v6967_v28 = vpop.f32.mrf.mxu3 }
 0x850   : > { %v6968_v51 = vadd.f32 %v6967_v28, %v6833_v42  ;;  %v7264_v42 = vld [vmem:[#allocation24 + $0xf8] sm:$0xff] }
 0x851   : > { %v6883_v59 = vpop.f32.mrf.mxu1  ;;  %7355 = vmatpush.msrb.mxu1 %v7264_v42  ;;  %v7292_v28 = vld [vmem:[#allocation24 + $0x1d8] sm:$0xff]  ;;  %v7267_v42 = vld [vmem:[#allocation24 + $0x110] sm:$0xff] }
 0x852   : > { %v6884_v12 = vadd.f32 %v6883_v59, %v6838_v32 }
 0x857   : > { %v6970_v16 = vpop.f32.mrf.mxu3 }
 0x858   : > { %v6971_v25 = vadd.f32 %v6970_v16, %v6838_v32  ;;  %v7291_v32 = vld [vmem:[#allocation24 + $0x1d0] sm:$0xff]  ;;  %v7286_v16 = vld [vmem:[#allocation24 + $0x1a8] sm:$0xff] }
 0x859   : > { %v6886_v18 = vpop.f32.mrf.mxu1 }
 0x85a   : > { %v6887_v4 = vadd.f32 %v6886_v18, %v6843_v5  ;;  %v7263_v18 = vld [vmem:[#allocation24 + $0xf0] sm:$0xff] }
 0x85b   : > { %7297 = vmatpush.msra.mxu2 %v7263_v18  ;;  %v7270_v18 = vld [vmem:[#allocation24 + $0x128] sm:$0xff] }
 0x85f   : > { %v6973_v54 = vpop.f32.mrf.mxu3 }
 0x860   : > { %v6974_v19 = vadd.f32 %v6973_v54, %v6843_v5  ;;  %v7287_v5 = vld [vmem:[#allocation24 + $0x1b0] sm:$0xff]  ;;  %v7277_v54 = vld [vmem:[#allocation24 + $0x160] sm:$0xff] }
 0x861   : > { %v6909_v9 = vpop.f32.mrf.mxu0  ;;  %v6889_v53 = vpop.f32.mrf.mxu1 }
 0x862   : > { %v6910_v20 = vadd.f32 %v6909_v9, %v6881_v3  ;;  %v6890_v35 = vadd.f32 %v6889_v53, %v6848_v43  ;;  %v7296_v3 = vld [vmem:[#allocation24 + $0x1f8] sm:$0xff]  ;;  %v7259_v53 = vld [vmem:[#allocation24 + $0xd0] sm:$0xff] }
 0x863   : > { %7384 = vmatpush.msrb.mxu0 %v7296_v3  ;;  %v7236_v3 = vld [vmem:[#allocation24 + $0x18] sm:$0xff] }
 0x868   : > { %v6976_v6 = vpop.f32.mrf.mxu3 }
 0x869   : > { %v6912_v11 = vpop.f32.mrf.mxu0  ;;  %v6977_v38 = vadd.f32 %v6976_v6, %v6848_v43  ;;  %v7249_v43 = vld [vmem:[#allocation24 + $0x80] sm:$0xff]  ;;  %v7239_v6 = vld [vmem:[#allocation24 + $0x30] sm:$0xff] }
 0x86a   : > { %v6913_v29 = vadd.f32 %v6912_v11, %v6884_v12  ;;  %v7295_v11 = vld [vmem:[#allocation24 + $0x1f0] sm:$0xff]  ;;  %v7260_v12 = vld [vmem:[#allocation24 + $0xd8] sm:$0xff] }
 0x86b   : > { %7326 = vmatpush.msra.mxu3 %v7295_v11  ;;  %v7235_v11 = vld [vmem:[#allocation24 + $0x10] sm:$0xff] }
 0x870   : > { %v6938_v50 = vpop.f32.mrf.mxu2 }
 0x871   : > { %v6939_v14 = vadd.f32 %v6938_v50, %v6910_v20  ;;  %v6915_v7 = vpop.f32.mrf.mxu0  ;;  %v7261_v20 = vld [vmem:[#allocation24 + $0xe0] sm:$0xff] }
 0x872   : > { %v6916_v62 = vadd.f32 %v6915_v7, %v6887_v4  ;;  %v7293_v50 = vld [vmem:[#allocation24 + $0x1e0] sm:$0xff]  ;;  %v7294_v7 = vld [vmem:[#allocation24 + $0x1e8] sm:$0xff]  ;;  %7298 = vmatpush.msra.mxu2 %v7261_v20  ;;  %v7256_v4 = vld [vmem:[#allocation24 + $0xb8] sm:$0xff] }
 0x873   : > { %v15265_v33 = vmax.f32 %v6939_v14, 0.0  ;;  %v7262_v14 = vld [vmem:[#allocation24 + $0xe8] sm:$0xff]  ;;  %7327 = vmatpush.msra.mxu3 %v7293_v50  ;;  %7385 = vmatpush.msrb.mxu0 %v7294_v7  ;;  %v7268_v20 = vld [vmem:[#allocation24 + $0x118] sm:$0xff]  ;;  %v7233_v50 = vld [vmem:[#allocation24] sm:$0xff] }
 0x874   : > { %7356 = vmatpush.msrb.mxu1 %v7262_v14  ;;  %7299 = vmatpush.msra.mxu2 %v7259_v53  ;;  %v7265_v14 = vld [vmem:[#allocation24 + $0x100] sm:$0xff]  ;;  %v7234_v7 = vld [vmem:[#allocation24 + $0x8] sm:$0xff] }
 0x875   : > { %7045 = vst [vmem:[%s15207_s5] sm:$0xff] %v15265_v33  ;;  %7328 = vmatpush.msra.mxu3 %v7291_v32  ;;  %7386 = vmatpush.msrb.mxu0 %v7292_v28  ;;  %v7266_v32 = vld [vmem:[#allocation24 + $0x108] sm:$0xff] }
 0x876   : > { %7357 = vmatpush.msrb.mxu1 %v7260_v12 }
 0x878   : > { %v6941_v49 = vpop.f32.mrf.mxu2 }
 0x879   : > { %v6942_v10 = vadd.f32 %v6941_v49, %v6913_v29  ;;  %v6918_v13 = vpop.f32.mrf.mxu0  ;;  %v7257_v29 = vld [vmem:[#allocation24 + $0xc0] sm:$0xff] }
 0x87a   : > { %v6996_v34 = vpop.f32.mrf.mxu1  ;;  %v6919_v46 = vadd.f32 %v6918_v13, %v6890_v35  ;;  %v7289_v49 = vld [vmem:[#allocation24 + $0x1c0] sm:$0xff]  ;;  %7300 = vmatpush.msra.mxu2 %v7257_v29  ;;  %v7290_v13 = vld [vmem:[#allocation24 + $0x1c8] sm:$0xff] }
 0x87b   : > { %v15269_v22 = vmax.f32 %v6942_v10, 0.0  ;;  %v6997_v58 = vadd.f32 %v6996_v34, %v6968_v51  ;;  %v7258_v10 = vld [vmem:[#allocation24 + $0xc8] sm:$0xff]  ;;  %7329 = vmatpush.msra.mxu3 %v7289_v49  ;;  %7387 = vmatpush.msrb.mxu0 %v7290_v13  ;;  %v7255_v34 = vld [vmem:[#allocation24 + $0xb0] sm:$0xff]  ;;  %v7285_v51 = vld [vmem:[#allocation24 + $0x1a0] sm:$0xff] }
 0x87c   : > { %7358 = vmatpush.msrb.mxu1 %v7258_v10  ;;  %7301 = vmatpush.msra.mxu2 %v7255_v34  ;;  %v7250_v35 = vld [vmem:[#allocation24 + $0x88] sm:$0xff] }
 0x87d   : > { %7047 = vst [vmem:[%s15207_s5 + $0x18] sm:$0xff] %v15269_v22  ;;  %v11029_v40 = vpack.i.bf16 %v15269_v22, %v14852_v45  ;;  %7330 = vmatpush.msra.mxu3 %v7287_v5 }
 0x87e   : > { %7359 = vmatpush.msrb.mxu1 %v7256_v4 }
 0x87f   : > { %11030 = vrot.lane.b32.xlu0 %v11029_v40, %s12042_s20  ;;  %11025 = vrot.lane.b32.xlu1 %v11029_v40, %s12043_s23 }
 0x880   : > { %v6944_v1 = vpop.f32.mrf.mxu2  ;;  %11020 = vrot.lane.b32.xlu2 %v11029_v40, %s16210_s6  ;;  %v7288_v40 = vld [vmem:[#allocation24 + $0x1b8] sm:$0xff]  ;;  %7331 = vmatpush.msra.mxu3 %v7285_v51 }
 0x881   : > { %v6945_v44 = vadd.f32 %v6944_v1, %v6916_v62  ;;  %7388 = vmatpush.msrb.mxu0 %v7288_v40  ;;  %v7253_v62 = vld [vmem:[#allocation24 + $0xa0] sm:$0xff]  ;;  %v7254_v1 = vld [vmem:[#allocation24 + $0xa8] sm:$0xff] }
 0x882   : > { %v6999_v57 = vpop.f32.mrf.mxu1  ;;  %7302 = vmatpush.msra.mxu2 %v7253_v62  ;;  %7360 = vmatpush.msrb.mxu1 %v7254_v1 }
 0x883   : > { %v15278_v52 = vmax.f32 %v6945_v44, 0.0  ;;  %v7025_v26 = vpop.f32.mrf.mxu0  ;;  %v7000_v21 = vadd.f32 %v6999_v57, %v6971_v25  ;;  %v7251_v44 = vld [vmem:[#allocation24 + $0x90] sm:$0xff]  ;;  %7389 = vmatpush.msrb.mxu0 %v7286_v16  ;;  %v7252_v57 = vld [vmem:[#allocation24 + $0x98] sm:$0xff] }
 0x884   : > { %v7026_v45 = vadd.f32 %v7025_v26, %v6997_v58  ;;  %v7283_v58 = vld [vmem:[#allocation24 + $0x190] sm:$0xff]  ;;  %v7284_v26 = vld [vmem:[#allocation24 + $0x198] sm:$0xff]  ;;  %7303 = vmatpush.msra.mxu2 %v7251_v44  ;;  %7361 = vmatpush.msrb.mxu1 %v7252_v57 }
 0x885   : > { %7049 = vst [vmem:[%s15207_s5 + $0x30] sm:$0xff] %v15278_v52  ;;  %7332 = vmatpush.msra.mxu3 %v7283_v58  ;;  %7390 = vmatpush.msrb.mxu0 %v7284_v26  ;;  %v7247_v25 = vld [vmem:[#allocation24 + $0x70] sm:$0xff] }
 0x886   : > { %v15282_v55 = vmax.f32 %v7026_v45, 0.0  ;;  %v7281_v45 = vld [vmem:[#allocation24 + $0x180] sm:$0xff]  ;;  %7304 = vmatpush.msra.mxu2 %v7249_v43  ;;  %7362 = vmatpush.msrb.mxu1 %v7250_v35 }
 0x887   : > { %7333 = vmatpush.msra.mxu3 %v7281_v45 }
 0x888   : > { %7046 = vst [vmem:[%s15207_s5 + $0x8] sm:$0xff] %v15282_v55  ;;  %v6947_v17 = vpop.f32.mrf.mxu2  ;;  %v11049_v23 = vpack.i.bf16 %v15282_v55, %v15265_v33  ;;  %7305 = vmatpush.msra.mxu2 %v7247_v25 }
 0x889   : > { %v6948_v61 = vadd.f32 %v6947_v17, %v6919_v46  ;;  %v7282_v46 = vld [vmem:[#allocation24 + $0x188] sm:$0xff]  ;;  %v7279_v17 = vld [vmem:[#allocation24 + $0x170] sm:$0xff] }
 0x88a   : > { %11050 = vrot.lane.b32.xlu0 %v11049_v23, %s12043_s23  ;;  %v7002_v27 = vpop.f32.mrf.mxu1  ;;  %7391 = vmatpush.msrb.mxu0 %v7282_v46 }
 0x88b   : > { %v15289_v2 = vmax.f32 %v6948_v61, 0.0  ;;  %v7028_v56 = vpop.f32.mrf.mxu0  ;;  %v7003_v39 = vadd.f32 %v7002_v27, %v6974_v19  ;;  %7334 = vmatpush.msra.mxu3 %v7279_v17  ;;  %v7280_v61 = vld [vmem:[#allocation24 + $0x178] sm:$0xff]  ;;  %v7243_v27 = vld [vmem:[#allocation24 + $0x50] sm:$0xff] }
 0x88c   : > { %v7029_v48 = vadd.f32 %v7028_v56, %v7000_v21  ;;  %v7245_v21 = vld [vmem:[#allocation24 + $0x60] sm:$0xff]  ;;  %7392 = vmatpush.msrb.mxu0 %v7280_v61  ;;  %v7246_v56 = vld [vmem:[#allocation24 + $0x68] sm:$0xff]  ;;  %v7276_v19 = vld [vmem:[#allocation24 + $0x158] sm:$0xff] }
 0x88d   : > { %7051 = vst [vmem:[%s15207_s5 + $0x48] sm:$0xff] %v15289_v2  ;;  %v11039_v24 = vpack.i.bf16 %v15289_v2, %v11596_v37  ;;  %7306 = vmatpush.msra.mxu2 %v7245_v21  ;;  %7335 = vmatpush.msra.mxu3 %v7277_v54 }
 0x88e   : > { %v15295_v47 = vmax.f32 %v7029_v48, 0.0  ;;  %v7278_v48 = vld [vmem:[#allocation24 + $0x168] sm:$0xff] }
 0x88f   : > { %11040 = vrot.lane.b32.xlu1 %v11039_v24, %s12043_s23  ;;  %11035 = vrot.lane.b32.xlu2 %v11039_v24, %s16210_s6 }
 0x890   : > { %7048 = vst [vmem:[%s15207_s5 + $0x20] sm:$0xff] %v15295_v47  ;;  %v11069_v15 = vpack.i.bf16 %v11596_v37, %v15295_v47  ;;  %7393 = vmatpush.msrb.mxu0 %v7278_v48  ;;  %7307 = vmatpush.msra.mxu2 %v7243_v27 }
 0x892   : > { %11070 = vrot.lane.b32.xlu0 %v11069_v15, %s12042_s20  ;;  %v7005_v8 = vpop.f32.mrf.mxu1  ;;  %7394 = vmatpush.msrb.mxu0 %v7276_v19 }
 0x893   : > { %v7031_v31 = vpop.f32.mrf.mxu0  ;;  %v7006_v30 = vadd.f32 %v7005_v8, %v6977_v38  ;;  %v7271_v8 = vld [vmem:[#allocation24 + $0x130] sm:$0xff]  ;;  %v7240_v38 = vld [vmem:[#allocation24 + $0x38] sm:$0xff] }
 0x894   : > { %v7032_v0 = vadd.f32 %v7031_v31, %v7003_v39  ;;  %v7273_v39 = vld [vmem:[#allocation24 + $0x140] sm:$0xff]  ;;  %v7242_v31 = vld [vmem:[#allocation24 + $0x48] sm:$0xff] }
 0x896   : > { %v15303_v41 = vmax.f32 %v7032_v0, 0.0  ;;  %v7274_v0 = vld [vmem:[#allocation24 + $0x148] sm:$0xff] }
 0x897   : > { %11055 = vrot.lane.b32.xlu2 %v11049_v23, %s12042_s20  ;;  %11045 = vrot.lane.b32.xlu1 %v11049_v23, %s16210_s6  ;;  %v7248_v23 = vld [vmem:[#allocation24 + $0x78] sm:$0xff] }
 0x898   : > { %7050 = vst [vmem:[%s15207_s5 + $0x38] sm:$0xff] %v15303_v41  ;;  %v11079_v60 = vpack.i.bf16 %v15303_v41, %v15278_v52  ;;  %7363 = vmatpush.msrb.mxu1 %v7248_v23  ;;  %7395 = vmatpush.msrb.mxu0 %v7274_v0 }
 0x89a   : > { %11080 = vrot.lane.b32.xlu0 %v11079_v60, %s12043_s23  ;;  %7364 = vmatpush.msrb.mxu1 %v7246_v56 }
 0x89b   : > { %v7034_v36 = vpop.f32.mrf.mxu0 }
 0x89c   : > { %v7035_v63 = vadd.f32 %v7034_v36, %v7006_v30  ;;  %v7237_v36 = vld [vmem:[#allocation24 + $0x20] sm:$0xff] }
 0x89e   : > { %v15312_v59 = vmax.f32 %v7035_v63, 0.0  ;;  %v7269_v63 = vld [vmem:[#allocation24 + $0x120] sm:$0xff] }
 0x89f   : > { %11065 = vrot.lane.b32.xlu2 %v11069_v15, %s12043_s23  ;;  %11060 = vrot.lane.b32.xlu1 %v11069_v15, %s16210_s6  ;;  %v7241_v15 = vld [vmem:[#allocation24 + $0x40] sm:$0xff] }
 0x8a0   : > { %7052 = vst [vmem:[%s15207_s5 + $0x50] sm:$0xff] %v15312_v59  ;;  %v11104_v9 = vpack.i.bf16 %v11596_v37, %v15312_v59  ;;  %v7275_v37 = vld [vmem:[#allocation24 + $0x150] sm:$0xff]  ;;  %7308 = vmatpush.msra.mxu2 %v7241_v15 }
 0x8a1   : > { %7336 = vmatpush.msra.mxu3 %v7275_v37 }
 0x8a2   : > { %11085 = vrot.lane.b32.xlu0 %v11039_v24, %s12042_s20  ;;  %v7244_v24 = vld [vmem:[#allocation24 + $0x58] sm:$0xff]  ;;  %7309 = vmatpush.msra.mxu2 %v7239_v6 }
 0x8a3   : > { %7365 = vmatpush.msrb.mxu1 %v7244_v24  ;;  %7337 = vmatpush.msra.mxu3 %v7273_v39 }
 0x8a4   : > { %7310 = vmatpush.msra.mxu2 %v7237_v36 }
 0x8a5   : > { %7366 = vmatpush.msrb.mxu1 %v7242_v31  ;;  %7338 = vmatpush.msra.mxu3 %v7271_v8 }
 0x8a6   : > { %7311 = vmatpush.msra.mxu2 %v7235_v11 }
 0x8a7   : > { %11090 = vrot.lane.b32.xlu2 %v11079_v60, %s12042_s20  ;;  %11075 = vrot.lane.b32.xlu1 %v11079_v60, %s16210_s6  ;;  %v7272_v60 = vld [vmem:[#allocation24 + $0x138] sm:$0xff] }
 0x8a8   : > { %7367 = vmatpush.msrb.mxu1 %v7240_v38  ;;  %7396 = vmatpush.msrb.mxu0 %v7272_v60 }
 0x8a9   : > { %7339 = vmatpush.msra.mxu3 %v7269_v63  ;;  %7312 = vmatpush.msra.mxu2 %v7233_v50 }
 0x8aa   : > { %11105 = vrot.lane.b32.xlu0 %v11104_v9, %s12042_s20  ;;  %7397 = vmatpush.msrb.mxu0 %v7270_v18  ;;  %s12046_s20 = smov 121  }
 0x8ab   : > { %7340 = vmatpush.msra.mxu3 %v7267_v42 }
 0x8ac   : > { %7398 = vmatpush.msrb.mxu0 %v7268_v20 }
 0x8ad   : > { %7341 = vmatpush.msra.mxu3 %v7265_v14 }
 0x8ae   : > { %7399 = vmatpush.msrb.mxu0 %v7266_v32 }
 0x8af   : > { %11100 = vrot.lane.b32.xlu2 %v11104_v9, %s12043_s23  ;;  %11095 = vrot.lane.b32.xlu1 %v11104_v9, %s16210_s6  ;;  %v7238_v9 = vld [vmem:[#allocation24 + $0x28] sm:$0xff]  ;;  %s16206_s23 = smov 115  }
 0x8b0   : > { %7368 = vmatpush.msrb.mxu1 %v7238_v9 }
 0x8b2   : > { %7369 = vmatpush.msrb.mxu1 %v7236_v3 }
 0x8b4   : > { %7370 = vmatpush.msrb.mxu1 %v7234_v7 }
 0x8da   : > { %v15325_v30 = vpop.permute.xlu2 %11020 }
 0x8db   : > { %v11022_v34 = vunpack.i.l.bf16 %v15325_v30  ;;  %v11023_v56 = vunpack.i.h.bf16 %v15325_v30 }
 0x8e9   : > { %v15327_v12 = vpop.permute.xlu2 %11035 }
 0x8ea   : > { %v11037_v20 = vunpack.i.l.bf16 %v15327_v12 }
 0x8f1   : > { %v11031_v53 = vpop.permute.xlu0 %11030  ;;  %v11026_v28 = vpop.permute.xlu1 %11025 }
 0x8f2   : > { %v11056_v49 = vpop.permute.xlu2 %11055  ;;  %v11032_v1 = vunpack.i.l.bf16 %v11031_v53  ;;  %v11027_v16 = vunpack.i.l.bf16 %v11026_v28  ;;  %v11028_v15 = vunpack.i.h.bf16 %v11026_v28  ;;  %v11033_v30 = vunpack.i.h.bf16 %v11031_v53 }
 0x8f3   : > { %v11058_v58 = vunpack.i.h.bf16 %v11056_v49  ;;  %v11057_v57 = vunpack.i.l.bf16 %v11056_v49 }
 0x8f5   : > { %v7210_v21 = vsel %vm5773_vm13, %v11058_v58, %v11032_v1  ;;  %v7209_v54 = vsel %vm5773_vm13, %v11057_v57, %v11058_v58 }
 0x8fa   : > { %v11066_v44 = vpop.permute.xlu2 %11065 }
 0x8fb   : > { %v11068_v24 = vunpack.i.h.bf16 %v11066_v44 }
 0x8fc   : > { %v11051_v29 = vpop.permute.xlu0 %11050 }
 0x8fd   : > { %v11053_v4 = vunpack.i.h.bf16 %v11051_v29  ;;  %v11052_v40 = vunpack.i.l.bf16 %v11051_v29 }
 0x8ff   : > { %v7162_v25 = vsel %vm5736_vm15, %v11053_v4, %v11027_v16  ;;  %v7161_v17 = vsel %vm5736_vm15, %v11052_v40, %v11053_v4 }
 0x901   : > { %v15329_v10 = vpop.permute.xlu1 %11040 }
 0x902   : > { %v11091_v8 = vpop.permute.xlu2 %11090  ;;  %v11042_v28 = vunpack.i.l.bf16 %v15329_v10 }
 0x903   : > { %v11093_v29 = vunpack.i.h.bf16 %v11091_v8  ;;  %v11092_v49 = vunpack.i.l.bf16 %v11091_v8 }
 0x904   : > { %v11071_v13 = vpop.permute.xlu0 %11070 }
 0x905   : > { %v11073_v39 = vunpack.i.h.bf16 %v11071_v13  ;;  %v11072_v31 = vunpack.i.l.bf16 %v11071_v13  ;;  %v7213_v58 = vsel %vm5773_vm13, %v11092_v49, %v11093_v29 }
 0x907   : > { %v7211_v42 = vsel %vm5773_vm13, %v11033_v30, %v11072_v31  ;;  %v7212_v3 = vsel %vm5773_vm13, %v11072_v31, %v11073_v39 }
 0x909   : > { %v11046_v5 = vpop.permute.xlu1 %11045 }
 0x90a   : > { %v11048_v62 = vunpack.i.h.bf16 %v11046_v5  ;;  %v11047_v51 = vunpack.i.l.bf16 %v11046_v5  ;;  %v11101_v1 = vpop.permute.xlu2 %11100 }
 0x90c   : > { %v7114_v26 = vsel %vm787_vm7, %v11048_v62, %v11022_v34  ;;  %v7113_v43 = vsel %vm787_vm7, %v11047_v51, %v11048_v62  ;;  %v11081_v46 = vpop.permute.xlu0 %11080 }
 0x90d   : > { %v7130_v45 = vmax.f32 %v15282_v55, %v7114_v26  ;;  %v7129_v35 = vmax.f32 %v15265_v33, %v7113_v43  ;;  %v11067_v55 = vunpack.i.l.bf16 %v11066_v44  ;;  %v11082_v32 = vunpack.i.l.bf16 %v11081_v46 }
 0x90e   : > { %v11038_v26 = vunpack.i.h.bf16 %v15327_v12 }
 0x90f   : > { %v7178_v23 = vmax.f32 %v7130_v45, %v7162_v25  ;;  %v7177_v61 = vmax.f32 %v7129_v35, %v7161_v17  ;;  %v7163_v36 = vsel %vm5736_vm15, %v11028_v15, %v11067_v55  ;;  %v7164_v63 = vsel %vm5736_vm15, %v11067_v55, %v11068_v24 }
 0x910   : > { %v11102_v25 = vunpack.i.l.bf16 %v11101_v1 }
 0x911   : > { %v7226_v48 = vmax.f32 %v7178_v23, %v7210_v21  ;;  %v7225_v27 = vmax.f32 %v7177_v61, %v7209_v54  ;;  %v11061_v37 = vpop.permute.xlu1 %11060  ;;  %v11043_v23 = vunpack.i.h.bf16 %v15329_v10 }
 0x912   : > { %v11063_v19 = vunpack.i.h.bf16 %v11061_v37  ;;  %v11062_v33 = vunpack.i.l.bf16 %v11061_v37 }
 0x913   : > { %7313 = vmatmul.f32.vlgmr.msra.gmra.mxu2 %v7225_v27  ;;  %7342 = vmatmul.f32.vlgmr.msra.gmra.mxu3 %v7226_v48 }
 0x914   : > { %v7115_v0 = vsel %vm787_vm7, %v11023_v56, %v11062_v33  ;;  %v7116_v6 = vsel %vm787_vm7, %v11062_v33, %v11063_v19  ;;  %7371 = vmatmul.f32.vlgmr.msrb.gmra.mxu1 %v7225_v27  ;;  %7400 = vmatmul.f32.vlgmr.msrb.gmra.mxu0 %v7226_v48  ;;  %v11086_v9 = vpop.permute.xlu0 %11085  ;;  %v7167_v27 = vsel %vm5736_vm15, %v11043_v23, %v11102_v25 }
 0x915   : > { %v7131_v38 = vmax.f32 %v15269_v22, %v7115_v0  ;;  %v7132_v60 = vmax.f32 %v15295_v47, %v7116_v6  ;;  %v11083_v22 = vunpack.i.h.bf16 %v11081_v46  ;;  %v11087_v13 = vunpack.i.l.bf16 %v11086_v9 }
 0x916   : > { %v11088_v24 = vunpack.i.h.bf16 %v11086_v9 }
 0x917   : > { %v7179_v18 = vmax.f32 %v7131_v38, %v7163_v36  ;;  %v7180_v11 = vmax.f32 %v7132_v60, %v7164_v63  ;;  %v7166_v62 = vsel %vm5736_vm15, %v11083_v22, %v11042_v28  ;;  %v7165_v51 = vsel %vm5736_vm15, %v11082_v32, %v11083_v22 }
 0x918   : > { %v7214_v57 = vsel %vm5773_vm13, %v11093_v29, %v11087_v13 }
 0x919   : > { %v11076_v50 = vpop.permute.xlu1 %11075  ;;  %v7227_v14 = vmax.f32 %v7179_v18, %v7211_v42  ;;  %v7228_v7 = vmax.f32 %v7180_v11, %v7212_v3 }
 0x91a   : > { %v11078_v47 = vunpack.i.h.bf16 %v11076_v50  ;;  %v11077_v53 = vunpack.i.l.bf16 %v11076_v50 }
 0x91b   : > { %7316 = vmatmul.f32.gmra.mxu2 %v7227_v14  ;;  %7345 = vmatmul.f32.gmra.mxu3 %v7228_v7 }
 0x91c   : > { %v7118_v34 = vsel %vm787_vm7, %v11078_v47, %v11037_v20  ;;  %v7117_v5 = vsel %vm787_vm7, %v11077_v53, %v11078_v47  ;;  %7374 = vmatmul.f32.gmra.mxu1 %v7227_v14  ;;  %7403 = vmatmul.f32.gmra.mxu0 %v7228_v7  ;;  %v11106_v43 = vpop.permute.xlu0 %11105 }
 0x91d   : > { %v7134_v4 = vmax.f32 %v15303_v41, %v7118_v34  ;;  %v7133_v40 = vmax.f32 %v15278_v52, %v7117_v5  ;;  %v11103_v41 = vunpack.i.h.bf16 %v11101_v1  ;;  %v11108_v61 = vunpack.i.h.bf16 %v11106_v43 }
 0x91e   : > { %v11107_v21 = vunpack.i.l.bf16 %v11106_v43 }
 0x91f   : > { %v7181_v16 = vmax.f32 %v7133_v40, %v7165_v51  ;;  %v7182_v44 = vmax.f32 %v7134_v4, %v7166_v62  ;;  %v7168_v37 = vsel %vm5736_vm15, %v11102_v25, %v11103_v41  ;;  %v7847_v4 = vld [vmem:[%s16375_s0] sm:$0xff]  ;;  %v7850_v40 = vld [vmem:[%s16375_s0 + $0x18] sm:$0xff]  ;;  %v7849_v62 = vld [vmem:[%s16375_s0 + $0x10] sm:$0xff] }
 0x920   : > { %v7215_v19 = vsel %vm5773_vm13, %v11088_v24, %v11107_v21  ;;  %v7216_v33 = vsel %vm5773_vm13, %v11107_v21, %v11108_v61  ;;  %v7848_v51 = vld [vmem:[%s16375_s0 + $0x8] sm:$0xff] }
 0x921   : > { %v11096_v45 = vpop.permute.xlu1 %11095  ;;  %v7229_v35 = vmax.f32 %v7181_v16, %v7213_v58  ;;  %v7230_v46 = vmax.f32 %v7182_v44, %v7214_v57  ;;  %v7853_v16 = vld [vmem:[%s16375_s0 + $0x30] sm:$0xff]  ;;  %v7852_v44 = vld [vmem:[%s16375_s0 + $0x28] sm:$0xff]  ;;  %v7851_v58 = vld [vmem:[%s16375_s0 + $0x20] sm:$0xff] }
 0x922   : > { %v11098_v52 = vunpack.i.h.bf16 %v11096_v45  ;;  %v11097_v17 = vunpack.i.l.bf16 %v11096_v45 }
 0x923   : > { %7319 = vmatmul.f32.gmra.mxu2 %v7229_v35  ;;  %7348 = vmatmul.f32.gmra.mxu3 %v7230_v46 }
 0x924   : > { %v7119_v54 = vsel %vm787_vm7, %v11038_v26, %v11097_v17  ;;  %v7120_v56 = vsel %vm787_vm7, %v11097_v17, %v11098_v52  ;;  %7377 = vmatmul.f32.gmra.mxu1 %v7229_v35  ;;  %7406 = vmatmul.f32.gmra.mxu0 %v7230_v46  ;;  %v7854_v26 = vld [vmem:[%s16375_s0 + $0x38] sm:$0xff] }
 0x925   : > { %v7135_v12 = vmax.f32 %v15289_v2, %v7119_v54  ;;  %v7136_v48 = vmax.f32 %v15312_v59, %v7120_v56 }
 0x927   : > { %v7183_v10 = vmax.f32 %v7135_v12, %v7167_v27  ;;  %v7184_v55 = vmax.f32 %v7136_v48, %v7168_v37 }
 0x929   : > { %v7231_v15 = vmax.f32 %v7183_v10, %v7215_v19  ;;  %v7232_v39 = vmax.f32 %v7184_v55, %v7216_v33 }
 0x92b   : > { %7322 = vmatmul.f32.gmra.mxu2 %v7231_v15  ;;  %7351 = vmatmul.f32.gmra.mxu3 %v7232_v39 }
 0x92c   : > { %7380 = vmatmul.f32.gmra.mxu1 %v7231_v15  ;;  %7409 = vmatmul.f32.gmra.mxu0 %v7232_v39 }
 0x991   : > { %v7372_v2 = vpop.f32.mrf.mxu1  ;;  %v7401_v31 = vpop.f32.mrf.mxu0 }
 0x992   : > { %v7402_v6 = vadd.f32 %v7401_v31, %v7372_v2 }
 0x996   : > { %v7314_v59 = vpop.f32.mrf.mxu2  ;;  %v7343_v0 = vpop.f32.mrf.mxu3 }
 0x997   : > { %v15369_v8 = vadd.f32 %v7343_v0, %v7314_v59 }
 0x999   : > { %v11119_v38 = vpack.i.bf16 %v7402_v6, %v15369_v8  ;;  %v7375_v60 = vpop.f32.mrf.mxu1  ;;  %v7404_v30 = vpop.f32.mrf.mxu0 }
 0x99a   : > { %v7405_v9 = vadd.f32 %v7404_v30, %v7375_v60 }
 0x99b   : > { %11120 = vrot.lane.b32.xlu0 %v11119_v38, %s12045_s8  ;;  %11115 = vrot.lane.b32.xlu2 %v11119_v38, %s16212_s19 }
 0x99c   : > { %11110 = vrot.lane.b32.xlu1 %v11119_v38, %s16210_s6 }
 0x99e   : > { %v7317_v36 = vpop.f32.mrf.mxu2  ;;  %v7346_v63 = vpop.f32.mrf.mxu3 }
 0x99f   : > { %v15375_v18 = vadd.f32 %v7346_v63, %v7317_v36 }
 0x9a1   : > { %v11139_v11 = vpack.i.bf16 %v7405_v9, %v15375_v18  ;;  %v7378_v20 = vpop.f32.mrf.mxu1  ;;  %v7407_v50 = vpop.f32.mrf.mxu0 }
 0x9a2   : > { %v7408_v7 = vadd.f32 %v7407_v50, %v7378_v20 }
 0x9a3   : > { %11140 = vrot.lane.b32.xlu0 %v11139_v11, %s16212_s19  ;;  %11135 = vrot.lane.b32.xlu2 %v11139_v11, %s16210_s6 }
 0x9a4   : > { %11125 = vrot.lane.b32.xlu1 %v11119_v38, %s12046_s20 }
 0x9a6   : > { %v7320_v42 = vpop.f32.mrf.mxu2  ;;  %v7349_v3 = vpop.f32.mrf.mxu3 }
 0x9a7   : > { %v15384_v14 = vadd.f32 %v7349_v3, %v7320_v42 }
 0x9a9   : > { %v11169_v22 = vpack.i.bf16 %v7408_v7, %v15384_v14  ;;  %v7381_v53 = vpop.f32.mrf.mxu1  ;;  %v7410_v28 = vpop.f32.mrf.mxu0 }
 0x9aa   : > { %v7411_v49 = vadd.f32 %v7410_v28, %v7381_v53 }
 0x9ab   : > { %11155 = vrot.lane.b32.xlu0 %v11139_v11, %s16206_s23  ;;  %11150 = vrot.lane.b32.xlu2 %v11139_v11, %s12046_s20 }
 0x9ac   : > { %11130 = vrot.lane.b32.xlu1 %v11119_v38, %s16206_s23  ;;  %v11244_v5 = vpack.i.bf16 %v7408_v7, %v7411_v49 }
 0x9ae   : > { %v7323_v32 = vpop.f32.mrf.mxu2  ;;  %v7352_v47 = vpop.f32.mrf.mxu3 }
 0x9af   : > { %v15393_v29 = vadd.f32 %v7352_v47, %v7323_v32 }
 0x9b1   : > { %v11194_v13 = vpack.i.bf16 %v7411_v49, %v15393_v29  ;;  %v11199_v34 = vpack.i.bf16 %v15393_v29, %v15384_v14 }
 0x9b3   : > { %11170 = vrot.lane.b32.xlu2 %v11169_v22, %s12045_s8  ;;  %11160 = vrot.lane.b32.xlu0 %v11169_v22, %s16210_s6 }
 0x9b4   : > { %11145 = vrot.lane.b32.xlu1 %v11139_v11, %s12045_s8 }
 0x9bb   : > { %11175 = vrot.lane.b32.xlu2 %v11169_v22, %s16206_s23  ;;  %11180 = vrot.lane.b32.xlu0 %v11169_v22, %s16204_s14 }
 0x9bc   : > { %11165 = vrot.lane.b32.xlu1 %v11169_v22, %s16212_s19 }
 0x9c3   : > { %11195 = vrot.lane.b32.xlu0 %v11194_v13, %s12045_s8  ;;  %11190 = vrot.lane.b32.xlu2 %v11194_v13, %s16212_s19  ;;  %s9582_s19 = smul.u32 192, %s12170_s18 }
 0x9c4   : > { %11185 = vrot.lane.b32.xlu1 %v11194_v13, %s16210_s6 }
 0x9cb   : > { %11200 = vrot.lane.b32.xlu0 %v11199_v34, %s12046_s20  ;;  %11215 = vrot.lane.b32.xlu2 %v11194_v13, %s16204_s14 }
 0x9cc   : > { %11205 = vrot.lane.b32.xlu1 %v11194_v13, %s16206_s23  ;;  %s16382_s23 = sld [smem:[#allocation64_spill]] }
 0x9d3   : > { %11235 = vrot.lane.b32.xlu0 %v11194_v13, %s16208_s30  ;;  %11220 = vrot.lane.b32.xlu2 %v11119_v38, %s16204_s14 }
 0x9d4   : > { %11210 = vrot.lane.b32.xlu1 %v11139_v11, %s16204_s14  ;;  %s16383_s14 = sld [smem:[#allocation66_spill]] }
 0x9db   : > { %11240 = vrot.lane.b32.xlu0 %v11119_v38, %s16208_s30  ;;  %11230 = vrot.lane.b32.xlu2 %v11139_v11, %s16208_s30 }
 0x9dc   : > { %11225 = vrot.lane.b32.xlu1 %v11169_v22, %s16208_s30  ;;  %s16376_s30 = smov 126  }
 0x9e3   : > { %11250 = vrot.lane.b32.xlu0 %v11169_v22, %s16214_s22  ;;  %11260 = vrot.lane.b32.xlu2 %v11194_v13, %s16214_s22 }
 0x9e4   : > { %11245 = vrot.lane.b32.xlu1 %v11244_v5, %s12046_s20 }
 0x9eb   : > { %7857 = vperm.xlu0 %9996, %v7847_v4   ;;  %11265 = vrot.lane.b32.xlu2 %v11119_v38, %s16214_s22 }
 0x9ec   : > { %11255 = vrot.lane.b32.xlu1 %v11139_v11, %s16214_s22  ;;  %s16377_s22 = smov 127  }
 0x9f3   : > { %7872 = vperm.xlu0 %9996, %v7850_v40   ;;  %7867 = vperm.xlu2 %10778, %v7849_v62  }
 0x9f4   : > { %7862 = vperm.xlu1 %9997, %v7848_v51  }
 0x9f5   : > { %v15427_v1 = vpop.permute.xlu2 %11115 }
 0x9f6   : > { %v11118_v40 = vunpack.i.h.bf16 %v15427_v1  ;;  %v11117_v62 = vunpack.i.l.bf16 %v15427_v1 }
 0x9fb   : > { %7887 = vperm.xlu0 %9996, %v7853_v16   ;;  %7882 = vperm.xlu2 %10778, %v7852_v44  }
 0x9fc   : > { %7877 = vperm.xlu1 %9997, %v7851_v58  }
 0x9fd   : > { %v15438_v57 = vpop.permute.xlu2 %11135 }
 0xa04   : > { %7892 = vperm.xlu1 %9997, %v7854_v26  }
 0xa05   : > { %v15443_v43 = vpop.permute.xlu2 %11150 }
 0xa0d   : > { %v11121_v45 = vpop.permute.xlu0 %11120  ;;  %v11171_v35 = vpop.permute.xlu2 %11170 }
 0xa0e   : > { %v15445_v46 = vpop.permute.xlu1 %11110  ;;  %v11173_v10 = vunpack.i.h.bf16 %v11171_v35  ;;  %v11172_v55 = vunpack.i.l.bf16 %v11171_v35  ;;  %v11123_v59 = vunpack.i.h.bf16 %v11121_v45  ;;  %v11122_v0 = vunpack.i.l.bf16 %v11121_v45 }
 0xa10   : > { %v7552_v6 = vsel %vm7549_vm1, %v11172_v55, %v11173_v10  ;;  %v7550_v9 = vsel %vm7549_vm1, %v11122_v0, %v11123_v59  ;;  %v11138_v55 = vunpack.i.h.bf16 %v15438_v57 }
 0xa15   : > { %v15447_v41 = vpop.permute.xlu0 %11140  ;;  %v15449_v25 = vpop.permute.xlu2 %11175 }
 0xa16   : > { %v15451_v52 = vpop.permute.xlu1 %11125  ;;  %v11178_v7 = vunpack.i.h.bf16 %v15449_v25  ;;  %v11177_v22 = vunpack.i.l.bf16 %v15449_v25  ;;  %v11143_v53 = vunpack.i.h.bf16 %v15447_v41  ;;  %v11142_v28 = vunpack.i.l.bf16 %v15447_v41 }
 0xa18   : > { %v7732_v58 = vsel %vm7729_vm2, %v11177_v22, %v11178_v7  ;;  %v7506_v35 = vsel %vm869_vm6, %v11142_v28, %v11143_v53  ;;  %v7787_v28 = vld [vmem:[#allocation25] sm:$0xff] }
 0xa1d   : > { %v15453_v17 = vpop.permute.xlu0 %11155  ;;  %v11191_v23 = vpop.permute.xlu2 %11190 }
 0xa1e   : > { %v15455_v61 = vpop.permute.xlu1 %11130  ;;  %v11193_v38 = vunpack.i.h.bf16 %v11191_v23  ;;  %v11192_v60 = vunpack.i.l.bf16 %v11191_v23  ;;  %v11158_v34 = vunpack.i.h.bf16 %v15453_v17  ;;  %v11157_v5 = vunpack.i.l.bf16 %v15453_v17 }
 0xa1f   : > { %v11133_v16 = vunpack.i.h.bf16 %v15455_v61  ;;  %v11132_v44 = vunpack.i.l.bf16 %v15455_v61 }
 0xa20   : > { %v7508_v49 = vsel %vm869_vm6, %v11192_v60, %v11193_v38  ;;  %v7731_v17 = vsel %vm7729_vm2, %v11157_v5, %v11158_v34 }
 0xa25   : > { %v15457_v21 = vpop.permute.xlu0 %11160  ;;  %v15459_v54 = vpop.permute.xlu2 %11215 }
 0xa26   : > { %v11146_v56 = vpop.permute.xlu1 %11145  ;;  %v11218_v41 = vunpack.i.h.bf16 %v15459_v54  ;;  %v11217_v1 = vunpack.i.l.bf16 %v15459_v54  ;;  %v11163_v23 = vunpack.i.h.bf16 %v15457_v21  ;;  %v11162_v61 = vunpack.i.l.bf16 %v15457_v21 }
 0xa27   : > { %v11148_v39 = vunpack.i.h.bf16 %v11146_v56  ;;  %v11147_v2 = vunpack.i.l.bf16 %v11146_v56  ;;  %v7730_v54 = vsel %vm7729_vm2, %v11132_v44, %v11133_v16  ;;  %v11128_v16 = vunpack.i.h.bf16 %v15451_v52 }
 0xa29   : > { %v7551_v30 = vsel %vm7549_vm1, %v11147_v2, %v11148_v39  ;;  %v7688_v39 = vsel %vm7684_vm4, %v11217_v1, %v11218_v41  ;;  %v11113_v2 = vunpack.i.h.bf16 %v15445_v46 }
 0xa2d   : > { %v15461_v12 = vpop.permute.xlu0 %11180  ;;  %v15463_v48 = vpop.permute.xlu2 %11220 }
 0xa2e   : > { %v11166_v27 = vpop.permute.xlu1 %11165  ;;  %v11182_v10 = vunpack.i.l.bf16 %v15461_v12  ;;  %v11223_v59 = vunpack.i.h.bf16 %v15463_v48  ;;  %v11222_v0 = vunpack.i.l.bf16 %v15463_v48 }
 0xa2f   : > { %v11168_v11 = vunpack.i.h.bf16 %v11166_v27  ;;  %v11167_v42 = vunpack.i.l.bf16 %v11166_v27  ;;  %v7505_v27 = vsel %vm869_vm6, %v11117_v62, %v11118_v40  ;;  %v11152_v40 = vunpack.i.l.bf16 %v15443_v43 }
 0xa30   : > { %v7685_v48 = vsel %vm7684_vm4, %v11222_v0, %v11223_v59  ;;  %v7804_v59 = vld [vmem:[#allocation25 + $0x88] sm:$0xff] }
 0xa31   : > { %v7507_v51 = vsel %vm869_vm6, %v11167_v42, %v11168_v11  ;;  %v7808_v0 = vld [vmem:[#allocation25 + $0xa8] sm:$0xff] }
 0xa35   : > { %v11196_v37 = vpop.permute.xlu0 %11195  ;;  %v15465_v24 = vpop.permute.xlu2 %11230 }
 0xa36   : > { %v11198_v19 = vunpack.i.h.bf16 %v11196_v37  ;;  %v11197_v33 = vunpack.i.l.bf16 %v11196_v37  ;;  %v15467_v15 = vpop.permute.xlu1 %11185  ;;  %v11183_v37 = vunpack.i.h.bf16 %v15461_v12  ;;  %v7463_v12 = vsel %vm787_vm7, %v11162_v61, %v11163_v23  ;;  %v7789_v23 = vld [vmem:[#allocation25 + $0x10] sm:$0xff] }
 0xa37   : > { %v11188_v26 = vunpack.i.h.bf16 %v15467_v15  ;;  %v11187_v45 = vunpack.i.l.bf16 %v15467_v15 }
 0xa38   : > { %v7553_v31 = vsel %vm7549_vm1, %v11197_v33, %v11198_v19  ;;  %v11137_v19 = vunpack.i.l.bf16 %v15438_v57  ;;  %v7687_v57 = vsel %vm7684_vm4, %v11182_v10, %v11183_v37  ;;  %v7792_v37 = vld [vmem:[#allocation25 + $0x28] sm:$0xff] }
 0xa39   : > { %7919 = vmatpush.msrb.mxu2 %v7553_v31  ;;  %v7464_v33 = vsel %vm787_vm7, %v11187_v45, %v11188_v26  ;;  %v11112_v31 = vunpack.i.l.bf16 %v15445_v46  ;;  %v7790_v45 = vld [vmem:[#allocation25 + $0x18] sm:$0xff]  ;;  %v7796_v10 = vld [vmem:[#allocation25 + $0x48] sm:$0xff] }
 0xa3b   : > { %7920 = vmatpush.msrb.mxu2 %v7552_v6  ;;  %v7462_v6 = vsel %vm787_vm7, %v11137_v19, %v11138_v55  ;;  %v7795_v55 = vld [vmem:[#allocation25 + $0x40] sm:$0xff] }
 0xa3c   : > { %v7799_v19 = vld [vmem:[#allocation25 + $0x60] sm:$0xff] }
 0xa3d   : > { %v15472_v36 = vpop.permute.xlu0 %11200  ;;  %7921 = vmatpush.msrb.mxu2 %v7551_v30  ;;  %v11261_v63 = vpop.permute.xlu2 %11260 }
 0xa3e   : > { %v11263_v3 = vunpack.i.h.bf16 %v11261_v63  ;;  %v11262_v20 = vunpack.i.l.bf16 %v11261_v63  ;;  %v11206_v50 = vpop.permute.xlu1 %11205  ;;  %v11202_v62 = vunpack.i.l.bf16 %v15472_v36 }
 0xa3f   : > { %v11208_v32 = vunpack.i.h.bf16 %v11206_v50  ;;  %v11207_v47 = vunpack.i.l.bf16 %v11206_v50  ;;  %7922 = vmatpush.msrb.mxu2 %v7550_v9  ;;  %v7461_v9 = vsel %vm787_vm7, %v11112_v31, %v11113_v2  ;;  %v7801_v2 = vld [vmem:[#allocation25 + $0x70] sm:$0xff] }
 0xa40   : > { %v7778_v13 = vsel %vm7774_vm3, %v11262_v20, %v11263_v3  ;;  %v11233_v3 = vunpack.i.h.bf16 %v15465_v24  ;;  %v11232_v20 = vunpack.i.l.bf16 %v15465_v24  ;;  %v7805_v31 = vld [vmem:[#allocation25 + $0x90] sm:$0xff] }
 0xa41   : > { %7923 = vmatpush.msrb.mxu2 %v7508_v49  ;;  %v7733_v4 = vsel %vm7729_vm2, %v11207_v47, %v11208_v32  ;;  %8013 = vmatpush.msra.mxu1 %v7778_v13 }
 0xa42   : > { %7960 = vmatpush.msrb.mxu3 %v7733_v4  ;;  %v7641_v53 = vsel %vm7639_vm5, %v11232_v20, %v11233_v3  ;;  %v11153_v4 = vunpack.i.h.bf16 %v15443_v43 }
 0xa43   : > { %7924 = vmatpush.msrb.mxu2 %v7507_v51 }
 0xa44   : > { %7961 = vmatpush.msrb.mxu3 %v7732_v58  ;;  %v7596_v26 = vsel %vm7594_vm8, %v11152_v40, %v11153_v4 }
 0xa45   : > { %v11236_v25 = vpop.permute.xlu0 %11235  ;;  %7925 = vmatpush.msrb.mxu2 %v7506_v35  ;;  %v11266_v58 = vpop.permute.xlu2 %11265 }
 0xa46   : > { %v11211_v56 = vpop.permute.xlu1 %11210  ;;  %7962 = vmatpush.msrb.mxu3 %v7731_v17  ;;  %v11238_v38 = vunpack.i.h.bf16 %v11236_v25  ;;  %v11237_v60 = vunpack.i.l.bf16 %v11236_v25  ;;  %v11268_v41 = vunpack.i.h.bf16 %v11266_v58  ;;  %v11267_v1 = vunpack.i.l.bf16 %v11266_v58 }
 0xa47   : > { %7926 = vmatpush.msrb.mxu2 %v7505_v27  ;;  %v11213_v21 = vunpack.i.h.bf16 %v11211_v56  ;;  %v11212_v15 = vunpack.i.l.bf16 %v11211_v56  ;;  %v7793_v56 = vld [vmem:[#allocation25 + $0x30] sm:$0xff]  ;;  %v7791_v27 = vld [vmem:[#allocation25 + $0x20] sm:$0xff] }
 0xa48   : > { %7963 = vmatpush.msrb.mxu3 %v7730_v54  ;;  %v7643_v50 = vsel %vm7639_vm5, %v11237_v60, %v11238_v38  ;;  %v7775_v61 = vsel %vm7774_vm3, %v11267_v1, %v11268_v41  ;;  %v7794_v54 = vld [vmem:[#allocation25 + $0x38] sm:$0xff]  ;;  %v7809_v38 = vld [vmem:[#allocation25 + $0xb0] sm:$0xff] }
 0xa49   : > { %7927 = vmatpush.msrb.mxu2 %v7464_v33  ;;  %v7686_v63 = vsel %vm7684_vm4, %v11212_v15, %v11213_v21  ;;  %v7797_v33 = vld [vmem:[#allocation25 + $0x50] sm:$0xff]  ;;  %v7798_v21 = vld [vmem:[#allocation25 + $0x58] sm:$0xff] }
 0xa4a   : > { %7964 = vmatpush.msrb.mxu3 %v7688_v39  ;;  %v7802_v15 = vld [vmem:[#allocation25 + $0x78] sm:$0xff]  ;;  %v7800_v39 = vld [vmem:[#allocation25 + $0x68] sm:$0xff] }
 0xa4b   : > { %7928 = vmatpush.msrb.mxu2 %v7463_v12  ;;  %v7803_v12 = vld [vmem:[#allocation25 + $0x80] sm:$0xff]  ;;  %v7810_v60 = vld [vmem:[#allocation25 + $0xb8] sm:$0xff] }
 0xa4c   : > { %7965 = vmatpush.msrb.mxu3 %v7687_v57  ;;  %v7806_v57 = vld [vmem:[#allocation25 + $0x98] sm:$0xff] }
 0xa4d   : > { %v11241_v30 = vpop.permute.xlu0 %11240  ;;  %7929 = vmatpush.msrb.mxu2 %v7462_v6  ;;  %v7807_v6 = vld [vmem:[#allocation25 + $0xa0] sm:$0xff] }
 0xa4e   : > { %v11226_v46 = vpop.permute.xlu1 %11225  ;;  %7966 = vmatpush.msrb.mxu3 %v7686_v63  ;;  %v11243_v7 = vunpack.i.h.bf16 %v11241_v30  ;;  %v11242_v22 = vunpack.i.l.bf16 %v11241_v30 }
 0xa4f   : > { %v11228_v11 = vunpack.i.h.bf16 %v11226_v46  ;;  %v11227_v42 = vunpack.i.l.bf16 %v11226_v46  ;;  %7930 = vmatpush.msrb.mxu2 %v7461_v9 }
 0xa50   : > { %7967 = vmatpush.msrb.mxu3 %v7685_v48 }
 0xa51   : > { %7931 = vmatpush.msrb.mxu2 %v15393_v29  ;;  %v7642_v32 = vsel %vm7639_vm5, %v11227_v42, %v11228_v11  ;;  %v11203_v29 = vunpack.i.h.bf16 %v15472_v36  ;;  %v7788_v36 = vld [vmem:[#allocation25 + $0x8] sm:$0xff] }
 0xa52   : > { %7968 = vmatpush.msrb.mxu3 %v7643_v50 }
 0xa53   : > { %7932 = vmatpush.msrb.mxu2 %v15384_v14  ;;  %v7640_v14 = vsel %vm7639_vm5, %v11242_v22, %v11243_v7 }
 0xa54   : > { %7969 = vmatpush.msrb.mxu3 %v7642_v32 }
 0xa55   : > { %v11251_v47 = vpop.permute.xlu0 %11250  ;;  %7933 = vmatpush.msrb.mxu2 %v15375_v18 }
 0xa56   : > { %v11253_v49 = vunpack.i.h.bf16 %v11251_v47  ;;  %v11252_v24 = vunpack.i.l.bf16 %v11251_v47  ;;  %v11246_v13 = vpop.permute.xlu1 %11245  ;;  %7970 = vmatpush.msrb.mxu3 %v7641_v53  ;;  %v15551_v47 = vld [vmem:[%s13448_s10 + $0x58] sm:$0xff] }
 0xa57   : > { %v11248_v34 = vunpack.i.h.bf16 %v11246_v13  ;;  %v11247_v5 = vunpack.i.l.bf16 %v11246_v13  ;;  %7934 = vmatpush.msrb.mxu2 %v15369_v8  ;;  %v11127_v8 = vunpack.i.l.bf16 %v15451_v52 }
 0xa58   : > { %7971 = vmatpush.msrb.mxu3 %v7640_v14  ;;  %7935 = vmatmul.f32.vlgmr.msrb.gmra.mxu2 %v7787_v28  ;;  %v7777_v18 = vsel %vm7774_vm3, %v11252_v24, %v11253_v49 }
 0xa59   : > { %v7598_v51 = vsel %vm7594_vm8, %v11203_v29, %v11247_v5  ;;  %8014 = vmatpush.msra.mxu1 %v7777_v18  ;;  %v7597_v44 = vsel %vm7594_vm8, %v11202_v62, %v11248_v34  ;;  %v7595_v43 = vsel %vm7594_vm8, %v11127_v8, %v11128_v16  ;;  %v7868_v29 = vpop.permute.xlu2 %7867 }
 0xa5a   : > { %7972 = vmatpush.msrb.mxu3 %v7598_v51 }
 0xa5c   : > { %7973 = vmatpush.msrb.mxu3 %v7597_v44 }
 0xa5d   : > { %v7858_v63 = vpop.permute.xlu0 %7857 }
 0xa5e   : > { %v11256_v35 = vpop.permute.xlu1 %11255  ;;  %7974 = vmatpush.msrb.mxu3 %v7596_v26 }
 0xa5f   : > { %v11258_v25 = vunpack.i.h.bf16 %v11256_v35  ;;  %v11257_v17 = vunpack.i.l.bf16 %v11256_v35 }
 0xa60   : > { %7975 = vmatpush.msrb.mxu3 %v7595_v43  ;;  %7938 = vmatmul.f32.gmra.mxu2 %v7790_v45 }
 0xa61   : > { %7976 = vmatmul.f32.vlgmr.msrb.gmra.mxu3 %v7788_v36  ;;  %v7776_v52 = vsel %vm7774_vm3, %v11257_v17, %v11258_v25 }
 0xa62   : > { %8015 = vmatpush.msra.mxu1 %v7776_v52 }
 0xa64   : > { %8016 = vmatpush.msra.mxu1 %v7775_v61  ;;  %v7883_v61 = vpop.permute.xlu2 %7882 }
 0xa65   : > { %9554 = vmatmul.msk.f32.vlgmr.msra.gmra.mxu1 %vm6850_vm0, %v7789_v23  ;;  %v7873_v8 = vpop.permute.xlu0 %7872 }
 0xa66   : > { %v7863_v50 = vpop.permute.xlu1 %7862 }
 0xa68   : > { %7941 = vmatmul.f32.gmra.mxu2 %v7793_v56 }
 0xa69   : > { %7979 = vmatmul.f32.gmra.mxu3 %v7791_v27 }
 0xa6d   : > { %9555 = vmatmul.msk.f32.gmra.mxu1 %vm6850_vm0, %v7792_v37 }
 0xa6e   : > { %v7878_v41 = vpop.permute.xlu1 %7877 }
 0xa70   : > { %7944 = vmatmul.f32.gmra.mxu2 %v7796_v10 }
 0xa71   : > { %7982 = vmatmul.f32.gmra.mxu3 %v7794_v54 }
 0xa75   : > { %9556 = vmatmul.msk.f32.gmra.mxu1 %vm6850_vm0, %v7795_v55 }
 0xa78   : > { %7947 = vmatmul.f32.gmra.mxu2 %v7799_v19 }
 0xa79   : > { %7985 = vmatmul.f32.gmra.mxu3 %v7797_v33 }
 0xa7d   : > { %9557 = vmatmul.msk.f32.gmra.mxu1 %vm6850_vm0, %v7798_v21 }
 0xa80   : > { %7950 = vmatmul.f32.gmra.mxu2 %v7802_v15 }
 0xa81   : > { %7988 = vmatmul.f32.gmra.mxu3 %v7800_v39  ;;  %v7888_v39 = vpop.permute.xlu0 %7887 }
 0xa85   : > { %9558 = vmatmul.msk.f32.gmra.mxu1 %vm6850_vm0, %v7801_v2 }
 0xa88   : > { %7953 = vmatmul.f32.gmra.mxu2 %v7805_v31 }
 0xa89   : > { %7991 = vmatmul.f32.gmra.mxu3 %v7803_v12 }
 0xa8d   : > { %9559 = vmatmul.msk.f32.gmra.mxu1 %vm6850_vm0, %v7804_v59 }
 0xa90   : > { %7956 = vmatmul.f32.gmra.mxu2 %v7808_v0 }
 0xa91   : > { %7994 = vmatmul.f32.gmra.mxu3 %v7806_v57 }
 0xa95   : > { %9560 = vmatmul.msk.f32.gmra.mxu1 %vm6850_vm0, %v7807_v6 }
 0xa99   : > { %7997 = vmatmul.f32.gmra.mxu3 %v7809_v38 }
 0xa9d   : > { %9561 = vmatmul.msk.f32.gmra.mxu1 %vm6850_vm0, %v7810_v60  ;;  %v7893_v60 = vpop.permute.xlu1 %7892 }
 0xadb   : > { %v7936_v30 = vpop.f32.mrf.mxu2 }
 0xadc   : > { %v7937_v9 = vadd.f32 %v7936_v30, %v7858_v63 }
 0xae2   : > { %v8018_v46 = vpop.f32.mrf.mxu1 }
 0xae3   : > { %v7939_v11 = vpop.f32.mrf.mxu2 }
 0xae4   : > { %v7977_v42 = vpop.f32.mrf.mxu3  ;;  %v7940_v22 = vadd.f32 %v7939_v11, %v7863_v50 }
 0xae5   : > { %v7978_v48 = vadd.f32 %v7977_v42, %v7937_v9 }
 0xae7   : > { %v15547_v3 = vadd.f32 %v8018_v46, %v7978_v48 }
 0xae9   : > { %v8042_v20 = vmax.f32 %v15547_v3, 0.0 }
 0xaea   : > { %v8021_v7 = vpop.f32.mrf.mxu1 }
 0xaeb   : > { %v7942_v32 = vpop.f32.mrf.mxu2  ;;  %v15556_v53 = vpack.i.bf16 %v15551_v47, %v8042_v20 }
 0xaec   : > { %v7980_v28 = vpop.f32.mrf.mxu3  ;;  %v7943_v5 = vadd.f32 %v7942_v32, %v7868_v29 }
 0xaed   : > { %v7981_v49 = vadd.f32 %v7980_v28, %v7940_v22  ;;  %11280 = vrot.lane.b32.xlu0 %v15556_v53, %s12045_s8  ;;  %11275 = vrot.lane.b32.xlu1 %v15556_v53, %s16376_s30 }
 0xaee   : > { %11270 = vrot.lane.b32.xlu2 %v15556_v53, %s16377_s22 }
 0xaef   : > { %v15564_v24 = vadd.f32 %v8021_v7, %v7981_v49 }
 0xaf1   : > { %v8043_v13 = vmax.f32 %v15564_v24, 0.0  ;;  %v8796_v24 = vld [vmem:[#allocation27 + $0x50] sm:$0xff] }
 0xaf2   : > { %v8024_v34 = vpop.f32.mrf.mxu1 }
 0xaf3   : > { %v7945_v14 = vpop.f32.mrf.mxu2  ;;  %v15570_v18 = vpack.i.bf16 %v15551_v47, %v8043_v13 }
 0xaf4   : > { %v7983_v4 = vpop.f32.mrf.mxu3  ;;  %v7946_v45 = vadd.f32 %v7945_v14, %v7873_v8 }
 0xaf5   : > { %v7984_v40 = vadd.f32 %v7983_v4, %v7943_v5  ;;  %11290 = vrot.lane.b32.xlu0 %v15570_v18, %s16377_s22  ;;  %11300 = vrot.lane.b32.xlu1 %v15570_v18, %s12045_s8  ;;  %v11474_v5 = vpack.i.bf16 %v15551_v47, %v15551_v47 }
 0xaf6   : > { %11285 = vrot.lane.b32.xlu2 %v15556_v53, %s12046_s20 }
 0xaf7   : > { %v15578_v62 = vadd.f32 %v8024_v34, %v7984_v40 }
 0xaf9   : > { %v8044_v51 = vmax.f32 %v15578_v62, 0.0 }
 0xafa   : > { %v8027_v16 = vpop.f32.mrf.mxu1 }
 0xafb   : > { %v15584_v44 = vpack.i.bf16 %v15551_v47, %v8044_v51  ;;  %v7948_v58 = vpop.f32.mrf.mxu2 }
 0xafc   : > { %v7986_v26 = vpop.f32.mrf.mxu3  ;;  %v7949_v25 = vadd.f32 %v7948_v58, %v7878_v41 }
 0xafd   : > { %11305 = vrot.lane.b32.xlu0 %v15570_v18, %s12046_s20  ;;  %11310 = vrot.lane.b32.xlu1 %v15584_v44, %s16377_s22  ;;  %v7987_v35 = vadd.f32 %v7986_v26, %v7946_v45 }
 0xafe   : > { %11295 = vrot.lane.b32.xlu2 %v15570_v18, %s16376_s30 }
 0xaff   : > { %v8028_v36 = vadd.f32 %v8027_v16, %v7987_v35 }
 0xb01   : > { %v15598_v52 = vmax.f32 %v8028_v36, 0.0 }
 0xb02   : > { %v8030_v43 = vpop.f32.mrf.mxu1 }
 0xb03   : > { %v7951_v17 = vpop.f32.mrf.mxu2  ;;  %v15602_v27 = vpack.i.bf16 %v15551_v47, %v15598_v52 }
 0xb04   : > { %v7989_v1 = vpop.f32.mrf.mxu3  ;;  %v7952_v54 = vadd.f32 %v7951_v17, %v7883_v61 }
 0xb05   : > { %11315 = vrot.lane.b32.xlu0 %v15584_v44, %s16376_s30  ;;  %11325 = vrot.lane.b32.xlu1 %v15584_v44, %s12046_s20  ;;  %v7990_v23 = vadd.f32 %v7989_v1, %v7949_v25 }
 0xb06   : > { %11320 = vrot.lane.b32.xlu2 %v15584_v44, %s12045_s8 }
 0xb07   : > { %v8031_v56 = vadd.f32 %v8030_v43, %v7990_v23 }
 0xb09   : > { %v15610_v55 = vmax.f32 %v8031_v56, 0.0 }
 0xb0a   : > { %v8033_v10 = vpop.f32.mrf.mxu1 }
 0xb0b   : > { %v7954_v33 = vpop.f32.mrf.mxu2  ;;  %v15614_v15 = vpack.i.bf16 %v15551_v47, %v15610_v55  ;;  %v11464_v29 = vpack.i.bf16 %v15610_v55, %v15551_v47 }
 0xb0c   : > { %v7992_v37 = vpop.f32.mrf.mxu3  ;;  %v7955_v31 = vadd.f32 %v7954_v33, %v7888_v39  ;;  %v8899_v33 = vld [vmem:[%s16382_s23 + $0x8] sm:$0xff]  ;;  %v8902_v39 = vld [vmem:[%s16382_s23 + $0x20] sm:$0xff] }
 0xb0d   : > { %11340 = vrot.lane.b32.xlu0 %v15602_v27, %s12045_s8  ;;  %11335 = vrot.lane.b32.xlu1 %v15602_v27, %s16376_s30  ;;  %v7993_v19 = vadd.f32 %v7992_v37, %v7952_v54 }
 0xb0e   : > { %11330 = vrot.lane.b32.xlu2 %v15602_v27, %s16377_s22 }
 0xb0f   : > { %v8034_v21 = vadd.f32 %v8033_v10, %v7993_v19  ;;  %v8898_v19 = vld [vmem:[%s16382_s23] sm:$0xff] }
 0xb11   : > { %v15622_v59 = vmax.f32 %v8034_v21, 0.0 }
 0xb12   : > { %v8036_v12 = vpop.f32.mrf.mxu1 }
 0xb13   : > { %v7957_v57 = vpop.f32.mrf.mxu2  ;;  %v11364_v38 = vpack.i.bf16 %v15551_v47, %v15622_v59  ;;  %v11454_v22 = vpack.i.bf16 %v15622_v59, %v15551_v47 }
 0xb14   : > { %v7995_v2 = vpop.f32.mrf.mxu3  ;;  %v7958_v63 = vadd.f32 %v7957_v57, %v7893_v60 }
 0xb15   : > { %11345 = vrot.lane.b32.xlu0 %v15614_v15, %s16377_s22  ;;  %11355 = vrot.lane.b32.xlu1 %v15614_v15, %s12045_s8  ;;  %v7996_v0 = vadd.f32 %v7995_v2, %v7955_v31  ;;  %v8900_v2 = vld [vmem:[%s16382_s23 + $0x10] sm:$0xff] }
 0xb16   : > { %11350 = vrot.lane.b32.xlu2 %v15614_v15, %s16376_s30 }
 0xb17   : > { %v8037_v6 = vadd.f32 %v8036_v12, %v7996_v0 }
 0xb19   : > { %v15629_v46 = vmax.f32 %v8037_v6, 0.0 }
 0xb1a   : > { %v8039_v11 = vpop.f32.mrf.mxu1 }
 0xb1b   : > { %v11389_v48 = vpack.i.bf16 %v15551_v47, %v15629_v46  ;;  %v11444_v28 = vpack.i.bf16 %v15629_v46, %v15551_v47 }
 0xb1c   : > { %v7998_v30 = vpop.f32.mrf.mxu3 }
 0xb1d   : > { %11365 = vrot.lane.b32.xlu0 %v11364_v38, %s16376_s30  ;;  %11360 = vrot.lane.b32.xlu1 %v11364_v38, %s16377_s22  ;;  %v7999_v9 = vadd.f32 %v7998_v30, %v7958_v63  ;;  %v8904_v30 = vld [vmem:[%s16382_s23 + $0x30] sm:$0xff]  ;;  %v8905_v63 = vld [vmem:[%s16382_s23 + $0x38] sm:$0xff] }
 0xb1e   : > { %11370 = vrot.lane.b32.xlu2 %v11364_v38, %s12045_s8 }
 0xb1f   : > { %v8040_v42 = vadd.f32 %v8039_v11, %v7999_v9 }
 0xb21   : > { %v15636_v50 = vmax.f32 %v8040_v42, 0.0  ;;  %v8903_v42 = vld [vmem:[%s16382_s23 + $0x28] sm:$0xff] }
 0xb23   : > { %v11399_v7 = vpack.i.bf16 %v15551_v47, %v15636_v50  ;;  %v11494_v14 = vpack.i.bf16 %v15636_v50, %v15598_v52 }
 0xb25   : > { %11390 = vrot.lane.b32.xlu0 %v11389_v48, %s12045_s8  ;;  %11385 = vrot.lane.b32.xlu1 %v11389_v48, %s16376_s30 }
 0xb26   : > { %11375 = vrot.lane.b32.xlu2 %v11364_v38, %s16378_s21 }
 0xb2d   : > { %11400 = vrot.lane.b32.xlu0 %v11399_v7, %s16377_s22  ;;  %11395 = vrot.lane.b32.xlu1 %v11389_v48, %s16378_s21 }
 0xb2e   : > { %11380 = vrot.lane.b32.xlu2 %v11389_v48, %s16377_s22  ;;  %s9240_s22 = sshll.u32 %s15207_s5, 4  ;;  %s9241_s22 = int_to_ptr.vmem [resolvable:$true] %s9240_s22 }
 0xb35   : > { %11405 = vrot.lane.b32.xlu0 %v15614_v15, %s16378_s21  ;;  %11410 = vrot.lane.b32.xlu1 %v15602_v27, %s16378_s21 }
 0xb36   : > { %11425 = vrot.lane.b32.xlu2 %v15570_v18, %s16378_s21 }
 0xb3d   : > { %11415 = vrot.lane.b32.xlu0 %v15584_v44, %s16378_s21  ;;  %11420 = vrot.lane.b32.xlu1 %v11389_v48, %s16379_s29 }
 0xb3e   : > { %11440 = vrot.lane.b32.xlu2 %v15614_v15, %s16379_s29 }
 0xb45   : > { %11430 = vrot.lane.b32.xlu0 %v11364_v38, %s16379_s29  ;;  %11435 = vrot.lane.b32.xlu1 %v15556_v53, %s16378_s21 }
 0xb46   : > { %11455 = vrot.lane.b32.xlu2 %v11454_v22, %s12046_s20 }
 0xb48   : > { %v15660_v32 = vpop.permute.xlu2 %11270 }
 0xb4d   : > { %11445 = vrot.lane.b32.xlu0 %v11444_v28, %s12046_s20  ;;  %11450 = vrot.lane.b32.xlu1 %v15602_v27, %s16379_s29 }
 0xb4e   : > { %11470 = vrot.lane.b32.xlu2 %v15570_v18, %s16379_s29 }
 0xb50   : > { %v15669_v49 = vpop.permute.xlu2 %11285 }
 0xb55   : > { %11460 = vrot.lane.b32.xlu0 %v15584_v44, %s16379_s29  ;;  %11465 = vrot.lane.b32.xlu1 %v11464_v29, %s12046_s20 }
 0xb56   : > { %11485 = vrot.lane.b32.xlu2 %v11399_v7, %s16376_s30  ;;  %s9205_s30 = sand.u32 1, %s12170_s18  }
 0xb57   : > { %s16038_s0 = scalar_lea.sflag [#allocation30], %s9205_s30 }
 0xb58   : > { %v15677_v34 = vpop.permute.xlu2 %11295 }
 0xb5d   : > { %11475 = vrot.lane.b32.xlu0 %v11474_v5, %s12046_s20  ;;  %11480 = vrot.lane.b32.xlu1 %v15556_v53, %s16379_s29 }
 0xb5e   : > { %11495 = vrot.lane.b32.xlu2 %v11494_v14, %s12046_s20  ;;  %s16381_s20 = smov 114  }
 0xb5f   : > { %v15687_v4 = vpop.permute.xlu0 %11280  ;;  %v15689_v40 = vpop.permute.xlu1 %11275 }
 0xb60   : > { %v15691_v16 = vpop.permute.xlu2 %11320 }
 0xb65   : > { %11500 = vrot.lane.b32.xlu0 %v11399_v7, %s16378_s21  ;;  %11490 = vrot.lane.b32.xlu1 %v11399_v7, %s12045_s8  ;;  %s9493_s21 = sshll.u32 %s12280_s28, 7 }
 0xb66   : > { %11510 = vrot.lane.b32.xlu2 %v11364_v38, %s16380_s16 }
 0xb67   : > { %v15696_v8 = vpop.permute.xlu0 %11290  ;;  %v15698_v58 = vpop.permute.xlu1 %11300 }
 0xb68   : > { %v15700_v26 = vpop.permute.xlu2 %11330 }
 0xb69   : > { %v11333_v28 = vunpack.i.h.bf16 %v15700_v26  ;;  %v11332_v29 = vunpack.i.l.bf16 %v15700_v26  ;;  %v11292_v26 = vunpack.i.l.bf16 %v15696_v8 }
 0xb6d   : > { %11505 = vrot.lane.b32.xlu0 %v11389_v48, %s16380_s16  ;;  %11520 = vrot.lane.b32.xlu1 %v15614_v15, %s16380_s16 }
 0xb6e   : > { %11525 = vrot.lane.b32.xlu2 %v11364_v38, %s16381_s20 }
 0xb6f   : > { %v15706_v45 = vpop.permute.xlu0 %11305  ;;  %v15708_v35 = vpop.permute.xlu1 %11310 }
 0xb70   : > { %v15710_v43 = vpop.permute.xlu2 %11350 }
 0xb75   : > { %11515 = vrot.lane.b32.xlu0 %v11389_v48, %s16381_s20  ;;  %11535 = vrot.lane.b32.xlu1 %v15614_v15, %s16381_s20  ;;  %v8901_v15 = vld [vmem:[%s16382_s23 + $0x18] sm:$0xff] }
 0xb76   : > { %11540 = vrot.lane.b32.xlu2 %v11399_v7, %s16379_s29  ;;  %s16006_s29 = scalar_lea.vmem [#allocation31], %s9493_s21 }
 0xb77   : > { %v15716_v36 = vpop.permute.xlu0 %11315  ;;  %v15718_v41 = vpop.permute.xlu1 %11325  ;;  %9192 = vst [vmem:[%s16006_s29 + $0x8] sm:$0xff] %v15551_v47 }
 0xb78   : > { %v15720_v1 = vpop.permute.xlu2 %11370  ;;  %9193 = vst [vmem:[%s16006_s29 + $0x18] sm:$0xff] %v15551_v47 }
 0xb79   : > { %9194 = vst [vmem:[%s16006_s29 + $0x28] sm:$0xff] %v15551_v47 }
 0xb7a   : > { %9195 = vst [vmem:[%s16006_s29 + $0x38] sm:$0xff] %v15551_v47 }
 0xb7b   : > { %9196 = vst [vmem:[%s16006_s29 + $0x48] sm:$0xff] %v15551_v47 }
 0xb7c   : > { %9197 = vst [vmem:[%s16006_s29 + $0x58] sm:$0xff] %v15551_v47  ;;  %v8808_v47 = vld [vmem:[#allocation27 + $0xb0] sm:$0xff] }
 0xb7d   : > { %11530 = vrot.lane.b32.xlu0 %v15602_v27, %s16380_s16  ;;  %11560 = vrot.lane.b32.xlu1 %v11399_v7, %s16381_s20 }
 0xb7e   : > { %11545 = vrot.lane.b32.xlu2 %v15584_v44, %s16380_s16 }
 0xb7f   : > { %v15727_v25 = vpop.permute.xlu0 %11340  ;;  %v15729_v17 = vpop.permute.xlu1 %11335 }
 0xb80   : > { %v15731_v23 = vpop.permute.xlu2 %11375 }
 0xb85   : > { %11550 = vrot.lane.b32.xlu0 %v15602_v27, %s16381_s20  ;;  %11565 = vrot.lane.b32.xlu1 %v15570_v18, %s16380_s16 }
 0xb86   : > { %11555 = vrot.lane.b32.xlu2 %v11399_v7, %s16380_s16 }
 0xb87   : > { %v11346_v61 = vpop.permute.xlu0 %11345  ;;  %v15738_v56 = vpop.permute.xlu1 %11355 }
 0xb88   : > { %v11381_v37 = vpop.permute.xlu2 %11380  ;;  %v11348_v48 = vunpack.i.h.bf16 %v11346_v61  ;;  %v11347_v7 = vunpack.i.l.bf16 %v11346_v61  ;;  %v11313_v61 = vunpack.i.h.bf16 %v15708_v35 }
 0xb89   : > { %v11383_v6 = vunpack.i.h.bf16 %v11381_v37  ;;  %v11382_v38 = vunpack.i.l.bf16 %v11381_v37 }
 0xb8b   : > { %v8152_v22 = vsel %vm787_vm7, %v11382_v38, %v11383_v6 }
 0xb8d   : > { %11575 = vrot.lane.b32.xlu0 %v15556_v53, %s16380_s16  ;;  %11580 = vrot.lane.b32.xlu1 %v15570_v18, %s16381_s20  ;;  %s9583_s16 = smul.u32 96, %s12170_s18 }
 0xb8e   : > { %11570 = vrot.lane.b32.xlu2 %v15584_v44, %s16381_s20 }
 0xb8f   : > { %v15746_v10 = vpop.permute.xlu0 %11365  ;;  %v11361_v27 = vpop.permute.xlu1 %11360  ;;  %s9239_s6 = scalar_lea.hbm %s16383_s14, %s9583_s16  ;;  %s11889_s16 = scalar_lea.hbm %s16383_s14, 192 }
 0xb90   : > { %v15748_v54 = vpop.permute.xlu2 %11425  ;;  %v11363_v9 = vunpack.i.h.bf16 %v11361_v27  ;;  %v11362_v11 = vunpack.i.l.bf16 %v11361_v27  ;;  %s9242_s21 = sshll.u32 %s9239_s6, 4  ;;  %s9243_s21 = int_to_ptr.hbm [resolvable:$true] %s9242_s21 }
 0xb91   : > { %s11883_s1 = sshra.s32 %s9243_s21, 4  ;;  %s11884_s1 = int_to_ptr.hbm [resolvable:$true] %s11883_s1 }
 0xb92   : > { %v8151_v37 = vsel %vm787_vm7, %v11362_v11, %v11363_v9  ;;  %s11885_s2 = scalar_lea.hbm %s11884_s1, 96  ;;  %p11890_p12 = scmp.lt.s32.totalorder %s11884_s1, %s16383_s14 }
 0xb93   : > { %p11886_p1 = scmp.ne.s32.totalorder %s11884_s1, %s11885_s2  ;;  %p11891_p7 = scmp.lt.s32.totalorder %s11889_s16, %s11885_s2 }
 0xb95   : > { %8908 = vperm.xlu0 %9996, %v8898_v19   ;;  %8913 = vperm.xlu1 %9997, %v8899_v33   ;;  %v11312_v19 = vunpack.i.l.bf16 %v15708_v35  ;;  %v8150_v33 = vsel %vm787_vm7, %v11347_v7, %v11348_v48  ;;  %p11887_p3 = pnand %p11886_p1, %p12251_p4  ;;  %p11892_p8 = por %p11891_p7, %p11890_p12 }
 0xb96   : > { %11585 = vrot.lane.b32.xlu2 %v15556_v53, %s16381_s20 }
 0xb97   : > { %v15758_v18 = vpop.permute.xlu0 %11390  ;;  %v15760_v44 = vpop.permute.xlu1 %11385  ;;  %p11888_p5 = pneg %p11887_p3 }
 0xb98   : > { %v15762_v21 = vpop.permute.xlu2 %11440 }
 0xb99   : > { %p11893_p9 = pnand %p11892_p8, %p11888_p5 }
 0xb9d   : > { %8923 = vperm.xlu0 %9996, %v8901_v15   ;;  %8928 = vperm.xlu1 %9997, %v8902_v39   ;;  %v11293_v15 = vunpack.i.h.bf16 %v15696_v8  ;;  %v8149_v39 = vsel %vm787_vm7, %v11332_v29, %v11333_v28 }
 0xb9e   : > { %8918 = vperm.xlu2 %10778, %v8900_v2   ;;  %v11273_v2 = vunpack.i.h.bf16 %v15660_v32 }
 0xb9f   : > { %v11401_v53 = vpop.permute.xlu0 %11400  ;;  %v15773_v31 = vpop.permute.xlu1 %11395  ;;  %v8147_v6 = vsel %vm787_vm7, %v11292_v26, %v11293_v15  ;;  %v11323_v15 = vunpack.i.h.bf16 %v15691_v16  ;;  %v11373_v26 = vunpack.i.h.bf16 %v15720_v1 }
 0xba0   : > { %v11403_v12 = vunpack.i.h.bf16 %v11401_v53  ;;  %v11402_v0 = vunpack.i.l.bf16 %v11401_v53  ;;  %v15775_v57 = vpop.permute.xlu2 %11455  ;;  %v11272_v53 = vunpack.i.l.bf16 %v15660_v32 }
 0xba2   : > { %v8153_v60 = vsel %vm787_vm7, %v11402_v0, %v11403_v12  ;;  %v8148_v12 = vsel %vm787_vm7, %v11312_v19, %v11313_v61  ;;  %v8146_v8 = vsel %vm787_vm7, %v11272_v53, %v11273_v2  ;;  %v11298_v61 = vunpack.i.h.bf16 %v15677_v34 }
 0xba3   : > { %8971 = vmatpush.msra.mxu0 %v8153_v60  ;;  %v11283_v19 = vunpack.i.h.bf16 %v15687_v4  ;;  %v11378_v2 = vunpack.i.h.bf16 %v15731_v23  ;;  %v11377_v53 = vunpack.i.l.bf16 %v15731_v23 }
 0xba5   : > { %8938 = vperm.xlu0 %9996, %v8904_v30   ;;  %8943 = vperm.xlu1 %9997, %v8905_v63  }
 0xba6   : > { %8933 = vperm.xlu2 %10778, %v8903_v42   ;;  %8972 = vmatpush.msra.mxu0 %v8152_v22  ;;  %v11442_v22 = vunpack.i.l.bf16 %v15762_v21 }
 0xba7   : > { %v15790_v5 = vpop.permute.xlu0 %11405  ;;  %v15792_v14 = vpop.permute.xlu1 %11410 }
 0xba8   : > { %v15795_v27 = vpop.permute.xlu2 %11470  ;;  %8973 = vmatpush.msra.mxu0 %v8151_v37 }
 0xbaa   : > { %8974 = vmatpush.msra.mxu0 %v8150_v33  ;;  %v11282_v33 = vunpack.i.l.bf16 %v15687_v4 }
 0xbac   : > { %8975 = vmatpush.msra.mxu0 %v8149_v39  ;;  %v11372_v39 = vunpack.i.l.bf16 %v15720_v1 }
 0xbae   : > { %8976 = vmatpush.msra.mxu0 %v8148_v12  ;;  %v11393_v12 = vunpack.i.h.bf16 %v15758_v18 }
 0xbaf   : > { %v15806_v0 = vpop.permute.xlu0 %11415  ;;  %v11421_v35 = vpop.permute.xlu1 %11420 }
 0xbb0   : > { %v15809_v38 = vpop.permute.xlu2 %11485  ;;  %8977 = vmatpush.msra.mxu0 %v8147_v6  ;;  %v11422_v48 = vunpack.i.l.bf16 %v11421_v35 }
 0xbb2   : > { %8978 = vmatpush.msra.mxu0 %v8146_v8 }
 0xbb4   : > { %8979 = vmatpush.msra.mxu0 %v15636_v50 }
 0xbb6   : > { %8980 = vmatpush.msra.mxu0 %v15629_v46  ;;  %v8786_v46 = vld [vmem:[#allocation27] sm:$0xff] }
 0xbb7   : > { %v11431_v60 = vpop.permute.xlu0 %11430  ;;  %v15814_v32 = vpop.permute.xlu1 %11435 }
 0xbb8   : > { %v15816_v30 = vpop.permute.xlu2 %11495  ;;  %8981 = vmatpush.msra.mxu0 %v15622_v59  ;;  %v11433_v28 = vunpack.i.h.bf16 %v11431_v60  ;;  %v11432_v29 = vunpack.i.l.bf16 %v11431_v60 }
 0xbba   : > { %8982 = vmatpush.msra.mxu0 %v15610_v55 }
 0xbbc   : > { %8983 = vmatpush.msra.mxu0 %v15598_v52 }
 0xbbe   : > { %8984 = vmatpush.msra.mxu0 %v8044_v51  ;;  %v8791_v51 = vld [vmem:[#allocation27 + $0x28] sm:$0xff] }
 0xbbf   : > { %v15823_v63 = vpop.permute.xlu0 %11445  ;;  %v15825_v9 = vpop.permute.xlu1 %11450 }
 0xbc0   : > { %v15827_v50 = vpop.permute.xlu2 %11510  ;;  %8985 = vmatpush.msra.mxu0 %v8043_v13  ;;  %v11423_v13 = vunpack.i.h.bf16 %v11421_v35  ;;  %v11392_v35 = vunpack.i.l.bf16 %v15758_v18  ;;  %v11453_v6 = vunpack.i.h.bf16 %v15825_v9  ;;  %v11452_v8 = vunpack.i.l.bf16 %v15825_v9 }
 0xbc1   : > { %v11398_v18 = vunpack.i.h.bf16 %v15773_v31 }
 0xbc2   : > { %8986 = vmatpush.msra.mxu0 %v8042_v20  ;;  %v11443_v20 = vunpack.i.h.bf16 %v15762_v21  ;;  %v8680_v21 = vsel %vm7729_vm2, %v11422_v48, %v11423_v13 }
 0xbc3   : > { %8987 = vmatmul.f32.vlgmr.msra.gmra.mxu0 %v8786_v46 }
 0xbc4   : > { %v8678_v1 = vsel %vm7729_vm2, %v11442_v22, %v11443_v20  ;;  %v11357_v20 = vunpack.i.l.bf16 %v15738_v56 }
 0xbc7   : > { %v15833_v55 = vpop.permute.xlu0 %11460  ;;  %v15835_v52 = vpop.permute.xlu1 %11465 }
 0xbc8   : > { %v15837_v62 = vpop.permute.xlu2 %11525  ;;  %v11463_v9 = vunpack.i.h.bf16 %v15833_v55 }
 0xbcb   : > { %8990 = vmatmul.f32.gmra.mxu0 %v8791_v51  ;;  %v8679_v51 = vsel %vm7729_vm2, %v11432_v29, %v11433_v28  ;;  %v11358_v28 = vunpack.i.h.bf16 %v15738_v56 }
 0xbcf   : > { %v15839_v59 = vpop.permute.xlu0 %11475  ;;  %v15841_v11 = vpop.permute.xlu1 %11480 }
 0xbd0   : > { %v11541_v42 = vpop.permute.xlu2 %11540  ;;  %v11483_v56 = vunpack.i.h.bf16 %v15841_v11 }
 0xbd1   : > { %v11543_v7 = vunpack.i.h.bf16 %v11541_v42  ;;  %v11542_v3 = vunpack.i.l.bf16 %v11541_v42 }
 0xbd3   : > { %8993 = vmatmul.f32.gmra.mxu0 %v8796_v24  ;;  %v8681_v37 = vsel %vm7729_vm2, %v11542_v3, %v11543_v7  ;;  %v8801_v7 = vld [vmem:[#allocation27 + $0x78] sm:$0xff]  ;;  %v11397_v3 = vunpack.i.l.bf16 %v15773_v31  ;;  %v8677_v31 = vsel %vm7729_vm2, %v11452_v8, %v11453_v6  ;;  %v11413_v8 = vunpack.i.h.bf16 %v15792_v14 }
 0xbd4   : > { %9094 = vmatpush.msrb.mxu1 %v8681_v37  ;;  %v11462_v37 = vunpack.i.l.bf16 %v15833_v55  ;;  %v11408_v55 = vunpack.i.h.bf16 %v15790_v5 }
 0xbd6   : > { %9095 = vmatpush.msrb.mxu1 %v8680_v21  ;;  %v11473_v21 = vunpack.i.h.bf16 %v15795_v27  ;;  %v8676_v6 = vsel %vm7729_vm2, %v11462_v37, %v11463_v9  ;;  %v11417_v9 = vunpack.i.l.bf16 %v15806_v0 }
 0xbd7   : > { %v11501_v60 = vpop.permute.xlu0 %11500  ;;  %v11491_v46 = vpop.permute.xlu1 %11490 }
 0xbd8   : > { %v11503_v42 = vunpack.i.h.bf16 %v11501_v60  ;;  %v11502_v24 = vunpack.i.l.bf16 %v11501_v60  ;;  %v11493_v13 = vunpack.i.h.bf16 %v11491_v46  ;;  %v11492_v48 = vunpack.i.l.bf16 %v11491_v46  ;;  %v15861_v23 = vpop.permute.xlu2 %11545  ;;  %9096 = vmatpush.msrb.mxu1 %v8679_v51 }
 0xbd9   : > { %v11472_v60 = vunpack.i.l.bf16 %v15795_v27  ;;  %v8328_v46 = vsel %vm7549_vm1, %v11392_v35, %v11393_v12  ;;  %v11407_v51 = vunpack.i.l.bf16 %v15790_v5  ;;  %v11303_v27 = vunpack.i.h.bf16 %v15698_v58 }
 0xbda   : > { %9097 = vmatpush.msrb.mxu1 %v8678_v1  ;;  %v8329_v22 = vsel %vm7549_vm1, %v11492_v48, %v11493_v13  ;;  %v8505_v29 = vsel %vm7639_vm5, %v11502_v24, %v11503_v42  ;;  %v11482_v1 = vunpack.i.l.bf16 %v15841_v11  ;;  %v11322_v42 = vunpack.i.l.bf16 %v15691_v16 }
 0xbdb   : > { %8996 = vmatmul.f32.gmra.mxu0 %v8801_v7  ;;  %9012 = vmatpush.msra.mxu2 %v8329_v22  ;;  %v8504_v24 = vsel %vm7639_vm5, %v11397_v3, %v11398_v18  ;;  %v11343_v12 = vunpack.i.h.bf16 %v15727_v25  ;;  %v11342_v35 = vunpack.i.l.bf16 %v15727_v25  ;;  %v8327_v5 = vsel %vm7549_vm1, %v11372_v39, %v11373_v26 }
 0xbdc   : > { %9053 = vmatpush.msra.mxu3 %v8505_v29  ;;  %9098 = vmatpush.msrb.mxu1 %v8677_v31  ;;  %v8503_v11 = vsel %vm7639_vm5, %v11377_v53, %v11378_v2  ;;  %v11412_v13 = vunpack.i.l.bf16 %v15792_v14  ;;  %v8675_v18 = vsel %vm7729_vm2, %v11472_v60, %v11473_v21  ;;  %v8326_v3 = vsel %vm7549_vm1, %v11357_v20, %v11358_v28  ;;  %v8806_v14 = vld [vmem:[#allocation27 + $0xa0] sm:$0xff] }
 0xbdd   : > { %9013 = vmatpush.msra.mxu2 %v8328_v46  ;;  %v11418_v25 = vunpack.i.h.bf16 %v15806_v0  ;;  %v8502_v26 = vsel %vm7639_vm5, %v11407_v51, %v11408_v55  ;;  %v8674_v39 = vsel %vm7729_vm2, %v11482_v1, %v11483_v56  ;;  %v11302_v21 = vunpack.i.l.bf16 %v15698_v58 }
 0xbde   : > { %9054 = vmatpush.msra.mxu3 %v8504_v24  ;;  %9099 = vmatpush.msrb.mxu1 %v8676_v6  ;;  %v11428_v28 = vunpack.i.h.bf16 %v15748_v54  ;;  %v11427_v20 = vunpack.i.l.bf16 %v15748_v54  ;;  %v8325_v0 = vsel %vm7549_vm1, %v11342_v35, %v11343_v12  ;;  %v11513_v60 = vunpack.i.h.bf16 %v15827_v50 }
 0xbdf   : > { %v11506_v48 = vpop.permute.xlu0 %11505  ;;  %v15889_v7 = vpop.permute.xlu1 %11520  ;;  %9014 = vmatpush.msra.mxu2 %v8327_v5  ;;  %v11512_v31 = vunpack.i.l.bf16 %v15827_v50  ;;  %v8501_v46 = vsel %vm7639_vm5, %v11412_v13, %v11413_v8  ;;  %v11297_v58 = vunpack.i.l.bf16 %v15677_v34  ;;  %v11438_v51 = vunpack.i.h.bf16 %v15814_v32 }
 0xbe0   : > { %v11556_v37 = vpop.permute.xlu2 %11555  ;;  %9055 = vmatpush.msra.mxu3 %v8503_v11  ;;  %9100 = vmatpush.msrb.mxu1 %v8675_v18  ;;  %v11508_v2 = vunpack.i.h.bf16 %v11506_v48  ;;  %v11507_v53 = vunpack.i.l.bf16 %v11506_v48  ;;  %v8324_v54 = vsel %vm7549_vm1, %v11322_v42, %v11323_v15  ;;  %v8500_v56 = vsel %vm7639_vm5, %v11417_v9, %v11418_v25  ;;  %v8811_v18 = vld [vmem:[#allocation27 + $0xc8] sm:$0xff] }
 0xbe1   : > { %v11558_v22 = vunpack.i.h.bf16 %v11556_v37  ;;  %v11557_v29 = vunpack.i.l.bf16 %v11556_v37  ;;  %9015 = vmatpush.msra.mxu2 %v8326_v3  ;;  %v11437_v50 = vunpack.i.l.bf16 %v15814_v32  ;;  %v11523_v1 = vunpack.i.h.bf16 %v15889_v7 }
 0xbe2   : > { %9056 = vmatpush.msra.mxu3 %v8502_v26  ;;  %9101 = vmatpush.msrb.mxu1 %v8674_v39  ;;  %v11522_v24 = vunpack.i.l.bf16 %v15889_v7  ;;  %v8592_v6 = vsel %vm7684_vm4, %v11507_v53, %v11508_v2  ;;  %v11278_v12 = vunpack.i.h.bf16 %v15689_v40  ;;  %v11488_v35 = vunpack.i.h.bf16 %v15809_v38 }
 0xbe3   : > { %8999 = vmatmul.f32.gmra.mxu0 %v8806_v14  ;;  %9016 = vmatpush.msra.mxu2 %v8325_v0  ;;  %v8593_v55 = vsel %vm7684_vm4, %v11557_v29, %v11558_v22  ;;  %v11487_v5 = vunpack.i.l.bf16 %v15809_v38  ;;  %v8323_v16 = vsel %vm7549_vm1, %v11302_v21, %v11303_v27  ;;  %v11447_v15 = vunpack.i.l.bf16 %v15823_v63 }
 0xbe4   : > { %9057 = vmatpush.msra.mxu3 %v8501_v46  ;;  %9102 = vmatpush.msrb.mxu1 %v8593_v55  ;;  %v8499_v11 = vsel %vm7639_vm5, %v11427_v20, %v11428_v28  ;;  %v8591_v8 = vsel %vm7684_vm4, %v11512_v31, %v11513_v60  ;;  %v8322_v38 = vsel %vm7549_vm1, %v11282_v33, %v11283_v19  ;;  %v11353_v13 = vunpack.i.h.bf16 %v15710_v43 }
 0xbe5   : > { %9017 = vmatpush.msra.mxu2 %v8324_v54  ;;  %v11352_v27 = vunpack.i.l.bf16 %v15710_v43  ;;  %v11388_v48 = vunpack.i.h.bf16 %v15760_v44  ;;  %v11387_v7 = vunpack.i.l.bf16 %v15760_v44  ;;  %v11498_v3 = vunpack.i.h.bf16 %v15816_v30 }
 0xbe6   : > { %9058 = vmatpush.msra.mxu3 %v8500_v56  ;;  %9103 = vmatpush.msrb.mxu1 %v8592_v6  ;;  %v11448_v25 = vunpack.i.h.bf16 %v15823_v63  ;;  %v8498_v4 = vsel %vm7639_vm5, %v11437_v50, %v11438_v51  ;;  %v8590_v19 = vsel %vm7684_vm4, %v11522_v24, %v11523_v1  ;;  %v11338_v33 = vunpack.i.h.bf16 %v15729_v17 }
 0xbe7   : > { %v15920_v32 = vpop.permute.xlu0 %11515  ;;  %v15922_v42 = vpop.permute.xlu1 %11535  ;;  %9018 = vmatpush.msra.mxu2 %v8323_v16  ;;  %v11368_v43 = vunpack.i.h.bf16 %v15746_v10  ;;  %v11367_v9 = vunpack.i.l.bf16 %v15746_v10  ;;  %v8241_v44 = vsel %vm869_vm6, %v11487_v5, %v11488_v35  ;;  %v11337_v37 = vunpack.i.l.bf16 %v15729_v17 }
 0xbe8   : > { %9059 = vmatpush.msra.mxu3 %v8499_v11  ;;  %9104 = vmatpush.msrb.mxu1 %v8591_v8  ;;  %v11457_v26 = vunpack.i.l.bf16 %v15775_v57  ;;  %v11467_v63 = vunpack.i.l.bf16 %v15835_v52  ;;  %v8417_v39 = vsel %vm7594_vm8, %v11498_v3, %v11447_v15  ;;  %v11277_v14 = vunpack.i.l.bf16 %v15689_v40  ;;  %v11571_v16 = vpop.permute.xlu2 %11570 }
 0xbe9   : > { %9019 = vmatpush.msra.mxu2 %v8322_v38  ;;  %v11308_v2 = vunpack.i.h.bf16 %v15706_v45  ;;  %v8240_v10 = vsel %vm869_vm6, %v11387_v7, %v11388_v48  ;;  %v8238_v53 = vsel %vm869_vm6, %v11352_v27, %v11353_v13  ;;  %v11318_v22 = vunpack.i.h.bf16 %v15716_v36 }
 0xbea   : > { %9060 = vmatpush.msra.mxu3 %v8498_v4  ;;  %9105 = vmatpush.msrb.mxu1 %v8590_v19  ;;  %v11458_v17 = vunpack.i.h.bf16 %v15775_v57  ;;  %v11477_v29 = vunpack.i.l.bf16 %v15839_v59  ;;  %v8416_v21 = vsel %vm7594_vm8, %v11448_v25, %v11457_v26  ;;  %v11317_v28 = vunpack.i.l.bf16 %v15716_v36  ;;  %v8788_v26 = vld [vmem:[#allocation27 + $0x10] sm:$0xff] }
 0xbeb   : > { %9002 = vmatmul.f32.gmra.mxu0 %v8811_v18  ;;  %9020 = vmatpush.msra.mxu2 %v8241_v44  ;;  %v11328_v20 = vunpack.i.h.bf16 %v15718_v41  ;;  %v11327_v0 = vunpack.i.l.bf16 %v15718_v41  ;;  %v8239_v60 = vsel %vm869_vm6, %v11367_v9, %v11368_v43  ;;  %v11468_v31 = vunpack.i.h.bf16 %v15835_v52  ;;  %v8816_v41 = vld [vmem:[#allocation27 + $0xf0] sm:$0xff]  ;;  %v8787_v43 = vld [vmem:[#allocation27 + $0x8] sm:$0xff] }
 0xbec   : > { %9061 = vmatpush.msra.mxu3 %v8417_v39  ;;  %v11478_v46 = vunpack.i.h.bf16 %v15839_v59  ;;  %v8415_v51 = vsel %vm7594_vm8, %v11458_v17, %v11467_v63  ;;  %v8237_v54 = vsel %vm869_vm6, %v11337_v37, %v11338_v33  ;;  %v11497_v24 = vunpack.i.l.bf16 %v15816_v30  ;;  %v8821_v37 = vld [vmem:[#allocation27 + $0x118] sm:$0xff] }
 0xbed   : > { %9021 = vmatpush.msra.mxu2 %v8240_v10  ;;  %v11548_v6 = vunpack.i.h.bf16 %v15861_v23  ;;  %v11547_v52 = vunpack.i.l.bf16 %v15861_v23  ;;  %v8414_v59 = vsel %vm7594_vm8, %v11468_v31, %v11477_v29  ;;  %v11518_v35 = vunpack.i.h.bf16 %v15920_v32  ;;  %v8792_v29 = vld [vmem:[#allocation27 + $0x30] sm:$0xff]  ;;  %v8789_v31 = vld [vmem:[#allocation27 + $0x18] sm:$0xff] }
 0xbee   : > { %9062 = vmatpush.msra.mxu3 %v8416_v21  ;;  %v11517_v5 = vunpack.i.l.bf16 %v15920_v32  ;;  %v11307_v8 = vunpack.i.l.bf16 %v15706_v45  ;;  %v11528_v30 = vunpack.i.h.bf16 %v15837_v62  ;;  %v11527_v38 = vunpack.i.l.bf16 %v15837_v62 }
 0xbef   : > { %v11531_v55 = vpop.permute.xlu0 %11530  ;;  %v11561_v57 = vpop.permute.xlu1 %11560  ;;  %9022 = vmatpush.msra.mxu2 %v8239_v60  ;;  %v8413_v23 = vsel %vm7594_vm8, %v11497_v24, %v11478_v46  ;;  %v8236_v32 = vsel %vm869_vm6, %v11317_v28, %v11318_v22  ;;  %v11288_v13 = vunpack.i.h.bf16 %v15669_v49  ;;  %v11287_v27 = vunpack.i.l.bf16 %v15669_v49  ;;  %v8793_v60 = vld [vmem:[#allocation27 + $0x38] sm:$0xff]  ;;  %v8803_v24 = vld [vmem:[#allocation27 + $0x88] sm:$0xff] }
 0xbf0   : > { %v11533_v56 = vunpack.i.h.bf16 %v11531_v55  ;;  %v11532_v36 = vunpack.i.l.bf16 %v11531_v55  ;;  %v11563_v50 = vunpack.i.h.bf16 %v11561_v57  ;;  %v11562_v1 = vunpack.i.l.bf16 %v11561_v57  ;;  %9063 = vmatpush.msra.mxu3 %v8415_v51  ;;  %v8790_v57 = vld [vmem:[#allocation27 + $0x20] sm:$0xff] }
 0xbf1   : > { %9023 = vmatpush.msra.mxu2 %v8238_v53  ;;  %v8412_v48 = vsel %vm7594_vm8, %v11327_v0, %v11328_v20  ;;  %v8588_v7 = vsel %vm7684_vm4, %v11547_v52, %v11548_v6  ;;  %v11538_v62 = vunpack.i.h.bf16 %v15922_v42  ;;  %v11537_v18 = vunpack.i.l.bf16 %v15922_v42  ;;  %v8799_v6 = vld [vmem:[#allocation27 + $0x68] sm:$0xff]  ;;  %v8800_v52 = vld [vmem:[#allocation27 + $0x70] sm:$0xff] }
 0xbf2   : > { %9064 = vmatpush.msra.mxu3 %v8414_v59  ;;  %v8589_v15 = vsel %vm7684_vm4, %v11532_v36, %v11533_v56  ;;  %v8769_v11 = vsel %vm7774_vm3, %v11562_v1, %v11563_v50  ;;  %v8768_v3 = vsel %vm7774_vm3, %v11517_v5, %v11518_v35  ;;  %v8235_v49 = vsel %vm869_vm6, %v11297_v58, %v11298_v61  ;;  %v8798_v56 = vld [vmem:[#allocation27 + $0x60] sm:$0xff]  ;;  %v11598_v50 = vld [vmem:[%s13448_s10 + $0x58] sm:$0xff]  ;;  %v8795_v1 = vld [vmem:[#allocation27 + $0x48] sm:$0xff] }
 0xbf3   : > { %9005 = vmatmul.f32.gmra.mxu0 %v8816_v41  ;;  %9024 = vmatpush.msra.mxu2 %v8237_v54  ;;  %v8411_v19 = vsel %vm7594_vm8, %v11307_v8, %v11308_v2  ;;  %v8767_v42 = vsel %vm7774_vm3, %v11527_v38, %v11528_v30  ;;  %v8234_v33 = vsel %vm869_vm6, %v11277_v14, %v11278_v12  ;;  %v11573_v44 = vunpack.i.h.bf16 %v11571_v16  ;;  %v11586_v14 = vpop.permute.xlu2 %11585  ;;  %v8797_v54 = vld [vmem:[#allocation27 + $0x58] sm:$0xff]  ;;  %v8794_v36 = vld [vmem:[#allocation27 + $0x40] sm:$0xff]  ;;  %v8807_v59 = vld [vmem:[#allocation27 + $0xa8] sm:$0xff] }
 0xbf4   : > { %9065 = vmatpush.msra.mxu3 %v8413_v23  ;;  %9106 = vmatpush.msrb.mxu1 %v8589_v15  ;;  %v8410_v45 = vsel %vm7594_vm8, %v11287_v27, %v11288_v13  ;;  %v11572_v63 = vunpack.i.l.bf16 %v11571_v16  ;;  %v8766_v39 = vsel %vm7774_vm3, %v11537_v18, %v11538_v62  ;;  %v11588_v10 = vunpack.i.h.bf16 %v11586_v14  ;;  %9198 = vst [vmem:[%s16006_s29 + $0x68] sm:$0xff] %v11598_v50  ;;  %v8802_v41 = vld [vmem:[#allocation27 + $0x80] sm:$0xff]  ;;  %v8804_v35 = vld [vmem:[#allocation27 + $0x90] sm:$0xff]  ;;  %v8805_v5 = vld [vmem:[#allocation27 + $0x98] sm:$0xff] }
 0xbf5   : > { %9143 = vmatpush.msrb.mxu0 %v8769_v11  ;;  %9025 = vmatpush.msra.mxu2 %v8236_v32  ;;  %v11587_v53 = vunpack.i.l.bf16 %v11586_v14  ;;  %vm8946_vm6 = vcmask 523264   ;;  %9199 = vst [vmem:[%s16006_s29 + $0x78] sm:$0xff] %v11598_v50  ;;  %v8812_v16 = vld [vmem:[#allocation27 + $0xd0] sm:$0xff]  ;;  %v8813_v15 = vld [vmem:[#allocation27 + $0xd8] sm:$0xff]  ;;  %v8810_v8 = vld [vmem:[#allocation27 + $0xc0] sm:$0xff] }
 0xbf6   : > { %9066 = vmatpush.msra.mxu3 %v8412_v48  ;;  %9107 = vmatpush.msrb.mxu1 %v8588_v7  ;;  %v8764_v2 = vsel %vm7774_vm3, %v11572_v63, %v11573_v44  ;;  %v8809_v11 = vld [vmem:[#allocation27 + $0xb8] sm:$0xff]  ;;  %v8818_v38 = vld [vmem:[#allocation27 + $0x100] sm:$0xff]  ;;  %v8815_v32 = vld [vmem:[#allocation27 + $0xe8] sm:$0xff] }
 0xbf7   : > { %9144 = vmatpush.msrb.mxu0 %v8768_v3  ;;  %v11551_v25 = vpop.permute.xlu0 %11550  ;;  %v11566_v4 = vpop.permute.xlu1 %11565  ;;  %9026 = vmatpush.msra.mxu2 %v8235_v49  ;;  %v8762_v51 = vsel %vm7774_vm3, %v11587_v53, %v11588_v10  ;;  %v8817_v30 = vld [vmem:[#allocation27 + $0xf8] sm:$0xff]  ;;  %v8814_v23 = vld [vmem:[#allocation27 + $0xe0] sm:$0xff]  ;;  %v8823_v27 = vld [vmem:[#allocation27 + $0x128] sm:$0xff] }
 0xbf8   : > { %v11553_v34 = vunpack.i.h.bf16 %v11551_v25  ;;  %v11552_v9 = vunpack.i.l.bf16 %v11551_v25  ;;  %v11568_v61 = vunpack.i.h.bf16 %v11566_v4  ;;  %v11567_v58 = vunpack.i.l.bf16 %v11566_v4  ;;  %9067 = vmatpush.msra.mxu3 %v8411_v19  ;;  %v8822_v13 = vld [vmem:[#allocation27 + $0x120] sm:$0xff]  ;;  %v8819_v48 = vld [vmem:[#allocation27 + $0x108] sm:$0xff]  ;;  %v8820_v7 = vld [vmem:[#allocation27 + $0x110] sm:$0xff] }
 0xbf9   : > { %9145 = vmatpush.msrb.mxu0 %v8767_v42  ;;  %9027 = vmatpush.msra.mxu2 %v8234_v33  ;;  %v8824_v62 = vld [vmem:[#allocation27 + $0x130] sm:$0xff]  ;;  %v8825_v18 = vld [vmem:[#allocation27 + $0x138] sm:$0xff] }
 0xbfa   : > { %9068 = vmatpush.msra.mxu3 %v8410_v45  ;;  %9028 = vmatmul.f32.vlgmr.msra.gmra.mxu2 %v8787_v43  ;;  %v8587_v40 = vsel %vm7684_vm4, %v11567_v58, %v11568_v61  ;;  %v8765_v12 = vsel %vm7774_vm3, %v11552_v9, %v11553_v34 }
 0xbfb   : > { %9146 = vmatpush.msrb.mxu0 %v8766_v39  ;;  %9108 = vmatpush.msrb.mxu1 %v8587_v40 }
 0xbfc   : > { %9008 = vmatmul.f32.gmra.mxu0 %v8821_v37  ;;  %9069 = vmatmul.f32.vlgmr.msra.gmra.mxu3 %v8788_v26 }
 0xbfd   : > { %9147 = vmatpush.msrb.mxu0 %v8765_v12 }
 0xbff   : > { %9148 = vmatpush.msrb.mxu0 %v8764_v2  ;;  %v11576_v22 = vpop.permute.xlu0 %11575  ;;  %v11581_v17 = vpop.permute.xlu1 %11580 }
 0xc00   : > { %v11578_v21 = vunpack.i.h.bf16 %v11576_v22  ;;  %v11577_v28 = vunpack.i.l.bf16 %v11576_v22  ;;  %v11583_v20 = vunpack.i.h.bf16 %v11581_v17  ;;  %v11582_v0 = vunpack.i.l.bf16 %v11581_v17 }
 0xc02   : > { %9031 = vmatmul.f32.gmra.mxu2 %v8792_v29  ;;  %v8586_v46 = vsel %vm7684_vm4, %v11577_v28, %v11578_v21  ;;  %v8763_v55 = vsel %vm7774_vm3, %v11582_v0, %v11583_v20 }
 0xc03   : > { %9109 = vmatpush.msrb.mxu1 %v8586_v46  ;;  %9149 = vmatpush.msrb.mxu0 %v8763_v55 }
 0xc04   : > { %9072 = vmatmul.f32.gmra.mxu3 %v8793_v60  ;;  %9110 = vmatmul.f32.vlgmr.msrb.gmra.mxu1 %v8789_v31 }
 0xc05   : > { %9150 = vmatpush.msrb.mxu0 %v8762_v51 }
 0xc06   : > { %9562 = vmatmul.msk.f32.vlgmr.msrb.gmra.mxu0 %vm8946_vm6, %v8790_v57 }
 0xc0a   : > { %9034 = vmatmul.f32.gmra.mxu2 %v8797_v54 }
 0xc0c   : > { %9075 = vmatmul.f32.gmra.mxu3 %v8798_v56  ;;  %9113 = vmatmul.f32.gmra.mxu1 %v8794_v36 }
 0xc0e   : > { %9563 = vmatmul.msk.f32.gmra.mxu0 %vm8946_vm6, %v8795_v1 }
 0xc12   : > { %9037 = vmatmul.f32.gmra.mxu2 %v8802_v41 }
 0xc14   : > { %9078 = vmatmul.f32.gmra.mxu3 %v8803_v24  ;;  %9116 = vmatmul.f32.gmra.mxu1 %v8799_v6 }
 0xc16   : > { %9564 = vmatmul.msk.f32.gmra.mxu0 %vm8946_vm6, %v8800_v52 }
 0xc1a   : > { %9040 = vmatmul.f32.gmra.mxu2 %v8807_v59 }
 0xc1c   : > { %9081 = vmatmul.f32.gmra.mxu3 %v8808_v47  ;;  %9119 = vmatmul.f32.gmra.mxu1 %v8804_v35 }
 0xc1e   : > { %9565 = vmatmul.msk.f32.gmra.mxu0 %vm8946_vm6, %v8805_v5 }
 0xc22   : > { %9043 = vmatmul.f32.gmra.mxu2 %v8812_v16 }
 0xc24   : > { %9084 = vmatmul.f32.gmra.mxu3 %v8813_v15  ;;  %9122 = vmatmul.f32.gmra.mxu1 %v8809_v11 }
 0xc26   : > { %9566 = vmatmul.msk.f32.gmra.mxu0 %vm8946_vm6, %v8810_v8 }
 0xc2a   : > { %9046 = vmatmul.f32.gmra.mxu2 %v8817_v30 }
 0xc2c   : > { %9087 = vmatmul.f32.gmra.mxu3 %v8818_v38  ;;  %9125 = vmatmul.f32.gmra.mxu1 %v8814_v23 }
 0xc2e   : > { %9567 = vmatmul.msk.f32.gmra.mxu0 %vm8946_vm6, %v8815_v32 }
 0xc32   : > { %9049 = vmatmul.f32.gmra.mxu2 %v8822_v13 }
 0xc34   : > { %9090 = vmatmul.f32.gmra.mxu3 %v8823_v27  ;;  %9128 = vmatmul.f32.gmra.mxu1 %v8819_v48 }
 0xc36   : > { %9568 = vmatmul.msk.f32.gmra.mxu0 %vm8946_vm6, %v8820_v7 }
 0xc3c   : > { %9131 = vmatmul.f32.gmra.mxu1 %v8824_v62 }
 0xc3e   : > { %9569 = vmatmul.msk.f32.gmra.mxu0 %vm8946_vm6, %v8825_v18 }
 0xc40   : > { %v8988_v3 = vpop.f32.mrf.mxu0 }
 0xc41   : > { %11896 = shalt.err (!%p11893_p9)
}
 0xc42   : > { %s12051_s5 = smov 384   ;;  %s12052_s6 = smov 24  }
 0xc43   : > { %9619 = dma.vmem_to_hbm [thread:$0]  (%p12251_p4), %s9241_s22, 1536, %s9243_s21, %s16038_s0, %s12051_s5, %s12051_s5, %s12052_s6  }
 0xc44   : > { %s16384_s3 = sld [smem:[#allocation65_spill]]  ;;  %s9223_s11 = sshll.u32 %s13448_s10, 4  ;;  %s9224_s11 = int_to_ptr.vmem [resolvable:$true] %s9223_s11 }
 0xc45   : > { %s9201_s2 = scalar_lea.sflag [#allocation15], %s12280_s28 }
 0xc48   : > { %v8991_v49 = vpop.f32.mrf.mxu0 }
 0xc4a   : > { %s9222_s9 = scalar_lea.hbm %s16384_s3, %s9582_s19  ;;  %s11917_s22 = scalar_lea.hbm %s16384_s3, 384 }
 0xc4b   : > { %s9225_s8 = sshll.u32 %s9222_s9, 4  ;;  %s9226_s8 = int_to_ptr.hbm [resolvable:$true] %s9225_s8 }
 0xc4c   : > { %s11911_s1 = sshra.s32 %s9226_s8, 4  ;;  %s11912_s1 = int_to_ptr.hbm [resolvable:$true] %s11911_s1 }
 0xc4d   : > { %s11913_s16 = scalar_lea.hbm %s11912_s1, 192  ;;  %p11918_p0 = scmp.lt.s32.totalorder %s11912_s1, %s16384_s3 }
 0xc4e   : > { %p11914_p10 = scmp.ne.s32.totalorder %s11912_s1, %s11913_s16  ;;  %p11919_p2 = scmp.lt.s32.totalorder %s11917_s22, %s11913_s16 }
 0xc50   : > { %p11915_p11 = pnand %p11914_p10, %p12251_p4  ;;  %p11920_p1 = por %p11919_p2, %p11918_p0 }
 0xc52   : > { %p11916_p13 = pneg %p11915_p11 }
 0xc54   : > { %p11921_p3 = pnand %p11920_p1, %p11916_p13 }
 0xc56   : > { %11924 = shalt.err (!%p11921_p3)
}
 0xc57   : > { %s12053_s9 = smov 1536   ;;  %s16385_s28 = smov 96   ;;  %v8994_v25 = vpop.f32.mrf.mxu0  ;;  %v8909_v43 = vpop.permute.xlu0 %8908 }
 0xc58   : > { %9618 = dma.vmem_to_hbm [thread:$0]  (%p12251_p4), %s9224_s11, 3072, %s9226_s8, %s9201_s2, %s12053_s9, %s12053_s9, %s16385_s28   ;;  %v8989_v9 = vadd.f32 %v8988_v3, %v8909_v43  ;;  %v8914_v63 = vpop.permute.xlu1 %8913  ;;  %v8919_v21 = vpop.permute.xlu2 %8918 }
 0xc59   : > { %v8992_v40 = vadd.f32 %v8991_v49, %v8914_v63  ;;  %v8995_v20 = vadd.f32 %v8994_v25, %v8919_v21  ;;  %s9577_s11 = sshll.u32 %s12170_s18, 7  ;;  %s16386_s19 = sld [smem:[#allocation67_spill]] }
 0xc5a   : > { %s9257_s30 = sshll.u32 %s16006_s29, 4  ;;  %s9258_s30 = int_to_ptr.vmem [resolvable:$true] %s9257_s30 }
 0xc5f   : > { %v8997_v4 = vpop.f32.mrf.mxu0  ;;  %v8924_v56 = vpop.permute.xlu0 %8923  ;;  %s9256_s6 = scalar_lea.hbm %s16386_s19, %s9577_s11  ;;  %s11945_s16 = scalar_lea.hbm %s16386_s19, 256 }
 0xc60   : > { %v8998_v50 = vadd.f32 %v8997_v4, %v8924_v56  ;;  %v8929_v5 = vpop.permute.xlu1 %8928  ;;  %v8934_v48 = vpop.permute.xlu2 %8933  ;;  %s9259_s4 = sshll.u32 %s9256_s6, 4  ;;  %s9260_s4 = int_to_ptr.hbm [resolvable:$true] %s9259_s4 }
 0xc61   : > { %s11939_s18 = sshra.s32 %s9260_s4, 4  ;;  %s11940_s18 = int_to_ptr.hbm [resolvable:$true] %s11939_s18 }
 0xc62   : > { %s11941_s8 = scalar_lea.hbm %s11940_s18, 128  ;;  %p11946_p8 = scmp.lt.s32.totalorder %s11940_s18, %s16386_s19 }
 0xc63   : > { %p11942_p5 = scmp.ne.s32.totalorder %s11940_s18, %s11941_s8  ;;  %p11947_p9 = scmp.lt.s32.totalorder %s11945_s16, %s11941_s8 }
 0xc65   : > { %p11943_p12 = pnand %p11942_p5, %p12251_p4  ;;  %p11948_p10 = por %p11947_p9, %p11946_p8 }
 0xc67   : > { %v9000_v19 = vpop.f32.mrf.mxu0  ;;  %p11944_p7 = pneg %p11943_p12 }
 0xc68   : > { %v9001_v15 = vadd.f32 %v9000_v19, %v8929_v5 }
 0xc69   : > { %p11949_p11 = pnand %p11948_p10, %p11944_p7 }
 0xc6f   : > { %v9003_v42 = vpop.f32.mrf.mxu0 }
 0xc70   : > { %v9004_v62 = vadd.f32 %v9003_v42, %v8934_v48 }
 0xc77   : > { %v16067_v33 = vpop.f32.mrf.mxu0 }
 0xc7d   : > { %v9029_v61 = vpop.f32.mrf.mxu2 }
 0xc7e   : > { %v9030_v58 = vadd.f32 %v9029_v61, %v8989_v9  ;;  %v8939_v61 = vpop.permute.xlu0 %8938 }
 0xc7f   : > { %v16069_v34 = vpop.f32.mrf.mxu0  ;;  %v9070_v44 = vpop.f32.mrf.mxu3 }
 0xc80   : > { %v9071_v45 = vadd.f32 %v9070_v44, %v9030_v58  ;;  %v9007_v44 = vadd.f32 %v16067_v33, %v8939_v61 }
 0xc81   : > { %v9111_v37 = vpop.f32.mrf.mxu1 }
 0xc82   : > { %v9112_v26 = vadd.f32 %v9111_v37, %v9071_v45 }
 0xc85   : > { %v9032_v14 = vpop.f32.mrf.mxu2 }
 0xc86   : > { %v9033_v10 = vadd.f32 %v9032_v14, %v8992_v40  ;;  %v8944_v14 = vpop.permute.xlu1 %8943 }
 0xc87   : > { %v9152_v39 = vpop.f32.mrf.mxu0  ;;  %v9073_v53 = vpop.f32.mrf.mxu3 }
 0xc88   : > { %v9153_v12 = vadd.f32 %v9152_v39, %v9112_v26  ;;  %v9074_v22 = vadd.f32 %v9073_v53, %v9033_v10  ;;  %v9010_v10 = vadd.f32 %v16069_v34, %v8944_v14 }
 0xc89   : > { %v9114_v17 = vpop.f32.mrf.mxu1 }
 0xc8a   : > { %v9176_v2 = vmax.f32 %v9153_v12, 0.0  ;;  %v9115_v29 = vadd.f32 %v9114_v17, %v9074_v22 }
 0xc8c   : > { %9184 = vst [vmem:[%s16006_s29] sm:$0xff] %v9176_v2 }
 0xc8d   : > { %v9035_v60 = vpop.f32.mrf.mxu2 }
 0xc8e   : > { %v9036_v46 = vadd.f32 %v9035_v60, %v8995_v20 }
 0xc8f   : > { %v9155_v28 = vpop.f32.mrf.mxu0  ;;  %v9076_v55 = vpop.f32.mrf.mxu3 }
 0xc90   : > { %v9156_v0 = vadd.f32 %v9155_v28, %v9115_v29  ;;  %v9077_v57 = vadd.f32 %v9076_v55, %v9036_v46 }
 0xc91   : > { %v9117_v51 = vpop.f32.mrf.mxu1 }
 0xc92   : > { %v9177_v31 = vmax.f32 %v9156_v0, 0.0  ;;  %v9118_v54 = vadd.f32 %v9117_v51, %v9077_v57 }
 0xc94   : > { %9185 = vst [vmem:[%s16006_s29 + $0x10] sm:$0xff] %v9177_v31 }
 0xc95   : > { %v9038_v41 = vpop.f32.mrf.mxu2 }
 0xc96   : > { %v9039_v6 = vadd.f32 %v9038_v41, %v8998_v50 }
 0xc97   : > { %v9158_v36 = vpop.f32.mrf.mxu0  ;;  %v9079_v52 = vpop.f32.mrf.mxu3 }
 0xc98   : > { %v9159_v1 = vadd.f32 %v9158_v36, %v9118_v54  ;;  %v9080_v59 = vadd.f32 %v9079_v52, %v9039_v6 }
 0xc99   : > { %v9120_v47 = vpop.f32.mrf.mxu1 }
 0xc9a   : > { %v9178_v24 = vmax.f32 %v9159_v1, 0.0  ;;  %v9121_v35 = vadd.f32 %v9120_v47, %v9080_v59 }
 0xc9c   : > { %9186 = vst [vmem:[%s16006_s29 + $0x20] sm:$0xff] %v9178_v24 }
 0xc9d   : > { %v9041_v8 = vpop.f32.mrf.mxu2 }
 0xc9e   : > { %v9042_v38 = vadd.f32 %v9041_v8, %v9001_v15 }
 0xc9f   : > { %v9161_v16 = vpop.f32.mrf.mxu0  ;;  %v9082_v23 = vpop.f32.mrf.mxu3 }
 0xca0   : > { %v9162_v11 = vadd.f32 %v9161_v16, %v9121_v35  ;;  %v9083_v32 = vadd.f32 %v9082_v23, %v9042_v38 }
 0xca1   : > { %v9123_v13 = vpop.f32.mrf.mxu1 }
 0xca2   : > { %v9179_v30 = vmax.f32 %v9162_v11, 0.0  ;;  %v9124_v27 = vadd.f32 %v9123_v13, %v9083_v32 }
 0xca4   : > { %9187 = vst [vmem:[%s16006_s29 + $0x30] sm:$0xff] %v9179_v30 }
 0xca5   : > { %v9044_v3 = vpop.f32.mrf.mxu2 }
 0xca6   : > { %v9045_v25 = vadd.f32 %v9044_v3, %v9004_v62 }
 0xca7   : > { %v9164_v7 = vpop.f32.mrf.mxu0  ;;  %v9085_v4 = vpop.f32.mrf.mxu3 }
 0xca8   : > { %v9165_v18 = vadd.f32 %v9164_v7, %v9124_v27  ;;  %v9086_v19 = vadd.f32 %v9085_v4, %v9045_v25 }
 0xca9   : > { %v9126_v43 = vpop.f32.mrf.mxu1 }
 0xcaa   : > { %v9180_v49 = vmax.f32 %v9165_v18, 0.0  ;;  %v9127_v9 = vadd.f32 %v9126_v43, %v9086_v19 }
 0xcac   : > { %9188 = vst [vmem:[%s16006_s29 + $0x40] sm:$0xff] %v9180_v49 }
 0xcad   : > { %v9047_v37 = vpop.f32.mrf.mxu2 }
 0xcae   : > { %v9048_v63 = vadd.f32 %v9047_v37, %v9007_v44 }
 0xcaf   : > { %v9167_v58 = vpop.f32.mrf.mxu0  ;;  %v9088_v42 = vpop.f32.mrf.mxu3 }
 0xcb0   : > { %v9168_v45 = vadd.f32 %v9167_v58, %v9127_v9  ;;  %v9089_v39 = vadd.f32 %v9088_v42, %v9048_v63 }
 0xcb1   : > { %v9129_v40 = vpop.f32.mrf.mxu1 }
 0xcb2   : > { %v9181_v26 = vmax.f32 %v9168_v45, 0.0  ;;  %v9130_v12 = vadd.f32 %v9129_v40, %v9089_v39 }
 0xcb4   : > { %9189 = vst [vmem:[%s16006_s29 + $0x50] sm:$0xff] %v9181_v26 }
 0xcb5   : > { %v9050_v22 = vpop.f32.mrf.mxu2 }
 0xcb6   : > { %v9051_v17 = vadd.f32 %v9050_v22, %v9010_v10 }
 0xcb7   : > { %v9170_v2 = vpop.f32.mrf.mxu0  ;;  %v9091_v29 = vpop.f32.mrf.mxu3 }
 0xcb8   : > { %v9171_v53 = vadd.f32 %v9170_v2, %v9130_v12  ;;  %v9092_v21 = vadd.f32 %v9091_v29, %v9051_v17 }
 0xcb9   : > { %v9132_v28 = vpop.f32.mrf.mxu1 }
 0xcba   : > { %v9182_v33 = vmax.f32 %v9171_v53, 0.0  ;;  %v9133_v20 = vadd.f32 %v9132_v28, %v9092_v21 }
 0xcbc   : > { %9190 = vst [vmem:[%s16006_s29 + $0x60] sm:$0xff] %v9182_v33 }
 0xcbf   : > { %v9173_v0 = vpop.f32.mrf.mxu0 }
 0xcc0   : > { %v9174_v34 = vadd.f32 %v9173_v0, %v9133_v20 }
 0xcc2   : > { %v9183_v60 = vmax.f32 %v9174_v34, 0.0 }
 0xcc4   : > { %9191 = vst [vmem:[%s16006_s29 + $0x70] sm:$0xff] %v9183_v60 }
 0xcc5   : > { %11952 = shalt.err (!%p11949_p11)
}
 0xcc6   : > { %s12054_s29 = smov 256   ;;  %s12055_s21 = smov 16  }
 0xcc7   : > { %9620 = dma.vmem_to_hbm [thread:$0]  (%p12251_p4), %s9258_s30, 2048, %s9260_s4, %s16038_s0, %s12054_s29, %s12054_s29, %s12055_s21  }
 0xcc8 PF: > { %s9274_s5 = sand.u32 1, %s11999_s24   ;;  %p16387_p13 = scmp.ge.s32.totalorder %s12011_s27, 2 }
 0xcc9   : > { %s9275_s9 = scalar_lea.sflag [#allocation15], %s9274_s5 }
 0xcca   : > { %p9654_p0 = pnand %p16387_p13, %p12255_p6 }
 0xccc   : > { %p9655_p2 = pneg %p9654_p0 }
 0xcce   : > { %11990 = dma.done.wait (%p9655_p2), %s9275_s9, 3072  }
 0xccf   : > { %11992 = vsyncadd (%p9655_p2), %s9275_s9, 4294964224  ;;  %s16388_s28 = sadd.s32 4294967294, %s12011_s27  }
 0xcd0   : > { %s9284_s11 = sand.u32 1, %s16388_s28  }
 0xcd1   : > { %s9285_s13 = scalar_lea.sflag [#allocation30], %s9284_s11 }
 0xcd2   : > { %11994 = dma.done.wait (%p9655_p2), %s9285_s13, 3584  }
 0xcd3   : > { %11996 = vsyncadd (%p9655_p2), %s9285_s13, 4294963712  ;;  %p38_p4 = scmp.ge.s32.totalorder %s12227_s17, 4   ;;  %s16389_s24 = smov %s12003_s25 }
 0xcd4   : > { %s16390_s25 = smov %s12007_s26  ;;  %s16391_s26 = smov %s12238_s12 }
 0xcd5   : > { %s16392_s27 = smov %s12227_s17  ;;  %40 = sbr.rel (!%p38_p4) target bundleno = 30 (0x1e), region = 189 }
 0xcda   :  { %9301 = vsyncpa [#allocation14], 1 }
 0xcdb   :  { %9303 = vsyncpa [#allocation14 + $0x1], 1 }
 0xcdc   :  { %9304 = vsyncpa [#allocation17], 1 }
 0xcdd   :  { %9305 = vsyncpa [#allocation20], 1 }
 0xcde   :  { %9306 = vsyncpa [#allocation23], 1 }
 0xcdf   :  { %9307 = vsyncpa [#allocation26], 1 }
 0xce0   :  { %9308 = vsyncpa [#allocation15], 1 }
 0xce1   :  { %9310 = vsyncpa [#allocation15 + $0x1], 1 }
 0xce2   :  { %9311 = vsyncpa [#allocation30], 1 }
 0xce3   :  { %9313 = vsyncpa [#allocation30 + $0x1], 1 }

</bundles_post_ra>
